<compile_context>
chip_gen: v5e
topology: v5e:2x2
jax: 0.10.0
libtpu: 0.0.40
codegen_flags: <defaults>
</compile_context>

<pallas_src>
import functools

import numpy as np
import jax
import jax.numpy as jnp
from jax.experimental import pallas as pl
from jax.experimental.pallas import tpu as pltpu


def _shifted_dft_matrix(n, inverse=False):
    """Matrix M s.t. M @ v == fftshift((i)fft(ifftshift(v)))."""
    eye = np.eye(n)
    if inverse:
        m = np.fft.fftshift(np.fft.ifft(np.fft.ifftshift(eye, axes=0), axis=0), axes=0)
    else:
        m = np.fft.fftshift(np.fft.fft(np.fft.ifftshift(eye, axes=0), axis=0), axes=0)
    return m.astype(np.complex64)


def _vmem_budget_and_cores():
    """Per-generation scoped-VMEM byte budget and TensorCores-per-chip."""
    vmem_cap = 128 * 1024 * 1024
    try:
        info = pltpu.get_tpu_info()
        vmem_cap = int(getattr(info, "vmem_capacity_bytes", vmem_cap))
    except Exception:
        pass
    num_tc = 1
    try:
        kind = jax.devices()[0].device_kind.lower()
        if "v7" in kind or "tpu7" in kind:
            num_tc = 2
    except Exception:
        pass
    # ~40 MiB scoped on v7x (64 MiB VMEM), ~80 MiB on v5e/v6e (128 MiB VMEM).
    budget = min(vmem_cap * 5 // 8, 96 * 1024 * 1024)
    budget = max(budget, 32 * 1024 * 1024)
    return budget, num_tc


def _pick_block_batch(b, h, w, budget_bytes, const_bytes, want_flatten, num_tc):
    """Largest per-step image count TB (a divisor of b) that fits the byte budget."""
    # ~16 live f32 copies of one (H, W) image per grid step: double-buffered
    # in/out blocks (4x) plus the packed-complex temporaries (~12x).
    per_image = 4 * 16 * h * w
    cap = max(1, min(b, (budget_bytes - const_bytes - (2 << 20)) // per_image))

    def valid(d, flat):
        # (8,128) sublane rule for 2-D (TB, H*W) blocks: TB % 8 == 0 or TB == B.
        return (not flat) or d == b or d % 8 == 0

    def pick(flat, min_steps):
        for d in range(int(min(b, cap)), 0, -1):
            if b % d == 0 and valid(d, flat) and b // d >= min_steps:
                return d
        return None

    # Keep >=2 grid steps only on 2-TensorCore parts (v7x); on v5e/v6e the
    # largest TB that fits is best (grid is a serial loop there).
    min_steps = 2 if (num_tc >= 2 and b >= 2) else 1
    flat = want_flatten
    tb = pick(flat, min_steps) or pick(flat, 1)
    if tb is None:
        flat = False
        tb = pick(False, min_steps) or pick(False, 1) or 1
    return tb, flat


def _fft_mask_kernel(x_ref, mask_ref, w1_ref, fh2_ref, gh2_ref, d2_ref, out_ref,
                     *, tb, h, w, high_precision=True):
    """One grid step processes TB images.

    Packed-complex layout: [real | imag] concatenated along the lane (last) dim.
    Stages: (1) fwd FFT over W (real->packed, K=W), (2) fwd FFT over H
    (packed x packed, one (2H,2H) matmul), mask, (3) inv FFT over H ((2H,2H)
    matmul), (4) inv FFT over W keeping the real part (K=2W matmul).
    Only two per-image (last-two-dims) transposes are needed.
    NOTE: H, W that are not multiples of 8 stay correct but force tile-boundary
    relayouts on the internal reshapes/slices.
    """
    f32 = jnp.float32
    prec = jax.lax.Precision.HIGHEST if high_precision else None
    dot = functools.partial(jnp.dot, preferred_element_type=f32, precision=prec)

    # ---- stage 1: forward FFT along W (real input), one packed matmul ------
    x2 = x_ref[...].reshape(tb * h, w)
    ypk = dot(x2, w1_ref[...])                              # (TB*H, 2W) = [Yr|Yi]

    # ---- per-image transpose into the packed (TB*W, 2H) layout -------------
    y3 = ypk.reshape(tb, h, 2 * w)
    ycat = jnp.concatenate(
        [jnp.swapaxes(y3[:, :, :w], 1, 2),
         jnp.swapaxes(y3[:, :, w:], 1, 2)], axis=-1).reshape(tb * w, 2 * h)

    # ---- stage 2: forward FFT along H, fused complex matmul (K=2H) ---------
    kt = dot(ycat, fh2_ref[...])                            # (TB*W, 2H) = [Kr^T|Ki^T]

    # ---- k-space undersampling mask, broadcast over batch (free on VPU) ----
    kt = (kt.reshape(tb, w, 2 * h) * mask_ref[...]).reshape(tb * w, 2 * h)

    # ---- stage 3: inverse FFT along H, one (2H,2H) block matmul ------------
    ut = dot(kt, gh2_ref[...])                              # (TB*W, 2H) = [Ur^T|Ui^T]

    # ---- transpose back to natural orientation -----------------------------
    u3 = ut.reshape(tb, w, 2 * h)
    ucat = jnp.concatenate(
        [jnp.swapaxes(u3[:, :, :h], 1, 2),
         jnp.swapaxes(u3[:, :, h:], 1, 2)], axis=-1).reshape(tb * h, 2 * w)

    # ---- stage 4: inverse FFT along W, keep the real part only (K=2W) ------
    out2 = dot(ucat, d2_ref[...])                           # (TB*H, W)
    out_ref[...] = out2.reshape(out_ref.shape)


def fft_mask_forback(x, full_mask, sigma=0.1, add_noise=True, key=None):
    """x: (N, C, H, W) float32; full_mask: (H, W, 2) -> uses channel 0."""
    N, C, H, W = x.shape
    B = N * C
    x = x.astype(jnp.float32)
    mask2d = full_mask[..., 0].astype(jnp.float32)          # (H, W)

    if add_noise:
        if key is None:
            key = jax.random.PRNGKey(0)
        # Folded into the image (FFT linearity): fft2(x)+fft2(n) == fft2(x+n).
        # In-kernel pltpu.prng_* generation would save one HBM pass of x but
        # changes the noise stream vs jax.random.normal; kept wrapper-side.
        noise = jax.random.normal(key, x.shape, dtype=jnp.float32) * (sigma * jnp.max(x))
        x = x + noise

    # ---- host-side packed DFT matrices (float32) ----------------------------
    fH = _shifted_dft_matrix(H, inverse=False)
    fW = _shifted_dft_matrix(W, inverse=False)
    gH = _shifted_dft_matrix(H, inverse=True)
    gW = _shifted_dft_matrix(W, inverse=True)

    ar, ai = np.real(fH).T, np.imag(fH).T                   # A = FH^T (H, H)
    br, bi = np.real(fW).T, np.imag(fW).T                   # B = FW^T (W, W)
    gr, gi = np.real(gH).T, np.imag(gH).T                   # G = GH^T (H, H)
    dr, di = np.real(gW).T, np.imag(gW).T                   # D = GW^T (W, W)

    w1 = jnp.asarray(np.concatenate([br, bi], axis=1), jnp.float32)      # (W, 2W)
    fh2 = jnp.asarray(np.block([[ar, ai], [-ai, ar]]), jnp.float32)      # (2H, 2H)
    gh2 = jnp.asarray(np.block([[gr, gi], [-gi, gr]]), jnp.float32)      # (2H, 2H)
    d2 = jnp.asarray(np.concatenate([dr, -di], axis=0), jnp.float32)     # (2W, W)

    # Mask in the transposed, packed layout: a single (W, 2H) copy,
    # broadcast over the TB batch dim inside the kernel.
    mt = mask2d.T                                                        # (W, H)
    mask_t2 = jnp.concatenate([mt, mt], axis=1)                          # (W, 2H)

    const_bytes = 4 * int(w1.size + fh2.size + gh2.size + d2.size + mask_t2.size)
    budget, num_tc = _vmem_budget_and_cores()
    want_flatten = (W % 128 != 0)                # lane-dense I/O when W < 128
    TB, flatten_pref = _pick_block_batch(B, H, W, budget, const_bytes,
                                         want_flatten, num_tc)
    grid = (B // TB,)

    def build_and_run(flatten, single_buffer, high_precision):
        if flatten:
            xb = x.reshape(B, H * W)
            img_spec = pl.BlockSpec((TB, H * W), lambda g: (g, 0))
            out_sds = jax.ShapeDtypeStruct((B, H * W), jnp.float32)
        else:
            xb = x.reshape(B, H, W)
            img_spec = pl.BlockSpec((TB, H, W), lambda g: (g, 0, 0))
            out_sds = jax.ShapeDtypeStruct((B, H, W), jnp.float32)

        def cspec(shape):
            idx = lambda g, _s=shape: (0,) * len(_s)
            if single_buffer:
                return pl.BlockSpec(shape, idx, pipeline_mode=pl.Buffered(1))
            return pl.BlockSpec(shape, idx)

        kernel = functools.partial(_fft_mask_kernel, tb=TB, h=H, w=W,
                                   high_precision=high_precision)
        out = pl.pallas_call(
            kernel,
            out_shape=out_sds,
            grid=grid,
            in_specs=[
                img_spec,                        # x block
                cspec((W, 2 * H)),               # packed mask
                cspec((W, 2 * W)),               # w1  (fwd W)
                cspec((2 * H, 2 * H)),           # fh2 (fwd H)
                cspec((2 * H, 2 * H)),           # gh2 (inv H)
                cspec((2 * W, W)),               # d2  (inv W)
            ],
            out_specs=img_spec,
            compiler_params=pltpu.CompilerParams(
                dimension_semantics=("parallel",),
                vmem_limit_bytes=int(budget),
            ),
        )(xb, mask_t2, w1, fh2, gh2, d2)
        out = jax.block_until_ready(out)
        return out.reshape(N, C, H, W)

    # Most-optimized config first; fall back (lane-dense layout, single-buffered
    # constants, explicit precision) if a configuration fails to lower on this
    # jax/libtpu version.  The final config matches the proven baseline structure.
    attempts = [
        (flatten_pref, True, True),
        (flatten_pref, False, True),
        (False, True, True),
        (False, False, True),
        (False, False, False),
    ]
    seen, last_err = set(), None
    for cfg in attempts:
        if cfg in seen:
            continue
        seen.add(cfg)
        try:
            return build_and_run(*cfg)
        except Exception as e:       # lowering/compile fallback only
            last_err = e
    raise last_err


def _reference(x, full_mask, noise):
    """Pure-JAX reference mirroring the PyTorch forward (same noise tensor)."""
    def fft2(d):
        return jnp.fft.fftshift(jnp.fft.fft2(jnp.fft.ifftshift(d, axes=(-2, -1))),
                                axes=(-2, -1))

    def ifft2(d):
        return jnp.fft.fftshift(jnp.fft.ifft2(jnp.fft.ifftshift(d, axes=(-2, -1))),
                                axes=(-2, -1))

    mask = full_mask[..., 0]
    k = fft2(x) + fft2(noise)
    k = k * mask.reshape(1, 1, *mask.shape)
    return jnp.real(ifft2(k)).astype(jnp.float32)


if __name__ == "__main__":
    key = jax.random.PRNGKey(0)
    kx, kmask, knoise = jax.random.split(key, 3)

    N, C, H, W = 2, 4, 16, 16
    sigma = 0.1

    x = jax.random.normal(kx, (N, C, H, W), dtype=jnp.float32)
    # undersampling mask, (H, W, 2) like the PyTorch code expects (takes [..., 0])
    full_mask = (jax.random.uniform(kmask, (H, W, 2)) > 0.5).astype(jnp.float32)

    out = fft_mask_forback(x, full_mask, sigma=sigma, add_noise=True, key=knoise)
    out = jax.block_until_ready(out)

    # correctness check against a pure-JAX FFT reference using the same noise
    noise = jax.random.normal(knoise, x.shape, dtype=jnp.float32) * sigma * jnp.max(x)
    ref = _reference(x, full_mask, noise)
    np.testing.assert_allclose(np.asarray(out), np.asarray(ref), rtol=1e-3, atol=2e-3)

    # also exercise the noiseless path
    out_clean = jax.block_until_ready(fft_mask_forback(x, full_mask, add_noise=False))
    ref_clean = _reference(x, full_mask, jnp.zeros_like(x))
    np.testing.assert_allclose(np.asarray(out_clean), np.asarray(ref_clean),
                               rtol=1e-3, atol=2e-3)

    print("KERNEL_OK")
</pallas_src>

<mosaic_0001>
module attributes {stable_mosaic.version = 11 : i64} {
  func.func @_fft_mask_kernel(%arg0: i32, %arg1: memref<8x256xf32, #tpu.memory_space<vmem>>, %arg2: memref<16x32xf32, #tpu.memory_space<vmem>>, %arg3: memref<16x32xf32, #tpu.memory_space<vmem>>, %arg4: memref<32x32xf32, #tpu.memory_space<vmem>>, %arg5: memref<32x32xf32, #tpu.memory_space<vmem>>, %arg6: memref<32x16xf32, #tpu.memory_space<vmem>>, %arg7: memref<8x256xf32, #tpu.memory_space<vmem>>) attributes {dimension_semantics = [#tpu.dimension_semantics<parallel>], iteration_bounds = array<i64: 1>, scalar_prefetch = 0 : i64, scratch_operands = 0 : i64, tpu.core_type = #tpu.core_type<tc>, window_params = [{transform_indices = @transform_0, window_bounds = array<i64: 8, 256>}, {pipeline_mode = #tpu.pipeline_mode<synchronous>, transform_indices = @transform_1, window_bounds = array<i64: 16, 32>}, {pipeline_mode = #tpu.pipeline_mode<synchronous>, transform_indices = @transform_2, window_bounds = array<i64: 16, 32>}, {pipeline_mode = #tpu.pipeline_mode<synchronous>, transform_indices = @transform_3, window_bounds = array<i64: 32, 32>}, {pipeline_mode = #tpu.pipeline_mode<synchronous>, transform_indices = @transform_4, window_bounds = array<i64: 32, 32>}, {pipeline_mode = #tpu.pipeline_mode<synchronous>, transform_indices = @transform_5, window_bounds = array<i64: 32, 16>}, {transform_indices = @transform_6, window_bounds = array<i64: 8, 256>}]} {
    %c0 = arith.constant 0 : index
    %c0_0 = arith.constant 0 : index
    %0 = vector.load %arg1[%c0, %c0_0] : memref<8x256xf32, #tpu.memory_space<vmem>>, vector<8x256xf32>
    %1 = vector.shape_cast %0 : vector<8x256xf32> to vector<128x16xf32>
    %c0_1 = arith.constant 0 : index
    %c0_2 = arith.constant 0 : index
    %2 = vector.load %arg3[%c0_1, %c0_2] : memref<16x32xf32, #tpu.memory_space<vmem>>, vector<16x32xf32>
    %cst = arith.constant dense<0.000000e+00> : vector<128x32xf32>
    %3 = tpu.matmul %1, %2, %cst {dimension_numbers = #tpu.dot_dimension_numbers<[1], [0], [0], [1], [0, 0, 1, 1], [], []>, precision = #tpu.contract_precision<fp32>} : vector<128x16xf32>, vector<16x32xf32>, vector<128x32xf32> -> vector<128x32xf32>
    %4 = vector.shape_cast %3 : vector<128x32xf32> to vector<8x16x32xf32>
    %5 = vector.extract_strided_slice %4 {offsets = [0, 0, 0], sizes = [8, 16, 16], strides = [1, 1, 1]} : vector<8x16x32xf32> to vector<8x16x16xf32>
    %6 = tpu.transpose %5, [0, 2, 1] : vector<8x16x16xf32> -> vector<8x16x16xf32>
    %7 = vector.extract_strided_slice %4 {offsets = [0, 0, 16], sizes = [8, 16, 16], strides = [1, 1, 1]} : vector<8x16x32xf32> to vector<8x16x16xf32>
    %8 = tpu.transpose %7, [0, 2, 1] : vector<8x16x16xf32> -> vector<8x16x16xf32>
    %9 = tpu.concatenate %6, %8 in 2 : vector<8x16x16xf32>, vector<8x16x16xf32> -> vector<8x16x32xf32>
    %10 = vector.shape_cast %9 : vector<8x16x32xf32> to vector<128x32xf32>
    %c0_3 = arith.constant 0 : index
    %c0_4 = arith.constant 0 : index
    %11 = vector.load %arg4[%c0_3, %c0_4] : memref<32x32xf32, #tpu.memory_space<vmem>>, vector<32x32xf32>
    %cst_5 = arith.constant dense<0.000000e+00> : vector<128x32xf32>
    %12 = tpu.matmul %10, %11, %cst_5 {dimension_numbers = #tpu.dot_dimension_numbers<[1], [0], [0], [1], [0, 0, 1, 1], [], []>, precision = #tpu.contract_precision<fp32>} : vector<128x32xf32>, vector<32x32xf32>, vector<128x32xf32> -> vector<128x32xf32>
    %13 = vector.shape_cast %12 : vector<128x32xf32> to vector<8x16x32xf32>
    %c0_6 = arith.constant 0 : index
    %c0_7 = arith.constant 0 : index
    %14 = vector.load %arg2[%c0_6, %c0_7] : memref<16x32xf32, #tpu.memory_space<vmem>>, vector<16x32xf32>
    %15 = vector.shape_cast %14 : vector<16x32xf32> to vector<1x16x32xf32>
    %16 = vector.broadcast %15 : vector<1x16x32xf32> to vector<8x16x32xf32>
    %17 = arith.mulf %13, %16 : vector<8x16x32xf32>
    %18 = vector.shape_cast %17 : vector<8x16x32xf32> to vector<128x32xf32>
    %c0_8 = arith.constant 0 : index
    %c0_9 = arith.constant 0 : index
    %19 = vector.load %arg5[%c0_8, %c0_9] : memref<32x32xf32, #tpu.memory_space<vmem>>, vector<32x32xf32>
    %cst_10 = arith.constant dense<0.000000e+00> : vector<128x32xf32>
    %20 = tpu.matmul %18, %19, %cst_10 {dimension_numbers = #tpu.dot_dimension_numbers<[1], [0], [0], [1], [0, 0, 1, 1], [], []>, precision = #tpu.contract_precision<fp32>} : vector<128x32xf32>, vector<32x32xf32>, vector<128x32xf32> -> vector<128x32xf32>
    %21 = vector.shape_cast %20 : vector<128x32xf32> to vector<8x16x32xf32>
    %22 = vector.extract_strided_slice %21 {offsets = [0, 0, 0], sizes = [8, 16, 16], strides = [1, 1, 1]} : vector<8x16x32xf32> to vector<8x16x16xf32>
    %23 = tpu.transpose %22, [0, 2, 1] : vector<8x16x16xf32> -> vector<8x16x16xf32>
    %24 = vector.extract_strided_slice %21 {offsets = [0, 0, 16], sizes = [8, 16, 16], strides = [1, 1, 1]} : vector<8x16x32xf32> to vector<8x16x16xf32>
    %25 = tpu.transpose %24, [0, 2, 1] : vector<8x16x16xf32> -> vector<8x16x16xf32>
    %26 = tpu.concatenate %23, %25 in 2 : vector<8x16x16xf32>, vector<8x16x16xf32> -> vector<8x16x32xf32>
    %27 = vector.shape_cast %26 : vector<8x16x32xf32> to vector<128x32xf32>
    %c0_11 = arith.constant 0 : index
    %c0_12 = arith.constant 0 : index
    %28 = vector.load %arg6[%c0_11, %c0_12] : memref<32x16xf32, #tpu.memory_space<vmem>>, vector<32x16xf32>
    %cst_13 = arith.constant dense<0.000000e+00> : vector<128x16xf32>
    %29 = tpu.matmul %27, %28, %cst_13 {dimension_numbers = #tpu.dot_dimension_numbers<[1], [0], [0], [1], [0, 0, 1, 1], [], []>, precision = #tpu.contract_precision<fp32>} : vector<128x32xf32>, vector<32x16xf32>, vector<128x16xf32> -> vector<128x16xf32>
    %30 = vector.shape_cast %29 : vector<128x16xf32> to vector<8x256xf32>
    %c0_14 = arith.constant 0 : index
    %c0_15 = arith.constant 0 : index
    %31 = vector.load %arg7[%c0_14, %c0_15] : memref<8x256xf32, #tpu.memory_space<vmem>>, vector<8x256xf32>
    tpu.vector_store %arg7[%c0_14, %c0_15], %30 {strides = array<i32>} : memref<8x256xf32, #tpu.memory_space<vmem>>, vector<8x256xf32>,
    return
  }
  func.func @transform_0(%arg0: i32) -> (i32, i32) {
    %c0_i32 = arith.constant 0 : i32
    %c0_i32_0 = arith.constant 0 : i32
    return %arg0, %c0_i32 : i32, i32
  }
  func.func @transform_1(%arg0: i32) -> (i32, i32) {
    %c0_i32 = arith.constant 0 : i32
    %c0_i32_0 = arith.constant 0 : i32
    %c0_i32_1 = arith.constant 0 : i32
    return %c0_i32, %c0_i32_0 : i32, i32
  }
  func.func @transform_2(%arg0: i32) -> (i32, i32) {
    %c0_i32 = arith.constant 0 : i32
    %c0_i32_0 = arith.constant 0 : i32
    %c0_i32_1 = arith.constant 0 : i32
    return %c0_i32, %c0_i32_0 : i32, i32
  }
  func.func @transform_3(%arg0: i32) -> (i32, i32) {
    %c0_i32 = arith.constant 0 : i32
    %c0_i32_0 = arith.constant 0 : i32
    %c0_i32_1 = arith.constant 0 : i32
    return %c0_i32, %c0_i32_0 : i32, i32
  }
  func.func @transform_4(%arg0: i32) -> (i32, i32) {
    %c0_i32 = arith.constant 0 : i32
    %c0_i32_0 = arith.constant 0 : i32
    %c0_i32_1 = arith.constant 0 : i32
    return %c0_i32, %c0_i32_0 : i32, i32
  }
  func.func @transform_5(%arg0: i32) -> (i32, i32) {
    %c0_i32 = arith.constant 0 : i32
    %c0_i32_0 = arith.constant 0 : i32
    %c0_i32_1 = arith.constant 0 : i32
    return %c0_i32, %c0_i32_0 : i32, i32
  }
  func.func @transform_6(%arg0: i32) -> (i32, i32) {
    %c0_i32 = arith.constant 0 : i32
    %c0_i32_0 = arith.constant 0 : i32
    return %arg0, %c0_i32 : i32, i32
  }
}

module attributes {stable_mosaic.version = 11 : i64} {
  func.func @_fft_mask_kernel(%arg0: i32, %arg1: memref<8x256xf32, #tpu.memory_space<vmem>>, %arg2: memref<16x32xf32, #tpu.memory_space<vmem>>, %arg3: memref<16x32xf32, #tpu.memory_space<vmem>>, %arg4: memref<32x32xf32, #tpu.memory_space<vmem>>, %arg5: memref<32x32xf32, #tpu.memory_space<vmem>>, %arg6: memref<32x16xf32, #tpu.memory_space<vmem>>, %arg7: memref<8x256xf32, #tpu.memory_space<vmem>>) attributes {dimension_semantics = [#tpu.dimension_semantics<parallel>], iteration_bounds = array<i64: 1>, scalar_prefetch = 0 : i64, scratch_operands = 0 : i64, tpu.core_type = #tpu.core_type<tc>, window_params = [{transform_indices = @transform_0, window_bounds = array<i64: 8, 256>}, {pipeline_mode = #tpu.pipeline_mode<synchronous>, transform_indices = @transform_1, window_bounds = array<i64: 16, 32>}, {pipeline_mode = #tpu.pipeline_mode<synchronous>, transform_indices = @transform_2, window_bounds = array<i64: 16, 32>}, {pipeline_mode = #tpu.pipeline_mode<synchronous>, transform_indices = @transform_3, window_bounds = array<i64: 32, 32>}, {pipeline_mode = #tpu.pipeline_mode<synchronous>, transform_indices = @transform_4, window_bounds = array<i64: 32, 32>}, {pipeline_mode = #tpu.pipeline_mode<synchronous>, transform_indices = @transform_5, window_bounds = array<i64: 32, 16>}, {transform_indices = @transform_6, window_bounds = array<i64: 8, 256>}]} {
    %c0 = arith.constant 0 : index
    %c0_0 = arith.constant 0 : index
    %0 = vector.load %arg1[%c0, %c0_0] : memref<8x256xf32, #tpu.memory_space<vmem>>, vector<8x256xf32>
    %1 = vector.shape_cast %0 : vector<8x256xf32> to vector<128x16xf32>
    %c0_1 = arith.constant 0 : index
    %c0_2 = arith.constant 0 : index
    %2 = vector.load %arg3[%c0_1, %c0_2] : memref<16x32xf32, #tpu.memory_space<vmem>>, vector<16x32xf32>
    %cst = arith.constant dense<0.000000e+00> : vector<128x32xf32>
    %3 = tpu.matmul %1, %2, %cst {dimension_numbers = #tpu.dot_dimension_numbers<[1], [0], [0], [1], [0, 0, 1, 1], [], []>, precision = #tpu.contract_precision<fp32>} : vector<128x16xf32>, vector<16x32xf32>, vector<128x32xf32> -> vector<128x32xf32>
    %4 = vector.shape_cast %3 : vector<128x32xf32> to vector<8x16x32xf32>
    %5 = vector.extract_strided_slice %4 {offsets = [0, 0, 0], sizes = [8, 16, 16], strides = [1, 1, 1]} : vector<8x16x32xf32> to vector<8x16x16xf32>
    %6 = tpu.transpose %5, [0, 2, 1] : vector<8x16x16xf32> -> vector<8x16x16xf32>
    %7 = vector.extract_strided_slice %4 {offsets = [0, 0, 16], sizes = [8, 16, 16], strides = [1, 1, 1]} : vector<8x16x32xf32> to vector<8x16x16xf32>
    %8 = tpu.transpose %7, [0, 2, 1] : vector<8x16x16xf32> -> vector<8x16x16xf32>
    %9 = tpu.concatenate %6, %8 in 2 : vector<8x16x16xf32>, vector<8x16x16xf32> -> vector<8x16x32xf32>
    %10 = vector.shape_cast %9 : vector<8x16x32xf32> to vector<128x32xf32>
    %c0_3 = arith.constant 0 : index
    %c0_4 = arith.constant 0 : index
    %11 = vector.load %arg4[%c0_3, %c0_4] : memref<32x32xf32, #tpu.memory_space<vmem>>, vector<32x32xf32>
    %cst_5 = arith.constant dense<0.000000e+00> : vector<128x32xf32>
    %12 = tpu.matmul %10, %11, %cst_5 {dimension_numbers = #tpu.dot_dimension_numbers<[1], [0], [0], [1], [0, 0, 1, 1], [], []>, precision = #tpu.contract_precision<fp32>} : vector<128x32xf32>, vector<32x32xf32>, vector<128x32xf32> -> vector<128x32xf32>
    %13 = vector.shape_cast %12 : vector<128x32xf32> to vector<8x16x32xf32>
    %c0_6 = arith.constant 0 : index
    %c0_7 = arith.constant 0 : index
    %14 = vector.load %arg2[%c0_6, %c0_7] : memref<16x32xf32, #tpu.memory_space<vmem>>, vector<16x32xf32>
    %15 = vector.shape_cast %14 : vector<16x32xf32> to vector<1x16x32xf32>
    %16 = vector.broadcast %15 : vector<1x16x32xf32> to vector<8x16x32xf32>
    %17 = arith.mulf %13, %16 : vector<8x16x32xf32>
    %18 = vector.shape_cast %17 : vector<8x16x32xf32> to vector<128x32xf32>
    %c0_8 = arith.constant 0 : index
    %c0_9 = arith.constant 0 : index
    %19 = vector.load %arg5[%c0_8, %c0_9] : memref<32x32xf32, #tpu.memory_space<vmem>>, vector<32x32xf32>
    %cst_10 = arith.constant dense<0.000000e+00> : vector<128x32xf32>
    %20 = tpu.matmul %18, %19, %cst_10 {dimension_numbers = #tpu.dot_dimension_numbers<[1], [0], [0], [1], [0, 0, 1, 1], [], []>, precision = #tpu.contract_precision<fp32>} : vector<128x32xf32>, vector<32x32xf32>, vector<128x32xf32> -> vector<128x32xf32>
    %21 = vector.shape_cast %20 : vector<128x32xf32> to vector<8x16x32xf32>
    %22 = vector.extract_strided_slice %21 {offsets = [0, 0, 0], sizes = [8, 16, 16], strides = [1, 1, 1]} : vector<8x16x32xf32> to vector<8x16x16xf32>
    %23 = tpu.transpose %22, [0, 2, 1] : vector<8x16x16xf32> -> vector<8x16x16xf32>
    %24 = vector.extract_strided_slice %21 {offsets = [0, 0, 16], sizes = [8, 16, 16], strides = [1, 1, 1]} : vector<8x16x32xf32> to vector<8x16x16xf32>
    %25 = tpu.transpose %24, [0, 2, 1] : vector<8x16x16xf32> -> vector<8x16x16xf32>
    %26 = tpu.concatenate %23, %25 in 2 : vector<8x16x16xf32>, vector<8x16x16xf32> -> vector<8x16x32xf32>
    %27 = vector.shape_cast %26 : vector<8x16x32xf32> to vector<128x32xf32>
    %c0_11 = arith.constant 0 : index
    %c0_12 = arith.constant 0 : index
    %28 = vector.load %arg6[%c0_11, %c0_12] : memref<32x16xf32, #tpu.memory_space<vmem>>, vector<32x16xf32>
    %cst_13 = arith.constant dense<0.000000e+00> : vector<128x16xf32>
    %29 = tpu.matmul %27, %28, %cst_13 {dimension_numbers = #tpu.dot_dimension_numbers<[1], [0], [0], [1], [0, 0, 1, 1], [], []>, precision = #tpu.contract_precision<fp32>} : vector<128x32xf32>, vector<32x16xf32>, vector<128x16xf32> -> vector<128x16xf32>
    %30 = vector.shape_cast %29 : vector<128x16xf32> to vector<8x256xf32>
    %c0_14 = arith.constant 0 : index
    %c0_15 = arith.constant 0 : index
    %31 = vector.load %arg7[%c0_14, %c0_15] : memref<8x256xf32, #tpu.memory_space<vmem>>, vector<8x256xf32>
    tpu.vector_store %arg7[%c0_14, %c0_15], %30 {strides = array<i32>} : memref<8x256xf32, #tpu.memory_space<vmem>>, vector<8x256xf32>,
    return
  }
  func.func @transform_0(%arg0: i32) -> (i32, i32) {
    %c0_i32 = arith.constant 0 : i32
    %c0_i32_0 = arith.constant 0 : i32
    return %arg0, %c0_i32 : i32, i32
  }
  func.func @transform_1(%arg0: i32) -> (i32, i32) {
    %c0_i32 = arith.constant 0 : i32
    %c0_i32_0 = arith.constant 0 : i32
    %c0_i32_1 = arith.constant 0 : i32
    return %c0_i32, %c0_i32_0 : i32, i32
  }
  func.func @transform_2(%arg0: i32) -> (i32, i32) {
    %c0_i32 = arith.constant 0 : i32
    %c0_i32_0 = arith.constant 0 : i32
    %c0_i32_1 = arith.constant 0 : i32
    return %c0_i32, %c0_i32_0 : i32, i32
  }
  func.func @transform_3(%arg0: i32) -> (i32, i32) {
    %c0_i32 = arith.constant 0 : i32
    %c0_i32_0 = arith.constant 0 : i32
    %c0_i32_1 = arith.constant 0 : i32
    return %c0_i32, %c0_i32_0 : i32, i32
  }
  func.func @transform_4(%arg0: i32) -> (i32, i32) {
    %c0_i32 = arith.constant 0 : i32
    %c0_i32_0 = arith.constant 0 : i32
    %c0_i32_1 = arith.constant 0 : i32
    return %c0_i32, %c0_i32_0 : i32, i32
  }
  func.func @transform_5(%arg0: i32) -> (i32, i32) {
    %c0_i32 = arith.constant 0 : i32
    %c0_i32_0 = arith.constant 0 : i32
    %c0_i32_1 = arith.constant 0 : i32
    return %c0_i32, %c0_i32_0 : i32, i32
  }
  func.func @transform_6(%arg0: i32) -> (i32, i32) {
    %c0_i32 = arith.constant 0 : i32
    %c0_i32_0 = arith.constant 0 : i32
    return %arg0, %c0_i32 : i32, i32
  }
}

module attributes {stable_mosaic.version = 11 : i64} {
  func.func @_fft_mask_kernel(%arg0: i32, %arg1: memref<8x16x16xf32, #tpu.memory_space<vmem>>, %arg2: memref<16x32xf32, #tpu.memory_space<vmem>>, %arg3: memref<16x32xf32, #tpu.memory_space<vmem>>, %arg4: memref<32x32xf32, #tpu.memory_space<vmem>>, %arg5: memref<32x32xf32, #tpu.memory_space<vmem>>, %arg6: memref<32x16xf32, #tpu.memory_space<vmem>>, %arg7: memref<8x16x16xf32, #tpu.memory_space<vmem>>) attributes {dimension_semantics = [#tpu.dimension_semantics<parallel>], iteration_bounds = array<i64: 1>, scalar_prefetch = 0 : i64, scratch_operands = 0 : i64, tpu.core_type = #tpu.core_type<tc>, window_params = [{transform_indices = @transform_0, window_bounds = array<i64: 8, 16, 16>}, {pipeline_mode = #tpu.pipeline_mode<synchronous>, transform_indices = @transform_1, window_bounds = array<i64: 16, 32>}, {pipeline_mode = #tpu.pipeline_mode<synchronous>, transform_indices = @transform_2, window_bounds = array<i64: 16, 32>}, {pipeline_mode = #tpu.pipeline_mode<synchronous>, transform_indices = @transform_3, window_bounds = array<i64: 32, 32>}, {pipeline_mode = #tpu.pipeline_mode<synchronous>, transform_indices = @transform_4, window_bounds = array<i64: 32, 32>}, {pipeline_mode = #tpu.pipeline_mode<synchronous>, transform_indices = @transform_5, window_bounds = array<i64: 32, 16>}, {transform_indices = @transform_6, window_bounds = array<i64: 8, 16, 16>}]} {
    %c0 = arith.constant 0 : index
    %c0_0 = arith.constant 0 : index
    %c0_1 = arith.constant 0 : index
    %0 = vector.load %arg1[%c0, %c0_0, %c0_1] : memref<8x16x16xf32, #tpu.memory_space<vmem>>, vector<8x16x16xf32>
    %1 = vector.shape_cast %0 : vector<8x16x16xf32> to vector<128x16xf32>
    %c0_2 = arith.constant 0 : index
    %c0_3 = arith.constant 0 : index
    %2 = vector.load %arg3[%c0_2, %c0_3] : memref<16x32xf32, #tpu.memory_space<vmem>>, vector<16x32xf32>
    %cst = arith.constant dense<0.000000e+00> : vector<128x32xf32>
    %3 = tpu.matmul %1, %2, %cst {dimension_numbers = #tpu.dot_dimension_numbers<[1], [0], [0], [1], [0, 0, 1, 1], [], []>, precision = #tpu.contract_precision<fp32>} : vector<128x16xf32>, vector<16x32xf32>, vector<128x32xf32> -> vector<128x32xf32>
    %4 = vector.shape_cast %3 : vector<128x32xf32> to vector<8x16x32xf32>
    %5 = vector.extract_strided_slice %4 {offsets = [0, 0, 0], sizes = [8, 16, 16], strides = [1, 1, 1]} : vector<8x16x32xf32> to vector<8x16x16xf32>
    %6 = tpu.transpose %5, [0, 2, 1] : vector<8x16x16xf32> -> vector<8x16x16xf32>
    %7 = vector.extract_strided_slice %4 {offsets = [0, 0, 16], sizes = [8, 16, 16], strides = [1, 1, 1]} : vector<8x16x32xf32> to vector<8x16x16xf32>
    %8 = tpu.transpose %7, [0, 2, 1] : vector<8x16x16xf32> -> vector<8x16x16xf32>
    %9 = tpu.concatenate %6, %8 in 2 : vector<8x16x16xf32>, vector<8x16x16xf32> -> vector<8x16x32xf32>
    %10 = vector.shape_cast %9 : vector<8x16x32xf32> to vector<128x32xf32>
    %c0_4 = arith.constant 0 : index
    %c0_5 = arith.constant 0 : index
    %11 = vector.load %arg4[%c0_4, %c0_5] : memref<32x32xf32, #tpu.memory_space<vmem>>, vector<32x32xf32>
    %cst_6 = arith.constant dense<0.000000e+00> : vector<128x32xf32>
    %12 = tpu.matmul %10, %11, %cst_6 {dimension_numbers = #tpu.dot_dimension_numbers<[1], [0], [0], [1], [0, 0, 1, 1], [], []>, precision = #tpu.contract_precision<fp32>} : vector<128x32xf32>, vector<32x32xf32>, vector<128x32xf32> -> vector<128x32xf32>
    %13 = vector.shape_cast %12 : vector<128x32xf32> to vector<8x16x32xf32>
    %c0_7 = arith.constant 0 : index
    %c0_8 = arith.constant 0 : index
    %14 = vector.load %arg2[%c0_7, %c0_8] : memref<16x32xf32, #tpu.memory_space<vmem>>, vector<16x32xf32>
    %15 = vector.shape_cast %14 : vector<16x32xf32> to vector<1x16x32xf32>
    %16 = vector.broadcast %15 : vector<1x16x32xf32> to vector<8x16x32xf32>
    %17 = arith.mulf %13, %16 : vector<8x16x32xf32>
    %18 = vector.shape_cast %17 : vector<8x16x32xf32> to vector<128x32xf32>
    %c0_9 = arith.constant 0 : index
    %c0_10 = arith.constant 0 : index
    %19 = vector.load %arg5[%c0_9, %c0_10] : memref<32x32xf32, #tpu.memory_space<vmem>>, vector<32x32xf32>
    %cst_11 = arith.constant dense<0.000000e+00> : vector<128x32xf32>
    %20 = tpu.matmul %18, %19, %cst_11 {dimension_numbers = #tpu.dot_dimension_numbers<[1], [0], [0], [1], [0, 0, 1, 1], [], []>, precision = #tpu.contract_precision<fp32>} : vector<128x32xf32>, vector<32x32xf32>, vector<128x32xf32> -> vector<128x32xf32>
    %21 = vector.shape_cast %20 : vector<128x32xf32> to vector<8x16x32xf32>
    %22 = vector.extract_strided_slice %21 {offsets = [0, 0, 0], sizes = [8, 16, 16], strides = [1, 1, 1]} : vector<8x16x32xf32> to vector<8x16x16xf32>
    %23 = tpu.transpose %22, [0, 2, 1] : vector<8x16x16xf32> -> vector<8x16x16xf32>
    %24 = vector.extract_strided_slice %21 {offsets = [0, 0, 16], sizes = [8, 16, 16], strides = [1, 1, 1]} : vector<8x16x32xf32> to vector<8x16x16xf32>
    %25 = tpu.transpose %24, [0, 2, 1] : vector<8x16x16xf32> -> vector<8x16x16xf32>
    %26 = tpu.concatenate %23, %25 in 2 : vector<8x16x16xf32>, vector<8x16x16xf32> -> vector<8x16x32xf32>
    %27 = vector.shape_cast %26 : vector<8x16x32xf32> to vector<128x32xf32>
    %c0_12 = arith.constant 0 : index
    %c0_13 = arith.constant 0 : index
    %28 = vector.load %arg6[%c0_12, %c0_13] : memref<32x16xf32, #tpu.memory_space<vmem>>, vector<32x16xf32>
    %cst_14 = arith.constant dense<0.000000e+00> : vector<128x16xf32>
    %29 = tpu.matmul %27, %28, %cst_14 {dimension_numbers = #tpu.dot_dimension_numbers<[1], [0], [0], [1], [0, 0, 1, 1], [], []>, precision = #tpu.contract_precision<fp32>} : vector<128x32xf32>, vector<32x16xf32>, vector<128x16xf32> -> vector<128x16xf32>
    %30 = vector.shape_cast %29 : vector<128x16xf32> to vector<8x16x16xf32>
    %c0_15 = arith.constant 0 : index
    %c0_16 = arith.constant 0 : index
    %c0_17 = arith.constant 0 : index
    %31 = vector.load %arg7[%c0_15, %c0_16, %c0_17] : memref<8x16x16xf32, #tpu.memory_space<vmem>>, vector<8x16x16xf32>
    tpu.vector_store %arg7[%c0_15, %c0_16, %c0_17], %30 {strides = array<i32>} : memref<8x16x16xf32, #tpu.memory_space<vmem>>, vector<8x16x16xf32>,
    return
  }
  func.func @transform_0(%arg0: i32) -> (i32, i32, i32) {
    %c0_i32 = arith.constant 0 : i32
    %c0_i32_0 = arith.constant 0 : i32
    %c0_i32_1 = arith.constant 0 : i32
    return %arg0, %c0_i32, %c0_i32_0 : i32, i32, i32
  }
  func.func @transform_1(%arg0: i32) -> (i32, i32) {
    %c0_i32 = arith.constant 0 : i32
    %c0_i32_0 = arith.constant 0 : i32
    %c0_i32_1 = arith.constant 0 : i32
    return %c0_i32, %c0_i32_0 : i32, i32
  }
  func.func @transform_2(%arg0: i32) -> (i32, i32) {
    %c0_i32 = arith.constant 0 : i32
    %c0_i32_0 = arith.constant 0 : i32
    %c0_i32_1 = arith.constant 0 : i32
    return %c0_i32, %c0_i32_0 : i32, i32
  }
  func.func @transform_3(%arg0: i32) -> (i32, i32) {
    %c0_i32 = arith.constant 0 : i32
    %c0_i32_0 = arith.constant 0 : i32
    %c0_i32_1 = arith.constant 0 : i32
    return %c0_i32, %c0_i32_0 : i32, i32
  }
  func.func @transform_4(%arg0: i32) -> (i32, i32) {
    %c0_i32 = arith.constant 0 : i32
    %c0_i32_0 = arith.constant 0 : i32
    %c0_i32_1 = arith.constant 0 : i32
    return %c0_i32, %c0_i32_0 : i32, i32
  }
  func.func @transform_5(%arg0: i32) -> (i32, i32) {
    %c0_i32 = arith.constant 0 : i32
    %c0_i32_0 = arith.constant 0 : i32
    %c0_i32_1 = arith.constant 0 : i32
    return %c0_i32, %c0_i32_0 : i32, i32
  }
  func.func @transform_6(%arg0: i32) -> (i32, i32, i32) {
    %c0_i32 = arith.constant 0 : i32
    %c0_i32_0 = arith.constant 0 : i32
    %c0_i32_1 = arith.constant 0 : i32
    return %arg0, %c0_i32, %c0_i32_0 : i32, i32, i32
  }
}

module attributes {stable_mosaic.version = 11 : i64} {
  func.func @_fft_mask_kernel(%arg0: i32, %arg1: memref<8x16x16xf32, #tpu.memory_space<vmem>>, %arg2: memref<16x32xf32, #tpu.memory_space<vmem>>, %arg3: memref<16x32xf32, #tpu.memory_space<vmem>>, %arg4: memref<32x32xf32, #tpu.memory_space<vmem>>, %arg5: memref<32x32xf32, #tpu.memory_space<vmem>>, %arg6: memref<32x16xf32, #tpu.memory_space<vmem>>, %arg7: memref<8x16x16xf32, #tpu.memory_space<vmem>>) attributes {dimension_semantics = [#tpu.dimension_semantics<parallel>], iteration_bounds = array<i64: 1>, scalar_prefetch = 0 : i64, scratch_operands = 0 : i64, tpu.core_type = #tpu.core_type<tc>, window_params = [{transform_indices = @transform_0, window_bounds = array<i64: 8, 16, 16>}, {pipeline_mode = #tpu.pipeline_mode<synchronous>, transform_indices = @transform_1, window_bounds = array<i64: 16, 32>}, {pipeline_mode = #tpu.pipeline_mode<synchronous>, transform_indices = @transform_2, window_bounds = array<i64: 16, 32>}, {pipeline_mode = #tpu.pipeline_mode<synchronous>, transform_indices = @transform_3, window_bounds = array<i64: 32, 32>}, {pipeline_mode = #tpu.pipeline_mode<synchronous>, transform_indices = @transform_4, window_bounds = array<i64: 32, 32>}, {pipeline_mode = #tpu.pipeline_mode<synchronous>, transform_indices = @transform_5, window_bounds = array<i64: 32, 16>}, {transform_indices = @transform_6, window_bounds = array<i64: 8, 16, 16>}]} {
    %c0 = arith.constant 0 : index
    %c0_0 = arith.constant 0 : index
    %c0_1 = arith.constant 0 : index
    %0 = vector.load %arg1[%c0, %c0_0, %c0_1] : memref<8x16x16xf32, #tpu.memory_space<vmem>>, vector<8x16x16xf32>
    %1 = vector.shape_cast %0 : vector<8x16x16xf32> to vector<128x16xf32>
    %c0_2 = arith.constant 0 : index
    %c0_3 = arith.constant 0 : index
    %2 = vector.load %arg3[%c0_2, %c0_3] : memref<16x32xf32, #tpu.memory_space<vmem>>, vector<16x32xf32>
    %cst = arith.constant dense<0.000000e+00> : vector<128x32xf32>
    %3 = tpu.matmul %1, %2, %cst {dimension_numbers = #tpu.dot_dimension_numbers<[1], [0], [0], [1], [0, 0, 1, 1], [], []>, precision = #tpu.contract_precision<fp32>} : vector<128x16xf32>, vector<16x32xf32>, vector<128x32xf32> -> vector<128x32xf32>
    %4 = vector.shape_cast %3 : vector<128x32xf32> to vector<8x16x32xf32>
    %5 = vector.extract_strided_slice %4 {offsets = [0, 0, 0], sizes = [8, 16, 16], strides = [1, 1, 1]} : vector<8x16x32xf32> to vector<8x16x16xf32>
    %6 = tpu.transpose %5, [0, 2, 1] : vector<8x16x16xf32> -> vector<8x16x16xf32>
    %7 = vector.extract_strided_slice %4 {offsets = [0, 0, 16], sizes = [8, 16, 16], strides = [1, 1, 1]} : vector<8x16x32xf32> to vector<8x16x16xf32>
    %8 = tpu.transpose %7, [0, 2, 1] : vector<8x16x16xf32> -> vector<8x16x16xf32>
    %9 = tpu.concatenate %6, %8 in 2 : vector<8x16x16xf32>, vector<8x16x16xf32> -> vector<8x16x32xf32>
    %10 = vector.shape_cast %9 : vector<8x16x32xf32> to vector<128x32xf32>
    %c0_4 = arith.constant 0 : index
    %c0_5 = arith.constant 0 : index
    %11 = vector.load %arg4[%c0_4, %c0_5] : memref<32x32xf32, #tpu.memory_space<vmem>>, vector<32x32xf32>
    %cst_6 = arith.constant dense<0.000000e+00> : vector<128x32xf32>
    %12 = tpu.matmul %10, %11, %cst_6 {dimension_numbers = #tpu.dot_dimension_numbers<[1], [0], [0], [1], [0, 0, 1, 1], [], []>, precision = #tpu.contract_precision<fp32>} : vector<128x32xf32>, vector<32x32xf32>, vector<128x32xf32> -> vector<128x32xf32>
    %13 = vector.shape_cast %12 : vector<128x32xf32> to vector<8x16x32xf32>
    %c0_7 = arith.constant 0 : index
    %c0_8 = arith.constant 0 : index
    %14 = vector.load %arg2[%c0_7, %c0_8] : memref<16x32xf32, #tpu.memory_space<vmem>>, vector<16x32xf32>
    %15 = vector.shape_cast %14 : vector<16x32xf32> to vector<1x16x32xf32>
    %16 = vector.broadcast %15 : vector<1x16x32xf32> to vector<8x16x32xf32>
    %17 = arith.mulf %13, %16 : vector<8x16x32xf32>
    %18 = vector.shape_cast %17 : vector<8x16x32xf32> to vector<128x32xf32>
    %c0_9 = arith.constant 0 : index
    %c0_10 = arith.constant 0 : index
    %19 = vector.load %arg5[%c0_9, %c0_10] : memref<32x32xf32, #tpu.memory_space<vmem>>, vector<32x32xf32>
    %cst_11 = arith.constant dense<0.000000e+00> : vector<128x32xf32>
    %20 = tpu.matmul %18, %19, %cst_11 {dimension_numbers = #tpu.dot_dimension_numbers<[1], [0], [0], [1], [0, 0, 1, 1], [], []>, precision = #tpu.contract_precision<fp32>} : vector<128x32xf32>, vector<32x32xf32>, vector<128x32xf32> -> vector<128x32xf32>
    %21 = vector.shape_cast %20 : vector<128x32xf32> to vector<8x16x32xf32>
    %22 = vector.extract_strided_slice %21 {offsets = [0, 0, 0], sizes = [8, 16, 16], strides = [1, 1, 1]} : vector<8x16x32xf32> to vector<8x16x16xf32>
    %23 = tpu.transpose %22, [0, 2, 1] : vector<8x16x16xf32> -> vector<8x16x16xf32>
    %24 = vector.extract_strided_slice %21 {offsets = [0, 0, 16], sizes = [8, 16, 16], strides = [1, 1, 1]} : vector<8x16x32xf32> to vector<8x16x16xf32>
    %25 = tpu.transpose %24, [0, 2, 1] : vector<8x16x16xf32> -> vector<8x16x16xf32>
    %26 = tpu.concatenate %23, %25 in 2 : vector<8x16x16xf32>, vector<8x16x16xf32> -> vector<8x16x32xf32>
    %27 = vector.shape_cast %26 : vector<8x16x32xf32> to vector<128x32xf32>
    %c0_12 = arith.constant 0 : index
    %c0_13 = arith.constant 0 : index
    %28 = vector.load %arg6[%c0_12, %c0_13] : memref<32x16xf32, #tpu.memory_space<vmem>>, vector<32x16xf32>
    %cst_14 = arith.constant dense<0.000000e+00> : vector<128x16xf32>
    %29 = tpu.matmul %27, %28, %cst_14 {dimension_numbers = #tpu.dot_dimension_numbers<[1], [0], [0], [1], [0, 0, 1, 1], [], []>, precision = #tpu.contract_precision<fp32>} : vector<128x32xf32>, vector<32x16xf32>, vector<128x16xf32> -> vector<128x16xf32>
    %30 = vector.shape_cast %29 : vector<128x16xf32> to vector<8x16x16xf32>
    %c0_15 = arith.constant 0 : index
    %c0_16 = arith.constant 0 : index
    %c0_17 = arith.constant 0 : index
    %31 = vector.load %arg7[%c0_15, %c0_16, %c0_17] : memref<8x16x16xf32, #tpu.memory_space<vmem>>, vector<8x16x16xf32>
    tpu.vector_store %arg7[%c0_15, %c0_16, %c0_17], %30 {strides = array<i32>} : memref<8x16x16xf32, #tpu.memory_space<vmem>>, vector<8x16x16xf32>,
    return
  }
  func.func @transform_0(%arg0: i32) -> (i32, i32, i32) {
    %c0_i32 = arith.constant 0 : i32
    %c0_i32_0 = arith.constant 0 : i32
    %c0_i32_1 = arith.constant 0 : i32
    return %arg0, %c0_i32, %c0_i32_0 : i32, i32, i32
  }
  func.func @transform_1(%arg0: i32) -> (i32, i32) {
    %c0_i32 = arith.constant 0 : i32
    %c0_i32_0 = arith.constant 0 : i32
    %c0_i32_1 = arith.constant 0 : i32
    return %c0_i32, %c0_i32_0 : i32, i32
  }
  func.func @transform_2(%arg0: i32) -> (i32, i32) {
    %c0_i32 = arith.constant 0 : i32
    %c0_i32_0 = arith.constant 0 : i32
    %c0_i32_1 = arith.constant 0 : i32
    return %c0_i32, %c0_i32_0 : i32, i32
  }
  func.func @transform_3(%arg0: i32) -> (i32, i32) {
    %c0_i32 = arith.constant 0 : i32
    %c0_i32_0 = arith.constant 0 : i32
    %c0_i32_1 = arith.constant 0 : i32
    return %c0_i32, %c0_i32_0 : i32, i32
  }
  func.func @transform_4(%arg0: i32) -> (i32, i32) {
    %c0_i32 = arith.constant 0 : i32
    %c0_i32_0 = arith.constant 0 : i32
    %c0_i32_1 = arith.constant 0 : i32
    return %c0_i32, %c0_i32_0 : i32, i32
  }
  func.func @transform_5(%arg0: i32) -> (i32, i32) {
    %c0_i32 = arith.constant 0 : i32
    %c0_i32_0 = arith.constant 0 : i32
    %c0_i32_1 = arith.constant 0 : i32
    return %c0_i32, %c0_i32_0 : i32, i32
  }
  func.func @transform_6(%arg0: i32) -> (i32, i32, i32) {
    %c0_i32 = arith.constant 0 : i32
    %c0_i32_0 = arith.constant 0 : i32
    %c0_i32_1 = arith.constant 0 : i32
    return %arg0, %c0_i32, %c0_i32_0 : i32, i32, i32
  }
}

module attributes {stable_mosaic.version = 11 : i64} {
  func.func @_fft_mask_kernel(%arg0: i32, %arg1: memref<8x16x16xf32, #tpu.memory_space<vmem>>, %arg2: memref<16x32xf32, #tpu.memory_space<vmem>>, %arg3: memref<16x32xf32, #tpu.memory_space<vmem>>, %arg4: memref<32x32xf32, #tpu.memory_space<vmem>>, %arg5: memref<32x32xf32, #tpu.memory_space<vmem>>, %arg6: memref<32x16xf32, #tpu.memory_space<vmem>>, %arg7: memref<8x16x16xf32, #tpu.memory_space<vmem>>) attributes {dimension_semantics = [#tpu.dimension_semantics<parallel>], iteration_bounds = array<i64: 1>, scalar_prefetch = 0 : i64, scratch_operands = 0 : i64, tpu.core_type = #tpu.core_type<tc>, window_params = [{transform_indices = @transform_0, window_bounds = array<i64: 8, 16, 16>}, {pipeline_mode = #tpu.pipeline_mode<synchronous>, transform_indices = @transform_1, window_bounds = array<i64: 16, 32>}, {pipeline_mode = #tpu.pipeline_mode<synchronous>, transform_indices = @transform_2, window_bounds = array<i64: 16, 32>}, {pipeline_mode = #tpu.pipeline_mode<synchronous>, transform_indices = @transform_3, window_bounds = array<i64: 32, 32>}, {pipeline_mode = #tpu.pipeline_mode<synchronous>, transform_indices = @transform_4, window_bounds = array<i64: 32, 32>}, {pipeline_mode = #tpu.pipeline_mode<synchronous>, transform_indices = @transform_5, window_bounds = array<i64: 32, 16>}, {transform_indices = @transform_6, window_bounds = array<i64: 8, 16, 16>}]} {
    %c0 = arith.constant 0 : index
    %c0_0 = arith.constant 0 : index
    %c0_1 = arith.constant 0 : index
    %0 = vector.load %arg1[%c0, %c0_0, %c0_1] : memref<8x16x16xf32, #tpu.memory_space<vmem>>, vector<8x16x16xf32>
    %1 = vector.shape_cast %0 : vector<8x16x16xf32> to vector<128x16xf32>
    %c0_2 = arith.constant 0 : index
    %c0_3 = arith.constant 0 : index
    %2 = vector.load %arg3[%c0_2, %c0_3] : memref<16x32xf32, #tpu.memory_space<vmem>>, vector<16x32xf32>
    %cst = arith.constant dense<0.000000e+00> : vector<128x32xf32>
    %3 = tpu.matmul %1, %2, %cst {dimension_numbers = #tpu.dot_dimension_numbers<[1], [0], [0], [1], [0, 0, 1, 1], [], []>} : vector<128x16xf32>, vector<16x32xf32>, vector<128x32xf32> -> vector<128x32xf32>
    %4 = vector.shape_cast %3 : vector<128x32xf32> to vector<8x16x32xf32>
    %5 = vector.extract_strided_slice %4 {offsets = [0, 0, 0], sizes = [8, 16, 16], strides = [1, 1, 1]} : vector<8x16x32xf32> to vector<8x16x16xf32>
    %6 = tpu.transpose %5, [0, 2, 1] : vector<8x16x16xf32> -> vector<8x16x16xf32>
    %7 = vector.extract_strided_slice %4 {offsets = [0, 0, 16], sizes = [8, 16, 16], strides = [1, 1, 1]} : vector<8x16x32xf32> to vector<8x16x16xf32>
    %8 = tpu.transpose %7, [0, 2, 1] : vector<8x16x16xf32> -> vector<8x16x16xf32>
    %9 = tpu.concatenate %6, %8 in 2 : vector<8x16x16xf32>, vector<8x16x16xf32> -> vector<8x16x32xf32>
    %10 = vector.shape_cast %9 : vector<8x16x32xf32> to vector<128x32xf32>
    %c0_4 = arith.constant 0 : index
    %c0_5 = arith.constant 0 : index
    %11 = vector.load %arg4[%c0_4, %c0_5] : memref<32x32xf32, #tpu.memory_space<vmem>>, vector<32x32xf32>
    %cst_6 = arith.constant dense<0.000000e+00> : vector<128x32xf32>
    %12 = tpu.matmul %10, %11, %cst_6 {dimension_numbers = #tpu.dot_dimension_numbers<[1], [0], [0], [1], [0, 0, 1, 1], [], []>} : vector<128x32xf32>, vector<32x32xf32>, vector<128x32xf32> -> vector<128x32xf32>
    %13 = vector.shape_cast %12 : vector<128x32xf32> to vector<8x16x32xf32>
    %c0_7 = arith.constant 0 : index
    %c0_8 = arith.constant 0 : index
    %14 = vector.load %arg2[%c0_7, %c0_8] : memref<16x32xf32, #tpu.memory_space<vmem>>, vector<16x32xf32>
    %15 = vector.shape_cast %14 : vector<16x32xf32> to vector<1x16x32xf32>
    %16 = vector.broadcast %15 : vector<1x16x32xf32> to vector<8x16x32xf32>
    %17 = arith.mulf %13, %16 : vector<8x16x32xf32>
    %18 = vector.shape_cast %17 : vector<8x16x32xf32> to vector<128x32xf32>
    %c0_9 = arith.constant 0 : index
    %c0_10 = arith.constant 0 : index
    %19 = vector.load %arg5[%c0_9, %c0_10] : memref<32x32xf32, #tpu.memory_space<vmem>>, vector<32x32xf32>
    %cst_11 = arith.constant dense<0.000000e+00> : vector<128x32xf32>
    %20 = tpu.matmul %18, %19, %cst_11 {dimension_numbers = #tpu.dot_dimension_numbers<[1], [0], [0], [1], [0, 0, 1, 1], [], []>} : vector<128x32xf32>, vector<32x32xf32>, vector<128x32xf32> -> vector<128x32xf32>
    %21 = vector.shape_cast %20 : vector<128x32xf32> to vector<8x16x32xf32>
    %22 = vector.extract_strided_slice %21 {offsets = [0, 0, 0], sizes = [8, 16, 16], strides = [1, 1, 1]} : vector<8x16x32xf32> to vector<8x16x16xf32>
    %23 = tpu.transpose %22, [0, 2, 1] : vector<8x16x16xf32> -> vector<8x16x16xf32>
    %24 = vector.extract_strided_slice %21 {offsets = [0, 0, 16], sizes = [8, 16, 16], strides = [1, 1, 1]} : vector<8x16x32xf32> to vector<8x16x16xf32>
    %25 = tpu.transpose %24, [0, 2, 1] : vector<8x16x16xf32> -> vector<8x16x16xf32>
    %26 = tpu.concatenate %23, %25 in 2 : vector<8x16x16xf32>, vector<8x16x16xf32> -> vector<8x16x32xf32>
    %27 = vector.shape_cast %26 : vector<8x16x32xf32> to vector<128x32xf32>
    %c0_12 = arith.constant 0 : index
    %c0_13 = arith.constant 0 : index
    %28 = vector.load %arg6[%c0_12, %c0_13] : memref<32x16xf32, #tpu.memory_space<vmem>>, vector<32x16xf32>
    %cst_14 = arith.constant dense<0.000000e+00> : vector<128x16xf32>
    %29 = tpu.matmul %27, %28, %cst_14 {dimension_numbers = #tpu.dot_dimension_numbers<[1], [0], [0], [1], [0, 0, 1, 1], [], []>} : vector<128x32xf32>, vector<32x16xf32>, vector<128x16xf32> -> vector<128x16xf32>
    %30 = vector.shape_cast %29 : vector<128x16xf32> to vector<8x16x16xf32>
    %c0_15 = arith.constant 0 : index
    %c0_16 = arith.constant 0 : index
    %c0_17 = arith.constant 0 : index
    %31 = vector.load %arg7[%c0_15, %c0_16, %c0_17] : memref<8x16x16xf32, #tpu.memory_space<vmem>>, vector<8x16x16xf32>
    tpu.vector_store %arg7[%c0_15, %c0_16, %c0_17], %30 {strides = array<i32>} : memref<8x16x16xf32, #tpu.memory_space<vmem>>, vector<8x16x16xf32>,
    return
  }
  func.func @transform_0(%arg0: i32) -> (i32, i32, i32) {
    %c0_i32 = arith.constant 0 : i32
    %c0_i32_0 = arith.constant 0 : i32
    %c0_i32_1 = arith.constant 0 : i32
    return %arg0, %c0_i32, %c0_i32_0 : i32, i32, i32
  }
  func.func @transform_1(%arg0: i32) -> (i32, i32) {
    %c0_i32 = arith.constant 0 : i32
    %c0_i32_0 = arith.constant 0 : i32
    %c0_i32_1 = arith.constant 0 : i32
    return %c0_i32, %c0_i32_0 : i32, i32
  }
  func.func @transform_2(%arg0: i32) -> (i32, i32) {
    %c0_i32 = arith.constant 0 : i32
    %c0_i32_0 = arith.constant 0 : i32
    %c0_i32_1 = arith.constant 0 : i32
    return %c0_i32, %c0_i32_0 : i32, i32
  }
  func.func @transform_3(%arg0: i32) -> (i32, i32) {
    %c0_i32 = arith.constant 0 : i32
    %c0_i32_0 = arith.constant 0 : i32
    %c0_i32_1 = arith.constant 0 : i32
    return %c0_i32, %c0_i32_0 : i32, i32
  }
  func.func @transform_4(%arg0: i32) -> (i32, i32) {
    %c0_i32 = arith.constant 0 : i32
    %c0_i32_0 = arith.constant 0 : i32
    %c0_i32_1 = arith.constant 0 : i32
    return %c0_i32, %c0_i32_0 : i32, i32
  }
  func.func @transform_5(%arg0: i32) -> (i32, i32) {
    %c0_i32 = arith.constant 0 : i32
    %c0_i32_0 = arith.constant 0 : i32
    %c0_i32_1 = arith.constant 0 : i32
    return %c0_i32, %c0_i32_0 : i32, i32
  }
  func.func @transform_6(%arg0: i32) -> (i32, i32, i32) {
    %c0_i32 = arith.constant 0 : i32
    %c0_i32_0 = arith.constant 0 : i32
    %c0_i32_1 = arith.constant 0 : i32
    return %arg0, %c0_i32, %c0_i32_0 : i32, i32, i32
  }
}

</mosaic_0001>

<bundles_post_ra>
// kernel: tpu_custom_call.1
= control target key start
LH: loop header
LB: loop body
LE: loop exit
PB: predicated region body
PF: predicated region fallthrough
CT: control target
= control target key end

     0   :  { %11 = vsyncpa [#allocation3], 0  ;;  %s5611_s0 = inlined_call_operand.hbm [shape: f32[8,16,16], index: 0, kind: input, shape index: {}]   ;;  %s5612_s1 = inlined_call_operand.vmem [shape: f32[16,32], index: 1, kind: input, shape index: {}]   ;;  %s5613_s2 = inlined_call_operand.hbm [shape: f32[16,32], index: 2, kind: input, shape index: {}]   ;;  %s5614_s3 = inlined_call_operand.vmem [shape: f32[32,32], index: 3, kind: input, shape index: {}]   ;;  %s5615_s4 = inlined_call_operand.hbm [shape: f32[32,32], index: 4, kind: input, shape index: {}]   ;;  %s5616_s5 = inlined_call_operand.vmem [shape: f32[32,16], index: 5, kind: input, shape index: {}]   ;;  %s5617_s6 = inlined_call_operand.hbm [shape: f32[8,16,16], index: 6, kind: output, shape index: {}]  }
   0x1   :  { %12 = vsyncpa [#allocation6], 0 }
   0x2   :  { %13 = vsyncpa [#allocation4], 0  ;;  %s33_s23 = sshll.u32 %s5613_s2, 4  ;;  %s4346_s24 = smov [#allocation5]   ;;  %s34_s23 = int_to_ptr.hbm [resolvable:$true] %s33_s23 }
   0x3   :  { %s35_s25 = sshll.u32 %s4346_s24, 4  ;;  %s18_s28 = sshll.u32 %s5611_s0, 4  ;;  %s36_s25 = int_to_ptr.vmem [resolvable:$true] %s35_s25  ;;  %s19_s28 = int_to_ptr.hbm [resolvable:$true] %s18_s28 }
   0x4   :  { %s4347_s29 = smov 128   ;;  %s4348_s30 = smov 8  }
   0x5   :  { %41 = dma.hbm_to_vmem [thread:$0]  %s34_s23, 256, %s36_s25, [#allocation6], %s4347_s29, %s4347_s29, %s4348_s30  }
   0x6   :  { %s4349_s7 = smov [#allocation2]   ;;  %s48_s2 = sshll.u32 %s5615_s4, 4  ;;  %s49_s2 = int_to_ptr.hbm [resolvable:$true] %s48_s2 }
   0x7   :  { %s20_s8 = sshll.u32 %s4349_s7, 4  ;;  %s4350_s0 = smov [#allocation7]   ;;  %s21_s8 = int_to_ptr.vmem [resolvable:$true] %s20_s8 }
   0x8   :  { %26 = dma.hbm_to_vmem [thread:$0]  %s19_s28, 2048, %s21_s8, [#allocation3], %s4347_s29, %s4347_s29, %s4348_s30  }
   0x9   :  { %s50_s11 = sshll.u32 %s4350_s0, 4  ;;  %s51_s11 = int_to_ptr.vmem [resolvable:$true] %s50_s11 }
   0xa   :  { %56 = dma.hbm_to_vmem [thread:$0]  %s49_s2, 512, %s51_s11, [#allocation6], %s4347_s29, %s4347_s29, %s4348_s30  }
   0xb   :  { %4340 = dma.done.wait [#allocation3], 2048  }
   0xc   :  { %4341 = vsyncadd [#allocation3], 4294965248 }
   0xd   :  { %4342 = dma.done.wait [#allocation6], 768  }
   0xe   :  { %4343 = vsyncadd [#allocation6], 4294966528  ;;  %vm89_vm0 = vcmask 130048   ;;  %v88_v0 = vld [vmem:[#allocation5 + $0x8] sm:$0xff]  ;;  %v87_v1 = vld [vmem:[#allocation5] sm:$0xff]  ;;  %s4351_s4 = smov 112  }
   0xf   :  { %v71_v2 = vld [vmem:[#allocation2] sm:$0xff]  ;;  %v152_v3 = vand.u32 4294901760, %v88_v0  ;;  %v154_v4 = vand.u32 4294901760, %v87_v1  ;;  %v72_v6 = vld [vmem:[#allocation2 + $0x8] sm:$0xff]  ;;  %v73_v9 = vld [vmem:[#allocation2 + $0x10] sm:$0xff]  ;;  %s4352_s12 = smov 16  }
  0x10   :  { %v91_v5 = vsel %vm89_vm0, %v71_v2, 0  ;;  %v94_v8 = vsel %vm89_vm0, %v72_v6, 0  ;;  %v97_v17 = vsel %vm89_vm0, %v73_v9, 0  ;;  %v74_v27 = vld [vmem:[#allocation2 + $0x18] sm:$0xff]  ;;  %v75_v34 = vld [vmem:[#allocation2 + $0x20] sm:$0xff]  ;;  %v76_v41 = vld [vmem:[#allocation2 + $0x28] sm:$0xff] }
  0x11   :  { %v4408_v7 = vand.u32 4294901760, %v91_v5  ;;  %v300_v10 = vsub.f32 %v88_v0, %v152_v3  ;;  %153 = vmatpush.msra.mxu0 %v152_v3  ;;  %v306_v11 = vsub.f32 %v87_v1, %v154_v4  ;;  %492 = vmatpush.msra.mxu3 %v152_v3  ;;  %v4411_v12 = vand.u32 4294901760, %v94_v8  ;;  %v77_v48 = vld [vmem:[#allocation2 + $0x30] sm:$0xff]  ;;  %v78_v55 = vld [vmem:[#allocation2 + $0x38] sm:$0xff]  ;;  %v79_v62 = vld [vmem:[#allocation2 + $0x40] sm:$0xff]  ;;  %s4221_s0 = sshll.u32 %s5617_s6, 4  ;;  %s4222_s0 = int_to_ptr.hbm [resolvable:$true] %s4221_s0 }
  0x12   :  { %v4416_v23 = vand.u32 4294901760, %v97_v17  ;;  %v100_v30 = vsel %vm89_vm0, %v74_v27, 0  ;;  %v103_v37 = vsel %vm89_vm0, %v75_v34, 0  ;;  %v106_v44 = vsel %vm89_vm0, %v76_v41, 0 }
  0x13   :  { %v157_v13 = vsub.f32 %v91_v5, %v4408_v7  ;;  %392 = vmatpush.msra.mxu2 %v300_v10  ;;  %155 = vmatpush.msra.mxu0 %v154_v4  ;;  %v301_v14 = vand.u32 4294901760, %v300_v10  ;;  %v307_v15 = vand.u32 4294901760, %v306_v11  ;;  %v165_v16 = vsub.f32 %v94_v8, %v4411_v12  ;;  %v80_v5 = vld [vmem:[#allocation2 + $0x48] sm:$0xff] }
  0x14   :  { %494 = vmatpush.msra.mxu3 %v154_v4  ;;  %v173_v29 = vsub.f32 %v97_v17, %v4416_v23  ;;  %v4421_v33 = vand.u32 4294901760, %v100_v30  ;;  %v4426_v40 = vand.u32 4294901760, %v103_v37  ;;  %v4431_v47 = vand.u32 4294901760, %v106_v44 }
  0x15   :  { %v158_v18 = vand.u32 4294901760, %v157_v13  ;;  %395 = vmatpush.msra.mxu2 %v306_v11  ;;  %v302_v19 = vsub.f32 %v300_v10, %v301_v14  ;;  %609 = vmatpush.msrb.mxu0 %v301_v14  ;;  %v308_v20 = vsub.f32 %v306_v11, %v307_v15  ;;  %v166_v22 = vand.u32 4294901760, %v165_v16  ;;  %v81_v14 = vld [vmem:[#allocation2 + $0x50] sm:$0xff] }
  0x16   :  { %398 = vmatmul.f32.vlgmr.msra.gmra.mxu2 %v157_v13  ;;  %v174_v32 = vand.u32 4294901760, %v173_v29  ;;  %v181_v36 = vsub.f32 %v100_v30, %v4421_v33  ;;  %v189_v43 = vsub.f32 %v103_v37, %v4426_v40  ;;  %v197_v50 = vsub.f32 %v106_v44, %v4431_v47  ;;  %v84_v37 = vld [vmem:[#allocation2 + $0x68] sm:$0xff] }
  0x17   :  { %v159_v21 = vsub.f32 %v157_v13, %v158_v18  ;;  %498 = vmatmul.f32.vlgmr.msra.gmra.mxu3 %v158_v18  ;;  %v303_v24 = vand.u32 4294901760, %v302_v19  ;;  %v309_v25 = vand.u32 4294901760, %v308_v20  ;;  %613 = vmatpush.msrb.mxu0 %v307_v15  ;;  %v167_v28 = vsub.f32 %v165_v16, %v166_v22 }
  0x18   :  { %v175_v35 = vsub.f32 %v173_v29, %v174_v32  ;;  %v182_v39 = vand.u32 4294901760, %v181_v36  ;;  %v190_v46 = vand.u32 4294901760, %v189_v43  ;;  %v109_v51 = vsel %vm89_vm0, %v77_v48, 0 }
  0x19   :  { %v160_v26 = vand.u32 4294901760, %v159_v21  ;;  %304 = vmatpush.msra.mxu1 %v303_v24  ;;  %v168_v31 = vand.u32 4294901760, %v167_v28  ;;  %v198_v53 = vand.u32 4294901760, %v197_v50  ;;  %v4436_v54 = vand.u32 4294901760, %v109_v51  ;;  %v82_v21 = vld [vmem:[#allocation2 + $0x58] sm:$0xff] }
  0x1a   :  { %v176_v38 = vand.u32 4294901760, %v175_v35  ;;  %v183_v42 = vsub.f32 %v181_v36, %v182_v39  ;;  %v191_v49 = vsub.f32 %v189_v43, %v190_v46  ;;  %v112_v58 = vsel %vm89_vm0, %v78_v55, 0 }
  0x1b   :  { %161 = vmatmul.f32.vlgmr.msra.gmra.mxu0 %v160_v26  ;;  %310 = vmatpush.msra.mxu1 %v309_v25  ;;  %v199_v56 = vsub.f32 %v197_v50, %v198_v53  ;;  %v205_v57 = vsub.f32 %v109_v51, %v4436_v54  ;;  %v4441_v61 = vand.u32 4294901760, %v112_v58  ;;  %v115_v1 = vsel %vm89_vm0, %v79_v62, 0 }
  0x1c   :  { %312 = vmatmul.f32.vlgmr.msra.gmra.mxu1 %v4408_v7  ;;  %v184_v45 = vand.u32 4294901760, %v183_v42  ;;  %v192_v52 = vand.u32 4294901760, %v191_v49  ;;  %v118_v9 = vsel %vm89_vm0, %v80_v5, 0  ;;  %v121_v17 = vsel %vm89_vm0, %v81_v14, 0 }
  0x1d   :  { %694 = vmatpush.msrb.mxu1 %v152_v3  ;;  %v200_v59 = vand.u32 4294901760, %v199_v56  ;;  %v206_v60 = vand.u32 4294901760, %v205_v57  ;;  %v213_v0 = vsub.f32 %v112_v58, %v4441_v61  ;;  %v4451_v13 = vand.u32 4294901760, %v118_v9 }
  0x1e   :  { %403 = vmatmul.f32.gmra.mxu2 %v165_v16  ;;  %v4456_v20 = vand.u32 4294901760, %v121_v17  ;;  %v124_v25 = vsel %vm89_vm0, %v82_v21, 0  ;;  %v130_v41 = vsel %vm89_vm0, %v84_v37, 0  ;;  %vm1422_vm1 = vcmask 261120  }
  0x1f   :  { %504 = vmatmul.f32.gmra.mxu3 %v166_v22  ;;  %696 = vmatpush.msrb.mxu1 %v154_v4  ;;  %v207_v63 = vsub.f32 %v205_v57, %v206_v60  ;;  %v214_v3 = vand.u32 4294901760, %v213_v0  ;;  %v4446_v4 = vand.u32 4294901760, %v115_v1  ;;  %v229_v16 = vsub.f32 %v118_v9, %v4451_v13 }
  0x20   :  { %v237_v24 = vsub.f32 %v121_v17, %v4456_v20  ;;  %v4461_v28 = vand.u32 4294901760, %v124_v25  ;;  %v4471_v44 = vand.u32 4294901760, %v130_v41 }
  0x21   :  { %v208_v2 = vand.u32 4294901760, %v207_v63  ;;  %v215_v6 = vsub.f32 %v213_v0, %v214_v3  ;;  %v221_v8 = vsub.f32 %v115_v1, %v4446_v4  ;;  %v230_v19 = vand.u32 4294901760, %v229_v16 }
  0x22   :  { %v238_v27 = vand.u32 4294901760, %v237_v24  ;;  %v261_v48 = vsub.f32 %v130_v41, %v4471_v44 }
  0x23   :  { %169 = vmatmul.f32.gmra.mxu0 %v168_v31  ;;  %v216_v10 = vand.u32 4294901760, %v215_v6  ;;  %v222_v11 = vand.u32 4294901760, %v221_v8  ;;  %v231_v22 = vsub.f32 %v229_v16, %v230_v19  ;;  %v245_v31 = vsub.f32 %v124_v25, %v4461_v28 }
  0x24   :  { %316 = vmatmul.f32.gmra.mxu1 %v4411_v12  ;;  %v239_v30 = vsub.f32 %v237_v24, %v238_v27  ;;  %v262_v51 = vand.u32 4294901760, %v261_v48 }
  0x25   :  { %v223_v15 = vsub.f32 %v221_v8, %v222_v11  ;;  %v232_v26 = vand.u32 4294901760, %v231_v22  ;;  %v246_v35 = vand.u32 4294901760, %v245_v31 }
  0x26   :  { %408 = vmatmul.f32.gmra.mxu2 %v173_v29  ;;  %v83_v29 = vld [vmem:[#allocation2 + $0x60] sm:$0xff]  ;;  %v240_v34 = vand.u32 4294901760, %v239_v30  ;;  %v263_v55 = vsub.f32 %v261_v48, %v262_v51 }
  0x27   :  { %510 = vmatmul.f32.gmra.mxu3 %v174_v32  ;;  %v224_v18 = vand.u32 4294901760, %v223_v15  ;;  %v127_v32 = vsel %vm89_vm0, %v83_v29, 0 }
  0x28   :  { %v264_v58 = vand.u32 4294901760, %v263_v55 }
  0x2b   :  { %177 = vmatmul.f32.gmra.mxu0 %v176_v38  ;;  %v247_v38 = vsub.f32 %v245_v31, %v246_v35 }
  0x2c   :  { %320 = vmatmul.f32.gmra.mxu1 %v4416_v23 }
  0x2d   :  { %v248_v42 = vand.u32 4294901760, %v247_v38 }
  0x2e   :  { %413 = vmatmul.f32.gmra.mxu2 %v181_v36  ;;  %v4466_v36 = vand.u32 4294901760, %v127_v32 }
  0x2f   :  { %516 = vmatmul.f32.gmra.mxu3 %v182_v39 }
  0x30   :  { %v253_v39 = vsub.f32 %v127_v32, %v4466_v36 }
  0x33   :  { %185 = vmatmul.f32.gmra.mxu0 %v184_v45  ;;  %v85_v45 = vld [vmem:[#allocation2 + $0x70] sm:$0xff] }
  0x34   :  { %324 = vmatmul.f32.gmra.mxu1 %v4421_v33  ;;  %v133_v49 = vsel %vm89_vm0, %v85_v45, 0 }
  0x36   :  { %418 = vmatmul.f32.gmra.mxu2 %v189_v43  ;;  %v254_v43 = vand.u32 4294901760, %v253_v39 }
  0x37   :  { %522 = vmatmul.f32.gmra.mxu3 %v190_v46 }
  0x38   :  { %v255_v46 = vsub.f32 %v253_v39, %v254_v43 }
  0x3b   :  { %193 = vmatmul.f32.gmra.mxu0 %v192_v52  ;;  %v4476_v52 = vand.u32 4294901760, %v133_v49 }
  0x3c   :  { %328 = vmatmul.f32.gmra.mxu1 %v4426_v40 }
  0x3d   :  { %v269_v56 = vsub.f32 %v133_v49, %v4476_v52 }
  0x3e   :  { %423 = vmatmul.f32.gmra.mxu2 %v197_v50  ;;  %v256_v50 = vand.u32 4294901760, %v255_v46 }
  0x3f   :  { %528 = vmatmul.f32.gmra.mxu3 %v198_v53  ;;  %v86_v53 = vld [vmem:[#allocation2 + $0x78] sm:$0xff] }
  0x43   :  { %201 = vmatmul.f32.gmra.mxu0 %v200_v59  ;;  %v270_v59 = vand.u32 4294901760, %v269_v56 }
  0x44   :  { %332 = vmatmul.f32.gmra.mxu1 %v4431_v47 }
  0x45   :  { %v271_v62 = vsub.f32 %v269_v56, %v270_v59 }
  0x46   :  { %428 = vmatmul.f32.gmra.mxu2 %v205_v57  ;;  %v136_v57 = vsel %vm89_vm0, %v86_v53, 0 }
  0x47   :  { %534 = vmatmul.f32.gmra.mxu3 %v206_v60  ;;  %v4481_v60 = vand.u32 4294901760, %v136_v57 }
  0x49   :  { %v277_v63 = vsub.f32 %v136_v57, %v4481_v60 }
  0x4b   :  { %209 = vmatmul.f32.gmra.mxu0 %v208_v2  ;;  %v278_v1 = vand.u32 4294901760, %v277_v63 }
  0x4c   :  { %336 = vmatmul.f32.gmra.mxu1 %v4436_v54 }
  0x4d   :  { %v279_v2 = vsub.f32 %v277_v63, %v278_v1 }
  0x4e   :  { %433 = vmatmul.f32.gmra.mxu2 %v213_v0  ;;  %v272_v0 = vand.u32 4294901760, %v271_v62 }
  0x4f   :  { %540 = vmatmul.f32.gmra.mxu3 %v214_v3  ;;  %v280_v3 = vand.u32 4294901760, %v279_v2 }
  0x53   :  { %217 = vmatmul.f32.gmra.mxu0 %v216_v10 }
  0x54   :  { %340 = vmatmul.f32.gmra.mxu1 %v4441_v61 }
  0x56   :  { %438 = vmatmul.f32.gmra.mxu2 %v221_v8 }
  0x57   :  { %546 = vmatmul.f32.gmra.mxu3 %v222_v11 }
  0x5b   :  { %225 = vmatmul.f32.gmra.mxu0 %v224_v18 }
  0x5c   :  { %344 = vmatmul.f32.gmra.mxu1 %v4446_v4 }
  0x5e   :  { %443 = vmatmul.f32.gmra.mxu2 %v229_v16 }
  0x5f   :  { %552 = vmatmul.f32.gmra.mxu3 %v230_v19 }
  0x63   :  { %233 = vmatmul.f32.gmra.mxu0 %v232_v26 }
  0x64   :  { %348 = vmatmul.f32.gmra.mxu1 %v4451_v13 }
  0x66   :  { %448 = vmatmul.f32.gmra.mxu2 %v237_v24 }
  0x67   :  { %558 = vmatmul.f32.gmra.mxu3 %v238_v27 }
  0x6b   :  { %241 = vmatmul.f32.gmra.mxu0 %v240_v34 }
  0x6c   :  { %352 = vmatmul.f32.gmra.mxu1 %v4456_v20 }
  0x6e   :  { %453 = vmatmul.f32.gmra.mxu2 %v245_v31 }
  0x6f   :  { %564 = vmatmul.f32.gmra.mxu3 %v246_v35 }
  0x73   :  { %249 = vmatmul.f32.gmra.mxu0 %v248_v42 }
  0x74   :  { %356 = vmatmul.f32.gmra.mxu1 %v4461_v28 }
  0x76   :  { %458 = vmatmul.f32.gmra.mxu2 %v253_v39 }
  0x77   :  { %570 = vmatmul.f32.gmra.mxu3 %v254_v43 }
  0x7b   :  { %257 = vmatmul.f32.gmra.mxu0 %v256_v50 }
  0x7c   :  { %360 = vmatmul.f32.gmra.mxu1 %v4466_v36 }
  0x7e   :  { %463 = vmatmul.f32.gmra.mxu2 %v261_v48 }
  0x7f   :  { %576 = vmatmul.f32.gmra.mxu3 %v262_v51 }
  0x83   :  { %265 = vmatmul.f32.gmra.mxu0 %v264_v58 }
  0x84   :  { %364 = vmatmul.f32.gmra.mxu1 %v4471_v44 }
  0x86   :  { %468 = vmatmul.f32.gmra.mxu2 %v269_v56 }
  0x87   :  { %582 = vmatmul.f32.gmra.mxu3 %v270_v59 }
  0x8b   :  { %273 = vmatmul.f32.gmra.mxu0 %v272_v0 }
  0x8c   :  { %368 = vmatmul.f32.gmra.mxu1 %v4476_v52 }
  0x8e   :  { %473 = vmatmul.f32.gmra.mxu2 %v277_v63 }
  0x8f   :  { %588 = vmatmul.f32.gmra.mxu3 %v278_v1 }
  0x93   :  { %281 = vmatmul.f32.gmra.mxu0 %v280_v3 }
  0x94   :  { %372 = vmatmul.f32.gmra.mxu1 %v4481_v60 }
  0x98   :  { %v4487_v5 = vpop.f32.mrf.mxu0 }
  0x99   :  { %v4489_v6 = vpop.f32.mrf.mxu1 }
  0x9a   :  { %v499_v27 = vpop.f32.mrf.mxu3  ;;  %v314_v34 = vadd.f32 %v4489_v6, %v4487_v5 }
  0x9b   :  { %615 = vmatmul.f32.vlgmr.msrb.gmra.mxu0 %v4408_v7 }
  0x9c   :  { %698 = vmatmul.f32.vlgmr.msrb.gmra.mxu1 %v4408_v7 }
  0xa0   :  { %v4493_v8 = vpop.f32.mrf.mxu0 }
  0xa1   :  { %v4495_v9 = vpop.f32.mrf.mxu1 }
  0xa2   :  { %v505_v31 = vpop.f32.mrf.mxu3  ;;  %v318_v42 = vadd.f32 %v4495_v9, %v4493_v8 }
  0xa3   :  { %619 = vmatmul.f32.gmra.mxu0 %v4411_v12 }
  0xa4   :  { %702 = vmatmul.f32.gmra.mxu1 %v4411_v12 }
  0xa8   :  { %v4499_v10 = vpop.f32.mrf.mxu0 }
  0xa9   :  { %v4501_v11 = vpop.f32.mrf.mxu1 }
  0xaa   :  { %v511_v39 = vpop.f32.mrf.mxu3 }
  0xab   :  { %623 = vmatmul.f32.gmra.mxu0 %v4416_v23 }
  0xac   :  { %706 = vmatmul.f32.gmra.mxu1 %v4416_v23 }
  0xb0   :  { %v4505_v14 = vpop.f32.mrf.mxu0 }
  0xb1   :  { %v4507_v15 = vpop.f32.mrf.mxu1 }
  0xb2   :  { %v517_v50 = vpop.f32.mrf.mxu3  ;;  %v326_v62 = vadd.f32 %v4507_v15, %v4505_v14 }
  0xb3   :  { %627 = vmatmul.f32.gmra.mxu0 %v4421_v33 }
  0xb4   :  { %710 = vmatmul.f32.gmra.mxu1 %v4421_v33 }
  0xb8   :  { %v4511_v7 = vpop.f32.mrf.mxu0 }
  0xb9   :  { %v4513_v16 = vpop.f32.mrf.mxu1 }
  0xba   :  { %v523_v63 = vpop.f32.mrf.mxu3 }
  0xbb   :  { %631 = vmatmul.f32.gmra.mxu0 %v4426_v40 }
  0xbc   :  { %714 = vmatmul.f32.gmra.mxu1 %v4426_v40 }
  0xc0   :  { %v4517_v12 = vpop.f32.mrf.mxu0 }
  0xc1   :  { %v4519_v17 = vpop.f32.mrf.mxu1 }
  0xc3   :  { %635 = vmatmul.f32.gmra.mxu0 %v4431_v47 }
  0xc4   :  { %718 = vmatmul.f32.gmra.mxu1 %v4431_v47 }
  0xc8   :  { %v4523_v23 = vpop.f32.mrf.mxu0 }
  0xc9   :  { %v4525_v18 = vpop.f32.mrf.mxu1 }
  0xcb   :  { %639 = vmatmul.f32.gmra.mxu0 %v4436_v54 }
  0xcc   :  { %722 = vmatmul.f32.gmra.mxu1 %v4436_v54 }
  0xd0   :  { %v4529_v33 = vpop.f32.mrf.mxu0 }
  0xd1   :  { %v4531_v19 = vpop.f32.mrf.mxu1 }
  0xd3   :  { %643 = vmatmul.f32.gmra.mxu0 %v4441_v61 }
  0xd4   :  { %726 = vmatmul.f32.gmra.mxu1 %v4441_v61 }
  0xd8   :  { %v4535_v40 = vpop.f32.mrf.mxu0 }
  0xd9   :  { %v4537_v21 = vpop.f32.mrf.mxu1 }
  0xdb   :  { %647 = vmatmul.f32.gmra.mxu0 %v4446_v4 }
  0xdc   :  { %730 = vmatmul.f32.gmra.mxu1 %v4446_v4 }
  0xe0   :  { %v4541_v47 = vpop.f32.mrf.mxu0 }
  0xe1   :  { %v4543_v22 = vpop.f32.mrf.mxu1 }
  0xe3   :  { %651 = vmatmul.f32.gmra.mxu0 %v4451_v13 }
  0xe4   :  { %734 = vmatmul.f32.gmra.mxu1 %v4451_v13  ;;  %v399_v13 = vpop.f32.mrf.mxu2 }
  0xe5   :  { %v400_v38 = vadd.f32 %v399_v13, %v314_v34  ;;  %v338_v34 = vadd.f32 %v4525_v18, %v4523_v23 }
  0xe7   :  { %v500_v41 = vadd.f32 %v499_v27, %v400_v38 }
  0xe8   :  { %v4547_v54 = vpop.f32.mrf.mxu0 }
  0xe9   :  { %v4549_v24 = vpop.f32.mrf.mxu1 }
  0xeb   :  { %655 = vmatmul.f32.gmra.mxu0 %v4456_v20 }
  0xec   :  { %738 = vmatmul.f32.gmra.mxu1 %v4456_v20  ;;  %v404_v30 = vpop.f32.mrf.mxu2 }
  0xed   :  { %v405_v48 = vadd.f32 %v404_v30, %v318_v42 }
  0xef   :  { %v506_v51 = vadd.f32 %v505_v31, %v405_v48 }
  0xf0   :  { %v4553_v61 = vpop.f32.mrf.mxu0 }
  0xf1   :  { %v4555_v25 = vpop.f32.mrf.mxu1 }
  0xf3   :  { %659 = vmatmul.f32.gmra.mxu0 %v4461_v28 }
  0xf4   :  { %742 = vmatmul.f32.gmra.mxu1 %v4461_v28  ;;  %v409_v35 = vpop.f32.mrf.mxu2 }
  0xf8   :  { %v4559_v4 = vpop.f32.mrf.mxu0 }
  0xf9   :  { %v4561_v26 = vpop.f32.mrf.mxu1 }
  0xfb   :  { %663 = vmatmul.f32.gmra.mxu0 %v4466_v36 }
  0xfc   :  { %746 = vmatmul.f32.gmra.mxu1 %v4466_v36  ;;  %v414_v45 = vpop.f32.mrf.mxu2 }
  0xfd   :  { %v415_v3 = vadd.f32 %v414_v45, %v326_v62 }
  0xff   :  { %v518_v8 = vadd.f32 %v517_v50, %v415_v3  ;;  %v342_v50 = vadd.f32 %v4531_v19, %v4529_v33  ;;  %v354_v33 = vadd.f32 %v4549_v24, %v4547_v54  ;;  %v330_v54 = vadd.f32 %v4513_v16, %v4511_v7 }
 0x100   :  { %v4565_v29 = vpop.f32.mrf.mxu0  ;;  %v358_v16 = vadd.f32 %v4555_v25, %v4553_v61 }
 0x101   :  { %v4567_v20 = vpop.f32.mrf.mxu1 }
 0x103   :  { %667 = vmatmul.f32.gmra.mxu0 %v4471_v44 }
 0x104   :  { %750 = vmatmul.f32.gmra.mxu1 %v4471_v44  ;;  %v4590_v59 = vpop.f32.mrf.mxu2 }
 0x105   :  { %v420_v24 = vadd.f32 %v4590_v59, %v330_v54 }
 0x108   :  { %v4571_v28 = vpop.f32.mrf.mxu0 }
 0x109   :  { %v4573_v32 = vpop.f32.mrf.mxu1 }
 0x10b   :  { %671 = vmatmul.f32.gmra.mxu0 %v4476_v52 }
 0x10c   :  { %754 = vmatmul.f32.gmra.mxu1 %v4476_v52  ;;  %v322_v52 = vadd.f32 %v4501_v11, %v4499_v10  ;;  %v424_v6 = vpop.f32.mrf.mxu2  ;;  %v529_v11 = vpop.f32.mrf.mxu3 }
 0x10e   :  { %v410_v57 = vadd.f32 %v409_v35, %v322_v52 }
 0x110   :  { %v4579_v36 = vpop.f32.mrf.mxu0 }
 0x111   :  { %v4581_v37 = vpop.f32.mrf.mxu1 }
 0x113   :  { %675 = vmatmul.f32.gmra.mxu0 %v4481_v60 }
 0x114   :  { %758 = vmatmul.f32.gmra.mxu1 %v4481_v60  ;;  %v512_v60 = vadd.f32 %v511_v39, %v410_v57  ;;  %v429_v30 = vpop.f32.mrf.mxu2  ;;  %v535_v15 = vpop.f32.mrf.mxu3 }
 0x118   :  { %v616_v43 = vpop.f32.mrf.mxu0 }
 0x119   :  { %v617_v44 = vadd.f32 %v616_v43, %v500_v41  ;;  %v699_v46 = vpop.f32.mrf.mxu1  ;;  %v430_v41 = vadd.f32 %v429_v30, %v338_v34  ;;  %v334_v30 = vadd.f32 %v4519_v17, %v4517_v12 }
 0x11b   :  { %v700_v49 = vadd.f32 %v699_v46, %v617_v44  ;;  %v536_v43 = vadd.f32 %v535_v15, %v430_v41  ;;  %v425_v34 = vadd.f32 %v424_v6, %v334_v30  ;;  %v366_v30 = vadd.f32 %v4567_v20, %v4565_v29 }
 0x11c   :  { %v434_v38 = vpop.f32.mrf.mxu2  ;;  %v541_v42 = vpop.f32.mrf.mxu3 }
 0x11d   :  { %762 = vxpose.xlu2.b32.start [1/2] (short) (narrow) %v700_v49, 16  ;;  %1034 = vrot.lane.b32.xlu0 %v700_v49, %s4351_s4  ;;  %v435_v52 = vadd.f32 %v434_v38, %v342_v50  ;;  %v530_v41 = vadd.f32 %v529_v11, %v425_v34  ;;  %v362_v11 = vadd.f32 %v4561_v26, %v4559_v4 }
 0x120   :  { %v620_v53 = vpop.f32.mrf.mxu0 }
 0x121   :  { %v621_v55 = vadd.f32 %v620_v53, %v506_v51  ;;  %v703_v56 = vpop.f32.mrf.mxu1 }
 0x123   :  { %v704_v58 = vadd.f32 %v703_v56, %v621_v55  ;;  %v542_v55 = vadd.f32 %v541_v42, %v435_v52  ;;  %v346_v52 = vadd.f32 %v4537_v21, %v4535_v40 }
 0x124   :  { %v4599_v49 = vpop.f32.mrf.mxu2  ;;  %v4604_v23 = vpop.f32.mrf.mxu3 }
 0x125   :  { %763 = vxpose.xlu2.b32.end [2/2] (short) (narrow) %v704_v58, 16  ;;  %1036 = vrot.lane.b32.xlu0 %v704_v58, %s4351_s4 }
 0x128   :  { %v624_v0 = vpop.f32.mrf.mxu0 }
 0x129   :  { %v625_v1 = vadd.f32 %v624_v0, %v512_v60  ;;  %v707_v2 = vpop.f32.mrf.mxu1 }
 0x12b   :  { %v708_v5 = vadd.f32 %v707_v2, %v625_v1 }
 0x12c   :  { %v4606_v53 = vpop.f32.mrf.mxu2  ;;  %v4610_v58 = vpop.f32.mrf.mxu3 }
 0x12d   :  { %1038 = vrot.lane.b32.xlu1 %v708_v5, %s4351_s4 }
 0x130   :  { %v628_v9 = vpop.f32.mrf.mxu0 }
 0x131   :  { %v629_v10 = vadd.f32 %v628_v9, %v518_v8  ;;  %v711_v13 = vpop.f32.mrf.mxu1 }
 0x133   :  { %v712_v27 = vadd.f32 %v711_v13, %v629_v10 }
 0x134   :  { %v449_v19 = vpop.f32.mrf.mxu2  ;;  %v559_v3 = vpop.f32.mrf.mxu3 }
 0x135   :  { %1040 = vrot.lane.b32.xlu1 %v712_v27, %s4351_s4  ;;  %v450_v2 = vadd.f32 %v449_v19, %v354_v33  ;;  %v350_v33 = vadd.f32 %v4543_v22, %v4541_v47 }
 0x138   :  { %v632_v31 = vpop.f32.mrf.mxu0 }
 0x139   :  { %v715_v14 = vpop.f32.mrf.mxu1 }
 0x13c   :  { %v454_v7 = vpop.f32.mrf.mxu2  ;;  %v565_v17 = vpop.f32.mrf.mxu3 }
 0x13d   :  { %v455_v59 = vadd.f32 %v454_v7, %v358_v16 }
 0x13f   :  { %v566_v6 = vadd.f32 %v565_v17, %v455_v59 }
 0x140   :  { %v636_v35 = vpop.f32.mrf.mxu0 }
 0x141   :  { %v719_v39 = vpop.f32.mrf.mxu1  ;;  %v637_v42 = vadd.f32 %v636_v35, %v530_v41 }
 0x147   :  { %794 = vxpose.xlu0.b32.start [1/2] (short) (narrow) %v708_v5, 16  ;;  %v560_v5 = vadd.f32 %v559_v3, %v450_v2  ;;  %v445_v2 = vadd.f32 %v4606_v53, %v350_v33 }
 0x148   :  { %v640_v44 = vpop.f32.mrf.mxu0 }
 0x149   :  { %v641_v45 = vadd.f32 %v640_v44, %v536_v43  ;;  %v723_v46 = vpop.f32.mrf.mxu1  ;;  %v720_v43 = vadd.f32 %v719_v39, %v637_v42 }
 0x14b   :  { %v724_v48 = vadd.f32 %v723_v46, %v641_v45  ;;  %v571_v46 = vpop.f32.mrf.mxu3 }
 0x14d   :  { %1046 = vrot.lane.b32.xlu1 %v724_v48, %s4351_s4 }
 0x14f   :  { %795 = vxpose.xlu0.b32.end [2/2] (short) (narrow) %v712_v27, 16  ;;  %v524_v27 = vadd.f32 %v523_v63, %v420_v24 }
 0x150   :  { %v644_v18 = vpop.f32.mrf.mxu0 }
 0x151   :  { %v727_v51 = vpop.f32.mrf.mxu1  ;;  %v645_v57 = vadd.f32 %v644_v18, %v542_v55  ;;  %v633_v15 = vadd.f32 %v632_v31, %v524_v27  ;;  %v459_v31 = vpop.f32.mrf.mxu2  ;;  %v440_v55 = vadd.f32 %v4599_v49, %v346_v52 }
 0x152   :  { %v460_v39 = vadd.f32 %v459_v31, %v362_v11 }
 0x153   :  { %v728_v62 = vadd.f32 %v727_v51, %v645_v57  ;;  %v716_v38 = vadd.f32 %v715_v14, %v633_v15  ;;  %v548_v57 = vadd.f32 %v4604_v23, %v440_v55  ;;  %v577_v15 = vpop.f32.mrf.mxu3 }
 0x154   :  { %v572_v18 = vadd.f32 %v571_v46, %v460_v39 }
 0x157   :  { %858 = vxpose.xlu0.b32.start [1/2] (short) (narrow) %v724_v48, 16 }
 0x158   :  { %v4608_v56 = vpop.f32.mrf.mxu0 }
 0x159   :  { %v4612_v60 = vpop.f32.mrf.mxu1  ;;  %v649_v19 = vadd.f32 %v4608_v56, %v548_v57  ;;  %v464_v27 = vpop.f32.mrf.mxu2 }
 0x15b   :  { %v732_v3 = vadd.f32 %v4612_v60, %v649_v19  ;;  %v583_v7 = vpop.f32.mrf.mxu3 }
 0x15f   :  { %859 = vxpose.xlu0.b32.end [2/2] (short) (narrow) %v728_v62, 16 }
 0x160   :  { %v4616_v0 = vpop.f32.mrf.mxu0 }
 0x161   :  { %v4618_v1 = vpop.f32.mrf.mxu1  ;;  %v469_v41 = vpop.f32.mrf.mxu2 }
 0x163   :  { %v589_v31 = vpop.f32.mrf.mxu3 }
 0x168   :  { %v656_v8 = vpop.f32.mrf.mxu0 }
 0x169   :  { %v657_v9 = vadd.f32 %v656_v8, %v560_v5  ;;  %v739_v10 = vpop.f32.mrf.mxu1  ;;  %v554_v5 = vadd.f32 %v4610_v58, %v445_v2  ;;  %v474_v29 = vpop.f32.mrf.mxu2 }
 0x16b   :  { %v4620_v13 = vadd.f32 %v739_v10, %v657_v9  ;;  %v653_v40 = vadd.f32 %v4616_v0, %v554_v5 }
 0x16d   :  { %1054 = vrot.lane.b32.xlu1 %v4620_v13, %s4351_s4  ;;  %v736_v21 = vadd.f32 %v4618_v1, %v653_v40  ;;  %v1420_v40 = vld [vmem:[%s5614_s3 + $0x10] sm:$0xff] }
 0x170   :  { %v660_v63 = vpop.f32.mrf.mxu0 }
 0x171   :  { %v743_v14 = vpop.f32.mrf.mxu1  ;;  %v661_v35 = vadd.f32 %v660_v63, %v566_v6  ;;  %v374_v63 = vadd.f32 %v4581_v37, %v4579_v36 }
 0x173   :  { %v4635_v48 = vadd.f32 %v743_v14, %v661_v35  ;;  %v475_v11 = vadd.f32 %v474_v29, %v374_v63 }
 0x178   :  { %v664_v50 = vpop.f32.mrf.mxu0 }
 0x179   :  { %v665_v61 = vadd.f32 %v664_v50, %v572_v18  ;;  %v747_v25 = vpop.f32.mrf.mxu1 }
 0x17b   :  { %v4639_v51 = vadd.f32 %v747_v25, %v665_v61 }
 0x180   :  { %v668_v34 = vpop.f32.mrf.mxu0 }
 0x181   :  { %v751_v42 = vpop.f32.mrf.mxu1 }
 0x189   :  { %v755_v20 = vpop.f32.mrf.mxu1 }
 0x18e   :  { %1042 = vrot.lane.b32.xlu2 %v716_v38, %s4351_s4 }
 0x18f   :  { %v1035_v4 = vpop.permute.xlu0 %1034 }
 0x191   :  { %v759_v39 = vpop.f32.mrf.mxu1 }
 0x196   :  { %1044 = vrot.lane.b32.xlu2 %v720_v43, %s4351_s4 }
 0x197   :  { %v1037_v26 = vpop.permute.xlu0 %1036 }
 0x19f   :  { %v1039_v44 = vpop.permute.xlu1 %1038 }
 0x1a2   :  { %1114 = vxpose.xlu1.b32.start [1/2] (short) (narrow) %v1039_v44, 16  ;;  %v370_v44 = vadd.f32 %v4573_v32, %v4571_v28  ;;  %v590_v32 = vadd.f32 %v589_v31, %v475_v11 }
 0x1a4   :  { %v470_v16 = vadd.f32 %v469_v41, %v370_v44 }
 0x1a6   :  { %v584_v59 = vadd.f32 %v583_v7, %v470_v16 }
 0x1a7   :  { %v1041_v45 = vpop.permute.xlu1 %1040 }
 0x1aa   :  { %1115 = vxpose.xlu1.b32.end [2/2] (short) (narrow) %v1041_v45, 16 }
 0x1b6   :  { %v4658_v49 = vpop.trf.xlu2 }
 0x1bc   :  { %826 = vxpose.xlu2.b32.start [1/2] (short) (narrow) %v716_v38, 16  ;;  %v465_v38 = vadd.f32 %v464_v27, %v366_v30 }
 0x1be   :  { %v4660_v47 = vpop.trf.xlu2 }
 0x1bf   :  { %v1047_v12 = vpop.permute.xlu1 %1046 }
 0x1c0   :  { %1178 = vxpose.xlu1.b32.start [1/2] (short) (narrow) %v1047_v12, 16  ;;  %v672_v12 = vpop.f32.mrf.mxu0 }
 0x1c1   :  { %v673_v6 = vadd.f32 %v672_v12, %v584_v59 }
 0x1c3   :  { %v4685_v14 = vadd.f32 %v755_v20, %v673_v6 }
 0x1c4   :  { %827 = vxpose.xlu2.b32.end [2/2] (short) (narrow) %v720_v43, 16  ;;  %v578_v43 = vadd.f32 %v577_v15, %v465_v38 }
 0x1c6   :  { %v669_v45 = vadd.f32 %v668_v34, %v578_v43 }
 0x1c8   :  { %v4679_v17 = vadd.f32 %v751_v42, %v669_v45  ;;  %v676_v28 = vpop.f32.mrf.mxu0 }
 0x1c9   :  { %v677_v35 = vadd.f32 %v676_v28, %v590_v32 }
 0x1cb   :  { %v4689_v46 = vadd.f32 %v759_v39, %v677_v35 }
 0x1cd   :  { %1056 = vrot.lane.b32.xlu0 %v4635_v48, %s4351_s4 }
 0x1d5   :  { %1058 = vrot.lane.b32.xlu0 %v4639_v51, %s4351_s4 }
 0x1df   :  { %v1055_v23 = vpop.permute.xlu1 %1054 }
 0x1e8   :  { %v1043_v22 = vpop.permute.xlu2 %1042 }
 0x1eb   :  { %v4663_v58 = vpop.trf.xlu0 }
 0x1f0   :  { %v1045_v56 = vpop.permute.xlu2 %1044 }
 0x1f7   :  { %1082 = vxpose.xlu0.b32.start [1/2] (short) (narrow) %v1035_v4, 16 }
 0x1ff   :  { %1083 = vxpose.xlu0.b32.end [2/2] (short) (narrow) %v1037_v26, 16 }
 0x22d   :  { %1048 = vrot.lane.b32.xlu2 %v728_v62, %s4351_s4  ;;  %v4667_v62 = vpop.trf.xlu0 }
 0x235   :  { %1050 = vrot.lane.b32.xlu2 %v732_v3, %s4351_s4  ;;  %v4671_v1 = vpop.trf.xlu0 }
 0x23d   :  { %1052 = vrot.lane.b32.xlu2 %v736_v21, %s4351_s4  ;;  %v4673_v9 = vpop.trf.xlu0 }
 0x245   :  { %v1057_v54 = vpop.permute.xlu0 %1056 }
 0x246   :  { %v1130_v53 = vpop.trf.xlu1 }
 0x24d   :  { %v4693_v36 = vpop.permute.xlu0 %1058 }
 0x24e   :  { %v1131_v50 = vpop.trf.xlu1 }
 0x255   :  { %v4665_v60 = vpop.trf.xlu2 }
 0x25d   :  { %v4669_v0 = vpop.trf.xlu2 }
 0x263   :  { %890 = vxpose.xlu2.b32.start [1/2] (short) (narrow) %v732_v3, 16  ;;  %v1421_v3 = vld [vmem:[%s5614_s3 + $0x18] sm:$0xff] }
 0x264   :  { %v1483_v5 = vand.u32 4294901760, %v1421_v3 }
 0x266   :  { %1839 = vmatpush.msra.mxu1 %v1483_v5  ;;  %1484 = vmatpush.msrb.mxu2 %v1483_v5 }
 0x26b   :  { %891 = vxpose.xlu2.b32.end [2/2] (short) (narrow) %v736_v21, 16 }
 0x26d   :  { %1358 = vrot.lane.b32.xlu0 %v1130_v53, %s4352_s12  ;;  %v1485_v53 = vand.u32 4294901760, %v1420_v40 }
 0x26f   :  { %1841 = vmatpush.msra.mxu1 %v1485_v53  ;;  %1486 = vmatpush.msrb.mxu2 %v1485_v53 }
 0x287   :  { %v1049_v8 = vpop.permute.xlu2 %1048 }
 0x288   :  { %1179 = vxpose.xlu1.b32.end [2/2] (short) (narrow) %v1049_v8, 16 }
 0x28f   :  { %v1051_v10 = vpop.permute.xlu2 %1050 }
 0x290   :  { %1242 = vxpose.xlu1.b32.start [1/2] (short) (narrow) %v1055_v23, 16  ;;  %1210 = vxpose.xlu0.b32.start [1/2] (short) (narrow) %v1051_v10, 16  ;;  %v1633_v23 = vsub.f32 %v1421_v3, %v1483_v5  ;;  %v1639_v10 = vsub.f32 %v1420_v40, %v1485_v53 }
 0x292   :  { %v1634_v8 = vand.u32 4294901760, %v1633_v23  ;;  %1735 = vmatpush.msra.mxu0 %v1633_v23  ;;  %v1640_v30 = vand.u32 4294901760, %v1639_v10 }
 0x294   :  { %v1635_v27 = vsub.f32 %v1633_v23, %v1634_v8  ;;  %1738 = vmatpush.msra.mxu0 %v1639_v10  ;;  %v1641_v41 = vsub.f32 %v1639_v10, %v1640_v30 }
 0x296   :  { %v1636_v38 = vand.u32 4294901760, %v1635_v27  ;;  %v1642_v44 = vand.u32 4294901760, %v1641_v41 }
 0x297   :  { %v1053_v24 = vpop.permute.xlu2 %1052 }
 0x298   :  { %1211 = vxpose.xlu0.b32.end [2/2] (short) (narrow) %v1053_v24, 16  ;;  %1243 = vxpose.xlu1.b32.end [2/2] (short) (narrow) %v1057_v54, 16  ;;  %v1418_v24 = vld [vmem:[%s5614_s3] sm:$0xff] }
 0x299   :  { %v1489_v34 = vand.u32 4294901760, %v1418_v24  ;;  %1637 = vmatpush.msrb.mxu3 %v1636_v38 }
 0x29b   :  { %v1098_v37 = vpop.trf.xlu0  ;;  %v1651_v43 = vsub.f32 %v1418_v24, %v1489_v34  ;;  %1643 = vmatpush.msrb.mxu3 %v1642_v44 }
 0x29d   :  { %v1652_v7 = vand.u32 4294901760, %v1651_v43 }
 0x29f   :  { %v1653_v12 = vsub.f32 %v1651_v43, %v1652_v7 }
 0x2a1   :  { %v1654_v59 = vand.u32 4294901760, %v1653_v12 }
 0x2a3   :  { %v1099_v18 = vpop.trf.xlu0 }
 0x2d4   :  { %1060 = vrot.lane.b32.xlu2 %v4679_v17, %s4351_s4 }
 0x2dc   :  { %1062 = vrot.lane.b32.xlu2 %v4685_v14, %s4351_s4 }
 0x2df   :  { %v4696_v25 = vpop.permute.xlu0 %1358 }
 0x2e0   :  { %v1404_v31 = vsel %vm89_vm0, %v4663_v58, %v4696_v25 }
 0x2e1   :  { %v1430_v35 = vsel %vm1422_vm1, %v1404_v31, 0 }
 0x2e4   :  { %1064 = vrot.lane.b32.xlu2 %v4689_v46, %s4351_s4 }
 0x2fc   :  { %v4699_v52 = vpop.trf.xlu2 }
 0x304   :  { %v4701_v55 = vpop.trf.xlu2 }
 0x30a   :  { %1146 = vxpose.xlu2.b32.start [1/2] (short) (narrow) %v1043_v22, 16 }
 0x312   :  { %1147 = vxpose.xlu2.b32.end [2/2] (short) (narrow) %v1045_v56, 16  ;;  %v1419_v56 = vld [vmem:[%s5614_s3 + $0x8] sm:$0xff] }
 0x313   :  { %v1487_v54 = vand.u32 4294901760, %v1419_v56 }
 0x315   :  { %v1645_v15 = vsub.f32 %v1419_v56, %v1487_v54  ;;  %1843 = vmatpush.msra.mxu1 %v1487_v54  ;;  %1488 = vmatpush.msrb.mxu2 %v1487_v54 }
 0x317   :  { %v1646_v42 = vand.u32 4294901760, %v1645_v15  ;;  %1741 = vmatpush.msra.mxu0 %v1645_v15  ;;  %1845 = vmatpush.msra.mxu1 %v1489_v34 }
 0x318   :  { %1490 = vmatpush.msrb.mxu2 %v1489_v34 }
 0x319   :  { %v1647_v45 = vsub.f32 %v1645_v15, %v1646_v42  ;;  %1744 = vmatpush.msra.mxu0 %v1651_v43 }
 0x31a   :  { %1958 = vmatpush.msra.mxu2 %v1634_v8 }
 0x31b   :  { %v1648_v16 = vand.u32 4294901760, %v1647_v45 }
 0x31c   :  { %1962 = vmatpush.msra.mxu2 %v1640_v30 }
 0x31d   :  { %1649 = vmatpush.msrb.mxu3 %v1648_v16 }
 0x31e   :  { %1966 = vmatpush.msra.mxu2 %v1646_v42 }
 0x31f   :  { %1655 = vmatpush.msrb.mxu3 %v1654_v59 }
 0x320   :  { %1970 = vmatpush.msra.mxu2 %v1652_v7 }
 0x321   :  { %2049 = vmatpush.msra.mxu3 %v1483_v5 }
 0x323   :  { %2051 = vmatpush.msra.mxu3 %v1485_v53 }
 0x324   :  { %v1194_v61 = vpop.trf.xlu1 }
 0x325   :  { %1366 = vrot.lane.b32.xlu1 %v1194_v61, %s4352_s12  ;;  %2053 = vmatpush.msra.mxu3 %v1487_v54 }
 0x327   :  { %2055 = vmatpush.msra.mxu3 %v1489_v34 }
 0x32c   :  { %v1195_v21 = vpop.trf.xlu1 }
 0x32e   :  { %v4703_v57 = vpop.permute.xlu2 %1060 }
 0x334   :  { %v1226_v4 = vpop.trf.xlu0  ;;  %v1258_v63 = vpop.trf.xlu1 }
 0x336   :  { %v1063_v33 = vpop.permute.xlu2 %1062 }
 0x33c   :  { %v1227_v26 = vpop.trf.xlu0  ;;  %v4756_v53 = vpop.trf.xlu1 }
 0x33d   :  { %1372 = vrot.lane.b32.xlu1 %v1227_v26, %s4352_s12 }
 0x33e   :  { %v1065_v19 = vpop.permute.xlu2 %1064 }
 0x372   :  { %1306 = vxpose.xlu1.b32.start [1/2] (short) (narrow) %v1063_v33, 16 }
 0x37a   :  { %1307 = vxpose.xlu1.b32.end [2/2] (short) (narrow) %v1065_v19, 16 }
 0x37b   :  { %1354 = vrot.lane.b32.xlu2 %v1098_v37, %s4352_s12 }
 0x383   :  { %1356 = vrot.lane.b32.xlu2 %v1099_v18, %s4352_s12 }
 0x38b   :  { %1360 = vrot.lane.b32.xlu2 %v1131_v50, %s4352_s12  ;;  %v4741_v50 = vand.u32 4294901760, %v1430_v35 }
 0x38d   :  { %v1508_v25 = vsub.f32 %v1430_v35, %v4741_v50 }
 0x38f   :  { %v1509_v3 = vand.u32 4294901760, %v1508_v25 }
 0x391   :  { %v1510_v40 = vsub.f32 %v1508_v25, %v1509_v3 }
 0x397   :  { %v1367_v27 = vpop.permute.xlu1 %1366 }
 0x398   :  { %v1408_v38 = vsel %vm89_vm0, %v4671_v1, %v1367_v27 }
 0x3a3   :  { %v1162_v2 = vpop.trf.xlu2 }
 0x3a4   :  { %1362 = vrot.lane.b32.xlu0 %v1162_v2, %s4352_s12 }
 0x3ab   :  { %v1163_v22 = vpop.trf.xlu2 }
 0x3ac   :  { %1368 = vrot.lane.b32.xlu0 %v1195_v21, %s4352_s12  ;;  %1364 = vrot.lane.b32.xlu2 %v1163_v22, %s4352_s12  ;;  %v1511_v21 = vand.u32 4294901760, %v1510_v40 }
 0x3b4   :  { %1370 = vrot.lane.b32.xlu0 %v1226_v4, %s4352_s12 }
 0x3bc   :  { %1374 = vrot.lane.b32.xlu0 %v1258_v63, %s4352_s12 }
 0x3d2   :  { %1274 = vxpose.xlu2.b32.start [1/2] (short) (narrow) %v4693_v36, 16 }
 0x3d5   :  { %v1355_v29 = vpop.permute.xlu2 %1354 }
 0x3d6   :  { %v1402_v20 = vsel %vm89_vm0, %v4658_v49, %v1355_v29 }
 0x3d7   :  { %v1424_v6 = vsel %vm1422_vm1, %v1402_v20, 0 }
 0x3d8   :  { %v4729_v11 = vand.u32 4294901760, %v1424_v6 }
 0x3da   :  { %v1492_v28 = vsub.f32 %v1424_v6, %v4729_v11  ;;  %1275 = vxpose.xlu2.b32.end [2/2] (short) (narrow) %v4703_v57, 16  ;;  %1657 = vmatmul.f32.vlgmr.msrb.gmra.mxu3 %v4729_v11 }
 0x3dc   :  { %v1493_v32 = vand.u32 4294901760, %v1492_v28  ;;  %1747 = vmatmul.f32.vlgmr.msra.gmra.mxu0 %v1492_v28 }
 0x3dd   :  { %v1357_v39 = vpop.permute.xlu2 %1356 }
 0x3de   :  { %v1403_v49 = vsel %vm89_vm0, %v4660_v47, %v1357_v39  ;;  %1849 = vmatmul.f32.vlgmr.msra.gmra.mxu1 %v1493_v32  ;;  %v1494_v36 = vsub.f32 %v1492_v28, %v1493_v32  ;;  %v1373_v39 = vpop.permute.xlu1 %1372 }
 0x3df   :  { %v1427_v37 = vsel %vm1422_vm1, %v1403_v49, 0 }
 0x3e0   :  { %v4743_v58 = vand.u32 4294901760, %v1427_v37  ;;  %v1495_v18 = vand.u32 4294901760, %v1494_v36 }
 0x3e2   :  { %v1500_v61 = vsub.f32 %v1427_v37, %v4743_v58  ;;  %1496 = vmatmul.f32.vlgmr.msrb.gmra.mxu2 %v1495_v18  ;;  %1661 = vmatmul.f32.gmra.mxu3 %v4743_v58  ;;  %v1411_v18 = vsel %vm89_vm0, %v4701_v55, %v1373_v39 }
 0x3e4   :  { %1752 = vmatmul.f32.gmra.mxu0 %v1500_v61  ;;  %v1501_v4 = vand.u32 4294901760, %v1500_v61 }
 0x3e5   :  { %v1361_v26 = vpop.permute.xlu2 %1360 }
 0x3e6   :  { %v1405_v47 = vsel %vm89_vm0, %v4667_v62, %v1361_v26  ;;  %1855 = vmatmul.f32.gmra.mxu1 %v1501_v4  ;;  %v1502_v57 = vsub.f32 %v1500_v61, %v1501_v4 }
 0x3e7   :  { %v1433_v33 = vsel %vm1422_vm1, %v1405_v47, 0 }
 0x3e8   :  { %v4751_v19 = vand.u32 4294901760, %v1433_v33  ;;  %v1503_v2 = vand.u32 4294901760, %v1502_v57 }
 0x3ea   :  { %1504 = vmatmul.f32.gmra.mxu2 %v1503_v2  ;;  %1665 = vmatmul.f32.gmra.mxu3 %v4741_v50  ;;  %v1516_v5 = vsub.f32 %v1433_v33, %v4751_v19 }
 0x3ec   :  { %1757 = vmatmul.f32.gmra.mxu0 %v1508_v25  ;;  %v1517_v22 = vand.u32 4294901760, %v1516_v5  ;;  %v1451_v25 = vsel %vm1422_vm1, %v1411_v18, 0 }
 0x3ed   :  { %v4795_v4 = vand.u32 4294901760, %v1451_v25 }
 0x3ee   :  { %1861 = vmatmul.f32.gmra.mxu1 %v1509_v3  ;;  %v1518_v62 = vsub.f32 %v1516_v5, %v1517_v22 }
 0x3ef   :  { %v1564_v57 = vsub.f32 %v1451_v25, %v4795_v4 }
 0x3f0   :  { %v1519_v23 = vand.u32 4294901760, %v1518_v62 }
 0x3f1   :  { %v1565_v2 = vand.u32 4294901760, %v1564_v57 }
 0x3f2   :  { %1512 = vmatmul.f32.gmra.mxu2 %v1511_v21  ;;  %1669 = vmatmul.f32.gmra.mxu3 %v4751_v19 }
 0x3f3   :  { %v1566_v3 = vsub.f32 %v1564_v57, %v1565_v2 }
 0x3f4   :  { %1762 = vmatmul.f32.gmra.mxu0 %v1516_v5 }
 0x3f5   :  { %v1567_v40 = vand.u32 4294901760, %v1566_v3 }
 0x3f6   :  { %1867 = vmatmul.f32.gmra.mxu1 %v1517_v22 }
 0x3fa   :  { %1520 = vmatmul.f32.gmra.mxu2 %v1519_v23 }
 0x406   :  { %v1365_v56 = vpop.permute.xlu2 %1364 }
 0x407   :  { %v1407_v8 = vsel %vm89_vm0, %v4669_v0, %v1365_v56 }
 0x408   :  { %v1439_v10 = vsel %vm1422_vm1, %v1407_v8, 0 }
 0x409   :  { %v4764_v15 = vand.u32 4294901760, %v1439_v10 }
 0x40b   :  { %v1532_v0 = vsub.f32 %v1439_v10, %v4764_v15 }
 0x40d   :  { %v1533_v16 = vand.u32 4294901760, %v1532_v0 }
 0x40f   :  { %v1534_v59 = vsub.f32 %v1532_v0, %v1533_v16 }
 0x411   :  { %v1535_v6 = vand.u32 4294901760, %v1534_v59 }
 0x416   :  { %v1363_v54 = vpop.permute.xlu0 %1362  ;;  %v1322_v5 = vpop.trf.xlu1 }
 0x417   :  { %v1406_v24 = vsel %vm89_vm0, %v4665_v60, %v1363_v54  ;;  %v1442_v60 = vsel %vm1422_vm1, %v1408_v38, 0 }
 0x418   :  { %v1436_v30 = vsel %vm1422_vm1, %v1406_v24, 0  ;;  %v4774_v45 = vand.u32 4294901760, %v1442_v60 }
 0x419   :  { %v4766_v34 = vand.u32 4294901760, %v1436_v30 }
 0x41a   :  { %v1540_v12 = vsub.f32 %v1442_v60, %v4774_v45 }
 0x41b   :  { %v1524_v41 = vsub.f32 %v1436_v30, %v4766_v34  ;;  %1673 = vmatmul.f32.gmra.mxu3 %v4766_v34 }
 0x41c   :  { %v1541_v31 = vand.u32 4294901760, %v1540_v12 }
 0x41d   :  { %1767 = vmatmul.f32.gmra.mxu0 %v1524_v41  ;;  %v1525_v42 = vand.u32 4294901760, %v1524_v41 }
 0x41e   :  { %v1369_v43 = vpop.permute.xlu0 %1368  ;;  %v1542_v32 = vsub.f32 %v1540_v12, %v1541_v31  ;;  %v1323_v21 = vpop.trf.xlu1 }
 0x41f   :  { %1873 = vmatmul.f32.gmra.mxu1 %v1525_v42  ;;  %v1526_v44 = vsub.f32 %v1524_v41, %v1525_v42  ;;  %v1409_v1 = vsel %vm89_vm0, %v4673_v9, %v1369_v43 }
 0x420   :  { %v1445_v63 = vsel %vm1422_vm1, %v1409_v1, 0  ;;  %v1543_v36 = vand.u32 4294901760, %v1542_v32 }
 0x421   :  { %v1527_v7 = vand.u32 4294901760, %v1526_v44  ;;  %v4781_v20 = vand.u32 4294901760, %v1445_v63 }
 0x423   :  { %1528 = vmatmul.f32.gmra.mxu2 %v1527_v7  ;;  %1677 = vmatmul.f32.gmra.mxu3 %v4764_v15  ;;  %v1548_v9 = vsub.f32 %v1445_v63, %v4781_v20 }
 0x425   :  { %1772 = vmatmul.f32.gmra.mxu0 %v1532_v0  ;;  %v1549_v37 = vand.u32 4294901760, %v1548_v9 }
 0x426   :  { %v1371_v29 = vpop.permute.xlu0 %1370 }
 0x427   :  { %1879 = vmatmul.f32.gmra.mxu1 %v1533_v16  ;;  %v1410_v28 = vsel %vm89_vm0, %v4699_v52, %v1371_v29  ;;  %v1550_v61 = vsub.f32 %v1548_v9, %v1549_v37 }
 0x428   :  { %v1448_v35 = vsel %vm1422_vm1, %v1410_v28, 0 }
 0x429   :  { %v4788_v49 = vand.u32 4294901760, %v1448_v35  ;;  %v1551_v26 = vand.u32 4294901760, %v1550_v61 }
 0x42b   :  { %1536 = vmatmul.f32.gmra.mxu2 %v1535_v6  ;;  %1681 = vmatmul.f32.gmra.mxu3 %v4774_v45  ;;  %v1556_v52 = vsub.f32 %v1448_v35, %v4788_v49 }
 0x42d   :  { %1777 = vmatmul.f32.gmra.mxu0 %v1540_v12  ;;  %v1557_v47 = vand.u32 4294901760, %v1556_v52 }
 0x42e   :  { %v1375_v23 = vpop.permute.xlu0 %1374 }
 0x42f   :  { %1885 = vmatmul.f32.gmra.mxu1 %v1541_v31  ;;  %v1558_v55 = vsub.f32 %v1556_v52, %v1557_v47 }
 0x431   :  { %v1559_v33 = vand.u32 4294901760, %v1558_v55 }
 0x433   :  { %1544 = vmatmul.f32.gmra.mxu2 %v1543_v36  ;;  %1685 = vmatmul.f32.gmra.mxu3 %v4781_v20 }
 0x435   :  { %1782 = vmatmul.f32.gmra.mxu0 %v1548_v9 }
 0x437   :  { %1891 = vmatmul.f32.gmra.mxu1 %v1549_v37 }
 0x43b   :  { %1552 = vmatmul.f32.gmra.mxu2 %v1551_v26  ;;  %1689 = vmatmul.f32.gmra.mxu3 %v4788_v49 }
 0x43d   :  { %1787 = vmatmul.f32.gmra.mxu0 %v1556_v52 }
 0x43f   :  { %1897 = vmatmul.f32.gmra.mxu1 %v1557_v47 }
 0x443   :  { %1376 = vrot.lane.b32.xlu2 %v4756_v53, %s4352_s12  ;;  %1560 = vmatmul.f32.gmra.mxu2 %v1559_v33 }
 0x444   :  { %1693 = vmatmul.f32.gmra.mxu3 %v4795_v4 }
 0x445   :  { %1792 = vmatmul.f32.gmra.mxu0 %v1564_v57 }
 0x447   :  { %1903 = vmatmul.f32.gmra.mxu1 %v1565_v2 }
 0x44b   :  { %1382 = vrot.lane.b32.xlu2 %v1322_v5, %s4352_s12  ;;  %1568 = vmatmul.f32.gmra.mxu2 %v1567_v40 }
 0x453   :  { %1384 = vrot.lane.b32.xlu2 %v1323_v21, %s4352_s12 }
 0x45d   :  { %v4847_v40 = vpop.f32.mrf.mxu3 }
 0x46b   :  { %v1290_v22 = vpop.trf.xlu2 }
 0x46c   :  { %1378 = vrot.lane.b32.xlu0 %v1290_v22, %s4352_s12 }
 0x473   :  { %v1291_v62 = vpop.trf.xlu2 }
 0x474   :  { %1380 = vrot.lane.b32.xlu1 %v1291_v62, %s4352_s12  ;;  %v2142_v62 = vld [vmem:[#allocation7 + $0x18] sm:$0xff] }
 0x479   :  { %986 = vxpose.xlu2.b32.start [1/2] (short) (narrow) %v4685_v14, 16 }
 0x481   :  { %987 = vxpose.xlu2.b32.end [2/2] (short) (narrow) %v4689_v46, 16 }
 0x48e   :  { %922 = vxpose.xlu0.b32.start [1/2] (short) (narrow) %v4620_v13, 16 }
 0x496   :  { %923 = vxpose.xlu0.b32.end [2/2] (short) (narrow) %v4635_v48, 16 }
 0x49d   :  { %v1377_v53 = vpop.permute.xlu2 %1376 }
 0x49e   :  { %954 = vxpose.xlu0.b32.start [1/2] (short) (narrow) %v4639_v51, 16 }
 0x4a5   :  { %v1383_v8 = vpop.permute.xlu2 %1382 }
 0x4a6   :  { %955 = vxpose.xlu0.b32.end [2/2] (short) (narrow) %v4679_v17, 16 }
 0x4ad   :  { %v1385_v51 = vpop.permute.xlu2 %1384 }
 0x4de   :  { %v1379_v56 = vpop.permute.xlu0 %1378 }
 0x4e6   :  { %v1381_v29 = vpop.permute.xlu1 %1380 }
 0x512   :  { %v1002_v60 = vpop.trf.xlu2 }
 0x513   :  { %v1416_v59 = vsel %vm89_vm0, %v1002_v60, %v1383_v8 }
 0x514   :  { %v1466_v31 = vsel %vm1422_vm1, %v1416_v59, 0  ;;  %v2140_v59 = vld [vmem:[#allocation7 + $0x8] sm:$0xff] }
 0x515   :  { %v4834_v36 = vand.u32 4294901760, %v1466_v31 }
 0x517   :  { %v1604_v25 = vsub.f32 %v1466_v31, %v4834_v36 }
 0x519   :  { %v1605_v2 = vand.u32 4294901760, %v1604_v25 }
 0x51a   :  { %v1003_v35 = vpop.trf.xlu2 }
 0x51b   :  { %v1417_v52 = vsel %vm89_vm0, %v1003_v35, %v1385_v51  ;;  %v1606_v5 = vsub.f32 %v1604_v25, %v1605_v2 }
 0x51c   :  { %v1469_v47 = vsel %vm1422_vm1, %v1417_v52, 0 }
 0x51d   :  { %v4843_v55 = vand.u32 4294901760, %v1469_v47  ;;  %v1607_v21 = vand.u32 4294901760, %v1606_v5 }
 0x51f   :  { %v1612_v3 = vsub.f32 %v1469_v47, %v4843_v55 }
 0x521   :  { %v1613_v22 = vand.u32 4294901760, %v1612_v3 }
 0x532   :  { %v938_v10 = vpop.trf.xlu0 }
 0x533   :  { %v1412_v14 = vsel %vm89_vm0, %v938_v10, %v1375_v23  ;;  %v4850_v23 = vand.u32 4294901760, %v2142_v62  ;;  %v4859_v10 = vpop.f32.mrf.mxu3 }
 0x534   :  { %v1454_v46 = vsel %vm1422_vm1, %v1412_v14, 0 }
 0x535   :  { %v4814_v54 = vand.u32 4294901760, %v1454_v46  ;;  %2204 = vmatpush.msrb.mxu0 %v4850_v23  ;;  %v4856_v8 = vsub.f32 %v2142_v62, %v4850_v23  ;;  %2559 = vmatpush.msrb.mxu3 %v4850_v23 }
 0x537   :  { %v1572_v13 = vsub.f32 %v1454_v46, %v4814_v54  ;;  %1697 = vmatmul.f32.gmra.mxu3 %v4814_v54  ;;  %v2354_v14 = vand.u32 4294901760, %v4856_v8  ;;  %2455 = vmatpush.msrb.mxu2 %v4856_v8 }
 0x539   :  { %1797 = vmatmul.f32.gmra.mxu0 %v1572_v13  ;;  %v1573_v48 = vand.u32 4294901760, %v1572_v13 }
 0x53a   :  { %v939_v24 = vpop.trf.xlu0 }
 0x53b   :  { %v1413_v17 = vsel %vm89_vm0, %v939_v24, %v1377_v53  ;;  %1909 = vmatmul.f32.gmra.mxu1 %v1573_v48  ;;  %v1574_v27 = vsub.f32 %v1572_v13, %v1573_v48  ;;  %v1614_v53 = vsub.f32 %v1612_v3, %v1613_v22  ;;  %v2355_v13 = vsub.f32 %v4856_v8, %v2354_v14  ;;  %v4869_v24 = vpop.f32.mrf.mxu3 }
 0x53c   :  { %v1457_v30 = vsel %vm1422_vm1, %v1413_v17, 0 }
 0x53d   :  { %v4820_v38 = vand.u32 4294901760, %v1457_v30  ;;  %v1575_v41 = vand.u32 4294901760, %v1574_v27  ;;  %v1615_v46 = vand.u32 4294901760, %v1614_v53  ;;  %v2356_v48 = vand.u32 4294901760, %v2355_v13 }
 0x53f   :  { %v1580_v0 = vsub.f32 %v1457_v30, %v4820_v38  ;;  %1576 = vmatmul.f32.gmra.mxu2 %v1575_v41  ;;  %1701 = vmatmul.f32.gmra.mxu3 %v4820_v38  ;;  %v2141_v30 = vld [vmem:[#allocation7 + $0x10] sm:$0xff] }
 0x540   :  { %2357 = vmatpush.msrb.mxu1 %v2356_v48 }
 0x541   :  { %1802 = vmatmul.f32.gmra.mxu0 %v1580_v0  ;;  %v1581_v42 = vand.u32 4294901760, %v1580_v0 }
 0x542   :  { %v970_v43 = vpop.trf.xlu0 }
 0x543   :  { %v1414_v44 = vsel %vm89_vm0, %v970_v43, %v1379_v56  ;;  %1915 = vmatmul.f32.gmra.mxu1 %v1581_v42  ;;  %v1582_v7 = vsub.f32 %v1580_v0, %v1581_v42  ;;  %v4852_v56 = vpop.f32.mrf.mxu2  ;;  %v4877_v27 = vpop.f32.mrf.mxu3 }
 0x544   :  { %v1460_v16 = vsel %vm1422_vm1, %v1414_v44, 0 }
 0x545   :  { %v4826_v1 = vand.u32 4294901760, %v1460_v16  ;;  %v1583_v12 = vand.u32 4294901760, %v1582_v7 }
 0x547   :  { %v1588_v63 = vsub.f32 %v1460_v16, %v4826_v1  ;;  %1584 = vmatmul.f32.gmra.mxu2 %v1583_v12  ;;  %1705 = vmatmul.f32.gmra.mxu3 %v4826_v1 }
 0x549   :  { %1807 = vmatmul.f32.gmra.mxu0 %v1588_v63  ;;  %v1589_v6 = vand.u32 4294901760, %v1588_v63 }
 0x54a   :  { %v971_v28 = vpop.trf.xlu0 }
 0x54b   :  { %v1415_v9 = vsel %vm89_vm0, %v971_v28, %v1381_v29  ;;  %1921 = vmatmul.f32.gmra.mxu1 %v1589_v6  ;;  %v1590_v32 = vsub.f32 %v1588_v63, %v1589_v6  ;;  %v4867_v51 = vpop.f32.mrf.mxu2  ;;  %v4883_v0 = vpop.f32.mrf.mxu3  ;;  %v2207_v63 = vand.u32 4294901760, %v2140_v59 }
 0x54c   :  { %v1463_v39 = vsel %vm1422_vm1, %v1415_v9, 0 }
 0x54d   :  { %v4836_v37 = vand.u32 4294901760, %v1463_v39  ;;  %v1591_v18 = vand.u32 4294901760, %v1590_v32 }
 0x54f   :  { %v1596_v61 = vsub.f32 %v1463_v39, %v4836_v37  ;;  %1592 = vmatmul.f32.gmra.mxu2 %v1591_v18  ;;  %1709 = vmatmul.f32.gmra.mxu3 %v4836_v37  ;;  %v2139_v39 = vld [vmem:[#allocation7] sm:$0xff] }
 0x550   :  { %v2209_v18 = vand.u32 4294901760, %v2139_v39 }
 0x551   :  { %1812 = vmatmul.f32.gmra.mxu0 %v1596_v61  ;;  %v1597_v26 = vand.u32 4294901760, %v1596_v61 }
 0x553   :  { %1927 = vmatmul.f32.gmra.mxu1 %v1597_v26  ;;  %v1598_v57 = vsub.f32 %v1596_v61, %v1597_v26  ;;  %v4873_v17 = vpop.f32.mrf.mxu2  ;;  %v4894_v44 = vpop.f32.mrf.mxu3 }
 0x555   :  { %v1599_v33 = vand.u32 4294901760, %v1598_v57 }
 0x557   :  { %1600 = vmatmul.f32.gmra.mxu2 %v1599_v33  ;;  %1713 = vmatmul.f32.gmra.mxu3 %v4834_v36  ;;  %v1850_v33 = vpop.f32.mrf.mxu1 }
 0x559   :  { %1817 = vmatmul.f32.gmra.mxu0 %v1604_v25 }
 0x55b   :  { %1933 = vmatmul.f32.gmra.mxu1 %v1605_v2  ;;  %v4881_v41 = vpop.f32.mrf.mxu2  ;;  %v4900_v16 = vpop.f32.mrf.mxu3 }
 0x55f   :  { %1608 = vmatmul.f32.gmra.mxu2 %v1607_v21  ;;  %1717 = vmatmul.f32.gmra.mxu3 %v4843_v55  ;;  %v1856_v5 = vpop.f32.mrf.mxu1 }
 0x561   :  { %1822 = vmatmul.f32.gmra.mxu0 %v1612_v3 }
 0x563   :  { %1939 = vmatmul.f32.gmra.mxu1 %v1613_v22  ;;  %v4906_v12 = vpop.f32.mrf.mxu3 }
 0x567   :  { %1616 = vmatmul.f32.gmra.mxu2 %v1615_v46  ;;  %2057 = vmatmul.f32.vlgmr.msra.gmra.mxu3 %v4729_v11 }
 0x56b   :  { %v4914_v29 = vpop.f32.mrf.mxu3 }
 0x56f   :  { %1972 = vmatmul.f32.vlgmr.msra.gmra.mxu2 %v4729_v11  ;;  %2061 = vmatmul.f32.gmra.mxu3 %v4743_v58  ;;  %v4885_v11 = vand.u32 4294901760, %v2141_v30 }
 0x571   :  { %2206 = vmatpush.msrb.mxu0 %v4885_v11  ;;  %v2359_v42 = vsub.f32 %v2141_v30, %v4885_v11  ;;  %2561 = vmatpush.msrb.mxu3 %v4885_v11 }
 0x573   :  { %2458 = vmatpush.msrb.mxu2 %v2359_v42  ;;  %2208 = vmatpush.msrb.mxu0 %v2207_v63  ;;  %v4920_v9 = vpop.f32.mrf.mxu3 }
 0x574   :  { %2563 = vmatpush.msrb.mxu3 %v2207_v63 }
 0x575   :  { %2210 = vmatpush.msrb.mxu0 %v2209_v18 }
 0x576   :  { %2565 = vmatpush.msrb.mxu3 %v2209_v18 }
 0x577   :  { %1976 = vmatmul.f32.gmra.mxu2 %v4743_v58  ;;  %2065 = vmatmul.f32.gmra.mxu3 %v4741_v50  ;;  %v2360_v58 = vand.u32 4294901760, %v2359_v42 }
 0x578   :  { %2678 = vmatpush.msra.mxu0 %v2354_v14 }
 0x579   :  { %v2361_v60 = vsub.f32 %v2359_v42, %v2360_v58 }
 0x57a   :  { %2682 = vmatpush.msra.mxu0 %v2360_v58 }
 0x57b   :  { %v2362_v43 = vand.u32 4294901760, %v2361_v60 }
 0x57d   :  { %2363 = vmatpush.msrb.mxu1 %v2362_v43  ;;  %v1667_v43 = vadd.f32 %v4869_v24, %v4873_v17 }
 0x57f   :  { %1980 = vmatmul.f32.gmra.mxu2 %v4741_v50  ;;  %2069 = vmatmul.f32.gmra.mxu3 %v4751_v19  ;;  %v4892_v50 = vpop.f32.mrf.mxu2 }
 0x587   :  { %1984 = vmatmul.f32.gmra.mxu2 %v4751_v19  ;;  %2073 = vmatmul.f32.gmra.mxu3 %v4766_v34  ;;  %v4898_v7 = vpop.f32.mrf.mxu2 }
 0x58f   :  { %1988 = vmatmul.f32.gmra.mxu2 %v4766_v34  ;;  %2077 = vmatmul.f32.gmra.mxu3 %v4764_v15  ;;  %v4904_v19 = vpop.f32.mrf.mxu2 }
 0x597   :  { %1992 = vmatmul.f32.gmra.mxu2 %v4764_v15  ;;  %2081 = vmatmul.f32.gmra.mxu3 %v4774_v45  ;;  %v4910_v34 = vpop.f32.mrf.mxu2  ;;  %v2365_v15 = vsub.f32 %v2140_v59, %v2207_v63 }
 0x599   :  { %v2366_v6 = vand.u32 4294901760, %v2365_v15  ;;  %2461 = vmatpush.msrb.mxu2 %v2365_v15 }
 0x59b   :  { %v2367_v31 = vsub.f32 %v2365_v15, %v2366_v6  ;;  %2686 = vmatpush.msra.mxu0 %v2366_v6 }
 0x59d   :  { %v2368_v28 = vand.u32 4294901760, %v2367_v31 }
 0x59f   :  { %1996 = vmatmul.f32.gmra.mxu2 %v4774_v45  ;;  %2085 = vmatmul.f32.gmra.mxu3 %v4781_v20  ;;  %v4918_v45 = vpop.f32.mrf.mxu2 }
 0x5a0   :  { %2369 = vmatpush.msrb.mxu1 %v2368_v28 }
 0x5a7   :  { %2000 = vmatmul.f32.gmra.mxu2 %v4781_v20  ;;  %2089 = vmatmul.f32.gmra.mxu3 %v4788_v49  ;;  %v4924_v20 = vpop.f32.mrf.mxu2 }
 0x5af   :  { %2004 = vmatmul.f32.gmra.mxu2 %v4788_v49  ;;  %2093 = vmatmul.f32.gmra.mxu3 %v4795_v4 }
 0x5b7   :  { %2008 = vmatmul.f32.gmra.mxu2 %v4795_v4  ;;  %2097 = vmatmul.f32.gmra.mxu3 %v4814_v54  ;;  %v2371_v4 = vsub.f32 %v2139_v39, %v2209_v18  ;;  %v4984_v39 = vld [vmem:[%s5612_s1 + $0x8] sm:$0xff] }
 0x5b9   :  { %v2372_v61 = vand.u32 4294901760, %v2371_v4  ;;  %2464 = vmatpush.msrb.mxu2 %v2371_v4 }
 0x5ba   :  { %v4926_v32 = vpop.f32.mrf.mxu3 }
 0x5bb   :  { %v2373_v25 = vsub.f32 %v2371_v4, %v2372_v61  ;;  %2690 = vmatpush.msra.mxu0 %v2372_v61 }
 0x5bd   :  { %v2374_v26 = vand.u32 4294901760, %v2373_v25  ;;  %v1671_v25 = vadd.f32 %v4877_v27, %v4881_v41 }
 0x5bf   :  { %2012 = vmatmul.f32.gmra.mxu2 %v4814_v54  ;;  %2101 = vmatmul.f32.gmra.mxu3 %v4820_v38 }
 0x5c0   :  { %2375 = vmatpush.msrb.mxu1 %v2374_v26 }
 0x5c2   :  { %v4930_v49 = vpop.f32.mrf.mxu2  ;;  %v4932_v35 = vpop.f32.mrf.mxu3  ;;  %2769 = vmatpush.msra.mxu1 %v4850_v23 }
 0x5c3   :  { %v1862_v23 = vpop.f32.mrf.mxu1 }
 0x5c4   :  { %2771 = vmatpush.msra.mxu1 %v4885_v11 }
 0x5c6   :  { %2773 = vmatpush.msra.mxu1 %v2207_v63 }
 0x5c7   :  { %2016 = vmatmul.f32.gmra.mxu2 %v4820_v38  ;;  %2105 = vmatmul.f32.gmra.mxu3 %v4826_v1  ;;  %v1748_v38 = vpop.f32.mrf.mxu0 }
 0x5c8   :  { %2775 = vmatpush.msra.mxu1 %v2209_v18 }
 0x5ca   :  { %v4938_v52 = vpop.f32.mrf.mxu2  ;;  %v4940_v54 = vpop.f32.mrf.mxu3 }
 0x5cb   :  { %v1868_v11 = vpop.f32.mrf.mxu1 }
 0x5cf   :  { %2020 = vmatmul.f32.gmra.mxu2 %v4826_v1  ;;  %2109 = vmatmul.f32.gmra.mxu3 %v4836_v37  ;;  %v1753_v3 = vpop.f32.mrf.mxu0 }
 0x5d2   :  { %v4945_v47 = vpop.f32.mrf.mxu2  ;;  %v4947_v57 = vpop.f32.mrf.mxu3 }
 0x5d3   :  { %v1874_v6 = vpop.f32.mrf.mxu1 }
 0x5d7   :  { %2024 = vmatmul.f32.gmra.mxu2 %v4836_v37  ;;  %2113 = vmatmul.f32.gmra.mxu3 %v4834_v36  ;;  %v1758_v62 = vpop.f32.mrf.mxu0  ;;  %v1659_v37 = vadd.f32 %v4847_v40, %v4852_v56 }
 0x5d8   :  { %v1759_v18 = vadd.f32 %v1758_v62, %v1667_v43 }
 0x5d9   :  { %v1749_v14 = vadd.f32 %v1748_v38, %v1659_v37 }
 0x5da   :  { %v4952_v1 = vpop.f32.mrf.mxu2  ;;  %v4954_v2 = vpop.f32.mrf.mxu3 }
 0x5db   :  { %v1851_v13 = vadd.f32 %v1850_v33, %v1749_v14  ;;  %v1863_v33 = vadd.f32 %v1862_v23, %v1759_v18  ;;  %v1679_v18 = vadd.f32 %v4894_v44, %v4898_v7 }
 0x5df   :  { %2028 = vmatmul.f32.gmra.mxu2 %v4834_v36  ;;  %2117 = vmatmul.f32.gmra.mxu3 %v4843_v55  ;;  %v1763_v46 = vpop.f32.mrf.mxu0  ;;  %v1663_v36 = vadd.f32 %v4859_v10, %v4867_v51 }
 0x5e1   :  { %v1754_v40 = vadd.f32 %v1753_v3, %v1663_v36  ;;  %v1764_v36 = vadd.f32 %v1763_v46, %v1671_v25 }
 0x5e2   :  { %v4958_v21 = vpop.f32.mrf.mxu2  ;;  %v4960_v22 = vpop.f32.mrf.mxu3 }
 0x5e3   :  { %v1857_v51 = vadd.f32 %v1856_v5, %v1754_v40  ;;  %v1869_v40 = vadd.f32 %v1868_v11, %v1764_v36 }
 0x5e7   :  { %2032 = vmatmul.f32.gmra.mxu2 %v4843_v55  ;;  %v4972_v55 = vld [vmem:[%s5612_s1] sm:$0xff]  ;;  %v1768_v58 = vpop.f32.mrf.mxu0 }
 0x5ea   :  { %v4965_v53 = vpop.f32.mrf.mxu2  ;;  %v2058_v8 = vpop.f32.mrf.mxu3 }
 0x5ef   :  { %v1773_v26 = vpop.f32.mrf.mxu0 }
 0x5f2   :  { %v1973_v48 = vpop.f32.mrf.mxu2  ;;  %v2062_v30 = vpop.f32.mrf.mxu3 }
 0x5f3   :  { %v1974_v42 = vadd.f32 %v1973_v48, %v1851_v13  ;;  %v1880_v13 = vpop.f32.mrf.mxu1 }
 0x5f5   :  { %v2059_v56 = vadd.f32 %v2058_v8, %v1974_v42 }
 0x5f7   :  { %v2123_v60 = vmul.f32 %v4972_v55, %v2059_v56  ;;  %v1778_v46 = vpop.f32.mrf.mxu0 }
 0x5f9   :  { %v2144_v10 = vsel %vm1422_vm1, %v2123_v60, 0 }
 0x5fa   :  { %v4978_v59 = vand.u32 4294901760, %v2144_v10  ;;  %v1977_v63 = vpop.f32.mrf.mxu2  ;;  %v2066_v15 = vpop.f32.mrf.mxu3 }
 0x5fb   :  { %v1978_v31 = vadd.f32 %v1977_v63, %v1857_v51 }
 0x5fc   :  { %v2212_v28 = vsub.f32 %v2144_v10, %v4978_v59  ;;  %2377 = vmatmul.f32.vlgmr.msrb.gmra.mxu1 %v4978_v59 }
 0x5fd   :  { %v2063_v24 = vadd.f32 %v2062_v30, %v1978_v31  ;;  %v1675_v30 = vadd.f32 %v4883_v0, %v4892_v50  ;;  %v1886_v0 = vpop.f32.mrf.mxu1 }
 0x5fe   :  { %2467 = vmatmul.f32.vlgmr.msrb.gmra.mxu2 %v2212_v28  ;;  %v2213_v17 = vand.u32 4294901760, %v2212_v28 }
 0x5ff   :  { %v2124_v4 = vmul.f32 %v4984_v39, %v2063_v24 }
 0x600   :  { %2569 = vmatmul.f32.vlgmr.msrb.gmra.mxu3 %v2213_v17  ;;  %v2214_v61 = vsub.f32 %v2212_v28, %v2213_v17 }
 0x601   :  { %v2147_v38 = vsel %vm1422_vm1, %v2124_v4, 0 }
 0x602   :  { %v1981_v3 = vpop.f32.mrf.mxu2  ;;  %v2070_v5 = vpop.f32.mrf.mxu3  ;;  %v2215_v37 = vand.u32 4294901760, %v2214_v61  ;;  %v4991_v8 = vand.u32 4294901760, %v2147_v38 }
 0x603   :  { %v1982_v62 = vadd.f32 %v1981_v3, %v1863_v33  ;;  %v1774_v3 = vadd.f32 %v1773_v26, %v1679_v18 }
 0x604   :  { %2216 = vmatmul.f32.vlgmr.msrb.gmra.mxu0 %v2215_v37  ;;  %2381 = vmatmul.f32.gmra.mxu1 %v4991_v8  ;;  %v2220_v14 = vsub.f32 %v2147_v38, %v4991_v8 }
 0x605   :  { %v2067_v48 = vadd.f32 %v2066_v15, %v1982_v62  ;;  %v1769_v15 = vadd.f32 %v1768_v58, %v1675_v30 }
 0x606   :  { %2472 = vmatmul.f32.gmra.mxu2 %v2220_v14  ;;  %v2221_v27 = vand.u32 4294901760, %v2220_v14 }
 0x607   :  { %v2125_v41 = vmul.f32 %v4972_v55, %v2067_v48  ;;  %v1875_v17 = vadd.f32 %v1874_v6, %v1769_v15  ;;  %v1892_v6 = vpop.f32.mrf.mxu1  ;;  %v1881_v48 = vadd.f32 %v1880_v13, %v1774_v3  ;;  %v1687_v13 = vadd.f32 %v4906_v12, %v4910_v34 }
 0x608   :  { %2575 = vmatmul.f32.gmra.mxu3 %v2221_v27  ;;  %v2222_v23 = vsub.f32 %v2220_v14, %v2221_v27  ;;  %v1683_v14 = vadd.f32 %v4900_v16, %v4904_v19 }
 0x609   :  { %v2150_v42 = vsel %vm1422_vm1, %v2125_v41, 0 }
 0x60a   :  { %v1985_v56 = vpop.f32.mrf.mxu2  ;;  %v2074_v60 = vpop.f32.mrf.mxu3  ;;  %v2223_v43 = vand.u32 4294901760, %v2222_v23  ;;  %v4999_v10 = vand.u32 4294901760, %v2150_v42 }
 0x60b   :  { %v1986_v51 = vadd.f32 %v1985_v56, %v1869_v40  ;;  %v1779_v40 = vadd.f32 %v1778_v46, %v1683_v14 }
 0x60c   :  { %2224 = vmatmul.f32.gmra.mxu0 %v2223_v43  ;;  %2385 = vmatmul.f32.gmra.mxu1 %v4999_v10  ;;  %v2228_v63 = vsub.f32 %v2150_v42, %v4999_v10 }
 0x60d   :  { %v2071_v31 = vadd.f32 %v2070_v5, %v1986_v51  ;;  %v1783_v5 = vpop.f32.mrf.mxu0 }
 0x60e   :  { %2477 = vmatmul.f32.gmra.mxu2 %v2228_v63  ;;  %v2229_v28 = vand.u32 4294901760, %v2228_v63 }
 0x60f   :  { %v2126_v50 = vmul.f32 %v4984_v39, %v2071_v31 }
 0x610   :  { %2581 = vmatmul.f32.gmra.mxu3 %v2229_v28  ;;  %v2230_v11 = vsub.f32 %v2228_v63, %v2229_v28  ;;  %v1887_v63 = vadd.f32 %v1886_v0, %v1779_v40 }
 0x611   :  { %v2153_v24 = vsel %vm1422_vm1, %v2126_v50, 0 }
 0x612   :  { %v1989_v4 = vpop.f32.mrf.mxu2  ;;  %v2078_v61 = vpop.f32.mrf.mxu3  ;;  %v2231_v25 = vand.u32 4294901760, %v2230_v11  ;;  %v5007_v38 = vand.u32 4294901760, %v2153_v24 }
 0x613   :  { %v1990_v58 = vadd.f32 %v1989_v4, %v1875_v17  ;;  %v1898_v11 = vpop.f32.mrf.mxu1 }
 0x614   :  { %2232 = vmatmul.f32.gmra.mxu0 %v2231_v25  ;;  %2389 = vmatmul.f32.gmra.mxu1 %v5007_v38  ;;  %v2236_v33 = vsub.f32 %v2153_v24, %v5007_v38  ;;  %v1784_v24 = vadd.f32 %v1783_v5, %v1687_v13 }
 0x615   :  { %v2075_v37 = vadd.f32 %v2074_v60, %v1990_v58  ;;  %v1788_v43 = vpop.f32.mrf.mxu0 }
 0x616   :  { %2482 = vmatmul.f32.gmra.mxu2 %v2236_v33  ;;  %v2237_v62 = vand.u32 4294901760, %v2236_v33  ;;  %v1893_v58 = vadd.f32 %v1892_v6, %v1784_v24  ;;  %v1695_v6 = vadd.f32 %v4920_v9, %v4924_v20 }
 0x617   :  { %v2127_v44 = vmul.f32 %v4972_v55, %v2075_v37 }
 0x618   :  { %2587 = vmatmul.f32.gmra.mxu3 %v2237_v62  ;;  %v2238_v7 = vsub.f32 %v2236_v33, %v2237_v62 }
 0x619   :  { %v2156_v36 = vsel %vm1422_vm1, %v2127_v44, 0 }
 0x61a   :  { %v1993_v27 = vpop.f32.mrf.mxu2  ;;  %v2082_v41 = vpop.f32.mrf.mxu3  ;;  %v2239_v23 = vand.u32 4294901760, %v2238_v7  ;;  %v5015_v30 = vand.u32 4294901760, %v2156_v36 }
 0x61b   :  { %v1994_v26 = vadd.f32 %v1993_v27, %v1881_v48 }
 0x61c   :  { %2240 = vmatmul.f32.gmra.mxu0 %v2239_v23  ;;  %2393 = vmatmul.f32.gmra.mxu1 %v5015_v30  ;;  %v2244_v42 = vsub.f32 %v2156_v36, %v5015_v30  ;;  %v1904_v36 = vpop.f32.mrf.mxu1 }
 0x61d   :  { %v2079_v56 = vadd.f32 %v2078_v61, %v1994_v26  ;;  %v1793_v0 = vpop.f32.mrf.mxu0  ;;  %v1691_v61 = vadd.f32 %v4914_v29, %v4918_v45 }
 0x61e   :  { %2487 = vmatmul.f32.gmra.mxu2 %v2244_v42  ;;  %v2245_v60 = vand.u32 4294901760, %v2244_v42 }
 0x61f   :  { %v2128_v16 = vmul.f32 %v4984_v39, %v2079_v56  ;;  %v1789_v7 = vadd.f32 %v1788_v43, %v1691_v61 }
 0x620   :  { %2593 = vmatmul.f32.gmra.mxu3 %v2245_v60  ;;  %v2246_v19 = vsub.f32 %v2244_v42, %v2245_v60 }
 0x621   :  { %v2159_v51 = vsel %vm1422_vm1, %v2128_v16, 0  ;;  %v1899_v23 = vadd.f32 %v1898_v11, %v1789_v7  ;;  %v1794_v16 = vadd.f32 %v1793_v0, %v1695_v6  ;;  %v1707_v6 = vadd.f32 %v4940_v54, %v4945_v47 }
 0x622   :  { %v1997_v15 = vpop.f32.mrf.mxu2  ;;  %v2086_v31 = vpop.f32.mrf.mxu3  ;;  %v2247_v28 = vand.u32 4294901760, %v2246_v19  ;;  %v5023_v50 = vand.u32 4294901760, %v2159_v51 }
 0x623   :  { %v1998_v46 = vadd.f32 %v1997_v15, %v1887_v63  ;;  %v1699_v63 = vadd.f32 %v4926_v32, %v4930_v49 }
 0x624   :  { %2248 = vmatmul.f32.gmra.mxu0 %v2247_v28  ;;  %2397 = vmatmul.f32.gmra.mxu1 %v5023_v50  ;;  %v2252_v18 = vsub.f32 %v2159_v51, %v5023_v50  ;;  %v1910_v13 = vpop.f32.mrf.mxu1 }
 0x625   :  { %v2083_v17 = vadd.f32 %v2082_v41, %v1998_v46  ;;  %v1798_v27 = vpop.f32.mrf.mxu0 }
 0x626   :  { %2492 = vmatmul.f32.gmra.mxu2 %v2252_v18  ;;  %v2253_v4 = vand.u32 4294901760, %v2252_v18 }
 0x627   :  { %v2129_v12 = vmul.f32 %v4972_v55, %v2083_v17 }
 0x628   :  { %2599 = vmatmul.f32.gmra.mxu3 %v2253_v4  ;;  %v2254_v34 = vsub.f32 %v2252_v18, %v2253_v4 }
 0x629   :  { %v2162_v25 = vsel %vm1422_vm1, %v2129_v12, 0  ;;  %v1799_v12 = vadd.f32 %v1798_v27, %v1699_v63 }
 0x62a   :  { %v2001_v33 = vpop.f32.mrf.mxu2  ;;  %v2090_v3 = vpop.f32.mrf.mxu3  ;;  %v2255_v37 = vand.u32 4294901760, %v2254_v34  ;;  %v5031_v62 = vand.u32 4294901760, %v2162_v25 }
 0x62b   :  { %v2002_v5 = vadd.f32 %v2001_v33, %v1893_v58  ;;  %v1911_v33 = vadd.f32 %v1910_v13, %v1799_v12 }
 0x62c   :  { %2256 = vmatmul.f32.gmra.mxu0 %v2255_v37  ;;  %2401 = vmatmul.f32.gmra.mxu1 %v5031_v62  ;;  %v2260_v44 = vsub.f32 %v2162_v25, %v5031_v62  ;;  %v1916_v49 = vpop.f32.mrf.mxu1  ;;  %v1703_v25 = vadd.f32 %v4932_v35, %v4938_v52 }
 0x62d   :  { %v2087_v14 = vadd.f32 %v2086_v31, %v2002_v5  ;;  %v1905_v31 = vadd.f32 %v1904_v36, %v1794_v16  ;;  %v1803_v17 = vpop.f32.mrf.mxu0 }
 0x62e   :  { %2497 = vmatmul.f32.gmra.mxu2 %v2260_v44  ;;  %v2261_v48 = vand.u32 4294901760, %v2260_v44  ;;  %v1804_v36 = vadd.f32 %v1803_v17, %v1703_v25 }
 0x62f   :  { %v2130_v29 = vmul.f32 %v4984_v39, %v2087_v14 }
 0x630   :  { %2605 = vmatmul.f32.gmra.mxu3 %v2261_v48  ;;  %v2262_v45 = vsub.f32 %v2260_v44, %v2261_v48 }
 0x631   :  { %v2165_v41 = vsel %vm1422_vm1, %v2130_v29, 0 }
 0x632   :  { %v2005_v26 = vpop.f32.mrf.mxu2  ;;  %v2094_v42 = vpop.f32.mrf.mxu3  ;;  %v2263_v40 = vand.u32 4294901760, %v2262_v45  ;;  %v5039_v56 = vand.u32 4294901760, %v2165_v41 }
 0x633   :  { %v2006_v60 = vadd.f32 %v2005_v26, %v1899_v23 }
 0x634   :  { %2264 = vmatmul.f32.gmra.mxu0 %v2263_v40  ;;  %2405 = vmatmul.f32.gmra.mxu1 %v5039_v56  ;;  %v2268_v43 = vsub.f32 %v2165_v41, %v5039_v56  ;;  %v1917_v41 = vadd.f32 %v1916_v49, %v1804_v36  ;;  %v1922_v23 = vpop.f32.mrf.mxu1 }
 0x635   :  { %v2091_v19 = vadd.f32 %v2090_v3, %v2006_v60  ;;  %v1808_v29 = vpop.f32.mrf.mxu0 }
 0x636   :  { %2502 = vmatmul.f32.gmra.mxu2 %v2268_v43  ;;  %v2269_v9 = vand.u32 4294901760, %v2268_v43  ;;  %v1809_v16 = vadd.f32 %v1808_v29, %v1707_v6  ;;  %v1719_v29 = vadd.f32 %v4960_v22, %v4965_v53 }
 0x637   :  { %v2131_v20 = vmul.f32 %v4972_v55, %v2091_v19 }
 0x638   :  { %2611 = vmatmul.f32.gmra.mxu3 %v2269_v9  ;;  %v2270_v51 = vsub.f32 %v2268_v43, %v2269_v9 }
 0x639   :  { %v2168_v15 = vsel %vm1422_vm1, %v2131_v20, 0 }
 0x63a   :  { %v2009_v28 = vpop.f32.mrf.mxu2  ;;  %v2098_v46 = vpop.f32.mrf.mxu3  ;;  %v2271_v11 = vand.u32 4294901760, %v2270_v51  ;;  %v5047_v18 = vand.u32 4294901760, %v2168_v15  ;;  %v1711_v51 = vadd.f32 %v4947_v57, %v4952_v1 }
 0x63b   :  { %v2010_v24 = vadd.f32 %v2009_v28, %v1905_v31 }
 0x63c   :  { %2272 = vmatmul.f32.gmra.mxu0 %v2271_v11  ;;  %2409 = vmatmul.f32.gmra.mxu1 %v5047_v18  ;;  %v2276_v4 = vsub.f32 %v2168_v15, %v5047_v18  ;;  %v1923_v15 = vadd.f32 %v1922_v23, %v1809_v16 }
 0x63d   :  { %v2095_v34 = vadd.f32 %v2094_v42, %v2010_v24  ;;  %v1813_v47 = vpop.f32.mrf.mxu0  ;;  %v1928_v24 = vpop.f32.mrf.mxu1 }
 0x63e   :  { %2507 = vmatmul.f32.gmra.mxu2 %v2276_v4  ;;  %v2277_v0 = vand.u32 4294901760, %v2276_v4 }
 0x63f   :  { %v2132_v32 = vmul.f32 %v4984_v39, %v2095_v34 }
 0x640   :  { %2617 = vmatmul.f32.gmra.mxu3 %v2277_v0  ;;  %v2278_v61 = vsub.f32 %v2276_v4, %v2277_v0  ;;  %v1814_v4 = vadd.f32 %v1813_v47, %v1711_v51 }
 0x641   :  { %v2171_v58 = vsel %vm1422_vm1, %v2132_v32, 0  ;;  %v1715_v32 = vadd.f32 %v4954_v2, %v4958_v21 }
 0x642   :  { %v2013_v3 = vpop.f32.mrf.mxu2  ;;  %v2279_v37 = vand.u32 4294901760, %v2278_v61  ;;  %v5055_v5 = vand.u32 4294901760, %v2171_v58  ;;  %v2102_v7 = vpop.f32.mrf.mxu3  ;;  %v1929_v61 = vadd.f32 %v1928_v24, %v1814_v4 }
 0x643   :  { %v2014_v44 = vadd.f32 %v2013_v3, %v1911_v33 }
 0x644   :  { %2280 = vmatmul.f32.gmra.mxu0 %v2279_v37  ;;  %2413 = vmatmul.f32.gmra.mxu1 %v5055_v5  ;;  %v2284_v14 = vsub.f32 %v2171_v58, %v5055_v5 }
 0x645   :  { %v2099_v48 = vadd.f32 %v2098_v46, %v2014_v44  ;;  %v1818_v25 = vpop.f32.mrf.mxu0  ;;  %v1934_v36 = vpop.f32.mrf.mxu1 }
 0x646   :  { %2512 = vmatmul.f32.gmra.mxu2 %v2284_v14  ;;  %v2285_v45 = vand.u32 4294901760, %v2284_v14 }
 0x647   :  { %v2133_v35 = vmul.f32 %v4972_v55, %v2099_v48 }
 0x648   :  { %2623 = vmatmul.f32.gmra.mxu3 %v2285_v45  ;;  %v2286_v52 = vsub.f32 %v2284_v14, %v2285_v45 }
 0x649   :  { %v2174_v27 = vsel %vm1422_vm1, %v2133_v35, 0 }
 0x64a   :  { %v2017_v26 = vpop.f32.mrf.mxu2  ;;  %v2287_v42 = vand.u32 4294901760, %v2286_v52  ;;  %v5063_v40 = vand.u32 4294901760, %v2174_v27  ;;  %v2106_v13 = vpop.f32.mrf.mxu3 }
 0x64b   :  { %v2018_v60 = vadd.f32 %v2017_v26, %v1917_v41 }
 0x64c   :  { %2288 = vmatmul.f32.gmra.mxu0 %v2287_v42  ;;  %2417 = vmatmul.f32.gmra.mxu1 %v5063_v40  ;;  %v2292_v43 = vsub.f32 %v2174_v27, %v5063_v40 }
 0x64d   :  { %v2103_v19 = vadd.f32 %v2102_v7, %v2018_v60  ;;  %v1819_v7 = vadd.f32 %v1818_v25, %v1715_v32  ;;  %v1823_v26 = vpop.f32.mrf.mxu0  ;;  %v1940_v53 = vpop.f32.mrf.mxu1 }
 0x64e   :  { %2517 = vmatmul.f32.gmra.mxu2 %v2292_v43  ;;  %v2293_v9 = vand.u32 4294901760, %v2292_v43  ;;  %v1824_v60 = vadd.f32 %v1823_v26, %v1719_v29 }
 0x64f   :  { %v2134_v54 = vmul.f32 %v4984_v39, %v2103_v19  ;;  %v1935_v35 = vadd.f32 %v1934_v36, %v1819_v7 }
 0x650   :  { %2629 = vmatmul.f32.gmra.mxu3 %v2293_v9  ;;  %v2294_v20 = vsub.f32 %v2292_v43, %v2293_v9  ;;  %v1941_v9 = vadd.f32 %v1940_v53, %v1824_v60 }
 0x651   :  { %v2177_v63 = vsel %vm1422_vm1, %v2134_v54, 0 }
 0x652   :  { %v2021_v31 = vpop.f32.mrf.mxu2  ;;  %v2295_v28 = vand.u32 4294901760, %v2294_v20  ;;  %v5071_v46 = vand.u32 4294901760, %v2177_v63  ;;  %v2110_v1 = vpop.f32.mrf.mxu3 }
 0x653   :  { %v2022_v11 = vadd.f32 %v2021_v31, %v1923_v15 }
 0x654   :  { %2296 = vmatmul.f32.gmra.mxu0 %v2295_v28  ;;  %2421 = vmatmul.f32.gmra.mxu1 %v5071_v46  ;;  %v2300_v17 = vsub.f32 %v2177_v63, %v5071_v46 }
 0x655   :  { %v2107_v12 = vadd.f32 %v2106_v13, %v2022_v11 }
 0x656   :  { %2522 = vmatmul.f32.gmra.mxu2 %v2300_v17  ;;  %v2301_v34 = vand.u32 4294901760, %v2300_v17 }
 0x657   :  { %v2135_v57 = vmul.f32 %v4972_v55, %v2107_v12 }
 0x658   :  { %2635 = vmatmul.f32.gmra.mxu3 %v2301_v34  ;;  %v2302_v0 = vsub.f32 %v2300_v17, %v2301_v34 }
 0x659   :  { %v2180_v49 = vsel %vm1422_vm1, %v2135_v57, 0 }
 0x65a   :  { %v2025_v58 = vpop.f32.mrf.mxu2  ;;  %v2303_v33 = vand.u32 4294901760, %v2302_v0  ;;  %v5079_v3 = vand.u32 4294901760, %v2180_v49  ;;  %v2114_v52 = vpop.f32.mrf.mxu3 }
 0x65b   :  { %v2026_v37 = vadd.f32 %v2025_v58, %v1929_v61 }
 0x65c   :  { %2304 = vmatmul.f32.gmra.mxu0 %v2303_v33  ;;  %2425 = vmatmul.f32.gmra.mxu1 %v5079_v3  ;;  %v2308_v44 = vsub.f32 %v2180_v49, %v5079_v3 }
 0x65d   :  { %v2111_v14 = vadd.f32 %v2110_v1, %v2026_v37 }
 0x65e   :  { %2527 = vmatmul.f32.gmra.mxu2 %v2308_v44  ;;  %v2309_v48 = vand.u32 4294901760, %v2308_v44 }
 0x65f   :  { %v2136_v2 = vmul.f32 %v4984_v39, %v2111_v14 }
 0x660   :  { %2641 = vmatmul.f32.gmra.mxu3 %v2309_v48  ;;  %v2310_v21 = vsub.f32 %v2308_v44, %v2309_v48 }
 0x661   :  { %v2183_v45 = vsel %vm1422_vm1, %v2136_v2, 0 }
 0x662   :  { %v2029_v6 = vpop.f32.mrf.mxu2  ;;  %v2311_v27 = vand.u32 4294901760, %v2310_v21  ;;  %v5087_v41 = vand.u32 4294901760, %v2183_v45  ;;  %v2118_v63 = vpop.f32.mrf.mxu3 }
 0x663   :  { %v2030_v23 = vadd.f32 %v2029_v6, %v1935_v35 }
 0x664   :  { %2312 = vmatmul.f32.gmra.mxu0 %v2311_v27  ;;  %2429 = vmatmul.f32.gmra.mxu1 %v5087_v41  ;;  %v2316_v42 = vsub.f32 %v2183_v45, %v5087_v41 }
 0x665   :  { %v2115_v43 = vadd.f32 %v2114_v52, %v2030_v23 }
 0x666   :  { %2532 = vmatmul.f32.gmra.mxu2 %v2316_v42  ;;  %v2317_v16 = vand.u32 4294901760, %v2316_v42 }
 0x667   :  { %v2137_v22 = vmul.f32 %v4972_v55, %v2115_v43 }
 0x668   :  { %2647 = vmatmul.f32.gmra.mxu3 %v2317_v16  ;;  %v2318_v19 = vsub.f32 %v2316_v42, %v2317_v16 }
 0x669   :  { %v2186_v13 = vsel %vm1422_vm1, %v2137_v22, 0 }
 0x66a   :  { %v2033_v54 = vpop.f32.mrf.mxu2  ;;  %v2319_v47 = vand.u32 4294901760, %v2318_v19  ;;  %v5093_v20 = vand.u32 4294901760, %v2186_v13 }
 0x66b   :  { %v2034_v51 = vadd.f32 %v2033_v54, %v1941_v9 }
 0x66c   :  { %2320 = vmatmul.f32.gmra.mxu0 %v2319_v47  ;;  %2433 = vmatmul.f32.gmra.mxu1 %v5093_v20  ;;  %v2324_v15 = vsub.f32 %v2186_v13, %v5093_v20 }
 0x66d   :  { %v2119_v31 = vadd.f32 %v2118_v63, %v2034_v51 }
 0x66e   :  { %2537 = vmatmul.f32.gmra.mxu2 %v2324_v15  ;;  %v2325_v55 = vand.u32 4294901760, %v2324_v15 }
 0x66f   :  { %v2138_v28 = vmul.f32 %v4984_v39, %v2119_v31 }
 0x670   :  { %2653 = vmatmul.f32.gmra.mxu3 %v2325_v55  ;;  %v2326_v11 = vsub.f32 %v2324_v15, %v2325_v55 }
 0x671   :  { %v2189_v24 = vsel %vm1422_vm1, %v2138_v28, 0 }
 0x672   :  { %v2327_v17 = vand.u32 4294901760, %v2326_v11  ;;  %v5099_v4 = vand.u32 4294901760, %v2189_v24 }
 0x674   :  { %2328 = vmatmul.f32.gmra.mxu0 %v2327_v17  ;;  %2437 = vmatmul.f32.gmra.mxu1 %v5099_v4  ;;  %v2332_v12 = vsub.f32 %v2189_v24, %v5099_v4 }
 0x676   :  { %2542 = vmatmul.f32.gmra.mxu2 %v2332_v12  ;;  %v2333_v34 = vand.u32 4294901760, %v2332_v12 }
 0x678   :  { %2659 = vmatmul.f32.gmra.mxu3 %v2333_v34  ;;  %v2334_v57 = vsub.f32 %v2332_v12, %v2333_v34 }
 0x679   :  { %v5103_v1 = vpop.f32.mrf.mxu1 }
 0x67a   :  { %v2335_v0 = vand.u32 4294901760, %v2334_v57 }
 0x67c   :  { %2336 = vmatmul.f32.gmra.mxu0 %v2335_v0  ;;  %2777 = vmatmul.f32.vlgmr.msra.gmra.mxu1 %v4978_v59 }
 0x681   :  { %v5106_v39 = vpop.f32.mrf.mxu0  ;;  %v5108_v32 = vpop.f32.mrf.mxu1 }
 0x682   :  { %v2468_v45 = vpop.f32.mrf.mxu2  ;;  %v2379_v26 = vadd.f32 %v5103_v1, %v5106_v39 }
 0x684   :  { %2692 = vmatmul.f32.vlgmr.msra.gmra.mxu0 %v4978_v59  ;;  %2781 = vmatmul.f32.gmra.mxu1 %v4991_v8 }
 0x689   :  { %v5112_v49 = vpop.f32.mrf.mxu0  ;;  %v5114_v61 = vpop.f32.mrf.mxu1 }
 0x68a   :  { %v2473_v6 = vpop.f32.mrf.mxu2  ;;  %v2383_v22 = vadd.f32 %v5108_v32, %v5112_v49 }
 0x68c   :  { %2696 = vmatmul.f32.gmra.mxu0 %v4991_v8  ;;  %2785 = vmatmul.f32.gmra.mxu1 %v4999_v10  ;;  %v2474_v54 = vadd.f32 %v2473_v6, %v2383_v22 }
 0x691   :  { %v5118_v25 = vpop.f32.mrf.mxu0  ;;  %v5120_v58 = vpop.f32.mrf.mxu1 }
 0x692   :  { %v2387_v63 = vadd.f32 %v5114_v61, %v5118_v25 }
 0x694   :  { %2700 = vmatmul.f32.gmra.mxu0 %v4999_v10  ;;  %2789 = vmatmul.f32.gmra.mxu1 %v5007_v38 }
 0x699   :  { %v5124_v33 = vpop.f32.mrf.mxu0  ;;  %v5126_v59 = vpop.f32.mrf.mxu1 }
 0x69a   :  { %v2391_v12 = vadd.f32 %v5120_v58, %v5124_v33 }
 0x69c   :  { %2704 = vmatmul.f32.gmra.mxu0 %v5007_v38  ;;  %2793 = vmatmul.f32.gmra.mxu1 %v5015_v30 }
 0x6a1   :  { %v5130_v37 = vpop.f32.mrf.mxu0  ;;  %v5132_v8 = vpop.f32.mrf.mxu1 }
 0x6a2   :  { %v2395_v61 = vadd.f32 %v5126_v59, %v5130_v37 }
 0x6a4   :  { %2708 = vmatmul.f32.gmra.mxu0 %v5015_v30  ;;  %2797 = vmatmul.f32.gmra.mxu1 %v5023_v50 }
 0x6a9   :  { %v5136_v44 = vpop.f32.mrf.mxu0  ;;  %v5138_v10 = vpop.f32.mrf.mxu1 }
 0x6aa   :  { %v2399_v33 = vadd.f32 %v5132_v8, %v5136_v44 }
 0x6ac   :  { %2712 = vmatmul.f32.gmra.mxu0 %v5023_v50  ;;  %2801 = vmatmul.f32.gmra.mxu1 %v5031_v62 }
 0x6b1   :  { %v5142_v7 = vpop.f32.mrf.mxu0  ;;  %v5144_v38 = vpop.f32.mrf.mxu1 }
 0x6b4   :  { %2716 = vmatmul.f32.gmra.mxu0 %v5031_v62  ;;  %2805 = vmatmul.f32.gmra.mxu1 %v5039_v56 }
 0x6b9   :  { %v5148_v14 = vpop.f32.mrf.mxu0  ;;  %v5150_v30 = vpop.f32.mrf.mxu1 }
 0x6bc   :  { %2720 = vmatmul.f32.gmra.mxu0 %v5039_v56  ;;  %2809 = vmatmul.f32.gmra.mxu1 %v5047_v18 }
 0x6c1   :  { %v5154_v36 = vpop.f32.mrf.mxu0  ;;  %v5156_v50 = vpop.f32.mrf.mxu1 }
 0x6c4   :  { %2724 = vmatmul.f32.gmra.mxu0 %v5047_v18  ;;  %2813 = vmatmul.f32.gmra.mxu1 %v5055_v5 }
 0x6c9   :  { %v5160_v48 = vpop.f32.mrf.mxu0  ;;  %v5162_v62 = vpop.f32.mrf.mxu1 }
 0x6cc   :  { %2728 = vmatmul.f32.gmra.mxu0 %v5055_v5  ;;  %2817 = vmatmul.f32.gmra.mxu1 %v5063_v40 }
 0x6d1   :  { %v5166_v2 = vpop.f32.mrf.mxu0  ;;  %v5168_v56 = vpop.f32.mrf.mxu1 }
 0x6d4   :  { %2732 = vmatmul.f32.gmra.mxu0 %v5063_v40  ;;  %2821 = vmatmul.f32.gmra.mxu1 %v5071_v46  ;;  %v2570_v40 = vpop.f32.mrf.mxu3 }
 0x6d9   :  { %v5172_v21 = vpop.f32.mrf.mxu0  ;;  %v5174_v18 = vpop.f32.mrf.mxu1 }
 0x6dc   :  { %2736 = vmatmul.f32.gmra.mxu0 %v5071_v46  ;;  %2825 = vmatmul.f32.gmra.mxu1 %v5079_v3  ;;  %v2576_v46 = vpop.f32.mrf.mxu3 }
 0x6dd   :  { %v2577_v51 = vadd.f32 %v2576_v46, %v2474_v54 }
 0x6e1   :  { %v5178_v29 = vpop.f32.mrf.mxu0  ;;  %v5180_v5 = vpop.f32.mrf.mxu1 }
 0x6e4   :  { %2740 = vmatmul.f32.gmra.mxu0 %v5079_v3  ;;  %2829 = vmatmul.f32.gmra.mxu1 %v5087_v41  ;;  %v2478_v3 = vpop.f32.mrf.mxu2  ;;  %v2582_v43 = vpop.f32.mrf.mxu3 }
 0x6e5   :  { %v2479_v11 = vadd.f32 %v2478_v3, %v2387_v63 }
 0x6e9   :  { %v5184_v35 = vpop.f32.mrf.mxu0  ;;  %v5186_v52 = vpop.f32.mrf.mxu1 }
 0x6ec   :  { %2744 = vmatmul.f32.gmra.mxu0 %v5087_v41  ;;  %2833 = vmatmul.f32.gmra.mxu1 %v5093_v20  ;;  %v2469_v41 = vadd.f32 %v2468_v45, %v2379_v26  ;;  %v2483_v53 = vpop.f32.mrf.mxu2  ;;  %v2588_v47 = vpop.f32.mrf.mxu3 }
 0x6ed   :  { %v2484_v0 = vadd.f32 %v2483_v53, %v2391_v12 }
 0x6ee   :  { %v2571_v16 = vadd.f32 %v2570_v40, %v2469_v41 }
 0x6ef   :  { %v2589_v49 = vadd.f32 %v2588_v47, %v2484_v0  ;;  %v2419_v0 = vadd.f32 %v5162_v62, %v5166_v2 }
 0x6f1   :  { %v5190_v27 = vpop.f32.mrf.mxu0  ;;  %v5192_v23 = vpop.f32.mrf.mxu1 }
 0x6f4   :  { %2748 = vmatmul.f32.gmra.mxu0 %v5093_v20  ;;  %2837 = vmatmul.f32.gmra.mxu1 %v5099_v4  ;;  %v2488_v55 = vpop.f32.mrf.mxu2  ;;  %v2594_v17 = vpop.f32.mrf.mxu3 }
 0x6f5   :  { %v2489_v46 = vadd.f32 %v2488_v55, %v2395_v61 }
 0x6f7   :  { %v2595_v58 = vadd.f32 %v2594_v17, %v2489_v46  ;;  %v2415_v17 = vadd.f32 %v5156_v50, %v5160_v48 }
 0x6f9   :  { %v5198_v42 = vpop.f32.mrf.mxu0  ;;  %v2778_v60 = vpop.f32.mrf.mxu1 }
 0x6fc   :  { %2752 = vmatmul.f32.gmra.mxu0 %v5099_v4  ;;  %v2583_v4 = vadd.f32 %v2582_v43, %v2479_v11  ;;  %v2493_v39 = vpop.f32.mrf.mxu2  ;;  %v2600_v25 = vpop.f32.mrf.mxu3 }
 0x6fd   :  { %v2494_v59 = vadd.f32 %v2493_v39, %v2399_v33  ;;  %v2427_v33 = vadd.f32 %v5174_v18, %v5178_v29  ;;  %v2403_v18 = vadd.f32 %v5138_v10, %v5142_v7  ;;  %v2431_v7 = vadd.f32 %v5180_v5, %v5184_v35 }
 0x6fe   :  { %v2439_v5 = vadd.f32 %v5192_v23, %v5198_v42 }
 0x6ff   :  { %v2601_v22 = vadd.f32 %v2600_v25, %v2494_v59 }
 0x701   :  { %v2693_v19 = vpop.f32.mrf.mxu0  ;;  %v2782_v13 = vpop.f32.mrf.mxu1 }
 0x702   :  { %v2694_v9 = vadd.f32 %v2693_v19, %v2571_v16 }
 0x704   :  { %v2779_v20 = vadd.f32 %v2778_v60, %v2694_v9  ;;  %v5212_v26 = vpop.f32.mrf.mxu2  ;;  %v5217_v16 = vpop.f32.mrf.mxu3 }
 0x705   :  { %v2499_v29 = vadd.f32 %v5212_v26, %v2403_v18 }
 0x706   :  { %3113 = vrot.lane.b32.xlu0 %v2779_v20, %s4351_s4 }
 0x709   :  { %v2697_v15 = vpop.f32.mrf.mxu0  ;;  %v2786_v31 = vpop.f32.mrf.mxu1 }
 0x70a   :  { %v2698_v28 = vadd.f32 %v2697_v15, %v2577_v51  ;;  %v2411_v15 = vadd.f32 %v5150_v30, %v5154_v36 }
 0x70c   :  { %v2783_v24 = vadd.f32 %v2782_v13, %v2698_v28  ;;  %v5223_v53 = vpop.f32.mrf.mxu2  ;;  %v5227_v44 = vpop.f32.mrf.mxu3 }
 0x70e   :  { %3115 = vrot.lane.b32.xlu2 %v2783_v24, %s4351_s4 }
 0x711   :  { %v2701_v34 = vpop.f32.mrf.mxu0  ;;  %v2790_v57 = vpop.f32.mrf.mxu1 }
 0x712   :  { %v2702_v1 = vadd.f32 %v2701_v34, %v2583_v4 }
 0x714   :  { %v2787_v32 = vadd.f32 %v2786_v31, %v2702_v1  ;;  %v2508_v51 = vpop.f32.mrf.mxu2  ;;  %v2618_v63 = vpop.f32.mrf.mxu3 }
 0x715   :  { %v2509_v55 = vadd.f32 %v2508_v51, %v2411_v15 }
 0x716   :  { %3117 = vrot.lane.b32.xlu1 %v2787_v32, %s4351_s4 }
 0x717   :  { %v2619_v11 = vadd.f32 %v2618_v63, %v2509_v55  ;;  %v2407_v55 = vadd.f32 %v5144_v38, %v5148_v14 }
 0x719   :  { %v2705_v45 = vpop.f32.mrf.mxu0  ;;  %v2794_v40 = vpop.f32.mrf.mxu1 }
 0x71a   :  { %v2706_v6 = vadd.f32 %v2705_v45, %v2589_v49  ;;  %v2423_v45 = vadd.f32 %v5168_v56, %v5172_v21 }
 0x71c   :  { %v2791_v3 = vadd.f32 %v2790_v57, %v2706_v6  ;;  %v2513_v28 = vpop.f32.mrf.mxu2  ;;  %v2624_v4 = vpop.f32.mrf.mxu3 }
 0x71d   :  { %v2514_v34 = vadd.f32 %v2513_v28, %v2415_v17 }
 0x71e   :  { %3119 = vrot.lane.b32.xlu1 %v2791_v3, %s4351_s4 }
 0x71f   :  { %v2625_v36 = vadd.f32 %v2624_v4, %v2514_v34 }
 0x721   :  { %v2709_v60 = vpop.f32.mrf.mxu0  ;;  %v2798_v43 = vpop.f32.mrf.mxu1 }
 0x722   :  { %v2710_v41 = vadd.f32 %v2709_v60, %v2595_v58 }
 0x724   :  { %v5219_v37 = vadd.f32 %v2794_v40, %v2710_v41  ;;  %v2518_v30 = vpop.f32.mrf.mxu2  ;;  %v2630_v49 = vpop.f32.mrf.mxu3 }
 0x725   :  { %v2519_v50 = vadd.f32 %v2518_v30, %v2419_v0 }
 0x726   :  { %3121 = vrot.lane.b32.xlu1 %v5219_v37, %s4351_s4 }
 0x727   :  { %v2631_v25 = vadd.f32 %v2630_v49, %v2519_v50 }
 0x728   :  { %2841 = vxpose.xlu0.b32.start [1/2] (short) (narrow) %v2779_v20, 16 }
 0x729   :  { %v2713_v19 = vpop.f32.mrf.mxu0  ;;  %v5225_v13 = vpop.f32.mrf.mxu1 }
 0x72a   :  { %v2714_v9 = vadd.f32 %v2713_v19, %v2601_v22 }
 0x72c   :  { %v2799_v8 = vadd.f32 %v2798_v43, %v2714_v9  ;;  %v2523_v40 = vpop.f32.mrf.mxu2  ;;  %v2636_v62 = vpop.f32.mrf.mxu3 }
 0x72e   :  { %3123 = vrot.lane.b32.xlu1 %v2799_v8, %s4351_s4 }
 0x730   :  { %2842 = vxpose.xlu0.b32.end [2/2] (short) (narrow) %v2783_v24, 16 }
 0x731   :  { %v2717_v54 = vpop.f32.mrf.mxu0  ;;  %v5230_v47 = vpop.f32.mrf.mxu1 }
 0x734   :  { %v2528_v59 = vpop.f32.mrf.mxu2  ;;  %v2642_v21 = vpop.f32.mrf.mxu3 }
 0x735   :  { %v2529_v22 = vadd.f32 %v2528_v59, %v2427_v33 }
 0x737   :  { %v2643_v19 = vadd.f32 %v2642_v21, %v2529_v22 }
 0x738   :  { %2873 = vxpose.xlu0.b32.start [1/2] (short) (narrow) %v2787_v32, 16 }
 0x739   :  { %v2721_v20 = vpop.f32.mrf.mxu0  ;;  %v2810_v31 = vpop.f32.mrf.mxu1 }
 0x73c   :  { %v2533_v4 = vpop.f32.mrf.mxu2  ;;  %v2648_v26 = vpop.f32.mrf.mxu3 }
 0x73d   :  { %v2534_v14 = vadd.f32 %v2533_v4, %v2431_v7  ;;  %v3500_v4 = vld [vmem:[%s5616_s5 + $0x18] sm:$0xff]  ;;  %v3499_v7 = vld [vmem:[%s5616_s5 + $0x10] sm:$0xff] }
 0x740   :  { %2874 = vxpose.xlu0.b32.end [2/2] (short) (narrow) %v2791_v3, 16  ;;  %v2524_v3 = vadd.f32 %v2523_v40, %v2423_v45 }
 0x741   :  { %v2725_v24 = vpop.f32.mrf.mxu0  ;;  %v2814_v1 = vpop.f32.mrf.mxu1 }
 0x742   :  { %v2726_v12 = vadd.f32 %v2725_v24, %v2619_v11  ;;  %v2637_v2 = vadd.f32 %v2636_v62, %v2524_v3  ;;  %v2504_v11 = vadd.f32 %v5223_v53, %v2407_v55  ;;  %v2435_v53 = vadd.f32 %v5186_v52, %v5190_v27 }
 0x744   :  { %v5236_v57 = vadd.f32 %v2810_v31, %v2726_v12  ;;  %v2607_v31 = vadd.f32 %v5217_v16, %v2499_v29  ;;  %v2613_v17 = vadd.f32 %v5227_v44, %v2504_v11  ;;  %v2649_v16 = vadd.f32 %v2648_v26, %v2534_v14  ;;  %v3497_v14 = vld [vmem:[%s5616_s5] sm:$0xff] }
 0x745   :  { %v3563_v26 = vand.u32 4294901760, %v3499_v7 }
 0x746   :  { %3129 = vrot.lane.b32.xlu2 %v5236_v57, %s4351_s4  ;;  %v2718_v28 = vadd.f32 %v2717_v54, %v2607_v31 }
 0x749   :  { %v2729_v39 = vpop.f32.mrf.mxu0  ;;  %v2818_v61 = vpop.f32.mrf.mxu1 }
 0x74a   :  { %v2730_v32 = vadd.f32 %v2729_v39, %v2625_v36 }
 0x74c   :  { %v5242_v48 = vadd.f32 %v2814_v1, %v2730_v32 }
 0x74e   :  { %3131 = vrot.lane.b32.xlu2 %v5242_v48, %s4351_s4 }
 0x751   :  { %v2733_v6 = vpop.f32.mrf.mxu0  ;;  %v2822_v60 = vpop.f32.mrf.mxu1 }
 0x752   :  { %v2734_v46 = vadd.f32 %v2733_v6, %v2631_v25 }
 0x754   :  { %v5248_v58 = vadd.f32 %v2818_v61, %v2734_v46 }
 0x756   :  { %3133 = vrot.lane.b32.xlu2 %v5248_v58, %s4351_s4 }
 0x759   :  { %v2737_v43 = vpop.f32.mrf.mxu0  ;;  %v2826_v63 = vpop.f32.mrf.mxu1 }
 0x75a   :  { %v2738_v41 = vadd.f32 %v2737_v43, %v2637_v2 }
 0x75c   :  { %v5254_v56 = vadd.f32 %v2822_v60, %v2738_v41 }
 0x75e   :  { %3135 = vrot.lane.b32.xlu2 %v5254_v56, %s4351_s4 }
 0x761   :  { %v2741_v9 = vpop.f32.mrf.mxu0  ;;  %v2830_v44 = vpop.f32.mrf.mxu1 }
 0x762   :  { %v2742_v51 = vadd.f32 %v2741_v9, %v2643_v19 }
 0x763   :  { %2905 = vxpose.xlu1.b32.start [1/2] (short) (narrow) %v5219_v37, 16  ;;  %v2803_v37 = vadd.f32 %v5225_v13, %v2718_v28  ;;  %v2538_v13 = vpop.f32.mrf.mxu2 }
 0x764   :  { %v5259_v15 = vadd.f32 %v2826_v63, %v2742_v51  ;;  %v2539_v24 = vadd.f32 %v2538_v13, %v2435_v53 }
 0x766   :  { %3137 = vrot.lane.b32.xlu2 %v5259_v15, %s4351_s4 }
 0x768   :  { %v3116_v3 = vpop.permute.xlu2 %3115 }
 0x769   :  { %v2745_v38 = vpop.f32.mrf.mxu0  ;;  %v2834_v30 = vpop.f32.mrf.mxu1 }
 0x76a   :  { %v2746_v54 = vadd.f32 %v2745_v38, %v2649_v16 }
 0x76b   :  { %2906 = vxpose.xlu1.b32.end [2/2] (short) (narrow) %v2799_v8, 16  ;;  %v2722_v8 = vadd.f32 %v2721_v20, %v2613_v17  ;;  %v2654_v20 = vpop.f32.mrf.mxu3  ;;  %v2543_v1 = vpop.f32.mrf.mxu2 }
 0x76c   :  { %v5279_v34 = vadd.f32 %v2830_v44, %v2746_v54  ;;  %v2544_v36 = vadd.f32 %v2543_v1, %v2439_v5  ;;  %v3567_v44 = vand.u32 4294901760, %v3497_v14 }
 0x76d   :  { %v2807_v10 = vadd.f32 %v5230_v47, %v2722_v8  ;;  %v2655_v47 = vadd.f32 %v2654_v20, %v2539_v24 }
 0x771   :  { %v2749_v12 = vpop.f32.mrf.mxu0  ;;  %v2838_v49 = vpop.f32.mrf.mxu1 }
 0x772   :  { %v2750_v35 = vadd.f32 %v2749_v12, %v2655_v47  ;;  %v3729_v12 = vsub.f32 %v3497_v14, %v3567_v44 }
 0x773   :  { %v2660_v27 = vpop.f32.mrf.mxu3 }
 0x774   :  { %v5285_v52 = vadd.f32 %v2834_v30, %v2750_v35  ;;  %v2661_v39 = vadd.f32 %v2660_v27, %v2544_v36  ;;  %v3730_v35 = vand.u32 4294901760, %v3729_v12 }
 0x776   :  { %v3731_v30 = vsub.f32 %v3729_v12, %v3730_v35 }
 0x778   :  { %v3114_v61 = vpop.permute.xlu0 %3113  ;;  %v3732_v36 = vand.u32 4294901760, %v3731_v30 }
 0x779   :  { %v2753_v0 = vpop.f32.mrf.mxu0 }
 0x77a   :  { %v2754_v32 = vadd.f32 %v2753_v0, %v2661_v39 }
 0x77c   :  { %v5289_v50 = vadd.f32 %v2838_v49, %v2754_v32 }
 0x788   :  { %v3118_v23 = vpop.permute.xlu1 %3117 }
 0x790   :  { %v3120_v42 = vpop.permute.xlu1 %3119 }
 0x798   :  { %v3122_v25 = vpop.permute.xlu1 %3121 }
 0x7a0   :  { %v3124_v40 = vpop.permute.xlu1 %3123  ;;  %v3130_v2 = vpop.permute.xlu2 %3129 }
 0x7a8   :  { %v3132_v60 = vpop.permute.xlu2 %3131 }
 0x7ae   :  { %3125 = vrot.lane.b32.xlu0 %v2803_v37, %s4351_s4 }
 0x7b0   :  { %v3134_v41 = vpop.permute.xlu2 %3133 }
 0x7b6   :  { %3127 = vrot.lane.b32.xlu0 %v2807_v10, %s4351_s4 }
 0x7b8   :  { %v3136_v59 = vpop.permute.xlu2 %3135 }
 0x7c0   :  { %v3138_v8 = vpop.permute.xlu2 %3137 }
 0x7c5   :  { %3139 = vrot.lane.b32.xlu1 %v5279_v34, %s4351_s4 }
 0x7cc   :  { %v5293_v45 = vpop.trf.xlu0 }
 0x7cd   :  { %3141 = vrot.lane.b32.xlu1 %v5285_v52, %s4351_s4 }
 0x7d4   :  { %v5295_v6 = vpop.trf.xlu0 }
 0x7d5   :  { %3143 = vrot.lane.b32.xlu1 %v5289_v50, %s4351_s4 }
 0x7d8   :  { %2937 = vxpose.xlu0.b32.start [1/2] (short) (narrow) %v2803_v37, 16 }
 0x7dc   :  { %v5297_v46 = vpop.trf.xlu0 }
 0x7e0   :  { %2938 = vxpose.xlu0.b32.end [2/2] (short) (narrow) %v2807_v10, 16  ;;  %v3561_v10 = vand.u32 4294901760, %v3500_v4 }
 0x7e2   :  { %3917 = vmatpush.msrb.mxu1 %v3561_v10  ;;  %3562 = vmatpush.msra.mxu2 %v3561_v10 }
 0x7e4   :  { %v5299_v62 = vpop.trf.xlu0  ;;  %3919 = vmatpush.msrb.mxu1 %v3563_v26  ;;  %3564 = vmatpush.msra.mxu2 %v3563_v26 }
 0x7e8   :  { %3193 = vxpose.xlu0.b32.start [1/2] (short) (narrow) %v3118_v23, 16 }
 0x7f0   :  { %3194 = vxpose.xlu0.b32.end [2/2] (short) (narrow) %v3120_v42, 16 }
 0x7f8   :  { %3225 = vxpose.xlu0.b32.start [1/2] (short) (narrow) %v3122_v25, 16 }
 0x800   :  { %3226 = vxpose.xlu0.b32.end [2/2] (short) (narrow) %v3124_v40, 16 }
 0x807   :  { %v5301_v22 = vpop.trf.xlu1 }
 0x80a   :  { %3161 = vxpose.xlu1.b32.start [1/2] (short) (narrow) %v3114_v61, 16 }
 0x80f   :  { %v5303_v21 = vpop.trf.xlu1 }
 0x812   :  { %3162 = vxpose.xlu1.b32.end [2/2] (short) (narrow) %v3116_v3, 16 }
 0x820   :  { %v3126_v33 = vpop.permute.xlu0 %3125 }
 0x821   :  { %3257 = vxpose.xlu0.b32.start [1/2] (short) (narrow) %v3126_v33, 16 }
 0x828   :  { %v3128_v43 = vpop.permute.xlu0 %3127 }
 0x829   :  { %3258 = vxpose.xlu0.b32.end [2/2] (short) (narrow) %v3128_v43, 16 }
 0x831   :  { %3321 = vxpose.xlu0.b32.start [1/2] (short) (narrow) %v3134_v41, 16 }
 0x837   :  { %v3140_v9 = vpop.permute.xlu1 %3139 }
 0x839   :  { %3322 = vxpose.xlu0.b32.end [2/2] (short) (narrow) %v3136_v59, 16 }
 0x83f   :  { %v5309_v63 = vpop.permute.xlu1 %3141 }
 0x847   :  { %v5311_v29 = vpop.permute.xlu1 %3143 }
 0x87c   :  { %v5305_v19 = vpop.trf.xlu0 }
 0x884   :  { %v5307_v51 = vpop.trf.xlu0 }
 0x88c   :  { %v3209_v18 = vpop.trf.xlu0 }
 0x894   :  { %v5313_v31 = vpop.trf.xlu0 }
 0x89c   :  { %v5316_v28 = vpop.trf.xlu0 }
 0x8a4   :  { %v5319_v37 = vpop.trf.xlu0 }
 0x8ae   :  { %v3177_v55 = vpop.trf.xlu1 }
 0x8af   :  { %3433 = vrot.lane.b32.xlu1 %v3177_v55, %s4352_s12 }
 0x8b6   :  { %v3178_v11 = vpop.trf.xlu1 }
 0x8b7   :  { %3435 = vrot.lane.b32.xlu2 %v3178_v11, %s4352_s12 }
 0x8bf   :  { %3437 = vrot.lane.b32.xlu2 %v3209_v18, %s4352_s12 }
 0x8c5   :  { %v3273_v17 = vpop.trf.xlu0 }
 0x8c6   :  { %3445 = vrot.lane.b32.xlu0 %v3273_v17, %s4352_s12 }
 0x8cd   :  { %v3274_v17 = vpop.trf.xlu0 }
 0x8e4   :  { %3001 = vxpose.xlu1.b32.start [1/2] (short) (narrow) %v5248_v58, 16  ;;  %v3711_v58 = vsub.f32 %v3500_v4, %v3561_v10 }
 0x8e5   :  { %3289 = vxpose.xlu2.b32.start [1/2] (short) (narrow) %v3130_v2, 16 }
 0x8e6   :  { %3813 = vmatpush.msrb.mxu0 %v3711_v58 }
 0x8e8   :  { %2969 = vxpose.xlu0.b32.start [1/2] (short) (narrow) %v5236_v57, 16  ;;  %v3498_v57 = vld [vmem:[%s5616_s5 + $0x8] sm:$0xff]  ;;  %s4353_s5 = smov [#allocation8]  }
 0x8e9   :  { %v3565_v38 = vand.u32 4294901760, %v3498_v57  ;;  %s4219_s9 = sshll.u32 %s4353_s5, 4  ;;  %s4220_s9 = int_to_ptr.vmem [resolvable:$true] %s4219_s9 }
 0x8eb   :  { %v3723_v13 = vsub.f32 %v3498_v57, %v3565_v38  ;;  %3921 = vmatpush.msrb.mxu1 %v3565_v38  ;;  %3566 = vmatpush.msra.mxu2 %v3565_v38 }
 0x8ec   :  { %3002 = vxpose.xlu1.b32.end [2/2] (short) (narrow) %v5254_v56, 16  ;;  %v3717_v56 = vsub.f32 %v3499_v7, %v3563_v26 }
 0x8ed   :  { %3290 = vxpose.xlu2.b32.end [2/2] (short) (narrow) %v3132_v60, 16  ;;  %v3724_v20 = vand.u32 4294901760, %v3723_v13  ;;  %3923 = vmatpush.msrb.mxu1 %v3567_v44 }
 0x8ee   :  { %v3718_v53 = vand.u32 4294901760, %v3717_v56  ;;  %3816 = vmatpush.msrb.mxu0 %v3717_v56  ;;  %3568 = vmatpush.msra.mxu2 %v3567_v44 }
 0x8ef   :  { %v3725_v5 = vsub.f32 %v3723_v13, %v3724_v20 }
 0x8f0   :  { %2970 = vxpose.xlu0.b32.end [2/2] (short) (narrow) %v5242_v48, 16  ;;  %v3712_v48 = vand.u32 4294901760, %v3711_v58  ;;  %v3719_v24 = vsub.f32 %v3717_v56, %v3718_v53  ;;  %3819 = vmatpush.msrb.mxu0 %v3723_v13 }
 0x8f1   :  { %v3726_v1 = vand.u32 4294901760, %v3725_v5 }
 0x8f2   :  { %v3713_v16 = vsub.f32 %v3711_v58, %v3712_v48  ;;  %v3720_v47 = vand.u32 4294901760, %v3719_v24  ;;  %3822 = vmatpush.msrb.mxu0 %v3729_v12  ;;  %4036 = vmatpush.msrb.mxu2 %v3712_v48 }
 0x8f4   :  { %3353 = vxpose.xlu1.b32.start [1/2] (short) (narrow) %v3138_v8, 16  ;;  %v3714_v54 = vand.u32 4294901760, %v3713_v16  ;;  %4040 = vmatpush.msrb.mxu2 %v3718_v53 }
 0x8f6   :  { %3715 = vmatpush.msra.mxu3 %v3714_v54  ;;  %4044 = vmatpush.msrb.mxu2 %v3724_v20 }
 0x8f8   :  { %3721 = vmatpush.msra.mxu3 %v3720_v47  ;;  %4048 = vmatpush.msrb.mxu2 %v3730_v35 }
 0x8fa   :  { %3727 = vmatpush.msra.mxu3 %v3726_v1 }
 0x8fc   :  { %3354 = vxpose.xlu1.b32.end [2/2] (short) (narrow) %v3140_v9, 16  ;;  %3733 = vmatpush.msra.mxu3 %v3732_v36 }
 0x8fe   :  { %4127 = vmatpush.msrb.mxu3 %v3561_v10 }
 0x900   :  { %4129 = vmatpush.msrb.mxu3 %v3563_v26 }
 0x902   :  { %4131 = vmatpush.msrb.mxu3 %v3565_v38 }
 0x904   :  { %4133 = vmatpush.msrb.mxu3 %v3567_v44 }
 0x911   :  { %v3436_v27 = vpop.permute.xlu2 %3435 }
 0x912   :  { %v3482_v0 = vsel %vm89_vm0, %v5295_v6, %v3436_v27 }
 0x913   :  { %v3505_v39 = vsel %vm1422_vm1, %v3482_v0, 0 }
 0x914   :  { %v5345_v61 = vand.u32 4294901760, %v3505_v39 }
 0x916   :  { %v3578_v6 = vsub.f32 %v3505_v39, %v5345_v61 }
 0x918   :  { %v3579_v41 = vand.u32 4294901760, %v3578_v6 }
 0x919   :  { %v3438_v23 = vpop.permute.xlu2 %3437 }
 0x91a   :  { %v3483_v40 = vsel %vm89_vm0, %v5297_v46, %v3438_v23  ;;  %v3580_v59 = vsub.f32 %v3578_v6, %v3579_v41 }
 0x91c   :  { %v3581_v9 = vand.u32 4294901760, %v3580_v59 }
 0x921   :  { %v3434_v32 = vpop.permute.xlu1 %3433 }
 0x922   :  { %v3481_v49 = vsel %vm89_vm0, %v5293_v45, %v3434_v32  ;;  %v3508_v45 = vsel %vm1422_vm1, %v3483_v40, 0 }
 0x923   :  { %v3502_v42 = vsel %vm1422_vm1, %v3481_v49, 0  ;;  %v5355_v60 = vand.u32 4294901760, %v3508_v45 }
 0x924   :  { %v5347_v25 = vand.u32 4294901760, %v3502_v42 }
 0x925   :  { %v3586_v46 = vsub.f32 %v3508_v45, %v5355_v60 }
 0x926   :  { %v3570_v3 = vsub.f32 %v3502_v42, %v5347_v25  ;;  %3735 = vmatmul.f32.vlgmr.msra.gmra.mxu3 %v5347_v25 }
 0x927   :  { %v3587_v18 = vand.u32 4294901760, %v3586_v46 }
 0x928   :  { %v3571_v2 = vand.u32 4294901760, %v3570_v3  ;;  %3825 = vmatmul.f32.vlgmr.msrb.gmra.mxu0 %v3570_v3 }
 0x929   :  { %v3588_v55 = vsub.f32 %v3586_v46, %v3587_v18 }
 0x92a   :  { %v3572_v33 = vsub.f32 %v3570_v3, %v3571_v2  ;;  %3927 = vmatmul.f32.vlgmr.msrb.gmra.mxu1 %v3571_v2 }
 0x92b   :  { %v3589_v11 = vand.u32 4294901760, %v3588_v55 }
 0x92c   :  { %v3573_v43 = vand.u32 4294901760, %v3572_v33 }
 0x92e   :  { %3574 = vmatmul.f32.vlgmr.msra.gmra.mxu2 %v3573_v43  ;;  %3739 = vmatmul.f32.gmra.mxu3 %v5345_v61 }
 0x930   :  { %3830 = vmatmul.f32.gmra.mxu0 %v3578_v6 }
 0x932   :  { %3933 = vmatmul.f32.gmra.mxu1 %v3579_v41 }
 0x936   :  { %3582 = vmatmul.f32.gmra.mxu2 %v3581_v9  ;;  %3743 = vmatmul.f32.gmra.mxu3 %v5355_v60 }
 0x938   :  { %3835 = vmatmul.f32.gmra.mxu0 %v3586_v46 }
 0x93a   :  { %3939 = vmatmul.f32.gmra.mxu1 %v3587_v18 }
 0x93e   :  { %3590 = vmatmul.f32.gmra.mxu2 %v3589_v11 }
 0x956   :  { %3439 = vrot.lane.b32.xlu2 %v5313_v31, %s4352_s12  ;;  %v5374_v31 = vpop.trf.xlu0 }
 0x95e   :  { %3441 = vrot.lane.b32.xlu2 %v5316_v28, %s4352_s12 }
 0x966   :  { %3443 = vrot.lane.b32.xlu2 %v5319_v37, %s4352_s12  ;;  %v5379_v37 = vpop.trf.xlu0 }
 0x96e   :  { %3447 = vrot.lane.b32.xlu2 %v3274_v17, %s4352_s12  ;;  %v3446_v16 = vpop.permute.xlu0 %3445 }
 0x96f   :  { %v3487_v44 = vsel %vm89_vm0, %v5305_v19, %v3446_v16 }
 0x970   :  { %v3520_v24 = vsel %vm1422_vm1, %v3487_v44, 0 }
 0x971   :  { %v5402_v5 = vand.u32 4294901760, %v3520_v24 }
 0x973   :  { %v3618_v30 = vsub.f32 %v3520_v24, %v5402_v5 }
 0x975   :  { %v3619_v49 = vand.u32 4294901760, %v3618_v30 }
 0x977   :  { %v3620_v42 = vsub.f32 %v3618_v30, %v3619_v49 }
 0x979   :  { %v3621_v40 = vand.u32 4294901760, %v3620_v42 }
 0x97e   :  { %v3305_v8 = vpop.trf.xlu2 }
 0x97f   :  { %3449 = vrot.lane.b32.xlu2 %v3305_v8, %s4352_s12 }
 0x986   :  { %v5376_v28 = vpop.trf.xlu2 }
 0x988   :  { %v5368_v4 = vpop.trf.xlu1 }
 0x990   :  { %v5370_v10 = vpop.trf.xlu1 }
 0x998   :  { %v3369_v7 = vpop.trf.xlu1 }
 0x999   :  { %3457 = vrot.lane.b32.xlu0 %v3369_v7, %s4352_s12 }
 0x9a0   :  { %v3370_v55 = vpop.trf.xlu1 }
 0x9a5   :  { %3385 = vxpose.xlu2.b32.start [1/2] (short) (narrow) %v5309_v63, 16 }
 0x9ad   :  { %3386 = vxpose.xlu2.b32.end [2/2] (short) (narrow) %v5311_v29, 16 }
 0x9b0   :  { %v3440_v58 = vpop.permute.xlu2 %3439 }
 0x9b1   :  { %v3484_v26 = vsel %vm89_vm0, %v5299_v62, %v3440_v58 }
 0x9b2   :  { %v3511_v57 = vsel %vm1422_vm1, %v3484_v26, 0 }
 0x9b3   :  { %v5384_v48 = vand.u32 4294901760, %v3511_v57 }
 0x9b5   :  { %v3594_v56 = vsub.f32 %v3511_v57, %v5384_v48  ;;  %3747 = vmatmul.f32.gmra.mxu3 %v5384_v48 }
 0x9b7   :  { %3840 = vmatmul.f32.gmra.mxu0 %v3594_v56  ;;  %v3595_v63 = vand.u32 4294901760, %v3594_v56 }
 0x9b8   :  { %v3442_v38 = vpop.permute.xlu2 %3441 }
 0x9b9   :  { %v3485_v29 = vsel %vm89_vm0, %v5301_v22, %v3442_v38  ;;  %3945 = vmatmul.f32.gmra.mxu1 %v3595_v63  ;;  %v3596_v14 = vsub.f32 %v3594_v56, %v3595_v63 }
 0x9ba   :  { %v3514_v53 = vsel %vm1422_vm1, %v3485_v29, 0 }
 0x9bb   :  { %v5391_v62 = vand.u32 4294901760, %v3514_v53  ;;  %3033 = vxpose.xlu0.b32.start [1/2] (short) (narrow) %v5259_v15, 16  ;;  %v3597_v13 = vand.u32 4294901760, %v3596_v14 }
 0x9bd   :  { %v3602_v54 = vsub.f32 %v3514_v53, %v5391_v62  ;;  %3598 = vmatmul.f32.gmra.mxu2 %v3597_v13  ;;  %3751 = vmatmul.f32.gmra.mxu3 %v5391_v62 }
 0x9bf   :  { %3845 = vmatmul.f32.gmra.mxu0 %v3602_v54  ;;  %v3603_v22 = vand.u32 4294901760, %v3602_v54 }
 0x9c0   :  { %v3444_v20 = vpop.permute.xlu2 %3443 }
 0x9c1   :  { %v3486_v12 = vsel %vm89_vm0, %v5303_v21, %v3444_v20  ;;  %3951 = vmatmul.f32.gmra.mxu1 %v3603_v22  ;;  %v3604_v47 = vsub.f32 %v3602_v54, %v3603_v22 }
 0x9c2   :  { %v3517_v15 = vsel %vm1422_vm1, %v3486_v12, 0 }
 0x9c3   :  { %v5404_v19 = vand.u32 4294901760, %v3517_v15  ;;  %3034 = vxpose.xlu0.b32.end [2/2] (short) (narrow) %v5279_v34, 16  ;;  %v3605_v35 = vand.u32 4294901760, %v3604_v47 }
 0x9c5   :  { %v3610_v1 = vsub.f32 %v3517_v15, %v5404_v19  ;;  %3606 = vmatmul.f32.gmra.mxu2 %v3605_v35  ;;  %3755 = vmatmul.f32.gmra.mxu3 %v5404_v19 }
 0x9c7   :  { %3850 = vmatmul.f32.gmra.mxu0 %v3610_v1  ;;  %v3611_v21 = vand.u32 4294901760, %v3610_v1 }
 0x9c8   :  { %v3448_v36 = vpop.permute.xlu2 %3447 }
 0x9c9   :  { %v3488_v27 = vsel %vm89_vm0, %v5307_v51, %v3448_v36  ;;  %3957 = vmatmul.f32.gmra.mxu1 %v3611_v21  ;;  %v3612_v0 = vsub.f32 %v3610_v1, %v3611_v21  ;;  %v2985_v51 = vpop.trf.xlu0 }
 0x9ca   :  { %v3523_v39 = vsel %vm1422_vm1, %v3488_v27, 0 }
 0x9cb   :  { %v5413_v32 = vand.u32 4294901760, %v3523_v39  ;;  %v3613_v34 = vand.u32 4294901760, %v3612_v0 }
 0x9cd   :  { %3614 = vmatmul.f32.gmra.mxu2 %v3613_v34  ;;  %3759 = vmatmul.f32.gmra.mxu3 %v5402_v5  ;;  %v3626_v23 = vsub.f32 %v3523_v39, %v5413_v32 }
 0x9cf   :  { %3855 = vmatmul.f32.gmra.mxu0 %v3618_v30  ;;  %v3627_v3 = vand.u32 4294901760, %v3626_v23 }
 0x9d1   :  { %3963 = vmatmul.f32.gmra.mxu1 %v3619_v49  ;;  %v3628_v6 = vsub.f32 %v3626_v23, %v3627_v3  ;;  %v2986_v8 = vpop.trf.xlu0 }
 0x9d3   :  { %v3629_v43 = vand.u32 4294901760, %v3628_v6  ;;  %v5467_v6 = vpop.f32.mrf.mxu3 }
 0x9d5   :  { %3622 = vmatmul.f32.gmra.mxu2 %v3621_v40  ;;  %3763 = vmatmul.f32.gmra.mxu3 %v5413_v32 }
 0x9d7   :  { %3860 = vmatmul.f32.gmra.mxu0 %v3626_v23 }
 0x9d9   :  { %v3450_v2 = vpop.permute.xlu2 %3449  ;;  %3969 = vmatmul.f32.gmra.mxu1 %v3627_v3 }
 0x9da   :  { %v3489_v45 = vsel %vm89_vm0, %v2985_v51, %v3450_v2  ;;  %v5469_v2 = vpop.f32.mrf.mxu2 }
 0x9db   :  { %v3526_v33 = vsel %vm1422_vm1, %v3489_v45, 0  ;;  %v5471_v45 = vpop.f32.mrf.mxu3 }
 0x9dc   :  { %v5420_v41 = vand.u32 4294901760, %v3526_v33 }
 0x9dd   :  { %3630 = vmatmul.f32.gmra.mxu2 %v3629_v43 }
 0x9de   :  { %v3634_v46 = vsub.f32 %v3526_v33, %v5420_v41  ;;  %3767 = vmatmul.f32.gmra.mxu3 %v5420_v41 }
 0x9e0   :  { %3865 = vmatmul.f32.gmra.mxu0 %v3634_v46  ;;  %v3635_v59 = vand.u32 4294901760, %v3634_v46 }
 0x9e2   :  { %3975 = vmatmul.f32.gmra.mxu1 %v3635_v59  ;;  %v3636_v9 = vsub.f32 %v3634_v46, %v3635_v59  ;;  %v5473_v33 = vpop.f32.mrf.mxu2 }
 0x9e3   :  { %v5475_v43 = vpop.f32.mrf.mxu3 }
 0x9e4   :  { %v3637_v18 = vand.u32 4294901760, %v3636_v9 }
 0x9e6   :  { %3638 = vmatmul.f32.gmra.mxu2 %v3637_v18 }
 0x9ea   :  { %v5477_v46 = vpop.f32.mrf.mxu2 }
 0xa16   :  { %3451 = vrot.lane.b32.xlu2 %v5376_v28, %s4352_s12 }
 0xa1e   :  { %3453 = vrot.lane.b32.xlu2 %v5374_v31, %s4352_s12 }
 0xa26   :  { %3455 = vrot.lane.b32.xlu2 %v5379_v37, %s4352_s12  ;;  %v3458_v37 = vpop.permute.xlu0 %3457 }
 0xa2e   :  { %3459 = vrot.lane.b32.xlu2 %v3370_v55, %s4352_s12 }
 0xa38   :  { %v5479_v59 = vpop.f32.mrf.mxu3 }
 0xa3e   :  { %v3401_v11 = vpop.trf.xlu2 }
 0xa3f   :  { %3461 = vrot.lane.b32.xlu1 %v3401_v11, %s4352_s12 }
 0xa40   :  { %v5481_v9 = vpop.f32.mrf.mxu2  ;;  %v5483_v18 = vpop.f32.mrf.mxu3 }
 0xa46   :  { %v3402_v17 = vpop.trf.xlu2 }
 0xa47   :  { %3463 = vrot.lane.b32.xlu1 %v3402_v17, %s4352_s12 }
 0xa48   :  { %v5485_v55 = vpop.f32.mrf.mxu2  ;;  %v5487_v11 = vpop.f32.mrf.mxu3 }
 0xa50   :  { %v5489_v17 = vpop.f32.mrf.mxu2 }
 0xa54   :  { %3065 = vxpose.xlu2.b32.start [1/2] (short) (narrow) %v5285_v52, 16 }
 0xa5c   :  { %3066 = vxpose.xlu2.b32.end [2/2] (short) (narrow) %v5289_v50, 16 }
 0xa5f   :  { %v3049_v14 = vpop.trf.xlu0 }
 0xa60   :  { %v3493_v53 = vsel %vm89_vm0, %v3049_v14, %v3458_v37 }
 0xa67   :  { %v3050_v35 = vpop.trf.xlu0 }
 0xa70   :  { %v3452_v7 = vpop.permute.xlu2 %3451 }
 0xa71   :  { %v3490_v31 = vsel %vm89_vm0, %v2986_v8, %v3452_v7  ;;  %v5491_v8 = vpop.f32.mrf.mxu3  ;;  %v5493_v7 = vpop.f32.mrf.mxu2 }
 0xa72   :  { %v3529_v28 = vsel %vm1422_vm1, %v3490_v31, 0 }
 0xa73   :  { %v5437_v58 = vand.u32 4294901760, %v3529_v28 }
 0xa75   :  { %v3642_v26 = vsub.f32 %v3529_v28, %v5437_v58  ;;  %3771 = vmatmul.f32.gmra.mxu3 %v5437_v58 }
 0xa77   :  { %3870 = vmatmul.f32.gmra.mxu0 %v3642_v26  ;;  %v3643_v57 = vand.u32 4294901760, %v3642_v26 }
 0xa78   :  { %v3454_v56 = vpop.permute.xlu2 %3453 }
 0xa79   :  { %v3491_v52 = vsel %vm89_vm0, %v5368_v4, %v3454_v56  ;;  %3981 = vmatmul.f32.gmra.mxu1 %v3643_v57  ;;  %v3644_v50 = vsub.f32 %v3642_v26, %v3643_v57  ;;  %v3538_v4 = vsel %vm1422_vm1, %v3493_v53, 0  ;;  %v5495_v31 = vpop.f32.mrf.mxu3  ;;  %v5497_v26 = vpop.f32.mrf.mxu2 }
 0xa7a   :  { %v3532_v63 = vsel %vm1422_vm1, %v3491_v52, 0  ;;  %v5455_v12 = vand.u32 4294901760, %v3538_v4 }
 0xa7b   :  { %v5444_v38 = vand.u32 4294901760, %v3532_v63  ;;  %v3645_v29 = vand.u32 4294901760, %v3644_v50 }
 0xa7c   :  { %v3666_v1 = vsub.f32 %v3538_v4, %v5455_v12 }
 0xa7d   :  { %v3650_v16 = vsub.f32 %v3532_v63, %v5444_v38  ;;  %3646 = vmatmul.f32.gmra.mxu2 %v3645_v29  ;;  %3775 = vmatmul.f32.gmra.mxu3 %v5444_v38 }
 0xa7e   :  { %v3667_v34 = vand.u32 4294901760, %v3666_v1 }
 0xa7f   :  { %3875 = vmatmul.f32.gmra.mxu0 %v3650_v16  ;;  %v3651_v13 = vand.u32 4294901760, %v3650_v16 }
 0xa80   :  { %v3456_v44 = vpop.permute.xlu2 %3455  ;;  %v3668_v23 = vsub.f32 %v3666_v1, %v3667_v34 }
 0xa81   :  { %v3492_v54 = vsel %vm89_vm0, %v5370_v10, %v3456_v44  ;;  %3987 = vmatmul.f32.gmra.mxu1 %v3651_v13  ;;  %v3652_v22 = vsub.f32 %v3650_v16, %v3651_v13  ;;  %v5503_v50 = vpop.f32.mrf.mxu3  ;;  %v5509_v4 = vpop.f32.mrf.mxu2 }
 0xa82   :  { %v3535_v24 = vsel %vm1422_vm1, %v3492_v54, 0  ;;  %v3669_v42 = vand.u32 4294901760, %v3668_v23 }
 0xa83   :  { %v5453_v20 = vand.u32 4294901760, %v3535_v24  ;;  %v3653_v47 = vand.u32 4294901760, %v3652_v22 }
 0xa85   :  { %v3658_v15 = vsub.f32 %v3535_v24, %v5453_v20  ;;  %3654 = vmatmul.f32.gmra.mxu2 %v3653_v47  ;;  %3779 = vmatmul.f32.gmra.mxu3 %v5453_v20 }
 0xa87   :  { %3880 = vmatmul.f32.gmra.mxu0 %v3658_v15  ;;  %v3659_v30 = vand.u32 4294901760, %v3658_v15 }
 0xa88   :  { %v3460_v10 = vpop.permute.xlu2 %3459 }
 0xa89   :  { %v3494_v21 = vsel %vm89_vm0, %v3050_v35, %v3460_v10  ;;  %3993 = vmatmul.f32.gmra.mxu1 %v3659_v30  ;;  %v3660_v36 = vsub.f32 %v3658_v15, %v3659_v30 }
 0xa8a   :  { %v3541_v27 = vsel %vm1422_vm1, %v3494_v21, 0 }
 0xa8b   :  { %v5462_v0 = vand.u32 4294901760, %v3541_v27  ;;  %v3661_v39 = vand.u32 4294901760, %v3660_v36 }
 0xa8d   :  { %3662 = vmatmul.f32.gmra.mxu2 %v3661_v39  ;;  %3783 = vmatmul.f32.gmra.mxu3 %v5455_v12  ;;  %v3674_v49 = vsub.f32 %v3541_v27, %v5462_v0 }
 0xa8f   :  { %3885 = vmatmul.f32.gmra.mxu0 %v3666_v1  ;;  %v3675_v40 = vand.u32 4294901760, %v3674_v49 }
 0xa91   :  { %3999 = vmatmul.f32.gmra.mxu1 %v3667_v34  ;;  %v3676_v3 = vsub.f32 %v3674_v49, %v3675_v40 }
 0xa93   :  { %v3677_v51 = vand.u32 4294901760, %v3676_v3 }
 0xa95   :  { %3670 = vmatmul.f32.gmra.mxu2 %v3669_v42  ;;  %3787 = vmatmul.f32.gmra.mxu3 %v5462_v0 }
 0xa97   :  { %3890 = vmatmul.f32.gmra.mxu0 %v3674_v49 }
 0xa99   :  { %4005 = vmatmul.f32.gmra.mxu1 %v3675_v40 }
 0xa9d   :  { %3678 = vmatmul.f32.gmra.mxu2 %v3677_v51 }
 0xab1   :  { %v3462_v28 = vpop.permute.xlu1 %3461 }
 0xab9   :  { %v3464_v29 = vpop.permute.xlu1 %3463 }
 0xaed   :  { %v3081_v37 = vpop.trf.xlu2 }
 0xaee   :  { %v3495_v57 = vsel %vm89_vm0, %v3081_v37, %v3462_v28 }
 0xaef   :  { %v3544_v56 = vsel %vm1422_vm1, %v3495_v57, 0  ;;  %v3741_v57 = vadd.f32 %v5471_v45, %v5473_v33  ;;  %v3749_v33 = vadd.f32 %v5479_v59, %v5481_v9 }
 0xaf0   :  { %v5501_v52 = vand.u32 4294901760, %v3544_v56 }
 0xaf2   :  { %v3682_v63 = vsub.f32 %v3544_v56, %v5501_v52  ;;  %3791 = vmatmul.f32.gmra.mxu3 %v5501_v52 }
 0xaf4   :  { %3895 = vmatmul.f32.gmra.mxu0 %v3682_v63  ;;  %v3683_v14 = vand.u32 4294901760, %v3682_v63 }
 0xaf5   :  { %v3082_v16 = vpop.trf.xlu2 }
 0xaf6   :  { %v3496_v53 = vsel %vm89_vm0, %v3082_v16, %v3464_v29  ;;  %4011 = vmatmul.f32.gmra.mxu1 %v3683_v14  ;;  %v3684_v13 = vsub.f32 %v3682_v63, %v3683_v14 }
 0xaf7   :  { %v3547_v44 = vsel %vm1422_vm1, %v3496_v53, 0 }
 0xaf8   :  { %v5511_v54 = vand.u32 4294901760, %v3547_v44  ;;  %v3685_v22 = vand.u32 4294901760, %v3684_v13  ;;  %v3772_v47 = vpop.f32.mrf.mxu3 }
 0xafa   :  { %v3690_v24 = vsub.f32 %v3547_v44, %v5511_v54  ;;  %3686 = vmatmul.f32.gmra.mxu2 %v3685_v22  ;;  %3795 = vmatmul.f32.gmra.mxu3 %v5511_v54 }
 0xafc   :  { %3900 = vmatmul.f32.gmra.mxu0 %v3690_v24  ;;  %v3691_v15 = vand.u32 4294901760, %v3690_v24 }
 0xafe   :  { %4017 = vmatmul.f32.gmra.mxu1 %v3691_v15  ;;  %v3692_v35 = vsub.f32 %v3690_v24, %v3691_v15 }
 0xb00   :  { %v3647_v1 = vpop.f32.mrf.mxu2  ;;  %v3693_v30 = vand.u32 4294901760, %v3692_v35  ;;  %v3776_v21 = vpop.f32.mrf.mxu3 }
 0xb01   :  { %v5515_v10 = vadd.f32 %v3772_v47, %v3647_v1 }
 0xb02   :  { %3694 = vmatmul.f32.gmra.mxu2 %v3693_v30  ;;  %4135 = vmatmul.f32.vlgmr.msrb.gmra.mxu3 %v5347_v25 }
 0xb08   :  { %v3655_v36 = vpop.f32.mrf.mxu2  ;;  %v3780_v39 = vpop.f32.mrf.mxu3 }
 0xb09   :  { %v5518_v27 = vadd.f32 %v3776_v21, %v3655_v36 }
 0xb0a   :  { %4050 = vmatmul.f32.vlgmr.msrb.gmra.mxu2 %v5347_v25  ;;  %4139 = vmatmul.f32.gmra.mxu3 %v5345_v61  ;;  %v3826_v25 = vpop.f32.mrf.mxu0 }
 0xb10   :  { %v3663_v34 = vpop.f32.mrf.mxu2  ;;  %v3784_v23 = vpop.f32.mrf.mxu3 }
 0xb11   :  { %v5522_v49 = vadd.f32 %v3780_v39, %v3663_v34  ;;  %v3753_v39 = vadd.f32 %v5483_v18, %v5485_v55  ;;  %v3761_v55 = vadd.f32 %v5491_v8, %v5493_v7  ;;  %v3769_v7 = vadd.f32 %v5503_v50, %v5509_v4 }
 0xb12   :  { %4054 = vmatmul.f32.gmra.mxu2 %v5345_v61  ;;  %4143 = vmatmul.f32.gmra.mxu3 %v5355_v60 }
 0xb18   :  { %v3671_v42 = vpop.f32.mrf.mxu2  ;;  %v5550_v61 = vpop.f32.mrf.mxu3 }
 0xb19   :  { %v5526_v40 = vadd.f32 %v3784_v23, %v3671_v42 }
 0xb1a   :  { %4058 = vmatmul.f32.gmra.mxu2 %v5355_v60  ;;  %4147 = vmatmul.f32.gmra.mxu3 %v5384_v48  ;;  %v3928_v60 = vpop.f32.mrf.mxu1 }
 0xb22   :  { %4062 = vmatmul.f32.gmra.mxu2 %v5384_v48  ;;  %4151 = vmatmul.f32.gmra.mxu3 %v5391_v62  ;;  %v5554_v48 = vpop.f32.mrf.mxu2 }
 0xb2a   :  { %4066 = vmatmul.f32.gmra.mxu2 %v5391_v62  ;;  %4155 = vmatmul.f32.gmra.mxu3 %v5404_v19 }
 0xb32   :  { %4070 = vmatmul.f32.gmra.mxu2 %v5404_v19  ;;  %4159 = vmatmul.f32.gmra.mxu3 %v5402_v5  ;;  %v3934_v19 = vpop.f32.mrf.mxu1 }
 0xb3a   :  { %4074 = vmatmul.f32.gmra.mxu2 %v5402_v5  ;;  %4163 = vmatmul.f32.gmra.mxu3 %v5413_v32  ;;  %v3831_v5 = vpop.f32.mrf.mxu0  ;;  %v3940_v3 = vpop.f32.mrf.mxu1 }
 0xb3b   :  { %v3832_v16 = vadd.f32 %v3831_v5, %v3741_v57  ;;  %v3757_v5 = vadd.f32 %v5487_v11, %v5489_v17  ;;  %v3765_v17 = vadd.f32 %v5495_v31, %v5497_v26 }
 0xb3d   :  { %v3935_v13 = vadd.f32 %v3934_v19, %v3832_v16 }
 0xb42   :  { %4078 = vmatmul.f32.gmra.mxu2 %v5413_v32  ;;  %4167 = vmatmul.f32.gmra.mxu3 %v5420_v41  ;;  %v3946_v29 = vpop.f32.mrf.mxu1 }
 0xb4a   :  { %4082 = vmatmul.f32.gmra.mxu2 %v5420_v41  ;;  %4171 = vmatmul.f32.gmra.mxu3 %v5437_v58  ;;  %v3952_v47 = vpop.f32.mrf.mxu1 }
 0xb52   :  { %4086 = vmatmul.f32.gmra.mxu2 %v5437_v58  ;;  %4175 = vmatmul.f32.gmra.mxu3 %v5444_v38 }
 0xb5a   :  { %4090 = vmatmul.f32.gmra.mxu2 %v5444_v38  ;;  %4179 = vmatmul.f32.gmra.mxu3 %v5453_v20  ;;  %v3836_v38 = vpop.f32.mrf.mxu0 }
 0xb62   :  { %4094 = vmatmul.f32.gmra.mxu2 %v5453_v20  ;;  %4183 = vmatmul.f32.gmra.mxu3 %v5455_v12  ;;  %v3737_v20 = vadd.f32 %v5467_v6, %v5469_v2  ;;  %v3841_v37 = vpop.f32.mrf.mxu0  ;;  %v3745_v6 = vadd.f32 %v5475_v43, %v5477_v46  ;;  %v3958_v46 = vpop.f32.mrf.mxu1 }
 0xb63   :  { %v3842_v36 = vadd.f32 %v3841_v37, %v3749_v33 }
 0xb64   :  { %v3827_v28 = vadd.f32 %v3826_v25, %v3737_v20  ;;  %v3837_v24 = vadd.f32 %v3836_v38, %v3745_v6 }
 0xb65   :  { %v3947_v34 = vadd.f32 %v3946_v29, %v3842_v36 }
 0xb66   :  { %v3929_v56 = vadd.f32 %v3928_v60, %v3827_v28  ;;  %v3941_v15 = vadd.f32 %v3940_v3, %v3837_v24 }
 0xb6a   :  { %4098 = vmatmul.f32.gmra.mxu2 %v5455_v12  ;;  %4187 = vmatmul.f32.gmra.mxu3 %v5462_v0  ;;  %v3846_v2 = vpop.f32.mrf.mxu0  ;;  %v3964_v9 = vpop.f32.mrf.mxu1 }
 0xb6b   :  { %v3847_v60 = vadd.f32 %v3846_v2, %v3753_v39 }
 0xb6d   :  { %v3953_v19 = vadd.f32 %v3952_v47, %v3847_v60 }
 0xb72   :  { %4102 = vmatmul.f32.gmra.mxu2 %v5462_v0  ;;  %4191 = vmatmul.f32.gmra.mxu3 %v5501_v52  ;;  %v3851_v30 = vpop.f32.mrf.mxu0  ;;  %v3970_v57 = vpop.f32.mrf.mxu1 }
 0xb73   :  { %v3852_v20 = vadd.f32 %v3851_v30, %v3757_v5 }
 0xb75   :  { %v3792_v62 = vpop.f32.mrf.mxu3 }
 0xb7a   :  { %4106 = vmatmul.f32.gmra.mxu2 %v5501_v52  ;;  %4195 = vmatmul.f32.gmra.mxu3 %v5511_v54  ;;  %v3976_v8 = vpop.f32.mrf.mxu1 }
 0xb7d   :  { %v3687_v32 = vpop.f32.mrf.mxu2  ;;  %v3796_v41 = vpop.f32.mrf.mxu3 }
 0xb7e   :  { %v5558_v58 = vadd.f32 %v3792_v62, %v3687_v32  ;;  %v3856_v62 = vpop.f32.mrf.mxu0 }
 0xb82   :  { %4110 = vmatmul.f32.gmra.mxu2 %v5511_v54  ;;  %v3982_v31 = vpop.f32.mrf.mxu1 }
 0xb85   :  { %v3695_v12 = vpop.f32.mrf.mxu2  ;;  %v4136_v0 = vpop.f32.mrf.mxu3 }
 0xb86   :  { %v5563_v51 = vadd.f32 %v3796_v41, %v3695_v12  ;;  %v3861_v18 = vpop.f32.mrf.mxu0 }
 0xb8a   :  { %v3988_v50 = vpop.f32.mrf.mxu1 }
 0xb8d   :  { %v4051_v52 = vpop.f32.mrf.mxu2  ;;  %v4140_v63 = vpop.f32.mrf.mxu3 }
 0xb8e   :  { %v4052_v14 = vadd.f32 %v4051_v52, %v3929_v56  ;;  %v3857_v56 = vadd.f32 %v3856_v62, %v3761_v55  ;;  %v3866_v11 = vpop.f32.mrf.mxu0 }
 0xb8f   :  { %v3867_v24 = vadd.f32 %v3866_v11, %v3769_v7 }
 0xb90   :  { %v4137_v53 = vadd.f32 %v4136_v0, %v4052_v14  ;;  %v3959_v0 = vadd.f32 %v3958_v46, %v3852_v20 }
 0xb91   :  { %v3977_v26 = vadd.f32 %v3976_v8, %v3867_v24 }
 0xb92   :  { %4199 = vst.msk [vmem:[#allocation8] sm:$0xff] %vm89_vm0, %v4137_v53  ;;  %v3862_v53 = vadd.f32 %v3861_v18, %v3765_v17 }
 0xb95   :  { %v4055_v44 = vpop.f32.mrf.mxu2  ;;  %v4144_v54 = vpop.f32.mrf.mxu3 }
 0xb96   :  { %v4056_v22 = vadd.f32 %v4055_v44, %v3935_v13  ;;  %v3871_v2 = vpop.f32.mrf.mxu0  ;;  %v3971_v13 = vadd.f32 %v3970_v57, %v3862_v53 }
 0xb98   :  { %v4141_v45 = vadd.f32 %v4140_v63, %v4056_v22  ;;  %v3965_v63 = vadd.f32 %v3964_v9, %v3857_v56 }
 0xb9a   :  { %4200 = vst.msk [vmem:[#allocation8 + $0x8] sm:$0xff] %vm89_vm0, %v4141_v45 }
 0xb9d   :  { %v4059_v35 = vpop.f32.mrf.mxu2  ;;  %v4148_v1 = vpop.f32.mrf.mxu3 }
 0xb9e   :  { %v4060_v21 = vadd.f32 %v4059_v35, %v3941_v15  ;;  %v3876_v35 = vpop.f32.mrf.mxu0 }
 0xb9f   :  { %v3877_v46 = vadd.f32 %v3876_v35, %v5518_v27 }
 0xba0   :  { %v4145_v43 = vadd.f32 %v4144_v54, %v4060_v21 }
 0xba2   :  { %4201 = vst.msk [vmem:[#allocation8 + $0x10] sm:$0xff] %vm89_vm0, %v4145_v43 }
 0xba5   :  { %v4063_v23 = vpop.f32.mrf.mxu2  ;;  %v4152_v42 = vpop.f32.mrf.mxu3 }
 0xba6   :  { %v4064_v25 = vadd.f32 %v4063_v23, %v3947_v34  ;;  %v3881_v34 = vpop.f32.mrf.mxu0  ;;  %v3989_v23 = vadd.f32 %v3988_v50, %v3877_v46 }
 0xba8   :  { %v4149_v59 = vadd.f32 %v4148_v1, %v4064_v25  ;;  %v3872_v1 = vadd.f32 %v3871_v2, %v5515_v10  ;;  %v3882_v10 = vadd.f32 %v3881_v34, %v5522_v49 }
 0xbaa   :  { %4202 = vst.msk [vmem:[#allocation8 + $0x18] sm:$0xff] %vm89_vm0, %v4149_v59  ;;  %v3983_v4 = vadd.f32 %v3982_v31, %v3872_v1 }
 0xbad   :  { %v4067_v32 = vpop.f32.mrf.mxu2  ;;  %v4156_v41 = vpop.f32.mrf.mxu3 }
 0xbae   :  { %v4068_v38 = vadd.f32 %v4067_v32, %v3953_v19  ;;  %v3886_v9 = vpop.f32.mrf.mxu0 }
 0xbaf   :  { %v3887_v27 = vadd.f32 %v3886_v9, %v5526_v40 }
 0xbb0   :  { %v4153_v12 = vadd.f32 %v4152_v42, %v4068_v38  ;;  %v3994_v42 = vpop.f32.mrf.mxu1 }
 0xbb1   :  { %v3995_v5 = vadd.f32 %v3994_v42, %v3882_v10 }
 0xbb2   :  { %4203 = vst.msk [vmem:[#allocation8 + $0x20] sm:$0xff] %vm89_vm0, %v4153_v12  ;;  %v3789_v12 = vadd.f32 %v5550_v61, %v5554_v48 }
 0xbb5   :  { %v4071_v3 = vpop.f32.mrf.mxu2  ;;  %v4160_v28 = vpop.f32.mrf.mxu3 }
 0xbb6   :  { %v4072_v37 = vadd.f32 %v4071_v3, %v3959_v0  ;;  %v3891_v55 = vpop.f32.mrf.mxu0 }
 0xbb7   :  { %v3892_v3 = vadd.f32 %v3891_v55, %v3789_v12 }
 0xbb8   :  { %v4157_v52 = vadd.f32 %v4156_v41, %v4072_v37  ;;  %v4000_v41 = vpop.f32.mrf.mxu1 }
 0xbb9   :  { %v4001_v18 = vadd.f32 %v4000_v41, %v3887_v27 }
 0xbba   :  { %4204 = vst.msk [vmem:[#allocation8 + $0x28] sm:$0xff] %vm89_vm0, %v4157_v52 }
 0xbbd   :  { %v4075_v29 = vpop.f32.mrf.mxu2  ;;  %v4164_v14 = vpop.f32.mrf.mxu3 }
 0xbbe   :  { %v4076_v16 = vadd.f32 %v4075_v29, %v3965_v63  ;;  %v3896_v52 = vpop.f32.mrf.mxu0 }
 0xbbf   :  { %v3897_v17 = vadd.f32 %v3896_v52, %v5558_v58 }
 0xbc0   :  { %v4161_v6 = vadd.f32 %v4160_v28, %v4076_v16  ;;  %v4006_v37 = vpop.f32.mrf.mxu1 }
 0xbc1   :  { %v4007_v56 = vadd.f32 %v4006_v37, %v3892_v3 }
 0xbc2   :  { %4205 = vst.msk [vmem:[#allocation8 + $0x30] sm:$0xff] %vm89_vm0, %v4161_v6 }
 0xbc5   :  { %v4079_v44 = vpop.f32.mrf.mxu2  ;;  %v4168_v54 = vpop.f32.mrf.mxu3 }
 0xbc6   :  { %v4080_v22 = vadd.f32 %v4079_v44, %v3971_v13  ;;  %v3901_v53 = vpop.f32.mrf.mxu0 }
 0xbc7   :  { %v3902_v6 = vadd.f32 %v3901_v53, %v5563_v51 }
 0xbc8   :  { %v4165_v47 = vadd.f32 %v4164_v14, %v4080_v22  ;;  %v4012_v29 = vpop.f32.mrf.mxu1 }
 0xbc9   :  { %v4013_v61 = vadd.f32 %v4012_v29, %v3897_v17 }
 0xbca   :  { %4206 = vst.msk [vmem:[#allocation8 + $0x38] sm:$0xff] %vm89_vm0, %v4165_v47 }
 0xbcd   :  { %v4083_v45 = vpop.f32.mrf.mxu2  ;;  %v4172_v33 = vpop.f32.mrf.mxu3 }
 0xbce   :  { %v4084_v15 = vadd.f32 %v4083_v45, %v3977_v26 }
 0xbd0   :  { %v4169_v30 = vadd.f32 %v4168_v54, %v4084_v15  ;;  %v4018_v7 = vpop.f32.mrf.mxu1 }
 0xbd1   :  { %v4019_v2 = vadd.f32 %v4018_v7, %v3902_v6 }
 0xbd2   :  { %4207 = vst.msk [vmem:[#allocation8 + $0x40] sm:$0xff] %vm89_vm0, %v4169_v30 }
 0xbd5   :  { %v4087_v21 = vpop.f32.mrf.mxu2  ;;  %v4176_v36 = vpop.f32.mrf.mxu3 }
 0xbd6   :  { %v4088_v43 = vadd.f32 %v4087_v21, %v3983_v4 }
 0xbd8   :  { %v4173_v39 = vadd.f32 %v4172_v33, %v4088_v43 }
 0xbda   :  { %4208 = vst.msk [vmem:[#allocation8 + $0x48] sm:$0xff] %vm89_vm0, %v4173_v39 }
 0xbdd   :  { %v4091_v25 = vpop.f32.mrf.mxu2  ;;  %v4180_v62 = vpop.f32.mrf.mxu3 }
 0xbde   :  { %v4092_v60 = vadd.f32 %v4091_v25, %v3989_v23 }
 0xbe0   :  { %v4177_v59 = vadd.f32 %v4176_v36, %v4092_v60 }
 0xbe2   :  { %4209 = vst.msk [vmem:[#allocation8 + $0x50] sm:$0xff] %vm89_vm0, %v4177_v59 }
 0xbe5   :  { %v4095_v19 = vpop.f32.mrf.mxu2  ;;  %v4184_v20 = vpop.f32.mrf.mxu3 }
 0xbe6   :  { %v4096_v32 = vadd.f32 %v4095_v19, %v3995_v5 }
 0xbe8   :  { %v4181_v38 = vadd.f32 %v4180_v62, %v4096_v32 }
 0xbea   :  { %4210 = vst.msk [vmem:[#allocation8 + $0x58] sm:$0xff] %vm89_vm0, %v4181_v38 }
 0xbed   :  { %v4099_v49 = vpop.f32.mrf.mxu2  ;;  %v4188_v57 = vpop.f32.mrf.mxu3 }
 0xbee   :  { %v4100_v0 = vadd.f32 %v4099_v49, %v4001_v18 }
 0xbf0   :  { %v4185_v28 = vadd.f32 %v4184_v20, %v4100_v0 }
 0xbf2   :  { %4211 = vst.msk [vmem:[#allocation8 + $0x60] sm:$0xff] %vm89_vm0, %v4185_v28 }
 0xbf5   :  { %v4103_v40 = vpop.f32.mrf.mxu2  ;;  %v4192_v48 = vpop.f32.mrf.mxu3 }
 0xbf6   :  { %v4104_v11 = vadd.f32 %v4103_v40, %v4007_v56 }
 0xbf8   :  { %v4189_v63 = vadd.f32 %v4188_v57, %v4104_v11 }
 0xbfa   :  { %4212 = vst.msk [vmem:[#allocation8 + $0x68] sm:$0xff] %vm89_vm0, %v4189_v63 }
 0xbfd   :  { %v4107_v14 = vpop.f32.mrf.mxu2  ;;  %v4196_v44 = vpop.f32.mrf.mxu3 }
 0xbfe   :  { %v4108_v16 = vadd.f32 %v4107_v14, %v4013_v61 }
 0xc00   :  { %v4193_v8 = vadd.f32 %v4192_v48, %v4108_v16 }
 0xc02   :  { %4213 = vst.msk [vmem:[#allocation8 + $0x70] sm:$0xff] %vm89_vm0, %v4193_v8 }
 0xc05   :  { %v4111_v13 = vpop.f32.mrf.mxu2 }
 0xc06   :  { %v4112_v58 = vadd.f32 %v4111_v13, %v4019_v2 }
 0xc08   :  { %v4197_v54 = vadd.f32 %v4196_v44, %v4112_v58 }
 0xc0a   :  { %4214 = vst.msk [vmem:[#allocation8 + $0x78] sm:$0xff] %vm89_vm0, %v4197_v54 }
 0xc0b   :  { %4227 = dma.vmem_to_hbm [thread:$0]  %s4220_s9, 2048, %s4222_s0, [#allocation4], %s4347_s29, %s4347_s29, %s4348_s30  }
 0xc0c   :  { %4344 = dma.done.wait [#allocation4], 2048  }
 0xc0d   :  { %4345 = vsyncadd [#allocation4], 4294965248 }
 0xc0e   :  { %4232 = vsyncpa [#allocation3], 1 }
 0xc0f   :  { %4233 = vsyncpa [#allocation6], 1 }
 0xc10   :  { %4234 = vsyncpa [#allocation4], 1 }

// kernel: tpu_custom_call.1
= control target key start
LH: loop header
LB: loop body
LE: loop exit
PB: predicated region body
PF: predicated region fallthrough
CT: control target
= control target key end

     0   :  { %11 = vsyncpa [#allocation3], 0  ;;  %s5611_s0 = inlined_call_operand.hbm [shape: f32[8,16,16], index: 0, kind: input, shape index: {}]   ;;  %s5612_s1 = inlined_call_operand.vmem [shape: f32[16,32], index: 1, kind: input, shape index: {}]   ;;  %s5613_s2 = inlined_call_operand.hbm [shape: f32[16,32], index: 2, kind: input, shape index: {}]   ;;  %s5614_s3 = inlined_call_operand.vmem [shape: f32[32,32], index: 3, kind: input, shape index: {}]   ;;  %s5615_s4 = inlined_call_operand.hbm [shape: f32[32,32], index: 4, kind: input, shape index: {}]   ;;  %s5616_s5 = inlined_call_operand.vmem [shape: f32[32,16], index: 5, kind: input, shape index: {}]   ;;  %s5617_s6 = inlined_call_operand.hbm [shape: f32[8,16,16], index: 6, kind: output, shape index: {}]  }
   0x1   :  { %12 = vsyncpa [#allocation6], 0 }
   0x2   :  { %13 = vsyncpa [#allocation4], 0  ;;  %s33_s23 = sshll.u32 %s5613_s2, 4  ;;  %s4346_s24 = smov [#allocation5]   ;;  %s34_s23 = int_to_ptr.hbm [resolvable:$true] %s33_s23 }
   0x3   :  { %s35_s25 = sshll.u32 %s4346_s24, 4  ;;  %s18_s28 = sshll.u32 %s5611_s0, 4  ;;  %s36_s25 = int_to_ptr.vmem [resolvable:$true] %s35_s25  ;;  %s19_s28 = int_to_ptr.hbm [resolvable:$true] %s18_s28 }
   0x4   :  { %s4347_s29 = smov 128   ;;  %s4348_s30 = smov 8  }
   0x5   :  { %41 = dma.hbm_to_vmem [thread:$0]  %s34_s23, 256, %s36_s25, [#allocation6], %s4347_s29, %s4347_s29, %s4348_s30  }
   0x6   :  { %s4349_s7 = smov [#allocation2]   ;;  %s48_s2 = sshll.u32 %s5615_s4, 4  ;;  %s49_s2 = int_to_ptr.hbm [resolvable:$true] %s48_s2 }
   0x7   :  { %s20_s8 = sshll.u32 %s4349_s7, 4  ;;  %s4350_s0 = smov [#allocation7]   ;;  %s21_s8 = int_to_ptr.vmem [resolvable:$true] %s20_s8 }
   0x8   :  { %26 = dma.hbm_to_vmem [thread:$0]  %s19_s28, 2048, %s21_s8, [#allocation3], %s4347_s29, %s4347_s29, %s4348_s30  }
   0x9   :  { %s50_s11 = sshll.u32 %s4350_s0, 4  ;;  %s51_s11 = int_to_ptr.vmem [resolvable:$true] %s50_s11 }
   0xa   :  { %56 = dma.hbm_to_vmem [thread:$0]  %s49_s2, 512, %s51_s11, [#allocation6], %s4347_s29, %s4347_s29, %s4348_s30  }
   0xb   :  { %4340 = dma.done.wait [#allocation3], 2048  }
   0xc   :  { %4341 = vsyncadd [#allocation3], 4294965248 }
   0xd   :  { %4342 = dma.done.wait [#allocation6], 768  }
   0xe   :  { %4343 = vsyncadd [#allocation6], 4294966528  ;;  %vm89_vm0 = vcmask 130048   ;;  %v88_v0 = vld [vmem:[#allocation5 + $0x8] sm:$0xff]  ;;  %v87_v1 = vld [vmem:[#allocation5] sm:$0xff]  ;;  %s4351_s4 = smov 112  }
   0xf   :  { %v71_v2 = vld [vmem:[#allocation2] sm:$0xff]  ;;  %v152_v3 = vand.u32 4294901760, %v88_v0  ;;  %v154_v4 = vand.u32 4294901760, %v87_v1  ;;  %v72_v6 = vld [vmem:[#allocation2 + $0x8] sm:$0xff]  ;;  %v73_v9 = vld [vmem:[#allocation2 + $0x10] sm:$0xff]  ;;  %s4352_s12 = smov 16  }
  0x10   :  { %v91_v5 = vsel %vm89_vm0, %v71_v2, 0  ;;  %v94_v8 = vsel %vm89_vm0, %v72_v6, 0  ;;  %v97_v17 = vsel %vm89_vm0, %v73_v9, 0  ;;  %v74_v27 = vld [vmem:[#allocation2 + $0x18] sm:$0xff]  ;;  %v75_v34 = vld [vmem:[#allocation2 + $0x20] sm:$0xff]  ;;  %v76_v41 = vld [vmem:[#allocation2 + $0x28] sm:$0xff] }
  0x11   :  { %v4408_v7 = vand.u32 4294901760, %v91_v5  ;;  %v300_v10 = vsub.f32 %v88_v0, %v152_v3  ;;  %153 = vmatpush.msra.mxu0 %v152_v3  ;;  %v306_v11 = vsub.f32 %v87_v1, %v154_v4  ;;  %492 = vmatpush.msra.mxu3 %v152_v3  ;;  %v4411_v12 = vand.u32 4294901760, %v94_v8  ;;  %v77_v48 = vld [vmem:[#allocation2 + $0x30] sm:$0xff]  ;;  %v78_v55 = vld [vmem:[#allocation2 + $0x38] sm:$0xff]  ;;  %v79_v62 = vld [vmem:[#allocation2 + $0x40] sm:$0xff]  ;;  %s4221_s0 = sshll.u32 %s5617_s6, 4  ;;  %s4222_s0 = int_to_ptr.hbm [resolvable:$true] %s4221_s0 }
  0x12   :  { %v4416_v23 = vand.u32 4294901760, %v97_v17  ;;  %v100_v30 = vsel %vm89_vm0, %v74_v27, 0  ;;  %v103_v37 = vsel %vm89_vm0, %v75_v34, 0  ;;  %v106_v44 = vsel %vm89_vm0, %v76_v41, 0 }
  0x13   :  { %v157_v13 = vsub.f32 %v91_v5, %v4408_v7  ;;  %392 = vmatpush.msra.mxu2 %v300_v10  ;;  %155 = vmatpush.msra.mxu0 %v154_v4  ;;  %v301_v14 = vand.u32 4294901760, %v300_v10  ;;  %v307_v15 = vand.u32 4294901760, %v306_v11  ;;  %v165_v16 = vsub.f32 %v94_v8, %v4411_v12  ;;  %v80_v5 = vld [vmem:[#allocation2 + $0x48] sm:$0xff] }
  0x14   :  { %494 = vmatpush.msra.mxu3 %v154_v4  ;;  %v173_v29 = vsub.f32 %v97_v17, %v4416_v23  ;;  %v4421_v33 = vand.u32 4294901760, %v100_v30  ;;  %v4426_v40 = vand.u32 4294901760, %v103_v37  ;;  %v4431_v47 = vand.u32 4294901760, %v106_v44 }
  0x15   :  { %v158_v18 = vand.u32 4294901760, %v157_v13  ;;  %395 = vmatpush.msra.mxu2 %v306_v11  ;;  %v302_v19 = vsub.f32 %v300_v10, %v301_v14  ;;  %609 = vmatpush.msrb.mxu0 %v301_v14  ;;  %v308_v20 = vsub.f32 %v306_v11, %v307_v15  ;;  %v166_v22 = vand.u32 4294901760, %v165_v16  ;;  %v81_v14 = vld [vmem:[#allocation2 + $0x50] sm:$0xff] }
  0x16   :  { %398 = vmatmul.f32.vlgmr.msra.gmra.mxu2 %v157_v13  ;;  %v174_v32 = vand.u32 4294901760, %v173_v29  ;;  %v181_v36 = vsub.f32 %v100_v30, %v4421_v33  ;;  %v189_v43 = vsub.f32 %v103_v37, %v4426_v40  ;;  %v197_v50 = vsub.f32 %v106_v44, %v4431_v47  ;;  %v84_v37 = vld [vmem:[#allocation2 + $0x68] sm:$0xff] }
  0x17   :  { %v159_v21 = vsub.f32 %v157_v13, %v158_v18  ;;  %498 = vmatmul.f32.vlgmr.msra.gmra.mxu3 %v158_v18  ;;  %v303_v24 = vand.u32 4294901760, %v302_v19  ;;  %v309_v25 = vand.u32 4294901760, %v308_v20  ;;  %613 = vmatpush.msrb.mxu0 %v307_v15  ;;  %v167_v28 = vsub.f32 %v165_v16, %v166_v22 }
  0x18   :  { %v175_v35 = vsub.f32 %v173_v29, %v174_v32  ;;  %v182_v39 = vand.u32 4294901760, %v181_v36  ;;  %v190_v46 = vand.u32 4294901760, %v189_v43  ;;  %v109_v51 = vsel %vm89_vm0, %v77_v48, 0 }
  0x19   :  { %v160_v26 = vand.u32 4294901760, %v159_v21  ;;  %304 = vmatpush.msra.mxu1 %v303_v24  ;;  %v168_v31 = vand.u32 4294901760, %v167_v28  ;;  %v198_v53 = vand.u32 4294901760, %v197_v50  ;;  %v4436_v54 = vand.u32 4294901760, %v109_v51  ;;  %v82_v21 = vld [vmem:[#allocation2 + $0x58] sm:$0xff] }
  0x1a   :  { %v176_v38 = vand.u32 4294901760, %v175_v35  ;;  %v183_v42 = vsub.f32 %v181_v36, %v182_v39  ;;  %v191_v49 = vsub.f32 %v189_v43, %v190_v46  ;;  %v112_v58 = vsel %vm89_vm0, %v78_v55, 0 }
  0x1b   :  { %161 = vmatmul.f32.vlgmr.msra.gmra.mxu0 %v160_v26  ;;  %310 = vmatpush.msra.mxu1 %v309_v25  ;;  %v199_v56 = vsub.f32 %v197_v50, %v198_v53  ;;  %v205_v57 = vsub.f32 %v109_v51, %v4436_v54  ;;  %v4441_v61 = vand.u32 4294901760, %v112_v58  ;;  %v115_v1 = vsel %vm89_vm0, %v79_v62, 0 }
  0x1c   :  { %312 = vmatmul.f32.vlgmr.msra.gmra.mxu1 %v4408_v7  ;;  %v184_v45 = vand.u32 4294901760, %v183_v42  ;;  %v192_v52 = vand.u32 4294901760, %v191_v49  ;;  %v118_v9 = vsel %vm89_vm0, %v80_v5, 0  ;;  %v121_v17 = vsel %vm89_vm0, %v81_v14, 0 }
  0x1d   :  { %694 = vmatpush.msrb.mxu1 %v152_v3  ;;  %v200_v59 = vand.u32 4294901760, %v199_v56  ;;  %v206_v60 = vand.u32 4294901760, %v205_v57  ;;  %v213_v0 = vsub.f32 %v112_v58, %v4441_v61  ;;  %v4451_v13 = vand.u32 4294901760, %v118_v9 }
  0x1e   :  { %403 = vmatmul.f32.gmra.mxu2 %v165_v16  ;;  %v4456_v20 = vand.u32 4294901760, %v121_v17  ;;  %v124_v25 = vsel %vm89_vm0, %v82_v21, 0  ;;  %v130_v41 = vsel %vm89_vm0, %v84_v37, 0  ;;  %vm1422_vm1 = vcmask 261120  }
  0x1f   :  { %504 = vmatmul.f32.gmra.mxu3 %v166_v22  ;;  %696 = vmatpush.msrb.mxu1 %v154_v4  ;;  %v207_v63 = vsub.f32 %v205_v57, %v206_v60  ;;  %v214_v3 = vand.u32 4294901760, %v213_v0  ;;  %v4446_v4 = vand.u32 4294901760, %v115_v1  ;;  %v229_v16 = vsub.f32 %v118_v9, %v4451_v13 }
  0x20   :  { %v237_v24 = vsub.f32 %v121_v17, %v4456_v20  ;;  %v4461_v28 = vand.u32 4294901760, %v124_v25  ;;  %v4471_v44 = vand.u32 4294901760, %v130_v41 }
  0x21   :  { %v208_v2 = vand.u32 4294901760, %v207_v63  ;;  %v215_v6 = vsub.f32 %v213_v0, %v214_v3  ;;  %v221_v8 = vsub.f32 %v115_v1, %v4446_v4  ;;  %v230_v19 = vand.u32 4294901760, %v229_v16 }
  0x22   :  { %v238_v27 = vand.u32 4294901760, %v237_v24  ;;  %v261_v48 = vsub.f32 %v130_v41, %v4471_v44 }
  0x23   :  { %169 = vmatmul.f32.gmra.mxu0 %v168_v31  ;;  %v216_v10 = vand.u32 4294901760, %v215_v6  ;;  %v222_v11 = vand.u32 4294901760, %v221_v8  ;;  %v231_v22 = vsub.f32 %v229_v16, %v230_v19  ;;  %v245_v31 = vsub.f32 %v124_v25, %v4461_v28 }
  0x24   :  { %316 = vmatmul.f32.gmra.mxu1 %v4411_v12  ;;  %v239_v30 = vsub.f32 %v237_v24, %v238_v27  ;;  %v262_v51 = vand.u32 4294901760, %v261_v48 }
  0x25   :  { %v223_v15 = vsub.f32 %v221_v8, %v222_v11  ;;  %v232_v26 = vand.u32 4294901760, %v231_v22  ;;  %v246_v35 = vand.u32 4294901760, %v245_v31 }
  0x26   :  { %408 = vmatmul.f32.gmra.mxu2 %v173_v29  ;;  %v83_v29 = vld [vmem:[#allocation2 + $0x60] sm:$0xff]  ;;  %v240_v34 = vand.u32 4294901760, %v239_v30  ;;  %v263_v55 = vsub.f32 %v261_v48, %v262_v51 }
  0x27   :  { %510 = vmatmul.f32.gmra.mxu3 %v174_v32  ;;  %v224_v18 = vand.u32 4294901760, %v223_v15  ;;  %v127_v32 = vsel %vm89_vm0, %v83_v29, 0 }
  0x28   :  { %v264_v58 = vand.u32 4294901760, %v263_v55 }
  0x2b   :  { %177 = vmatmul.f32.gmra.mxu0 %v176_v38  ;;  %v247_v38 = vsub.f32 %v245_v31, %v246_v35 }
  0x2c   :  { %320 = vmatmul.f32.gmra.mxu1 %v4416_v23 }
  0x2d   :  { %v248_v42 = vand.u32 4294901760, %v247_v38 }
  0x2e   :  { %413 = vmatmul.f32.gmra.mxu2 %v181_v36  ;;  %v4466_v36 = vand.u32 4294901760, %v127_v32 }
  0x2f   :  { %516 = vmatmul.f32.gmra.mxu3 %v182_v39 }
  0x30   :  { %v253_v39 = vsub.f32 %v127_v32, %v4466_v36 }
  0x33   :  { %185 = vmatmul.f32.gmra.mxu0 %v184_v45  ;;  %v85_v45 = vld [vmem:[#allocation2 + $0x70] sm:$0xff] }
  0x34   :  { %324 = vmatmul.f32.gmra.mxu1 %v4421_v33  ;;  %v133_v49 = vsel %vm89_vm0, %v85_v45, 0 }
  0x36   :  { %418 = vmatmul.f32.gmra.mxu2 %v189_v43  ;;  %v254_v43 = vand.u32 4294901760, %v253_v39 }
  0x37   :  { %522 = vmatmul.f32.gmra.mxu3 %v190_v46 }
  0x38   :  { %v255_v46 = vsub.f32 %v253_v39, %v254_v43 }
  0x3b   :  { %193 = vmatmul.f32.gmra.mxu0 %v192_v52  ;;  %v4476_v52 = vand.u32 4294901760, %v133_v49 }
  0x3c   :  { %328 = vmatmul.f32.gmra.mxu1 %v4426_v40 }
  0x3d   :  { %v269_v56 = vsub.f32 %v133_v49, %v4476_v52 }
  0x3e   :  { %423 = vmatmul.f32.gmra.mxu2 %v197_v50  ;;  %v256_v50 = vand.u32 4294901760, %v255_v46 }
  0x3f   :  { %528 = vmatmul.f32.gmra.mxu3 %v198_v53  ;;  %v86_v53 = vld [vmem:[#allocation2 + $0x78] sm:$0xff] }
  0x43   :  { %201 = vmatmul.f32.gmra.mxu0 %v200_v59  ;;  %v270_v59 = vand.u32 4294901760, %v269_v56 }
  0x44   :  { %332 = vmatmul.f32.gmra.mxu1 %v4431_v47 }
  0x45   :  { %v271_v62 = vsub.f32 %v269_v56, %v270_v59 }
  0x46   :  { %428 = vmatmul.f32.gmra.mxu2 %v205_v57  ;;  %v136_v57 = vsel %vm89_vm0, %v86_v53, 0 }
  0x47   :  { %534 = vmatmul.f32.gmra.mxu3 %v206_v60  ;;  %v4481_v60 = vand.u32 4294901760, %v136_v57 }
  0x49   :  { %v277_v63 = vsub.f32 %v136_v57, %v4481_v60 }
  0x4b   :  { %209 = vmatmul.f32.gmra.mxu0 %v208_v2  ;;  %v278_v1 = vand.u32 4294901760, %v277_v63 }
  0x4c   :  { %336 = vmatmul.f32.gmra.mxu1 %v4436_v54 }
  0x4d   :  { %v279_v2 = vsub.f32 %v277_v63, %v278_v1 }
  0x4e   :  { %433 = vmatmul.f32.gmra.mxu2 %v213_v0  ;;  %v272_v0 = vand.u32 4294901760, %v271_v62 }
  0x4f   :  { %540 = vmatmul.f32.gmra.mxu3 %v214_v3  ;;  %v280_v3 = vand.u32 4294901760, %v279_v2 }
  0x53   :  { %217 = vmatmul.f32.gmra.mxu0 %v216_v10 }
  0x54   :  { %340 = vmatmul.f32.gmra.mxu1 %v4441_v61 }
  0x56   :  { %438 = vmatmul.f32.gmra.mxu2 %v221_v8 }
  0x57   :  { %546 = vmatmul.f32.gmra.mxu3 %v222_v11 }
  0x5b   :  { %225 = vmatmul.f32.gmra.mxu0 %v224_v18 }
  0x5c   :  { %344 = vmatmul.f32.gmra.mxu1 %v4446_v4 }
  0x5e   :  { %443 = vmatmul.f32.gmra.mxu2 %v229_v16 }
  0x5f   :  { %552 = vmatmul.f32.gmra.mxu3 %v230_v19 }
  0x63   :  { %233 = vmatmul.f32.gmra.mxu0 %v232_v26 }
  0x64   :  { %348 = vmatmul.f32.gmra.mxu1 %v4451_v13 }
  0x66   :  { %448 = vmatmul.f32.gmra.mxu2 %v237_v24 }
  0x67   :  { %558 = vmatmul.f32.gmra.mxu3 %v238_v27 }
  0x6b   :  { %241 = vmatmul.f32.gmra.mxu0 %v240_v34 }
  0x6c   :  { %352 = vmatmul.f32.gmra.mxu1 %v4456_v20 }
  0x6e   :  { %453 = vmatmul.f32.gmra.mxu2 %v245_v31 }
  0x6f   :  { %564 = vmatmul.f32.gmra.mxu3 %v246_v35 }
  0x73   :  { %249 = vmatmul.f32.gmra.mxu0 %v248_v42 }
  0x74   :  { %356 = vmatmul.f32.gmra.mxu1 %v4461_v28 }
  0x76   :  { %458 = vmatmul.f32.gmra.mxu2 %v253_v39 }
  0x77   :  { %570 = vmatmul.f32.gmra.mxu3 %v254_v43 }
  0x7b   :  { %257 = vmatmul.f32.gmra.mxu0 %v256_v50 }
  0x7c   :  { %360 = vmatmul.f32.gmra.mxu1 %v4466_v36 }
  0x7e   :  { %463 = vmatmul.f32.gmra.mxu2 %v261_v48 }
  0x7f   :  { %576 = vmatmul.f32.gmra.mxu3 %v262_v51 }
  0x83   :  { %265 = vmatmul.f32.gmra.mxu0 %v264_v58 }
  0x84   :  { %364 = vmatmul.f32.gmra.mxu1 %v4471_v44 }
  0x86   :  { %468 = vmatmul.f32.gmra.mxu2 %v269_v56 }
  0x87   :  { %582 = vmatmul.f32.gmra.mxu3 %v270_v59 }
  0x8b   :  { %273 = vmatmul.f32.gmra.mxu0 %v272_v0 }
  0x8c   :  { %368 = vmatmul.f32.gmra.mxu1 %v4476_v52 }
  0x8e   :  { %473 = vmatmul.f32.gmra.mxu2 %v277_v63 }
  0x8f   :  { %588 = vmatmul.f32.gmra.mxu3 %v278_v1 }
  0x93   :  { %281 = vmatmul.f32.gmra.mxu0 %v280_v3 }
  0x94   :  { %372 = vmatmul.f32.gmra.mxu1 %v4481_v60 }
  0x98   :  { %v4487_v5 = vpop.f32.mrf.mxu0 }
  0x99   :  { %v4489_v6 = vpop.f32.mrf.mxu1 }
  0x9a   :  { %v499_v27 = vpop.f32.mrf.mxu3  ;;  %v314_v34 = vadd.f32 %v4489_v6, %v4487_v5 }
  0x9b   :  { %615 = vmatmul.f32.vlgmr.msrb.gmra.mxu0 %v4408_v7 }
  0x9c   :  { %698 = vmatmul.f32.vlgmr.msrb.gmra.mxu1 %v4408_v7 }
  0xa0   :  { %v4493_v8 = vpop.f32.mrf.mxu0 }
  0xa1   :  { %v4495_v9 = vpop.f32.mrf.mxu1 }
  0xa2   :  { %v505_v31 = vpop.f32.mrf.mxu3  ;;  %v318_v42 = vadd.f32 %v4495_v9, %v4493_v8 }
  0xa3   :  { %619 = vmatmul.f32.gmra.mxu0 %v4411_v12 }
  0xa4   :  { %702 = vmatmul.f32.gmra.mxu1 %v4411_v12 }
  0xa8   :  { %v4499_v10 = vpop.f32.mrf.mxu0 }
  0xa9   :  { %v4501_v11 = vpop.f32.mrf.mxu1 }
  0xaa   :  { %v511_v39 = vpop.f32.mrf.mxu3 }
  0xab   :  { %623 = vmatmul.f32.gmra.mxu0 %v4416_v23 }
  0xac   :  { %706 = vmatmul.f32.gmra.mxu1 %v4416_v23 }
  0xb0   :  { %v4505_v14 = vpop.f32.mrf.mxu0 }
  0xb1   :  { %v4507_v15 = vpop.f32.mrf.mxu1 }
  0xb2   :  { %v517_v50 = vpop.f32.mrf.mxu3  ;;  %v326_v62 = vadd.f32 %v4507_v15, %v4505_v14 }
  0xb3   :  { %627 = vmatmul.f32.gmra.mxu0 %v4421_v33 }
  0xb4   :  { %710 = vmatmul.f32.gmra.mxu1 %v4421_v33 }
  0xb8   :  { %v4511_v7 = vpop.f32.mrf.mxu0 }
  0xb9   :  { %v4513_v16 = vpop.f32.mrf.mxu1 }
  0xba   :  { %v523_v63 = vpop.f32.mrf.mxu3 }
  0xbb   :  { %631 = vmatmul.f32.gmra.mxu0 %v4426_v40 }
  0xbc   :  { %714 = vmatmul.f32.gmra.mxu1 %v4426_v40 }
  0xc0   :  { %v4517_v12 = vpop.f32.mrf.mxu0 }
  0xc1   :  { %v4519_v17 = vpop.f32.mrf.mxu1 }
  0xc3   :  { %635 = vmatmul.f32.gmra.mxu0 %v4431_v47 }
  0xc4   :  { %718 = vmatmul.f32.gmra.mxu1 %v4431_v47 }
  0xc8   :  { %v4523_v23 = vpop.f32.mrf.mxu0 }
  0xc9   :  { %v4525_v18 = vpop.f32.mrf.mxu1 }
  0xcb   :  { %639 = vmatmul.f32.gmra.mxu0 %v4436_v54 }
  0xcc   :  { %722 = vmatmul.f32.gmra.mxu1 %v4436_v54 }
  0xd0   :  { %v4529_v33 = vpop.f32.mrf.mxu0 }
  0xd1   :  { %v4531_v19 = vpop.f32.mrf.mxu1 }
  0xd3   :  { %643 = vmatmul.f32.gmra.mxu0 %v4441_v61 }
  0xd4   :  { %726 = vmatmul.f32.gmra.mxu1 %v4441_v61 }
  0xd8   :  { %v4535_v40 = vpop.f32.mrf.mxu0 }
  0xd9   :  { %v4537_v21 = vpop.f32.mrf.mxu1 }
  0xdb   :  { %647 = vmatmul.f32.gmra.mxu0 %v4446_v4 }
  0xdc   :  { %730 = vmatmul.f32.gmra.mxu1 %v4446_v4 }
  0xe0   :  { %v4541_v47 = vpop.f32.mrf.mxu0 }
  0xe1   :  { %v4543_v22 = vpop.f32.mrf.mxu1 }
  0xe3   :  { %651 = vmatmul.f32.gmra.mxu0 %v4451_v13 }
  0xe4   :  { %734 = vmatmul.f32.gmra.mxu1 %v4451_v13  ;;  %v399_v13 = vpop.f32.mrf.mxu2 }
  0xe5   :  { %v400_v38 = vadd.f32 %v399_v13, %v314_v34  ;;  %v338_v34 = vadd.f32 %v4525_v18, %v4523_v23 }
  0xe7   :  { %v500_v41 = vadd.f32 %v499_v27, %v400_v38 }
  0xe8   :  { %v4547_v54 = vpop.f32.mrf.mxu0 }
  0xe9   :  { %v4549_v24 = vpop.f32.mrf.mxu1 }
  0xeb   :  { %655 = vmatmul.f32.gmra.mxu0 %v4456_v20 }
  0xec   :  { %738 = vmatmul.f32.gmra.mxu1 %v4456_v20  ;;  %v404_v30 = vpop.f32.mrf.mxu2 }
  0xed   :  { %v405_v48 = vadd.f32 %v404_v30, %v318_v42 }
  0xef   :  { %v506_v51 = vadd.f32 %v505_v31, %v405_v48 }
  0xf0   :  { %v4553_v61 = vpop.f32.mrf.mxu0 }
  0xf1   :  { %v4555_v25 = vpop.f32.mrf.mxu1 }
  0xf3   :  { %659 = vmatmul.f32.gmra.mxu0 %v4461_v28 }
  0xf4   :  { %742 = vmatmul.f32.gmra.mxu1 %v4461_v28  ;;  %v409_v35 = vpop.f32.mrf.mxu2 }
  0xf8   :  { %v4559_v4 = vpop.f32.mrf.mxu0 }
  0xf9   :  { %v4561_v26 = vpop.f32.mrf.mxu1 }
  0xfb   :  { %663 = vmatmul.f32.gmra.mxu0 %v4466_v36 }
  0xfc   :  { %746 = vmatmul.f32.gmra.mxu1 %v4466_v36  ;;  %v414_v45 = vpop.f32.mrf.mxu2 }
  0xfd   :  { %v415_v3 = vadd.f32 %v414_v45, %v326_v62 }
  0xff   :  { %v518_v8 = vadd.f32 %v517_v50, %v415_v3  ;;  %v342_v50 = vadd.f32 %v4531_v19, %v4529_v33  ;;  %v354_v33 = vadd.f32 %v4549_v24, %v4547_v54  ;;  %v330_v54 = vadd.f32 %v4513_v16, %v4511_v7 }
 0x100   :  { %v4565_v29 = vpop.f32.mrf.mxu0  ;;  %v358_v16 = vadd.f32 %v4555_v25, %v4553_v61 }
 0x101   :  { %v4567_v20 = vpop.f32.mrf.mxu1 }
 0x103   :  { %667 = vmatmul.f32.gmra.mxu0 %v4471_v44 }
 0x104   :  { %750 = vmatmul.f32.gmra.mxu1 %v4471_v44  ;;  %v4590_v59 = vpop.f32.mrf.mxu2 }
 0x105   :  { %v420_v24 = vadd.f32 %v4590_v59, %v330_v54 }
 0x108   :  { %v4571_v28 = vpop.f32.mrf.mxu0 }
 0x109   :  { %v4573_v32 = vpop.f32.mrf.mxu1 }
 0x10b   :  { %671 = vmatmul.f32.gmra.mxu0 %v4476_v52 }
 0x10c   :  { %754 = vmatmul.f32.gmra.mxu1 %v4476_v52  ;;  %v322_v52 = vadd.f32 %v4501_v11, %v4499_v10  ;;  %v424_v6 = vpop.f32.mrf.mxu2  ;;  %v529_v11 = vpop.f32.mrf.mxu3 }
 0x10e   :  { %v410_v57 = vadd.f32 %v409_v35, %v322_v52 }
 0x110   :  { %v4579_v36 = vpop.f32.mrf.mxu0 }
 0x111   :  { %v4581_v37 = vpop.f32.mrf.mxu1 }
 0x113   :  { %675 = vmatmul.f32.gmra.mxu0 %v4481_v60 }
 0x114   :  { %758 = vmatmul.f32.gmra.mxu1 %v4481_v60  ;;  %v512_v60 = vadd.f32 %v511_v39, %v410_v57  ;;  %v429_v30 = vpop.f32.mrf.mxu2  ;;  %v535_v15 = vpop.f32.mrf.mxu3 }
 0x118   :  { %v616_v43 = vpop.f32.mrf.mxu0 }
 0x119   :  { %v617_v44 = vadd.f32 %v616_v43, %v500_v41  ;;  %v699_v46 = vpop.f32.mrf.mxu1  ;;  %v430_v41 = vadd.f32 %v429_v30, %v338_v34  ;;  %v334_v30 = vadd.f32 %v4519_v17, %v4517_v12 }
 0x11b   :  { %v700_v49 = vadd.f32 %v699_v46, %v617_v44  ;;  %v536_v43 = vadd.f32 %v535_v15, %v430_v41  ;;  %v425_v34 = vadd.f32 %v424_v6, %v334_v30  ;;  %v366_v30 = vadd.f32 %v4567_v20, %v4565_v29 }
 0x11c   :  { %v434_v38 = vpop.f32.mrf.mxu2  ;;  %v541_v42 = vpop.f32.mrf.mxu3 }
 0x11d   :  { %762 = vxpose.xlu2.b32.start [1/2] (short) (narrow) %v700_v49, 16  ;;  %1034 = vrot.lane.b32.xlu0 %v700_v49, %s4351_s4  ;;  %v435_v52 = vadd.f32 %v434_v38, %v342_v50  ;;  %v530_v41 = vadd.f32 %v529_v11, %v425_v34  ;;  %v362_v11 = vadd.f32 %v4561_v26, %v4559_v4 }
 0x120   :  { %v620_v53 = vpop.f32.mrf.mxu0 }
 0x121   :  { %v621_v55 = vadd.f32 %v620_v53, %v506_v51  ;;  %v703_v56 = vpop.f32.mrf.mxu1 }
 0x123   :  { %v704_v58 = vadd.f32 %v703_v56, %v621_v55  ;;  %v542_v55 = vadd.f32 %v541_v42, %v435_v52  ;;  %v346_v52 = vadd.f32 %v4537_v21, %v4535_v40 }
 0x124   :  { %v4599_v49 = vpop.f32.mrf.mxu2  ;;  %v4604_v23 = vpop.f32.mrf.mxu3 }
 0x125   :  { %763 = vxpose.xlu2.b32.end [2/2] (short) (narrow) %v704_v58, 16  ;;  %1036 = vrot.lane.b32.xlu0 %v704_v58, %s4351_s4 }
 0x128   :  { %v624_v0 = vpop.f32.mrf.mxu0 }
 0x129   :  { %v625_v1 = vadd.f32 %v624_v0, %v512_v60  ;;  %v707_v2 = vpop.f32.mrf.mxu1 }
 0x12b   :  { %v708_v5 = vadd.f32 %v707_v2, %v625_v1 }
 0x12c   :  { %v4606_v53 = vpop.f32.mrf.mxu2  ;;  %v4610_v58 = vpop.f32.mrf.mxu3 }
 0x12d   :  { %1038 = vrot.lane.b32.xlu1 %v708_v5, %s4351_s4 }
 0x130   :  { %v628_v9 = vpop.f32.mrf.mxu0 }
 0x131   :  { %v629_v10 = vadd.f32 %v628_v9, %v518_v8  ;;  %v711_v13 = vpop.f32.mrf.mxu1 }
 0x133   :  { %v712_v27 = vadd.f32 %v711_v13, %v629_v10 }
 0x134   :  { %v449_v19 = vpop.f32.mrf.mxu2  ;;  %v559_v3 = vpop.f32.mrf.mxu3 }
 0x135   :  { %1040 = vrot.lane.b32.xlu1 %v712_v27, %s4351_s4  ;;  %v450_v2 = vadd.f32 %v449_v19, %v354_v33  ;;  %v350_v33 = vadd.f32 %v4543_v22, %v4541_v47 }
 0x138   :  { %v632_v31 = vpop.f32.mrf.mxu0 }
 0x139   :  { %v715_v14 = vpop.f32.mrf.mxu1 }
 0x13c   :  { %v454_v7 = vpop.f32.mrf.mxu2  ;;  %v565_v17 = vpop.f32.mrf.mxu3 }
 0x13d   :  { %v455_v59 = vadd.f32 %v454_v7, %v358_v16 }
 0x13f   :  { %v566_v6 = vadd.f32 %v565_v17, %v455_v59 }
 0x140   :  { %v636_v35 = vpop.f32.mrf.mxu0 }
 0x141   :  { %v719_v39 = vpop.f32.mrf.mxu1  ;;  %v637_v42 = vadd.f32 %v636_v35, %v530_v41 }
 0x147   :  { %794 = vxpose.xlu0.b32.start [1/2] (short) (narrow) %v708_v5, 16  ;;  %v560_v5 = vadd.f32 %v559_v3, %v450_v2  ;;  %v445_v2 = vadd.f32 %v4606_v53, %v350_v33 }
 0x148   :  { %v640_v44 = vpop.f32.mrf.mxu0 }
 0x149   :  { %v641_v45 = vadd.f32 %v640_v44, %v536_v43  ;;  %v723_v46 = vpop.f32.mrf.mxu1  ;;  %v720_v43 = vadd.f32 %v719_v39, %v637_v42 }
 0x14b   :  { %v724_v48 = vadd.f32 %v723_v46, %v641_v45  ;;  %v571_v46 = vpop.f32.mrf.mxu3 }
 0x14d   :  { %1046 = vrot.lane.b32.xlu1 %v724_v48, %s4351_s4 }
 0x14f   :  { %795 = vxpose.xlu0.b32.end [2/2] (short) (narrow) %v712_v27, 16  ;;  %v524_v27 = vadd.f32 %v523_v63, %v420_v24 }
 0x150   :  { %v644_v18 = vpop.f32.mrf.mxu0 }
 0x151   :  { %v727_v51 = vpop.f32.mrf.mxu1  ;;  %v645_v57 = vadd.f32 %v644_v18, %v542_v55  ;;  %v633_v15 = vadd.f32 %v632_v31, %v524_v27  ;;  %v459_v31 = vpop.f32.mrf.mxu2  ;;  %v440_v55 = vadd.f32 %v4599_v49, %v346_v52 }
 0x152   :  { %v460_v39 = vadd.f32 %v459_v31, %v362_v11 }
 0x153   :  { %v728_v62 = vadd.f32 %v727_v51, %v645_v57  ;;  %v716_v38 = vadd.f32 %v715_v14, %v633_v15  ;;  %v548_v57 = vadd.f32 %v4604_v23, %v440_v55  ;;  %v577_v15 = vpop.f32.mrf.mxu3 }
 0x154   :  { %v572_v18 = vadd.f32 %v571_v46, %v460_v39 }
 0x157   :  { %858 = vxpose.xlu0.b32.start [1/2] (short) (narrow) %v724_v48, 16 }
 0x158   :  { %v4608_v56 = vpop.f32.mrf.mxu0 }
 0x159   :  { %v4612_v60 = vpop.f32.mrf.mxu1  ;;  %v649_v19 = vadd.f32 %v4608_v56, %v548_v57  ;;  %v464_v27 = vpop.f32.mrf.mxu2 }
 0x15b   :  { %v732_v3 = vadd.f32 %v4612_v60, %v649_v19  ;;  %v583_v7 = vpop.f32.mrf.mxu3 }
 0x15f   :  { %859 = vxpose.xlu0.b32.end [2/2] (short) (narrow) %v728_v62, 16 }
 0x160   :  { %v4616_v0 = vpop.f32.mrf.mxu0 }
 0x161   :  { %v4618_v1 = vpop.f32.mrf.mxu1  ;;  %v469_v41 = vpop.f32.mrf.mxu2 }
 0x163   :  { %v589_v31 = vpop.f32.mrf.mxu3 }
 0x168   :  { %v656_v8 = vpop.f32.mrf.mxu0 }
 0x169   :  { %v657_v9 = vadd.f32 %v656_v8, %v560_v5  ;;  %v739_v10 = vpop.f32.mrf.mxu1  ;;  %v554_v5 = vadd.f32 %v4610_v58, %v445_v2  ;;  %v474_v29 = vpop.f32.mrf.mxu2 }
 0x16b   :  { %v4620_v13 = vadd.f32 %v739_v10, %v657_v9  ;;  %v653_v40 = vadd.f32 %v4616_v0, %v554_v5 }
 0x16d   :  { %1054 = vrot.lane.b32.xlu1 %v4620_v13, %s4351_s4  ;;  %v736_v21 = vadd.f32 %v4618_v1, %v653_v40  ;;  %v1420_v40 = vld [vmem:[%s5614_s3 + $0x10] sm:$0xff] }
 0x170   :  { %v660_v63 = vpop.f32.mrf.mxu0 }
 0x171   :  { %v743_v14 = vpop.f32.mrf.mxu1  ;;  %v661_v35 = vadd.f32 %v660_v63, %v566_v6  ;;  %v374_v63 = vadd.f32 %v4581_v37, %v4579_v36 }
 0x173   :  { %v4635_v48 = vadd.f32 %v743_v14, %v661_v35  ;;  %v475_v11 = vadd.f32 %v474_v29, %v374_v63 }
 0x178   :  { %v664_v50 = vpop.f32.mrf.mxu0 }
 0x179   :  { %v665_v61 = vadd.f32 %v664_v50, %v572_v18  ;;  %v747_v25 = vpop.f32.mrf.mxu1 }
 0x17b   :  { %v4639_v51 = vadd.f32 %v747_v25, %v665_v61 }
 0x180   :  { %v668_v34 = vpop.f32.mrf.mxu0 }
 0x181   :  { %v751_v42 = vpop.f32.mrf.mxu1 }
 0x189   :  { %v755_v20 = vpop.f32.mrf.mxu1 }
 0x18e   :  { %1042 = vrot.lane.b32.xlu2 %v716_v38, %s4351_s4 }
 0x18f   :  { %v1035_v4 = vpop.permute.xlu0 %1034 }
 0x191   :  { %v759_v39 = vpop.f32.mrf.mxu1 }
 0x196   :  { %1044 = vrot.lane.b32.xlu2 %v720_v43, %s4351_s4 }
 0x197   :  { %v1037_v26 = vpop.permute.xlu0 %1036 }
 0x19f   :  { %v1039_v44 = vpop.permute.xlu1 %1038 }
 0x1a2   :  { %1114 = vxpose.xlu1.b32.start [1/2] (short) (narrow) %v1039_v44, 16  ;;  %v370_v44 = vadd.f32 %v4573_v32, %v4571_v28  ;;  %v590_v32 = vadd.f32 %v589_v31, %v475_v11 }
 0x1a4   :  { %v470_v16 = vadd.f32 %v469_v41, %v370_v44 }
 0x1a6   :  { %v584_v59 = vadd.f32 %v583_v7, %v470_v16 }
 0x1a7   :  { %v1041_v45 = vpop.permute.xlu1 %1040 }
 0x1aa   :  { %1115 = vxpose.xlu1.b32.end [2/2] (short) (narrow) %v1041_v45, 16 }
 0x1b6   :  { %v4658_v49 = vpop.trf.xlu2 }
 0x1bc   :  { %826 = vxpose.xlu2.b32.start [1/2] (short) (narrow) %v716_v38, 16  ;;  %v465_v38 = vadd.f32 %v464_v27, %v366_v30 }
 0x1be   :  { %v4660_v47 = vpop.trf.xlu2 }
 0x1bf   :  { %v1047_v12 = vpop.permute.xlu1 %1046 }
 0x1c0   :  { %1178 = vxpose.xlu1.b32.start [1/2] (short) (narrow) %v1047_v12, 16  ;;  %v672_v12 = vpop.f32.mrf.mxu0 }
 0x1c1   :  { %v673_v6 = vadd.f32 %v672_v12, %v584_v59 }
 0x1c3   :  { %v4685_v14 = vadd.f32 %v755_v20, %v673_v6 }
 0x1c4   :  { %827 = vxpose.xlu2.b32.end [2/2] (short) (narrow) %v720_v43, 16  ;;  %v578_v43 = vadd.f32 %v577_v15, %v465_v38 }
 0x1c6   :  { %v669_v45 = vadd.f32 %v668_v34, %v578_v43 }
 0x1c8   :  { %v4679_v17 = vadd.f32 %v751_v42, %v669_v45  ;;  %v676_v28 = vpop.f32.mrf.mxu0 }
 0x1c9   :  { %v677_v35 = vadd.f32 %v676_v28, %v590_v32 }
 0x1cb   :  { %v4689_v46 = vadd.f32 %v759_v39, %v677_v35 }
 0x1cd   :  { %1056 = vrot.lane.b32.xlu0 %v4635_v48, %s4351_s4 }
 0x1d5   :  { %1058 = vrot.lane.b32.xlu0 %v4639_v51, %s4351_s4 }
 0x1df   :  { %v1055_v23 = vpop.permute.xlu1 %1054 }
 0x1e8   :  { %v1043_v22 = vpop.permute.xlu2 %1042 }
 0x1eb   :  { %v4663_v58 = vpop.trf.xlu0 }
 0x1f0   :  { %v1045_v56 = vpop.permute.xlu2 %1044 }
 0x1f7   :  { %1082 = vxpose.xlu0.b32.start [1/2] (short) (narrow) %v1035_v4, 16 }
 0x1ff   :  { %1083 = vxpose.xlu0.b32.end [2/2] (short) (narrow) %v1037_v26, 16 }
 0x22d   :  { %1048 = vrot.lane.b32.xlu2 %v728_v62, %s4351_s4  ;;  %v4667_v62 = vpop.trf.xlu0 }
 0x235   :  { %1050 = vrot.lane.b32.xlu2 %v732_v3, %s4351_s4  ;;  %v4671_v1 = vpop.trf.xlu0 }
 0x23d   :  { %1052 = vrot.lane.b32.xlu2 %v736_v21, %s4351_s4  ;;  %v4673_v9 = vpop.trf.xlu0 }
 0x245   :  { %v1057_v54 = vpop.permute.xlu0 %1056 }
 0x246   :  { %v1130_v53 = vpop.trf.xlu1 }
 0x24d   :  { %v4693_v36 = vpop.permute.xlu0 %1058 }
 0x24e   :  { %v1131_v50 = vpop.trf.xlu1 }
 0x255   :  { %v4665_v60 = vpop.trf.xlu2 }
 0x25d   :  { %v4669_v0 = vpop.trf.xlu2 }
 0x263   :  { %890 = vxpose.xlu2.b32.start [1/2] (short) (narrow) %v732_v3, 16  ;;  %v1421_v3 = vld [vmem:[%s5614_s3 + $0x18] sm:$0xff] }
 0x264   :  { %v1483_v5 = vand.u32 4294901760, %v1421_v3 }
 0x266   :  { %1839 = vmatpush.msra.mxu1 %v1483_v5  ;;  %1484 = vmatpush.msrb.mxu2 %v1483_v5 }
 0x26b   :  { %891 = vxpose.xlu2.b32.end [2/2] (short) (narrow) %v736_v21, 16 }
 0x26d   :  { %1358 = vrot.lane.b32.xlu0 %v1130_v53, %s4352_s12  ;;  %v1485_v53 = vand.u32 4294901760, %v1420_v40 }
 0x26f   :  { %1841 = vmatpush.msra.mxu1 %v1485_v53  ;;  %1486 = vmatpush.msrb.mxu2 %v1485_v53 }
 0x287   :  { %v1049_v8 = vpop.permute.xlu2 %1048 }
 0x288   :  { %1179 = vxpose.xlu1.b32.end [2/2] (short) (narrow) %v1049_v8, 16 }
 0x28f   :  { %v1051_v10 = vpop.permute.xlu2 %1050 }
 0x290   :  { %1242 = vxpose.xlu1.b32.start [1/2] (short) (narrow) %v1055_v23, 16  ;;  %1210 = vxpose.xlu0.b32.start [1/2] (short) (narrow) %v1051_v10, 16  ;;  %v1633_v23 = vsub.f32 %v1421_v3, %v1483_v5  ;;  %v1639_v10 = vsub.f32 %v1420_v40, %v1485_v53 }
 0x292   :  { %v1634_v8 = vand.u32 4294901760, %v1633_v23  ;;  %1735 = vmatpush.msra.mxu0 %v1633_v23  ;;  %v1640_v30 = vand.u32 4294901760, %v1639_v10 }
 0x294   :  { %v1635_v27 = vsub.f32 %v1633_v23, %v1634_v8  ;;  %1738 = vmatpush.msra.mxu0 %v1639_v10  ;;  %v1641_v41 = vsub.f32 %v1639_v10, %v1640_v30 }
 0x296   :  { %v1636_v38 = vand.u32 4294901760, %v1635_v27  ;;  %v1642_v44 = vand.u32 4294901760, %v1641_v41 }
 0x297   :  { %v1053_v24 = vpop.permute.xlu2 %1052 }
 0x298   :  { %1211 = vxpose.xlu0.b32.end [2/2] (short) (narrow) %v1053_v24, 16  ;;  %1243 = vxpose.xlu1.b32.end [2/2] (short) (narrow) %v1057_v54, 16  ;;  %v1418_v24 = vld [vmem:[%s5614_s3] sm:$0xff] }
 0x299   :  { %v1489_v34 = vand.u32 4294901760, %v1418_v24  ;;  %1637 = vmatpush.msrb.mxu3 %v1636_v38 }
 0x29b   :  { %v1098_v37 = vpop.trf.xlu0  ;;  %v1651_v43 = vsub.f32 %v1418_v24, %v1489_v34  ;;  %1643 = vmatpush.msrb.mxu3 %v1642_v44 }
 0x29d   :  { %v1652_v7 = vand.u32 4294901760, %v1651_v43 }
 0x29f   :  { %v1653_v12 = vsub.f32 %v1651_v43, %v1652_v7 }
 0x2a1   :  { %v1654_v59 = vand.u32 4294901760, %v1653_v12 }
 0x2a3   :  { %v1099_v18 = vpop.trf.xlu0 }
 0x2d4   :  { %1060 = vrot.lane.b32.xlu2 %v4679_v17, %s4351_s4 }
 0x2dc   :  { %1062 = vrot.lane.b32.xlu2 %v4685_v14, %s4351_s4 }
 0x2df   :  { %v4696_v25 = vpop.permute.xlu0 %1358 }
 0x2e0   :  { %v1404_v31 = vsel %vm89_vm0, %v4663_v58, %v4696_v25 }
 0x2e1   :  { %v1430_v35 = vsel %vm1422_vm1, %v1404_v31, 0 }
 0x2e4   :  { %1064 = vrot.lane.b32.xlu2 %v4689_v46, %s4351_s4 }
 0x2fc   :  { %v4699_v52 = vpop.trf.xlu2 }
 0x304   :  { %v4701_v55 = vpop.trf.xlu2 }
 0x30a   :  { %1146 = vxpose.xlu2.b32.start [1/2] (short) (narrow) %v1043_v22, 16 }
 0x312   :  { %1147 = vxpose.xlu2.b32.end [2/2] (short) (narrow) %v1045_v56, 16  ;;  %v1419_v56 = vld [vmem:[%s5614_s3 + $0x8] sm:$0xff] }
 0x313   :  { %v1487_v54 = vand.u32 4294901760, %v1419_v56 }
 0x315   :  { %v1645_v15 = vsub.f32 %v1419_v56, %v1487_v54  ;;  %1843 = vmatpush.msra.mxu1 %v1487_v54  ;;  %1488 = vmatpush.msrb.mxu2 %v1487_v54 }
 0x317   :  { %v1646_v42 = vand.u32 4294901760, %v1645_v15  ;;  %1741 = vmatpush.msra.mxu0 %v1645_v15  ;;  %1845 = vmatpush.msra.mxu1 %v1489_v34 }
 0x318   :  { %1490 = vmatpush.msrb.mxu2 %v1489_v34 }
 0x319   :  { %v1647_v45 = vsub.f32 %v1645_v15, %v1646_v42  ;;  %1744 = vmatpush.msra.mxu0 %v1651_v43 }
 0x31a   :  { %1958 = vmatpush.msra.mxu2 %v1634_v8 }
 0x31b   :  { %v1648_v16 = vand.u32 4294901760, %v1647_v45 }
 0x31c   :  { %1962 = vmatpush.msra.mxu2 %v1640_v30 }
 0x31d   :  { %1649 = vmatpush.msrb.mxu3 %v1648_v16 }
 0x31e   :  { %1966 = vmatpush.msra.mxu2 %v1646_v42 }
 0x31f   :  { %1655 = vmatpush.msrb.mxu3 %v1654_v59 }
 0x320   :  { %1970 = vmatpush.msra.mxu2 %v1652_v7 }
 0x321   :  { %2049 = vmatpush.msra.mxu3 %v1483_v5 }
 0x323   :  { %2051 = vmatpush.msra.mxu3 %v1485_v53 }
 0x324   :  { %v1194_v61 = vpop.trf.xlu1 }
 0x325   :  { %1366 = vrot.lane.b32.xlu1 %v1194_v61, %s4352_s12  ;;  %2053 = vmatpush.msra.mxu3 %v1487_v54 }
 0x327   :  { %2055 = vmatpush.msra.mxu3 %v1489_v34 }
 0x32c   :  { %v1195_v21 = vpop.trf.xlu1 }
 0x32e   :  { %v4703_v57 = vpop.permute.xlu2 %1060 }
 0x334   :  { %v1226_v4 = vpop.trf.xlu0  ;;  %v1258_v63 = vpop.trf.xlu1 }
 0x336   :  { %v1063_v33 = vpop.permute.xlu2 %1062 }
 0x33c   :  { %v1227_v26 = vpop.trf.xlu0  ;;  %v4756_v53 = vpop.trf.xlu1 }
 0x33d   :  { %1372 = vrot.lane.b32.xlu1 %v1227_v26, %s4352_s12 }
 0x33e   :  { %v1065_v19 = vpop.permute.xlu2 %1064 }
 0x372   :  { %1306 = vxpose.xlu1.b32.start [1/2] (short) (narrow) %v1063_v33, 16 }
 0x37a   :  { %1307 = vxpose.xlu1.b32.end [2/2] (short) (narrow) %v1065_v19, 16 }
 0x37b   :  { %1354 = vrot.lane.b32.xlu2 %v1098_v37, %s4352_s12 }
 0x383   :  { %1356 = vrot.lane.b32.xlu2 %v1099_v18, %s4352_s12 }
 0x38b   :  { %1360 = vrot.lane.b32.xlu2 %v1131_v50, %s4352_s12  ;;  %v4741_v50 = vand.u32 4294901760, %v1430_v35 }
 0x38d   :  { %v1508_v25 = vsub.f32 %v1430_v35, %v4741_v50 }
 0x38f   :  { %v1509_v3 = vand.u32 4294901760, %v1508_v25 }
 0x391   :  { %v1510_v40 = vsub.f32 %v1508_v25, %v1509_v3 }
 0x397   :  { %v1367_v27 = vpop.permute.xlu1 %1366 }
 0x398   :  { %v1408_v38 = vsel %vm89_vm0, %v4671_v1, %v1367_v27 }
 0x3a3   :  { %v1162_v2 = vpop.trf.xlu2 }
 0x3a4   :  { %1362 = vrot.lane.b32.xlu0 %v1162_v2, %s4352_s12 }
 0x3ab   :  { %v1163_v22 = vpop.trf.xlu2 }
 0x3ac   :  { %1368 = vrot.lane.b32.xlu0 %v1195_v21, %s4352_s12  ;;  %1364 = vrot.lane.b32.xlu2 %v1163_v22, %s4352_s12  ;;  %v1511_v21 = vand.u32 4294901760, %v1510_v40 }
 0x3b4   :  { %1370 = vrot.lane.b32.xlu0 %v1226_v4, %s4352_s12 }
 0x3bc   :  { %1374 = vrot.lane.b32.xlu0 %v1258_v63, %s4352_s12 }
 0x3d2   :  { %1274 = vxpose.xlu2.b32.start [1/2] (short) (narrow) %v4693_v36, 16 }
 0x3d5   :  { %v1355_v29 = vpop.permute.xlu2 %1354 }
 0x3d6   :  { %v1402_v20 = vsel %vm89_vm0, %v4658_v49, %v1355_v29 }
 0x3d7   :  { %v1424_v6 = vsel %vm1422_vm1, %v1402_v20, 0 }
 0x3d8   :  { %v4729_v11 = vand.u32 4294901760, %v1424_v6 }
 0x3da   :  { %v1492_v28 = vsub.f32 %v1424_v6, %v4729_v11  ;;  %1275 = vxpose.xlu2.b32.end [2/2] (short) (narrow) %v4703_v57, 16  ;;  %1657 = vmatmul.f32.vlgmr.msrb.gmra.mxu3 %v4729_v11 }
 0x3dc   :  { %v1493_v32 = vand.u32 4294901760, %v1492_v28  ;;  %1747 = vmatmul.f32.vlgmr.msra.gmra.mxu0 %v1492_v28 }
 0x3dd   :  { %v1357_v39 = vpop.permute.xlu2 %1356 }
 0x3de   :  { %v1403_v49 = vsel %vm89_vm0, %v4660_v47, %v1357_v39  ;;  %1849 = vmatmul.f32.vlgmr.msra.gmra.mxu1 %v1493_v32  ;;  %v1494_v36 = vsub.f32 %v1492_v28, %v1493_v32  ;;  %v1373_v39 = vpop.permute.xlu1 %1372 }
 0x3df   :  { %v1427_v37 = vsel %vm1422_vm1, %v1403_v49, 0 }
 0x3e0   :  { %v4743_v58 = vand.u32 4294901760, %v1427_v37  ;;  %v1495_v18 = vand.u32 4294901760, %v1494_v36 }
 0x3e2   :  { %v1500_v61 = vsub.f32 %v1427_v37, %v4743_v58  ;;  %1496 = vmatmul.f32.vlgmr.msrb.gmra.mxu2 %v1495_v18  ;;  %1661 = vmatmul.f32.gmra.mxu3 %v4743_v58  ;;  %v1411_v18 = vsel %vm89_vm0, %v4701_v55, %v1373_v39 }
 0x3e4   :  { %1752 = vmatmul.f32.gmra.mxu0 %v1500_v61  ;;  %v1501_v4 = vand.u32 4294901760, %v1500_v61 }
 0x3e5   :  { %v1361_v26 = vpop.permute.xlu2 %1360 }
 0x3e6   :  { %v1405_v47 = vsel %vm89_vm0, %v4667_v62, %v1361_v26  ;;  %1855 = vmatmul.f32.gmra.mxu1 %v1501_v4  ;;  %v1502_v57 = vsub.f32 %v1500_v61, %v1501_v4 }
 0x3e7   :  { %v1433_v33 = vsel %vm1422_vm1, %v1405_v47, 0 }
 0x3e8   :  { %v4751_v19 = vand.u32 4294901760, %v1433_v33  ;;  %v1503_v2 = vand.u32 4294901760, %v1502_v57 }
 0x3ea   :  { %1504 = vmatmul.f32.gmra.mxu2 %v1503_v2  ;;  %1665 = vmatmul.f32.gmra.mxu3 %v4741_v50  ;;  %v1516_v5 = vsub.f32 %v1433_v33, %v4751_v19 }
 0x3ec   :  { %1757 = vmatmul.f32.gmra.mxu0 %v1508_v25  ;;  %v1517_v22 = vand.u32 4294901760, %v1516_v5  ;;  %v1451_v25 = vsel %vm1422_vm1, %v1411_v18, 0 }
 0x3ed   :  { %v4795_v4 = vand.u32 4294901760, %v1451_v25 }
 0x3ee   :  { %1861 = vmatmul.f32.gmra.mxu1 %v1509_v3  ;;  %v1518_v62 = vsub.f32 %v1516_v5, %v1517_v22 }
 0x3ef   :  { %v1564_v57 = vsub.f32 %v1451_v25, %v4795_v4 }
 0x3f0   :  { %v1519_v23 = vand.u32 4294901760, %v1518_v62 }
 0x3f1   :  { %v1565_v2 = vand.u32 4294901760, %v1564_v57 }
 0x3f2   :  { %1512 = vmatmul.f32.gmra.mxu2 %v1511_v21  ;;  %1669 = vmatmul.f32.gmra.mxu3 %v4751_v19 }
 0x3f3   :  { %v1566_v3 = vsub.f32 %v1564_v57, %v1565_v2 }
 0x3f4   :  { %1762 = vmatmul.f32.gmra.mxu0 %v1516_v5 }
 0x3f5   :  { %v1567_v40 = vand.u32 4294901760, %v1566_v3 }
 0x3f6   :  { %1867 = vmatmul.f32.gmra.mxu1 %v1517_v22 }
 0x3fa   :  { %1520 = vmatmul.f32.gmra.mxu2 %v1519_v23 }
 0x406   :  { %v1365_v56 = vpop.permute.xlu2 %1364 }
 0x407   :  { %v1407_v8 = vsel %vm89_vm0, %v4669_v0, %v1365_v56 }
 0x408   :  { %v1439_v10 = vsel %vm1422_vm1, %v1407_v8, 0 }
 0x409   :  { %v4764_v15 = vand.u32 4294901760, %v1439_v10 }
 0x40b   :  { %v1532_v0 = vsub.f32 %v1439_v10, %v4764_v15 }
 0x40d   :  { %v1533_v16 = vand.u32 4294901760, %v1532_v0 }
 0x40f   :  { %v1534_v59 = vsub.f32 %v1532_v0, %v1533_v16 }
 0x411   :  { %v1535_v6 = vand.u32 4294901760, %v1534_v59 }
 0x416   :  { %v1363_v54 = vpop.permute.xlu0 %1362  ;;  %v1322_v5 = vpop.trf.xlu1 }
 0x417   :  { %v1406_v24 = vsel %vm89_vm0, %v4665_v60, %v1363_v54  ;;  %v1442_v60 = vsel %vm1422_vm1, %v1408_v38, 0 }
 0x418   :  { %v1436_v30 = vsel %vm1422_vm1, %v1406_v24, 0  ;;  %v4774_v45 = vand.u32 4294901760, %v1442_v60 }
 0x419   :  { %v4766_v34 = vand.u32 4294901760, %v1436_v30 }
 0x41a   :  { %v1540_v12 = vsub.f32 %v1442_v60, %v4774_v45 }
 0x41b   :  { %v1524_v41 = vsub.f32 %v1436_v30, %v4766_v34  ;;  %1673 = vmatmul.f32.gmra.mxu3 %v4766_v34 }
 0x41c   :  { %v1541_v31 = vand.u32 4294901760, %v1540_v12 }
 0x41d   :  { %1767 = vmatmul.f32.gmra.mxu0 %v1524_v41  ;;  %v1525_v42 = vand.u32 4294901760, %v1524_v41 }
 0x41e   :  { %v1369_v43 = vpop.permute.xlu0 %1368  ;;  %v1542_v32 = vsub.f32 %v1540_v12, %v1541_v31  ;;  %v1323_v21 = vpop.trf.xlu1 }
 0x41f   :  { %1873 = vmatmul.f32.gmra.mxu1 %v1525_v42  ;;  %v1526_v44 = vsub.f32 %v1524_v41, %v1525_v42  ;;  %v1409_v1 = vsel %vm89_vm0, %v4673_v9, %v1369_v43 }
 0x420   :  { %v1445_v63 = vsel %vm1422_vm1, %v1409_v1, 0  ;;  %v1543_v36 = vand.u32 4294901760, %v1542_v32 }
 0x421   :  { %v1527_v7 = vand.u32 4294901760, %v1526_v44  ;;  %v4781_v20 = vand.u32 4294901760, %v1445_v63 }
 0x423   :  { %1528 = vmatmul.f32.gmra.mxu2 %v1527_v7  ;;  %1677 = vmatmul.f32.gmra.mxu3 %v4764_v15  ;;  %v1548_v9 = vsub.f32 %v1445_v63, %v4781_v20 }
 0x425   :  { %1772 = vmatmul.f32.gmra.mxu0 %v1532_v0  ;;  %v1549_v37 = vand.u32 4294901760, %v1548_v9 }
 0x426   :  { %v1371_v29 = vpop.permute.xlu0 %1370 }
 0x427   :  { %1879 = vmatmul.f32.gmra.mxu1 %v1533_v16  ;;  %v1410_v28 = vsel %vm89_vm0, %v4699_v52, %v1371_v29  ;;  %v1550_v61 = vsub.f32 %v1548_v9, %v1549_v37 }
 0x428   :  { %v1448_v35 = vsel %vm1422_vm1, %v1410_v28, 0 }
 0x429   :  { %v4788_v49 = vand.u32 4294901760, %v1448_v35  ;;  %v1551_v26 = vand.u32 4294901760, %v1550_v61 }
 0x42b   :  { %1536 = vmatmul.f32.gmra.mxu2 %v1535_v6  ;;  %1681 = vmatmul.f32.gmra.mxu3 %v4774_v45  ;;  %v1556_v52 = vsub.f32 %v1448_v35, %v4788_v49 }
 0x42d   :  { %1777 = vmatmul.f32.gmra.mxu0 %v1540_v12  ;;  %v1557_v47 = vand.u32 4294901760, %v1556_v52 }
 0x42e   :  { %v1375_v23 = vpop.permute.xlu0 %1374 }
 0x42f   :  { %1885 = vmatmul.f32.gmra.mxu1 %v1541_v31  ;;  %v1558_v55 = vsub.f32 %v1556_v52, %v1557_v47 }
 0x431   :  { %v1559_v33 = vand.u32 4294901760, %v1558_v55 }
 0x433   :  { %1544 = vmatmul.f32.gmra.mxu2 %v1543_v36  ;;  %1685 = vmatmul.f32.gmra.mxu3 %v4781_v20 }
 0x435   :  { %1782 = vmatmul.f32.gmra.mxu0 %v1548_v9 }
 0x437   :  { %1891 = vmatmul.f32.gmra.mxu1 %v1549_v37 }
 0x43b   :  { %1552 = vmatmul.f32.gmra.mxu2 %v1551_v26  ;;  %1689 = vmatmul.f32.gmra.mxu3 %v4788_v49 }
 0x43d   :  { %1787 = vmatmul.f32.gmra.mxu0 %v1556_v52 }
 0x43f   :  { %1897 = vmatmul.f32.gmra.mxu1 %v1557_v47 }
 0x443   :  { %1376 = vrot.lane.b32.xlu2 %v4756_v53, %s4352_s12  ;;  %1560 = vmatmul.f32.gmra.mxu2 %v1559_v33 }
 0x444   :  { %1693 = vmatmul.f32.gmra.mxu3 %v4795_v4 }
 0x445   :  { %1792 = vmatmul.f32.gmra.mxu0 %v1564_v57 }
 0x447   :  { %1903 = vmatmul.f32.gmra.mxu1 %v1565_v2 }
 0x44b   :  { %1382 = vrot.lane.b32.xlu2 %v1322_v5, %s4352_s12  ;;  %1568 = vmatmul.f32.gmra.mxu2 %v1567_v40 }
 0x453   :  { %1384 = vrot.lane.b32.xlu2 %v1323_v21, %s4352_s12 }
 0x45d   :  { %v4847_v40 = vpop.f32.mrf.mxu3 }
 0x46b   :  { %v1290_v22 = vpop.trf.xlu2 }
 0x46c   :  { %1378 = vrot.lane.b32.xlu0 %v1290_v22, %s4352_s12 }
 0x473   :  { %v1291_v62 = vpop.trf.xlu2 }
 0x474   :  { %1380 = vrot.lane.b32.xlu1 %v1291_v62, %s4352_s12  ;;  %v2142_v62 = vld [vmem:[#allocation7 + $0x18] sm:$0xff] }
 0x479   :  { %986 = vxpose.xlu2.b32.start [1/2] (short) (narrow) %v4685_v14, 16 }
 0x481   :  { %987 = vxpose.xlu2.b32.end [2/2] (short) (narrow) %v4689_v46, 16 }
 0x48e   :  { %922 = vxpose.xlu0.b32.start [1/2] (short) (narrow) %v4620_v13, 16 }
 0x496   :  { %923 = vxpose.xlu0.b32.end [2/2] (short) (narrow) %v4635_v48, 16 }
 0x49d   :  { %v1377_v53 = vpop.permute.xlu2 %1376 }
 0x49e   :  { %954 = vxpose.xlu0.b32.start [1/2] (short) (narrow) %v4639_v51, 16 }
 0x4a5   :  { %v1383_v8 = vpop.permute.xlu2 %1382 }
 0x4a6   :  { %955 = vxpose.xlu0.b32.end [2/2] (short) (narrow) %v4679_v17, 16 }
 0x4ad   :  { %v1385_v51 = vpop.permute.xlu2 %1384 }
 0x4de   :  { %v1379_v56 = vpop.permute.xlu0 %1378 }
 0x4e6   :  { %v1381_v29 = vpop.permute.xlu1 %1380 }
 0x512   :  { %v1002_v60 = vpop.trf.xlu2 }
 0x513   :  { %v1416_v59 = vsel %vm89_vm0, %v1002_v60, %v1383_v8 }
 0x514   :  { %v1466_v31 = vsel %vm1422_vm1, %v1416_v59, 0  ;;  %v2140_v59 = vld [vmem:[#allocation7 + $0x8] sm:$0xff] }
 0x515   :  { %v4834_v36 = vand.u32 4294901760, %v1466_v31 }
 0x517   :  { %v1604_v25 = vsub.f32 %v1466_v31, %v4834_v36 }
 0x519   :  { %v1605_v2 = vand.u32 4294901760, %v1604_v25 }
 0x51a   :  { %v1003_v35 = vpop.trf.xlu2 }
 0x51b   :  { %v1417_v52 = vsel %vm89_vm0, %v1003_v35, %v1385_v51  ;;  %v1606_v5 = vsub.f32 %v1604_v25, %v1605_v2 }
 0x51c   :  { %v1469_v47 = vsel %vm1422_vm1, %v1417_v52, 0 }
 0x51d   :  { %v4843_v55 = vand.u32 4294901760, %v1469_v47  ;;  %v1607_v21 = vand.u32 4294901760, %v1606_v5 }
 0x51f   :  { %v1612_v3 = vsub.f32 %v1469_v47, %v4843_v55 }
 0x521   :  { %v1613_v22 = vand.u32 4294901760, %v1612_v3 }
 0x532   :  { %v938_v10 = vpop.trf.xlu0 }
 0x533   :  { %v1412_v14 = vsel %vm89_vm0, %v938_v10, %v1375_v23  ;;  %v4850_v23 = vand.u32 4294901760, %v2142_v62  ;;  %v4859_v10 = vpop.f32.mrf.mxu3 }
 0x534   :  { %v1454_v46 = vsel %vm1422_vm1, %v1412_v14, 0 }
 0x535   :  { %v4814_v54 = vand.u32 4294901760, %v1454_v46  ;;  %2204 = vmatpush.msrb.mxu0 %v4850_v23  ;;  %v4856_v8 = vsub.f32 %v2142_v62, %v4850_v23  ;;  %2559 = vmatpush.msrb.mxu3 %v4850_v23 }
 0x537   :  { %v1572_v13 = vsub.f32 %v1454_v46, %v4814_v54  ;;  %1697 = vmatmul.f32.gmra.mxu3 %v4814_v54  ;;  %v2354_v14 = vand.u32 4294901760, %v4856_v8  ;;  %2455 = vmatpush.msrb.mxu2 %v4856_v8 }
 0x539   :  { %1797 = vmatmul.f32.gmra.mxu0 %v1572_v13  ;;  %v1573_v48 = vand.u32 4294901760, %v1572_v13 }
 0x53a   :  { %v939_v24 = vpop.trf.xlu0 }
 0x53b   :  { %v1413_v17 = vsel %vm89_vm0, %v939_v24, %v1377_v53  ;;  %1909 = vmatmul.f32.gmra.mxu1 %v1573_v48  ;;  %v1574_v27 = vsub.f32 %v1572_v13, %v1573_v48  ;;  %v1614_v53 = vsub.f32 %v1612_v3, %v1613_v22  ;;  %v2355_v13 = vsub.f32 %v4856_v8, %v2354_v14  ;;  %v4869_v24 = vpop.f32.mrf.mxu3 }
 0x53c   :  { %v1457_v30 = vsel %vm1422_vm1, %v1413_v17, 0 }
 0x53d   :  { %v4820_v38 = vand.u32 4294901760, %v1457_v30  ;;  %v1575_v41 = vand.u32 4294901760, %v1574_v27  ;;  %v1615_v46 = vand.u32 4294901760, %v1614_v53  ;;  %v2356_v48 = vand.u32 4294901760, %v2355_v13 }
 0x53f   :  { %v1580_v0 = vsub.f32 %v1457_v30, %v4820_v38  ;;  %1576 = vmatmul.f32.gmra.mxu2 %v1575_v41  ;;  %1701 = vmatmul.f32.gmra.mxu3 %v4820_v38  ;;  %v2141_v30 = vld [vmem:[#allocation7 + $0x10] sm:$0xff] }
 0x540   :  { %2357 = vmatpush.msrb.mxu1 %v2356_v48 }
 0x541   :  { %1802 = vmatmul.f32.gmra.mxu0 %v1580_v0  ;;  %v1581_v42 = vand.u32 4294901760, %v1580_v0 }
 0x542   :  { %v970_v43 = vpop.trf.xlu0 }
 0x543   :  { %v1414_v44 = vsel %vm89_vm0, %v970_v43, %v1379_v56  ;;  %1915 = vmatmul.f32.gmra.mxu1 %v1581_v42  ;;  %v1582_v7 = vsub.f32 %v1580_v0, %v1581_v42  ;;  %v4852_v56 = vpop.f32.mrf.mxu2  ;;  %v4877_v27 = vpop.f32.mrf.mxu3 }
 0x544   :  { %v1460_v16 = vsel %vm1422_vm1, %v1414_v44, 0 }
 0x545   :  { %v4826_v1 = vand.u32 4294901760, %v1460_v16  ;;  %v1583_v12 = vand.u32 4294901760, %v1582_v7 }
 0x547   :  { %v1588_v63 = vsub.f32 %v1460_v16, %v4826_v1  ;;  %1584 = vmatmul.f32.gmra.mxu2 %v1583_v12  ;;  %1705 = vmatmul.f32.gmra.mxu3 %v4826_v1 }
 0x549   :  { %1807 = vmatmul.f32.gmra.mxu0 %v1588_v63  ;;  %v1589_v6 = vand.u32 4294901760, %v1588_v63 }
 0x54a   :  { %v971_v28 = vpop.trf.xlu0 }
 0x54b   :  { %v1415_v9 = vsel %vm89_vm0, %v971_v28, %v1381_v29  ;;  %1921 = vmatmul.f32.gmra.mxu1 %v1589_v6  ;;  %v1590_v32 = vsub.f32 %v1588_v63, %v1589_v6  ;;  %v4867_v51 = vpop.f32.mrf.mxu2  ;;  %v4883_v0 = vpop.f32.mrf.mxu3  ;;  %v2207_v63 = vand.u32 4294901760, %v2140_v59 }
 0x54c   :  { %v1463_v39 = vsel %vm1422_vm1, %v1415_v9, 0 }
 0x54d   :  { %v4836_v37 = vand.u32 4294901760, %v1463_v39  ;;  %v1591_v18 = vand.u32 4294901760, %v1590_v32 }
 0x54f   :  { %v1596_v61 = vsub.f32 %v1463_v39, %v4836_v37  ;;  %1592 = vmatmul.f32.gmra.mxu2 %v1591_v18  ;;  %1709 = vmatmul.f32.gmra.mxu3 %v4836_v37  ;;  %v2139_v39 = vld [vmem:[#allocation7] sm:$0xff] }
 0x550   :  { %v2209_v18 = vand.u32 4294901760, %v2139_v39 }
 0x551   :  { %1812 = vmatmul.f32.gmra.mxu0 %v1596_v61  ;;  %v1597_v26 = vand.u32 4294901760, %v1596_v61 }
 0x553   :  { %1927 = vmatmul.f32.gmra.mxu1 %v1597_v26  ;;  %v1598_v57 = vsub.f32 %v1596_v61, %v1597_v26  ;;  %v4873_v17 = vpop.f32.mrf.mxu2  ;;  %v4894_v44 = vpop.f32.mrf.mxu3 }
 0x555   :  { %v1599_v33 = vand.u32 4294901760, %v1598_v57 }
 0x557   :  { %1600 = vmatmul.f32.gmra.mxu2 %v1599_v33  ;;  %1713 = vmatmul.f32.gmra.mxu3 %v4834_v36  ;;  %v1850_v33 = vpop.f32.mrf.mxu1 }
 0x559   :  { %1817 = vmatmul.f32.gmra.mxu0 %v1604_v25 }
 0x55b   :  { %1933 = vmatmul.f32.gmra.mxu1 %v1605_v2  ;;  %v4881_v41 = vpop.f32.mrf.mxu2  ;;  %v4900_v16 = vpop.f32.mrf.mxu3 }
 0x55f   :  { %1608 = vmatmul.f32.gmra.mxu2 %v1607_v21  ;;  %1717 = vmatmul.f32.gmra.mxu3 %v4843_v55  ;;  %v1856_v5 = vpop.f32.mrf.mxu1 }
 0x561   :  { %1822 = vmatmul.f32.gmra.mxu0 %v1612_v3 }
 0x563   :  { %1939 = vmatmul.f32.gmra.mxu1 %v1613_v22  ;;  %v4906_v12 = vpop.f32.mrf.mxu3 }
 0x567   :  { %1616 = vmatmul.f32.gmra.mxu2 %v1615_v46  ;;  %2057 = vmatmul.f32.vlgmr.msra.gmra.mxu3 %v4729_v11 }
 0x56b   :  { %v4914_v29 = vpop.f32.mrf.mxu3 }
 0x56f   :  { %1972 = vmatmul.f32.vlgmr.msra.gmra.mxu2 %v4729_v11  ;;  %2061 = vmatmul.f32.gmra.mxu3 %v4743_v58  ;;  %v4885_v11 = vand.u32 4294901760, %v2141_v30 }
 0x571   :  { %2206 = vmatpush.msrb.mxu0 %v4885_v11  ;;  %v2359_v42 = vsub.f32 %v2141_v30, %v4885_v11  ;;  %2561 = vmatpush.msrb.mxu3 %v4885_v11 }
 0x573   :  { %2458 = vmatpush.msrb.mxu2 %v2359_v42  ;;  %2208 = vmatpush.msrb.mxu0 %v2207_v63  ;;  %v4920_v9 = vpop.f32.mrf.mxu3 }
 0x574   :  { %2563 = vmatpush.msrb.mxu3 %v2207_v63 }
 0x575   :  { %2210 = vmatpush.msrb.mxu0 %v2209_v18 }
 0x576   :  { %2565 = vmatpush.msrb.mxu3 %v2209_v18 }
 0x577   :  { %1976 = vmatmul.f32.gmra.mxu2 %v4743_v58  ;;  %2065 = vmatmul.f32.gmra.mxu3 %v4741_v50  ;;  %v2360_v58 = vand.u32 4294901760, %v2359_v42 }
 0x578   :  { %2678 = vmatpush.msra.mxu0 %v2354_v14 }
 0x579   :  { %v2361_v60 = vsub.f32 %v2359_v42, %v2360_v58 }
 0x57a   :  { %2682 = vmatpush.msra.mxu0 %v2360_v58 }
 0x57b   :  { %v2362_v43 = vand.u32 4294901760, %v2361_v60 }
 0x57d   :  { %2363 = vmatpush.msrb.mxu1 %v2362_v43  ;;  %v1667_v43 = vadd.f32 %v4869_v24, %v4873_v17 }
 0x57f   :  { %1980 = vmatmul.f32.gmra.mxu2 %v4741_v50  ;;  %2069 = vmatmul.f32.gmra.mxu3 %v4751_v19  ;;  %v4892_v50 = vpop.f32.mrf.mxu2 }
 0x587   :  { %1984 = vmatmul.f32.gmra.mxu2 %v4751_v19  ;;  %2073 = vmatmul.f32.gmra.mxu3 %v4766_v34  ;;  %v4898_v7 = vpop.f32.mrf.mxu2 }
 0x58f   :  { %1988 = vmatmul.f32.gmra.mxu2 %v4766_v34  ;;  %2077 = vmatmul.f32.gmra.mxu3 %v4764_v15  ;;  %v4904_v19 = vpop.f32.mrf.mxu2 }
 0x597   :  { %1992 = vmatmul.f32.gmra.mxu2 %v4764_v15  ;;  %2081 = vmatmul.f32.gmra.mxu3 %v4774_v45  ;;  %v4910_v34 = vpop.f32.mrf.mxu2  ;;  %v2365_v15 = vsub.f32 %v2140_v59, %v2207_v63 }
 0x599   :  { %v2366_v6 = vand.u32 4294901760, %v2365_v15  ;;  %2461 = vmatpush.msrb.mxu2 %v2365_v15 }
 0x59b   :  { %v2367_v31 = vsub.f32 %v2365_v15, %v2366_v6  ;;  %2686 = vmatpush.msra.mxu0 %v2366_v6 }
 0x59d   :  { %v2368_v28 = vand.u32 4294901760, %v2367_v31 }
 0x59f   :  { %1996 = vmatmul.f32.gmra.mxu2 %v4774_v45  ;;  %2085 = vmatmul.f32.gmra.mxu3 %v4781_v20  ;;  %v4918_v45 = vpop.f32.mrf.mxu2 }
 0x5a0   :  { %2369 = vmatpush.msrb.mxu1 %v2368_v28 }
 0x5a7   :  { %2000 = vmatmul.f32.gmra.mxu2 %v4781_v20  ;;  %2089 = vmatmul.f32.gmra.mxu3 %v4788_v49  ;;  %v4924_v20 = vpop.f32.mrf.mxu2 }
 0x5af   :  { %2004 = vmatmul.f32.gmra.mxu2 %v4788_v49  ;;  %2093 = vmatmul.f32.gmra.mxu3 %v4795_v4 }
 0x5b7   :  { %2008 = vmatmul.f32.gmra.mxu2 %v4795_v4  ;;  %2097 = vmatmul.f32.gmra.mxu3 %v4814_v54  ;;  %v2371_v4 = vsub.f32 %v2139_v39, %v2209_v18  ;;  %v4984_v39 = vld [vmem:[%s5612_s1 + $0x8] sm:$0xff] }
 0x5b9   :  { %v2372_v61 = vand.u32 4294901760, %v2371_v4  ;;  %2464 = vmatpush.msrb.mxu2 %v2371_v4 }
 0x5ba   :  { %v4926_v32 = vpop.f32.mrf.mxu3 }
 0x5bb   :  { %v2373_v25 = vsub.f32 %v2371_v4, %v2372_v61  ;;  %2690 = vmatpush.msra.mxu0 %v2372_v61 }
 0x5bd   :  { %v2374_v26 = vand.u32 4294901760, %v2373_v25  ;;  %v1671_v25 = vadd.f32 %v4877_v27, %v4881_v41 }
 0x5bf   :  { %2012 = vmatmul.f32.gmra.mxu2 %v4814_v54  ;;  %2101 = vmatmul.f32.gmra.mxu3 %v4820_v38 }
 0x5c0   :  { %2375 = vmatpush.msrb.mxu1 %v2374_v26 }
 0x5c2   :  { %v4930_v49 = vpop.f32.mrf.mxu2  ;;  %v4932_v35 = vpop.f32.mrf.mxu3  ;;  %2769 = vmatpush.msra.mxu1 %v4850_v23 }
 0x5c3   :  { %v1862_v23 = vpop.f32.mrf.mxu1 }
 0x5c4   :  { %2771 = vmatpush.msra.mxu1 %v4885_v11 }
 0x5c6   :  { %2773 = vmatpush.msra.mxu1 %v2207_v63 }
 0x5c7   :  { %2016 = vmatmul.f32.gmra.mxu2 %v4820_v38  ;;  %2105 = vmatmul.f32.gmra.mxu3 %v4826_v1  ;;  %v1748_v38 = vpop.f32.mrf.mxu0 }
 0x5c8   :  { %2775 = vmatpush.msra.mxu1 %v2209_v18 }
 0x5ca   :  { %v4938_v52 = vpop.f32.mrf.mxu2  ;;  %v4940_v54 = vpop.f32.mrf.mxu3 }
 0x5cb   :  { %v1868_v11 = vpop.f32.mrf.mxu1 }
 0x5cf   :  { %2020 = vmatmul.f32.gmra.mxu2 %v4826_v1  ;;  %2109 = vmatmul.f32.gmra.mxu3 %v4836_v37  ;;  %v1753_v3 = vpop.f32.mrf.mxu0 }
 0x5d2   :  { %v4945_v47 = vpop.f32.mrf.mxu2  ;;  %v4947_v57 = vpop.f32.mrf.mxu3 }
 0x5d3   :  { %v1874_v6 = vpop.f32.mrf.mxu1 }
 0x5d7   :  { %2024 = vmatmul.f32.gmra.mxu2 %v4836_v37  ;;  %2113 = vmatmul.f32.gmra.mxu3 %v4834_v36  ;;  %v1758_v62 = vpop.f32.mrf.mxu0  ;;  %v1659_v37 = vadd.f32 %v4847_v40, %v4852_v56 }
 0x5d8   :  { %v1759_v18 = vadd.f32 %v1758_v62, %v1667_v43 }
 0x5d9   :  { %v1749_v14 = vadd.f32 %v1748_v38, %v1659_v37 }
 0x5da   :  { %v4952_v1 = vpop.f32.mrf.mxu2  ;;  %v4954_v2 = vpop.f32.mrf.mxu3 }
 0x5db   :  { %v1851_v13 = vadd.f32 %v1850_v33, %v1749_v14  ;;  %v1863_v33 = vadd.f32 %v1862_v23, %v1759_v18  ;;  %v1679_v18 = vadd.f32 %v4894_v44, %v4898_v7 }
 0x5df   :  { %2028 = vmatmul.f32.gmra.mxu2 %v4834_v36  ;;  %2117 = vmatmul.f32.gmra.mxu3 %v4843_v55  ;;  %v1763_v46 = vpop.f32.mrf.mxu0  ;;  %v1663_v36 = vadd.f32 %v4859_v10, %v4867_v51 }
 0x5e1   :  { %v1754_v40 = vadd.f32 %v1753_v3, %v1663_v36  ;;  %v1764_v36 = vadd.f32 %v1763_v46, %v1671_v25 }
 0x5e2   :  { %v4958_v21 = vpop.f32.mrf.mxu2  ;;  %v4960_v22 = vpop.f32.mrf.mxu3 }
 0x5e3   :  { %v1857_v51 = vadd.f32 %v1856_v5, %v1754_v40  ;;  %v1869_v40 = vadd.f32 %v1868_v11, %v1764_v36 }
 0x5e7   :  { %2032 = vmatmul.f32.gmra.mxu2 %v4843_v55  ;;  %v4972_v55 = vld [vmem:[%s5612_s1] sm:$0xff]  ;;  %v1768_v58 = vpop.f32.mrf.mxu0 }
 0x5ea   :  { %v4965_v53 = vpop.f32.mrf.mxu2  ;;  %v2058_v8 = vpop.f32.mrf.mxu3 }
 0x5ef   :  { %v1773_v26 = vpop.f32.mrf.mxu0 }
 0x5f2   :  { %v1973_v48 = vpop.f32.mrf.mxu2  ;;  %v2062_v30 = vpop.f32.mrf.mxu3 }
 0x5f3   :  { %v1974_v42 = vadd.f32 %v1973_v48, %v1851_v13  ;;  %v1880_v13 = vpop.f32.mrf.mxu1 }
 0x5f5   :  { %v2059_v56 = vadd.f32 %v2058_v8, %v1974_v42 }
 0x5f7   :  { %v2123_v60 = vmul.f32 %v4972_v55, %v2059_v56  ;;  %v1778_v46 = vpop.f32.mrf.mxu0 }
 0x5f9   :  { %v2144_v10 = vsel %vm1422_vm1, %v2123_v60, 0 }
 0x5fa   :  { %v4978_v59 = vand.u32 4294901760, %v2144_v10  ;;  %v1977_v63 = vpop.f32.mrf.mxu2  ;;  %v2066_v15 = vpop.f32.mrf.mxu3 }
 0x5fb   :  { %v1978_v31 = vadd.f32 %v1977_v63, %v1857_v51 }
 0x5fc   :  { %v2212_v28 = vsub.f32 %v2144_v10, %v4978_v59  ;;  %2377 = vmatmul.f32.vlgmr.msrb.gmra.mxu1 %v4978_v59 }
 0x5fd   :  { %v2063_v24 = vadd.f32 %v2062_v30, %v1978_v31  ;;  %v1675_v30 = vadd.f32 %v4883_v0, %v4892_v50  ;;  %v1886_v0 = vpop.f32.mrf.mxu1 }
 0x5fe   :  { %2467 = vmatmul.f32.vlgmr.msrb.gmra.mxu2 %v2212_v28  ;;  %v2213_v17 = vand.u32 4294901760, %v2212_v28 }
 0x5ff   :  { %v2124_v4 = vmul.f32 %v4984_v39, %v2063_v24 }
 0x600   :  { %2569 = vmatmul.f32.vlgmr.msrb.gmra.mxu3 %v2213_v17  ;;  %v2214_v61 = vsub.f32 %v2212_v28, %v2213_v17 }
 0x601   :  { %v2147_v38 = vsel %vm1422_vm1, %v2124_v4, 0 }
 0x602   :  { %v1981_v3 = vpop.f32.mrf.mxu2  ;;  %v2070_v5 = vpop.f32.mrf.mxu3  ;;  %v2215_v37 = vand.u32 4294901760, %v2214_v61  ;;  %v4991_v8 = vand.u32 4294901760, %v2147_v38 }
 0x603   :  { %v1982_v62 = vadd.f32 %v1981_v3, %v1863_v33  ;;  %v1774_v3 = vadd.f32 %v1773_v26, %v1679_v18 }
 0x604   :  { %2216 = vmatmul.f32.vlgmr.msrb.gmra.mxu0 %v2215_v37  ;;  %2381 = vmatmul.f32.gmra.mxu1 %v4991_v8  ;;  %v2220_v14 = vsub.f32 %v2147_v38, %v4991_v8 }
 0x605   :  { %v2067_v48 = vadd.f32 %v2066_v15, %v1982_v62  ;;  %v1769_v15 = vadd.f32 %v1768_v58, %v1675_v30 }
 0x606   :  { %2472 = vmatmul.f32.gmra.mxu2 %v2220_v14  ;;  %v2221_v27 = vand.u32 4294901760, %v2220_v14 }
 0x607   :  { %v2125_v41 = vmul.f32 %v4972_v55, %v2067_v48  ;;  %v1875_v17 = vadd.f32 %v1874_v6, %v1769_v15  ;;  %v1892_v6 = vpop.f32.mrf.mxu1  ;;  %v1881_v48 = vadd.f32 %v1880_v13, %v1774_v3  ;;  %v1687_v13 = vadd.f32 %v4906_v12, %v4910_v34 }
 0x608   :  { %2575 = vmatmul.f32.gmra.mxu3 %v2221_v27  ;;  %v2222_v23 = vsub.f32 %v2220_v14, %v2221_v27  ;;  %v1683_v14 = vadd.f32 %v4900_v16, %v4904_v19 }
 0x609   :  { %v2150_v42 = vsel %vm1422_vm1, %v2125_v41, 0 }
 0x60a   :  { %v1985_v56 = vpop.f32.mrf.mxu2  ;;  %v2074_v60 = vpop.f32.mrf.mxu3  ;;  %v2223_v43 = vand.u32 4294901760, %v2222_v23  ;;  %v4999_v10 = vand.u32 4294901760, %v2150_v42 }
 0x60b   :  { %v1986_v51 = vadd.f32 %v1985_v56, %v1869_v40  ;;  %v1779_v40 = vadd.f32 %v1778_v46, %v1683_v14 }
 0x60c   :  { %2224 = vmatmul.f32.gmra.mxu0 %v2223_v43  ;;  %2385 = vmatmul.f32.gmra.mxu1 %v4999_v10  ;;  %v2228_v63 = vsub.f32 %v2150_v42, %v4999_v10 }
 0x60d   :  { %v2071_v31 = vadd.f32 %v2070_v5, %v1986_v51  ;;  %v1783_v5 = vpop.f32.mrf.mxu0 }
 0x60e   :  { %2477 = vmatmul.f32.gmra.mxu2 %v2228_v63  ;;  %v2229_v28 = vand.u32 4294901760, %v2228_v63 }
 0x60f   :  { %v2126_v50 = vmul.f32 %v4984_v39, %v2071_v31 }
 0x610   :  { %2581 = vmatmul.f32.gmra.mxu3 %v2229_v28  ;;  %v2230_v11 = vsub.f32 %v2228_v63, %v2229_v28  ;;  %v1887_v63 = vadd.f32 %v1886_v0, %v1779_v40 }
 0x611   :  { %v2153_v24 = vsel %vm1422_vm1, %v2126_v50, 0 }
 0x612   :  { %v1989_v4 = vpop.f32.mrf.mxu2  ;;  %v2078_v61 = vpop.f32.mrf.mxu3  ;;  %v2231_v25 = vand.u32 4294901760, %v2230_v11  ;;  %v5007_v38 = vand.u32 4294901760, %v2153_v24 }
 0x613   :  { %v1990_v58 = vadd.f32 %v1989_v4, %v1875_v17  ;;  %v1898_v11 = vpop.f32.mrf.mxu1 }
 0x614   :  { %2232 = vmatmul.f32.gmra.mxu0 %v2231_v25  ;;  %2389 = vmatmul.f32.gmra.mxu1 %v5007_v38  ;;  %v2236_v33 = vsub.f32 %v2153_v24, %v5007_v38  ;;  %v1784_v24 = vadd.f32 %v1783_v5, %v1687_v13 }
 0x615   :  { %v2075_v37 = vadd.f32 %v2074_v60, %v1990_v58  ;;  %v1788_v43 = vpop.f32.mrf.mxu0 }
 0x616   :  { %2482 = vmatmul.f32.gmra.mxu2 %v2236_v33  ;;  %v2237_v62 = vand.u32 4294901760, %v2236_v33  ;;  %v1893_v58 = vadd.f32 %v1892_v6, %v1784_v24  ;;  %v1695_v6 = vadd.f32 %v4920_v9, %v4924_v20 }
 0x617   :  { %v2127_v44 = vmul.f32 %v4972_v55, %v2075_v37 }
 0x618   :  { %2587 = vmatmul.f32.gmra.mxu3 %v2237_v62  ;;  %v2238_v7 = vsub.f32 %v2236_v33, %v2237_v62 }
 0x619   :  { %v2156_v36 = vsel %vm1422_vm1, %v2127_v44, 0 }
 0x61a   :  { %v1993_v27 = vpop.f32.mrf.mxu2  ;;  %v2082_v41 = vpop.f32.mrf.mxu3  ;;  %v2239_v23 = vand.u32 4294901760, %v2238_v7  ;;  %v5015_v30 = vand.u32 4294901760, %v2156_v36 }
 0x61b   :  { %v1994_v26 = vadd.f32 %v1993_v27, %v1881_v48 }
 0x61c   :  { %2240 = vmatmul.f32.gmra.mxu0 %v2239_v23  ;;  %2393 = vmatmul.f32.gmra.mxu1 %v5015_v30  ;;  %v2244_v42 = vsub.f32 %v2156_v36, %v5015_v30  ;;  %v1904_v36 = vpop.f32.mrf.mxu1 }
 0x61d   :  { %v2079_v56 = vadd.f32 %v2078_v61, %v1994_v26  ;;  %v1793_v0 = vpop.f32.mrf.mxu0  ;;  %v1691_v61 = vadd.f32 %v4914_v29, %v4918_v45 }
 0x61e   :  { %2487 = vmatmul.f32.gmra.mxu2 %v2244_v42  ;;  %v2245_v60 = vand.u32 4294901760, %v2244_v42 }
 0x61f   :  { %v2128_v16 = vmul.f32 %v4984_v39, %v2079_v56  ;;  %v1789_v7 = vadd.f32 %v1788_v43, %v1691_v61 }
 0x620   :  { %2593 = vmatmul.f32.gmra.mxu3 %v2245_v60  ;;  %v2246_v19 = vsub.f32 %v2244_v42, %v2245_v60 }
 0x621   :  { %v2159_v51 = vsel %vm1422_vm1, %v2128_v16, 0  ;;  %v1899_v23 = vadd.f32 %v1898_v11, %v1789_v7  ;;  %v1794_v16 = vadd.f32 %v1793_v0, %v1695_v6  ;;  %v1707_v6 = vadd.f32 %v4940_v54, %v4945_v47 }
 0x622   :  { %v1997_v15 = vpop.f32.mrf.mxu2  ;;  %v2086_v31 = vpop.f32.mrf.mxu3  ;;  %v2247_v28 = vand.u32 4294901760, %v2246_v19  ;;  %v5023_v50 = vand.u32 4294901760, %v2159_v51 }
 0x623   :  { %v1998_v46 = vadd.f32 %v1997_v15, %v1887_v63  ;;  %v1699_v63 = vadd.f32 %v4926_v32, %v4930_v49 }
 0x624   :  { %2248 = vmatmul.f32.gmra.mxu0 %v2247_v28  ;;  %2397 = vmatmul.f32.gmra.mxu1 %v5023_v50  ;;  %v2252_v18 = vsub.f32 %v2159_v51, %v5023_v50  ;;  %v1910_v13 = vpop.f32.mrf.mxu1 }
 0x625   :  { %v2083_v17 = vadd.f32 %v2082_v41, %v1998_v46  ;;  %v1798_v27 = vpop.f32.mrf.mxu0 }
 0x626   :  { %2492 = vmatmul.f32.gmra.mxu2 %v2252_v18  ;;  %v2253_v4 = vand.u32 4294901760, %v2252_v18 }
 0x627   :  { %v2129_v12 = vmul.f32 %v4972_v55, %v2083_v17 }
 0x628   :  { %2599 = vmatmul.f32.gmra.mxu3 %v2253_v4  ;;  %v2254_v34 = vsub.f32 %v2252_v18, %v2253_v4 }
 0x629   :  { %v2162_v25 = vsel %vm1422_vm1, %v2129_v12, 0  ;;  %v1799_v12 = vadd.f32 %v1798_v27, %v1699_v63 }
 0x62a   :  { %v2001_v33 = vpop.f32.mrf.mxu2  ;;  %v2090_v3 = vpop.f32.mrf.mxu3  ;;  %v2255_v37 = vand.u32 4294901760, %v2254_v34  ;;  %v5031_v62 = vand.u32 4294901760, %v2162_v25 }
 0x62b   :  { %v2002_v5 = vadd.f32 %v2001_v33, %v1893_v58  ;;  %v1911_v33 = vadd.f32 %v1910_v13, %v1799_v12 }
 0x62c   :  { %2256 = vmatmul.f32.gmra.mxu0 %v2255_v37  ;;  %2401 = vmatmul.f32.gmra.mxu1 %v5031_v62  ;;  %v2260_v44 = vsub.f32 %v2162_v25, %v5031_v62  ;;  %v1916_v49 = vpop.f32.mrf.mxu1  ;;  %v1703_v25 = vadd.f32 %v4932_v35, %v4938_v52 }
 0x62d   :  { %v2087_v14 = vadd.f32 %v2086_v31, %v2002_v5  ;;  %v1905_v31 = vadd.f32 %v1904_v36, %v1794_v16  ;;  %v1803_v17 = vpop.f32.mrf.mxu0 }
 0x62e   :  { %2497 = vmatmul.f32.gmra.mxu2 %v2260_v44  ;;  %v2261_v48 = vand.u32 4294901760, %v2260_v44  ;;  %v1804_v36 = vadd.f32 %v1803_v17, %v1703_v25 }
 0x62f   :  { %v2130_v29 = vmul.f32 %v4984_v39, %v2087_v14 }
 0x630   :  { %2605 = vmatmul.f32.gmra.mxu3 %v2261_v48  ;;  %v2262_v45 = vsub.f32 %v2260_v44, %v2261_v48 }
 0x631   :  { %v2165_v41 = vsel %vm1422_vm1, %v2130_v29, 0 }
 0x632   :  { %v2005_v26 = vpop.f32.mrf.mxu2  ;;  %v2094_v42 = vpop.f32.mrf.mxu3  ;;  %v2263_v40 = vand.u32 4294901760, %v2262_v45  ;;  %v5039_v56 = vand.u32 4294901760, %v2165_v41 }
 0x633   :  { %v2006_v60 = vadd.f32 %v2005_v26, %v1899_v23 }
 0x634   :  { %2264 = vmatmul.f32.gmra.mxu0 %v2263_v40  ;;  %2405 = vmatmul.f32.gmra.mxu1 %v5039_v56  ;;  %v2268_v43 = vsub.f32 %v2165_v41, %v5039_v56  ;;  %v1917_v41 = vadd.f32 %v1916_v49, %v1804_v36  ;;  %v1922_v23 = vpop.f32.mrf.mxu1 }
 0x635   :  { %v2091_v19 = vadd.f32 %v2090_v3, %v2006_v60  ;;  %v1808_v29 = vpop.f32.mrf.mxu0 }
 0x636   :  { %2502 = vmatmul.f32.gmra.mxu2 %v2268_v43  ;;  %v2269_v9 = vand.u32 4294901760, %v2268_v43  ;;  %v1809_v16 = vadd.f32 %v1808_v29, %v1707_v6  ;;  %v1719_v29 = vadd.f32 %v4960_v22, %v4965_v53 }
 0x637   :  { %v2131_v20 = vmul.f32 %v4972_v55, %v2091_v19 }
 0x638   :  { %2611 = vmatmul.f32.gmra.mxu3 %v2269_v9  ;;  %v2270_v51 = vsub.f32 %v2268_v43, %v2269_v9 }
 0x639   :  { %v2168_v15 = vsel %vm1422_vm1, %v2131_v20, 0 }
 0x63a   :  { %v2009_v28 = vpop.f32.mrf.mxu2  ;;  %v2098_v46 = vpop.f32.mrf.mxu3  ;;  %v2271_v11 = vand.u32 4294901760, %v2270_v51  ;;  %v5047_v18 = vand.u32 4294901760, %v2168_v15  ;;  %v1711_v51 = vadd.f32 %v4947_v57, %v4952_v1 }
 0x63b   :  { %v2010_v24 = vadd.f32 %v2009_v28, %v1905_v31 }
 0x63c   :  { %2272 = vmatmul.f32.gmra.mxu0 %v2271_v11  ;;  %2409 = vmatmul.f32.gmra.mxu1 %v5047_v18  ;;  %v2276_v4 = vsub.f32 %v2168_v15, %v5047_v18  ;;  %v1923_v15 = vadd.f32 %v1922_v23, %v1809_v16 }
 0x63d   :  { %v2095_v34 = vadd.f32 %v2094_v42, %v2010_v24  ;;  %v1813_v47 = vpop.f32.mrf.mxu0  ;;  %v1928_v24 = vpop.f32.mrf.mxu1 }
 0x63e   :  { %2507 = vmatmul.f32.gmra.mxu2 %v2276_v4  ;;  %v2277_v0 = vand.u32 4294901760, %v2276_v4 }
 0x63f   :  { %v2132_v32 = vmul.f32 %v4984_v39, %v2095_v34 }
 0x640   :  { %2617 = vmatmul.f32.gmra.mxu3 %v2277_v0  ;;  %v2278_v61 = vsub.f32 %v2276_v4, %v2277_v0  ;;  %v1814_v4 = vadd.f32 %v1813_v47, %v1711_v51 }
 0x641   :  { %v2171_v58 = vsel %vm1422_vm1, %v2132_v32, 0  ;;  %v1715_v32 = vadd.f32 %v4954_v2, %v4958_v21 }
 0x642   :  { %v2013_v3 = vpop.f32.mrf.mxu2  ;;  %v2279_v37 = vand.u32 4294901760, %v2278_v61  ;;  %v5055_v5 = vand.u32 4294901760, %v2171_v58  ;;  %v2102_v7 = vpop.f32.mrf.mxu3  ;;  %v1929_v61 = vadd.f32 %v1928_v24, %v1814_v4 }
 0x643   :  { %v2014_v44 = vadd.f32 %v2013_v3, %v1911_v33 }
 0x644   :  { %2280 = vmatmul.f32.gmra.mxu0 %v2279_v37  ;;  %2413 = vmatmul.f32.gmra.mxu1 %v5055_v5  ;;  %v2284_v14 = vsub.f32 %v2171_v58, %v5055_v5 }
 0x645   :  { %v2099_v48 = vadd.f32 %v2098_v46, %v2014_v44  ;;  %v1818_v25 = vpop.f32.mrf.mxu0  ;;  %v1934_v36 = vpop.f32.mrf.mxu1 }
 0x646   :  { %2512 = vmatmul.f32.gmra.mxu2 %v2284_v14  ;;  %v2285_v45 = vand.u32 4294901760, %v2284_v14 }
 0x647   :  { %v2133_v35 = vmul.f32 %v4972_v55, %v2099_v48 }
 0x648   :  { %2623 = vmatmul.f32.gmra.mxu3 %v2285_v45  ;;  %v2286_v52 = vsub.f32 %v2284_v14, %v2285_v45 }
 0x649   :  { %v2174_v27 = vsel %vm1422_vm1, %v2133_v35, 0 }
 0x64a   :  { %v2017_v26 = vpop.f32.mrf.mxu2  ;;  %v2287_v42 = vand.u32 4294901760, %v2286_v52  ;;  %v5063_v40 = vand.u32 4294901760, %v2174_v27  ;;  %v2106_v13 = vpop.f32.mrf.mxu3 }
 0x64b   :  { %v2018_v60 = vadd.f32 %v2017_v26, %v1917_v41 }
 0x64c   :  { %2288 = vmatmul.f32.gmra.mxu0 %v2287_v42  ;;  %2417 = vmatmul.f32.gmra.mxu1 %v5063_v40  ;;  %v2292_v43 = vsub.f32 %v2174_v27, %v5063_v40 }
 0x64d   :  { %v2103_v19 = vadd.f32 %v2102_v7, %v2018_v60  ;;  %v1819_v7 = vadd.f32 %v1818_v25, %v1715_v32  ;;  %v1823_v26 = vpop.f32.mrf.mxu0  ;;  %v1940_v53 = vpop.f32.mrf.mxu1 }
 0x64e   :  { %2517 = vmatmul.f32.gmra.mxu2 %v2292_v43  ;;  %v2293_v9 = vand.u32 4294901760, %v2292_v43  ;;  %v1824_v60 = vadd.f32 %v1823_v26, %v1719_v29 }
 0x64f   :  { %v2134_v54 = vmul.f32 %v4984_v39, %v2103_v19  ;;  %v1935_v35 = vadd.f32 %v1934_v36, %v1819_v7 }
 0x650   :  { %2629 = vmatmul.f32.gmra.mxu3 %v2293_v9  ;;  %v2294_v20 = vsub.f32 %v2292_v43, %v2293_v9  ;;  %v1941_v9 = vadd.f32 %v1940_v53, %v1824_v60 }
 0x651   :  { %v2177_v63 = vsel %vm1422_vm1, %v2134_v54, 0 }
 0x652   :  { %v2021_v31 = vpop.f32.mrf.mxu2  ;;  %v2295_v28 = vand.u32 4294901760, %v2294_v20  ;;  %v5071_v46 = vand.u32 4294901760, %v2177_v63  ;;  %v2110_v1 = vpop.f32.mrf.mxu3 }
 0x653   :  { %v2022_v11 = vadd.f32 %v2021_v31, %v1923_v15 }
 0x654   :  { %2296 = vmatmul.f32.gmra.mxu0 %v2295_v28  ;;  %2421 = vmatmul.f32.gmra.mxu1 %v5071_v46  ;;  %v2300_v17 = vsub.f32 %v2177_v63, %v5071_v46 }
 0x655   :  { %v2107_v12 = vadd.f32 %v2106_v13, %v2022_v11 }
 0x656   :  { %2522 = vmatmul.f32.gmra.mxu2 %v2300_v17  ;;  %v2301_v34 = vand.u32 4294901760, %v2300_v17 }
 0x657   :  { %v2135_v57 = vmul.f32 %v4972_v55, %v2107_v12 }
 0x658   :  { %2635 = vmatmul.f32.gmra.mxu3 %v2301_v34  ;;  %v2302_v0 = vsub.f32 %v2300_v17, %v2301_v34 }
 0x659   :  { %v2180_v49 = vsel %vm1422_vm1, %v2135_v57, 0 }
 0x65a   :  { %v2025_v58 = vpop.f32.mrf.mxu2  ;;  %v2303_v33 = vand.u32 4294901760, %v2302_v0  ;;  %v5079_v3 = vand.u32 4294901760, %v2180_v49  ;;  %v2114_v52 = vpop.f32.mrf.mxu3 }
 0x65b   :  { %v2026_v37 = vadd.f32 %v2025_v58, %v1929_v61 }
 0x65c   :  { %2304 = vmatmul.f32.gmra.mxu0 %v2303_v33  ;;  %2425 = vmatmul.f32.gmra.mxu1 %v5079_v3  ;;  %v2308_v44 = vsub.f32 %v2180_v49, %v5079_v3 }
 0x65d   :  { %v2111_v14 = vadd.f32 %v2110_v1, %v2026_v37 }
 0x65e   :  { %2527 = vmatmul.f32.gmra.mxu2 %v2308_v44  ;;  %v2309_v48 = vand.u32 4294901760, %v2308_v44 }
 0x65f   :  { %v2136_v2 = vmul.f32 %v4984_v39, %v2111_v14 }
 0x660   :  { %2641 = vmatmul.f32.gmra.mxu3 %v2309_v48  ;;  %v2310_v21 = vsub.f32 %v2308_v44, %v2309_v48 }
 0x661   :  { %v2183_v45 = vsel %vm1422_vm1, %v2136_v2, 0 }
 0x662   :  { %v2029_v6 = vpop.f32.mrf.mxu2  ;;  %v2311_v27 = vand.u32 4294901760, %v2310_v21  ;;  %v5087_v41 = vand.u32 4294901760, %v2183_v45  ;;  %v2118_v63 = vpop.f32.mrf.mxu3 }
 0x663   :  { %v2030_v23 = vadd.f32 %v2029_v6, %v1935_v35 }
 0x664   :  { %2312 = vmatmul.f32.gmra.mxu0 %v2311_v27  ;;  %2429 = vmatmul.f32.gmra.mxu1 %v5087_v41  ;;  %v2316_v42 = vsub.f32 %v2183_v45, %v5087_v41 }
 0x665   :  { %v2115_v43 = vadd.f32 %v2114_v52, %v2030_v23 }
 0x666   :  { %2532 = vmatmul.f32.gmra.mxu2 %v2316_v42  ;;  %v2317_v16 = vand.u32 4294901760, %v2316_v42 }
 0x667   :  { %v2137_v22 = vmul.f32 %v4972_v55, %v2115_v43 }
 0x668   :  { %2647 = vmatmul.f32.gmra.mxu3 %v2317_v16  ;;  %v2318_v19 = vsub.f32 %v2316_v42, %v2317_v16 }
 0x669   :  { %v2186_v13 = vsel %vm1422_vm1, %v2137_v22, 0 }
 0x66a   :  { %v2033_v54 = vpop.f32.mrf.mxu2  ;;  %v2319_v47 = vand.u32 4294901760, %v2318_v19  ;;  %v5093_v20 = vand.u32 4294901760, %v2186_v13 }
 0x66b   :  { %v2034_v51 = vadd.f32 %v2033_v54, %v1941_v9 }
 0x66c   :  { %2320 = vmatmul.f32.gmra.mxu0 %v2319_v47  ;;  %2433 = vmatmul.f32.gmra.mxu1 %v5093_v20  ;;  %v2324_v15 = vsub.f32 %v2186_v13, %v5093_v20 }
 0x66d   :  { %v2119_v31 = vadd.f32 %v2118_v63, %v2034_v51 }
 0x66e   :  { %2537 = vmatmul.f32.gmra.mxu2 %v2324_v15  ;;  %v2325_v55 = vand.u32 4294901760, %v2324_v15 }
 0x66f   :  { %v2138_v28 = vmul.f32 %v4984_v39, %v2119_v31 }
 0x670   :  { %2653 = vmatmul.f32.gmra.mxu3 %v2325_v55  ;;  %v2326_v11 = vsub.f32 %v2324_v15, %v2325_v55 }
 0x671   :  { %v2189_v24 = vsel %vm1422_vm1, %v2138_v28, 0 }
 0x672   :  { %v2327_v17 = vand.u32 4294901760, %v2326_v11  ;;  %v5099_v4 = vand.u32 4294901760, %v2189_v24 }
 0x674   :  { %2328 = vmatmul.f32.gmra.mxu0 %v2327_v17  ;;  %2437 = vmatmul.f32.gmra.mxu1 %v5099_v4  ;;  %v2332_v12 = vsub.f32 %v2189_v24, %v5099_v4 }
 0x676   :  { %2542 = vmatmul.f32.gmra.mxu2 %v2332_v12  ;;  %v2333_v34 = vand.u32 4294901760, %v2332_v12 }
 0x678   :  { %2659 = vmatmul.f32.gmra.mxu3 %v2333_v34  ;;  %v2334_v57 = vsub.f32 %v2332_v12, %v2333_v34 }
 0x679   :  { %v5103_v1 = vpop.f32.mrf.mxu1 }
 0x67a   :  { %v2335_v0 = vand.u32 4294901760, %v2334_v57 }
 0x67c   :  { %2336 = vmatmul.f32.gmra.mxu0 %v2335_v0  ;;  %2777 = vmatmul.f32.vlgmr.msra.gmra.mxu1 %v4978_v59 }
 0x681   :  { %v5106_v39 = vpop.f32.mrf.mxu0  ;;  %v5108_v32 = vpop.f32.mrf.mxu1 }
 0x682   :  { %v2468_v45 = vpop.f32.mrf.mxu2  ;;  %v2379_v26 = vadd.f32 %v5103_v1, %v5106_v39 }
 0x684   :  { %2692 = vmatmul.f32.vlgmr.msra.gmra.mxu0 %v4978_v59  ;;  %2781 = vmatmul.f32.gmra.mxu1 %v4991_v8 }
 0x689   :  { %v5112_v49 = vpop.f32.mrf.mxu0  ;;  %v5114_v61 = vpop.f32.mrf.mxu1 }
 0x68a   :  { %v2473_v6 = vpop.f32.mrf.mxu2  ;;  %v2383_v22 = vadd.f32 %v5108_v32, %v5112_v49 }
 0x68c   :  { %2696 = vmatmul.f32.gmra.mxu0 %v4991_v8  ;;  %2785 = vmatmul.f32.gmra.mxu1 %v4999_v10  ;;  %v2474_v54 = vadd.f32 %v2473_v6, %v2383_v22 }
 0x691   :  { %v5118_v25 = vpop.f32.mrf.mxu0  ;;  %v5120_v58 = vpop.f32.mrf.mxu1 }
 0x692   :  { %v2387_v63 = vadd.f32 %v5114_v61, %v5118_v25 }
 0x694   :  { %2700 = vmatmul.f32.gmra.mxu0 %v4999_v10  ;;  %2789 = vmatmul.f32.gmra.mxu1 %v5007_v38 }
 0x699   :  { %v5124_v33 = vpop.f32.mrf.mxu0  ;;  %v5126_v59 = vpop.f32.mrf.mxu1 }
 0x69a   :  { %v2391_v12 = vadd.f32 %v5120_v58, %v5124_v33 }
 0x69c   :  { %2704 = vmatmul.f32.gmra.mxu0 %v5007_v38  ;;  %2793 = vmatmul.f32.gmra.mxu1 %v5015_v30 }
 0x6a1   :  { %v5130_v37 = vpop.f32.mrf.mxu0  ;;  %v5132_v8 = vpop.f32.mrf.mxu1 }
 0x6a2   :  { %v2395_v61 = vadd.f32 %v5126_v59, %v5130_v37 }
 0x6a4   :  { %2708 = vmatmul.f32.gmra.mxu0 %v5015_v30  ;;  %2797 = vmatmul.f32.gmra.mxu1 %v5023_v50 }
 0x6a9   :  { %v5136_v44 = vpop.f32.mrf.mxu0  ;;  %v5138_v10 = vpop.f32.mrf.mxu1 }
 0x6aa   :  { %v2399_v33 = vadd.f32 %v5132_v8, %v5136_v44 }
 0x6ac   :  { %2712 = vmatmul.f32.gmra.mxu0 %v5023_v50  ;;  %2801 = vmatmul.f32.gmra.mxu1 %v5031_v62 }
 0x6b1   :  { %v5142_v7 = vpop.f32.mrf.mxu0  ;;  %v5144_v38 = vpop.f32.mrf.mxu1 }
 0x6b4   :  { %2716 = vmatmul.f32.gmra.mxu0 %v5031_v62  ;;  %2805 = vmatmul.f32.gmra.mxu1 %v5039_v56 }
 0x6b9   :  { %v5148_v14 = vpop.f32.mrf.mxu0  ;;  %v5150_v30 = vpop.f32.mrf.mxu1 }
 0x6bc   :  { %2720 = vmatmul.f32.gmra.mxu0 %v5039_v56  ;;  %2809 = vmatmul.f32.gmra.mxu1 %v5047_v18 }
 0x6c1   :  { %v5154_v36 = vpop.f32.mrf.mxu0  ;;  %v5156_v50 = vpop.f32.mrf.mxu1 }
 0x6c4   :  { %2724 = vmatmul.f32.gmra.mxu0 %v5047_v18  ;;  %2813 = vmatmul.f32.gmra.mxu1 %v5055_v5 }
 0x6c9   :  { %v5160_v48 = vpop.f32.mrf.mxu0  ;;  %v5162_v62 = vpop.f32.mrf.mxu1 }
 0x6cc   :  { %2728 = vmatmul.f32.gmra.mxu0 %v5055_v5  ;;  %2817 = vmatmul.f32.gmra.mxu1 %v5063_v40 }
 0x6d1   :  { %v5166_v2 = vpop.f32.mrf.mxu0  ;;  %v5168_v56 = vpop.f32.mrf.mxu1 }
 0x6d4   :  { %2732 = vmatmul.f32.gmra.mxu0 %v5063_v40  ;;  %2821 = vmatmul.f32.gmra.mxu1 %v5071_v46  ;;  %v2570_v40 = vpop.f32.mrf.mxu3 }
 0x6d9   :  { %v5172_v21 = vpop.f32.mrf.mxu0  ;;  %v5174_v18 = vpop.f32.mrf.mxu1 }
 0x6dc   :  { %2736 = vmatmul.f32.gmra.mxu0 %v5071_v46  ;;  %2825 = vmatmul.f32.gmra.mxu1 %v5079_v3  ;;  %v2576_v46 = vpop.f32.mrf.mxu3 }
 0x6dd   :  { %v2577_v51 = vadd.f32 %v2576_v46, %v2474_v54 }
 0x6e1   :  { %v5178_v29 = vpop.f32.mrf.mxu0  ;;  %v5180_v5 = vpop.f32.mrf.mxu1 }
 0x6e4   :  { %2740 = vmatmul.f32.gmra.mxu0 %v5079_v3  ;;  %2829 = vmatmul.f32.gmra.mxu1 %v5087_v41  ;;  %v2478_v3 = vpop.f32.mrf.mxu2  ;;  %v2582_v43 = vpop.f32.mrf.mxu3 }
 0x6e5   :  { %v2479_v11 = vadd.f32 %v2478_v3, %v2387_v63 }
 0x6e9   :  { %v5184_v35 = vpop.f32.mrf.mxu0  ;;  %v5186_v52 = vpop.f32.mrf.mxu1 }
 0x6ec   :  { %2744 = vmatmul.f32.gmra.mxu0 %v5087_v41  ;;  %2833 = vmatmul.f32.gmra.mxu1 %v5093_v20  ;;  %v2469_v41 = vadd.f32 %v2468_v45, %v2379_v26  ;;  %v2483_v53 = vpop.f32.mrf.mxu2  ;;  %v2588_v47 = vpop.f32.mrf.mxu3 }
 0x6ed   :  { %v2484_v0 = vadd.f32 %v2483_v53, %v2391_v12 }
 0x6ee   :  { %v2571_v16 = vadd.f32 %v2570_v40, %v2469_v41 }
 0x6ef   :  { %v2589_v49 = vadd.f32 %v2588_v47, %v2484_v0  ;;  %v2419_v0 = vadd.f32 %v5162_v62, %v5166_v2 }
 0x6f1   :  { %v5190_v27 = vpop.f32.mrf.mxu0  ;;  %v5192_v23 = vpop.f32.mrf.mxu1 }
 0x6f4   :  { %2748 = vmatmul.f32.gmra.mxu0 %v5093_v20  ;;  %2837 = vmatmul.f32.gmra.mxu1 %v5099_v4  ;;  %v2488_v55 = vpop.f32.mrf.mxu2  ;;  %v2594_v17 = vpop.f32.mrf.mxu3 }
 0x6f5   :  { %v2489_v46 = vadd.f32 %v2488_v55, %v2395_v61 }
 0x6f7   :  { %v2595_v58 = vadd.f32 %v2594_v17, %v2489_v46  ;;  %v2415_v17 = vadd.f32 %v5156_v50, %v5160_v48 }
 0x6f9   :  { %v5198_v42 = vpop.f32.mrf.mxu0  ;;  %v2778_v60 = vpop.f32.mrf.mxu1 }
 0x6fc   :  { %2752 = vmatmul.f32.gmra.mxu0 %v5099_v4  ;;  %v2583_v4 = vadd.f32 %v2582_v43, %v2479_v11  ;;  %v2493_v39 = vpop.f32.mrf.mxu2  ;;  %v2600_v25 = vpop.f32.mrf.mxu3 }
 0x6fd   :  { %v2494_v59 = vadd.f32 %v2493_v39, %v2399_v33  ;;  %v2427_v33 = vadd.f32 %v5174_v18, %v5178_v29  ;;  %v2403_v18 = vadd.f32 %v5138_v10, %v5142_v7  ;;  %v2431_v7 = vadd.f32 %v5180_v5, %v5184_v35 }
 0x6fe   :  { %v2439_v5 = vadd.f32 %v5192_v23, %v5198_v42 }
 0x6ff   :  { %v2601_v22 = vadd.f32 %v2600_v25, %v2494_v59 }
 0x701   :  { %v2693_v19 = vpop.f32.mrf.mxu0  ;;  %v2782_v13 = vpop.f32.mrf.mxu1 }
 0x702   :  { %v2694_v9 = vadd.f32 %v2693_v19, %v2571_v16 }
 0x704   :  { %v2779_v20 = vadd.f32 %v2778_v60, %v2694_v9  ;;  %v5212_v26 = vpop.f32.mrf.mxu2  ;;  %v5217_v16 = vpop.f32.mrf.mxu3 }
 0x705   :  { %v2499_v29 = vadd.f32 %v5212_v26, %v2403_v18 }
 0x706   :  { %3113 = vrot.lane.b32.xlu0 %v2779_v20, %s4351_s4 }
 0x709   :  { %v2697_v15 = vpop.f32.mrf.mxu0  ;;  %v2786_v31 = vpop.f32.mrf.mxu1 }
 0x70a   :  { %v2698_v28 = vadd.f32 %v2697_v15, %v2577_v51  ;;  %v2411_v15 = vadd.f32 %v5150_v30, %v5154_v36 }
 0x70c   :  { %v2783_v24 = vadd.f32 %v2782_v13, %v2698_v28  ;;  %v5223_v53 = vpop.f32.mrf.mxu2  ;;  %v5227_v44 = vpop.f32.mrf.mxu3 }
 0x70e   :  { %3115 = vrot.lane.b32.xlu2 %v2783_v24, %s4351_s4 }
 0x711   :  { %v2701_v34 = vpop.f32.mrf.mxu0  ;;  %v2790_v57 = vpop.f32.mrf.mxu1 }
 0x712   :  { %v2702_v1 = vadd.f32 %v2701_v34, %v2583_v4 }
 0x714   :  { %v2787_v32 = vadd.f32 %v2786_v31, %v2702_v1  ;;  %v2508_v51 = vpop.f32.mrf.mxu2  ;;  %v2618_v63 = vpop.f32.mrf.mxu3 }
 0x715   :  { %v2509_v55 = vadd.f32 %v2508_v51, %v2411_v15 }
 0x716   :  { %3117 = vrot.lane.b32.xlu1 %v2787_v32, %s4351_s4 }
 0x717   :  { %v2619_v11 = vadd.f32 %v2618_v63, %v2509_v55  ;;  %v2407_v55 = vadd.f32 %v5144_v38, %v5148_v14 }
 0x719   :  { %v2705_v45 = vpop.f32.mrf.mxu0  ;;  %v2794_v40 = vpop.f32.mrf.mxu1 }
 0x71a   :  { %v2706_v6 = vadd.f32 %v2705_v45, %v2589_v49  ;;  %v2423_v45 = vadd.f32 %v5168_v56, %v5172_v21 }
 0x71c   :  { %v2791_v3 = vadd.f32 %v2790_v57, %v2706_v6  ;;  %v2513_v28 = vpop.f32.mrf.mxu2  ;;  %v2624_v4 = vpop.f32.mrf.mxu3 }
 0x71d   :  { %v2514_v34 = vadd.f32 %v2513_v28, %v2415_v17 }
 0x71e   :  { %3119 = vrot.lane.b32.xlu1 %v2791_v3, %s4351_s4 }
 0x71f   :  { %v2625_v36 = vadd.f32 %v2624_v4, %v2514_v34 }
 0x721   :  { %v2709_v60 = vpop.f32.mrf.mxu0  ;;  %v2798_v43 = vpop.f32.mrf.mxu1 }
 0x722   :  { %v2710_v41 = vadd.f32 %v2709_v60, %v2595_v58 }
 0x724   :  { %v5219_v37 = vadd.f32 %v2794_v40, %v2710_v41  ;;  %v2518_v30 = vpop.f32.mrf.mxu2  ;;  %v2630_v49 = vpop.f32.mrf.mxu3 }
 0x725   :  { %v2519_v50 = vadd.f32 %v2518_v30, %v2419_v0 }
 0x726   :  { %3121 = vrot.lane.b32.xlu1 %v5219_v37, %s4351_s4 }
 0x727   :  { %v2631_v25 = vadd.f32 %v2630_v49, %v2519_v50 }
 0x728   :  { %2841 = vxpose.xlu0.b32.start [1/2] (short) (narrow) %v2779_v20, 16 }
 0x729   :  { %v2713_v19 = vpop.f32.mrf.mxu0  ;;  %v5225_v13 = vpop.f32.mrf.mxu1 }
 0x72a   :  { %v2714_v9 = vadd.f32 %v2713_v19, %v2601_v22 }
 0x72c   :  { %v2799_v8 = vadd.f32 %v2798_v43, %v2714_v9  ;;  %v2523_v40 = vpop.f32.mrf.mxu2  ;;  %v2636_v62 = vpop.f32.mrf.mxu3 }
 0x72e   :  { %3123 = vrot.lane.b32.xlu1 %v2799_v8, %s4351_s4 }
 0x730   :  { %2842 = vxpose.xlu0.b32.end [2/2] (short) (narrow) %v2783_v24, 16 }
 0x731   :  { %v2717_v54 = vpop.f32.mrf.mxu0  ;;  %v5230_v47 = vpop.f32.mrf.mxu1 }
 0x734   :  { %v2528_v59 = vpop.f32.mrf.mxu2  ;;  %v2642_v21 = vpop.f32.mrf.mxu3 }
 0x735   :  { %v2529_v22 = vadd.f32 %v2528_v59, %v2427_v33 }
 0x737   :  { %v2643_v19 = vadd.f32 %v2642_v21, %v2529_v22 }
 0x738   :  { %2873 = vxpose.xlu0.b32.start [1/2] (short) (narrow) %v2787_v32, 16 }
 0x739   :  { %v2721_v20 = vpop.f32.mrf.mxu0  ;;  %v2810_v31 = vpop.f32.mrf.mxu1 }
 0x73c   :  { %v2533_v4 = vpop.f32.mrf.mxu2  ;;  %v2648_v26 = vpop.f32.mrf.mxu3 }
 0x73d   :  { %v2534_v14 = vadd.f32 %v2533_v4, %v2431_v7  ;;  %v3500_v4 = vld [vmem:[%s5616_s5 + $0x18] sm:$0xff]  ;;  %v3499_v7 = vld [vmem:[%s5616_s5 + $0x10] sm:$0xff] }
 0x740   :  { %2874 = vxpose.xlu0.b32.end [2/2] (short) (narrow) %v2791_v3, 16  ;;  %v2524_v3 = vadd.f32 %v2523_v40, %v2423_v45 }
 0x741   :  { %v2725_v24 = vpop.f32.mrf.mxu0  ;;  %v2814_v1 = vpop.f32.mrf.mxu1 }
 0x742   :  { %v2726_v12 = vadd.f32 %v2725_v24, %v2619_v11  ;;  %v2637_v2 = vadd.f32 %v2636_v62, %v2524_v3  ;;  %v2504_v11 = vadd.f32 %v5223_v53, %v2407_v55  ;;  %v2435_v53 = vadd.f32 %v5186_v52, %v5190_v27 }
 0x744   :  { %v5236_v57 = vadd.f32 %v2810_v31, %v2726_v12  ;;  %v2607_v31 = vadd.f32 %v5217_v16, %v2499_v29  ;;  %v2613_v17 = vadd.f32 %v5227_v44, %v2504_v11  ;;  %v2649_v16 = vadd.f32 %v2648_v26, %v2534_v14  ;;  %v3497_v14 = vld [vmem:[%s5616_s5] sm:$0xff] }
 0x745   :  { %v3563_v26 = vand.u32 4294901760, %v3499_v7 }
 0x746   :  { %3129 = vrot.lane.b32.xlu2 %v5236_v57, %s4351_s4  ;;  %v2718_v28 = vadd.f32 %v2717_v54, %v2607_v31 }
 0x749   :  { %v2729_v39 = vpop.f32.mrf.mxu0  ;;  %v2818_v61 = vpop.f32.mrf.mxu1 }
 0x74a   :  { %v2730_v32 = vadd.f32 %v2729_v39, %v2625_v36 }
 0x74c   :  { %v5242_v48 = vadd.f32 %v2814_v1, %v2730_v32 }
 0x74e   :  { %3131 = vrot.lane.b32.xlu2 %v5242_v48, %s4351_s4 }
 0x751   :  { %v2733_v6 = vpop.f32.mrf.mxu0  ;;  %v2822_v60 = vpop.f32.mrf.mxu1 }
 0x752   :  { %v2734_v46 = vadd.f32 %v2733_v6, %v2631_v25 }
 0x754   :  { %v5248_v58 = vadd.f32 %v2818_v61, %v2734_v46 }
 0x756   :  { %3133 = vrot.lane.b32.xlu2 %v5248_v58, %s4351_s4 }
 0x759   :  { %v2737_v43 = vpop.f32.mrf.mxu0  ;;  %v2826_v63 = vpop.f32.mrf.mxu1 }
 0x75a   :  { %v2738_v41 = vadd.f32 %v2737_v43, %v2637_v2 }
 0x75c   :  { %v5254_v56 = vadd.f32 %v2822_v60, %v2738_v41 }
 0x75e   :  { %3135 = vrot.lane.b32.xlu2 %v5254_v56, %s4351_s4 }
 0x761   :  { %v2741_v9 = vpop.f32.mrf.mxu0  ;;  %v2830_v44 = vpop.f32.mrf.mxu1 }
 0x762   :  { %v2742_v51 = vadd.f32 %v2741_v9, %v2643_v19 }
 0x763   :  { %2905 = vxpose.xlu1.b32.start [1/2] (short) (narrow) %v5219_v37, 16  ;;  %v2803_v37 = vadd.f32 %v5225_v13, %v2718_v28  ;;  %v2538_v13 = vpop.f32.mrf.mxu2 }
 0x764   :  { %v5259_v15 = vadd.f32 %v2826_v63, %v2742_v51  ;;  %v2539_v24 = vadd.f32 %v2538_v13, %v2435_v53 }
 0x766   :  { %3137 = vrot.lane.b32.xlu2 %v5259_v15, %s4351_s4 }
 0x768   :  { %v3116_v3 = vpop.permute.xlu2 %3115 }
 0x769   :  { %v2745_v38 = vpop.f32.mrf.mxu0  ;;  %v2834_v30 = vpop.f32.mrf.mxu1 }
 0x76a   :  { %v2746_v54 = vadd.f32 %v2745_v38, %v2649_v16 }
 0x76b   :  { %2906 = vxpose.xlu1.b32.end [2/2] (short) (narrow) %v2799_v8, 16  ;;  %v2722_v8 = vadd.f32 %v2721_v20, %v2613_v17  ;;  %v2654_v20 = vpop.f32.mrf.mxu3  ;;  %v2543_v1 = vpop.f32.mrf.mxu2 }
 0x76c   :  { %v5279_v34 = vadd.f32 %v2830_v44, %v2746_v54  ;;  %v2544_v36 = vadd.f32 %v2543_v1, %v2439_v5  ;;  %v3567_v44 = vand.u32 4294901760, %v3497_v14 }
 0x76d   :  { %v2807_v10 = vadd.f32 %v5230_v47, %v2722_v8  ;;  %v2655_v47 = vadd.f32 %v2654_v20, %v2539_v24 }
 0x771   :  { %v2749_v12 = vpop.f32.mrf.mxu0  ;;  %v2838_v49 = vpop.f32.mrf.mxu1 }
 0x772   :  { %v2750_v35 = vadd.f32 %v2749_v12, %v2655_v47  ;;  %v3729_v12 = vsub.f32 %v3497_v14, %v3567_v44 }
 0x773   :  { %v2660_v27 = vpop.f32.mrf.mxu3 }
 0x774   :  { %v5285_v52 = vadd.f32 %v2834_v30, %v2750_v35  ;;  %v2661_v39 = vadd.f32 %v2660_v27, %v2544_v36  ;;  %v3730_v35 = vand.u32 4294901760, %v3729_v12 }
 0x776   :  { %v3731_v30 = vsub.f32 %v3729_v12, %v3730_v35 }
 0x778   :  { %v3114_v61 = vpop.permute.xlu0 %3113  ;;  %v3732_v36 = vand.u32 4294901760, %v3731_v30 }
 0x779   :  { %v2753_v0 = vpop.f32.mrf.mxu0 }
 0x77a   :  { %v2754_v32 = vadd.f32 %v2753_v0, %v2661_v39 }
 0x77c   :  { %v5289_v50 = vadd.f32 %v2838_v49, %v2754_v32 }
 0x788   :  { %v3118_v23 = vpop.permute.xlu1 %3117 }
 0x790   :  { %v3120_v42 = vpop.permute.xlu1 %3119 }
 0x798   :  { %v3122_v25 = vpop.permute.xlu1 %3121 }
 0x7a0   :  { %v3124_v40 = vpop.permute.xlu1 %3123  ;;  %v3130_v2 = vpop.permute.xlu2 %3129 }
 0x7a8   :  { %v3132_v60 = vpop.permute.xlu2 %3131 }
 0x7ae   :  { %3125 = vrot.lane.b32.xlu0 %v2803_v37, %s4351_s4 }
 0x7b0   :  { %v3134_v41 = vpop.permute.xlu2 %3133 }
 0x7b6   :  { %3127 = vrot.lane.b32.xlu0 %v2807_v10, %s4351_s4 }
 0x7b8   :  { %v3136_v59 = vpop.permute.xlu2 %3135 }
 0x7c0   :  { %v3138_v8 = vpop.permute.xlu2 %3137 }
 0x7c5   :  { %3139 = vrot.lane.b32.xlu1 %v5279_v34, %s4351_s4 }
 0x7cc   :  { %v5293_v45 = vpop.trf.xlu0 }
 0x7cd   :  { %3141 = vrot.lane.b32.xlu1 %v5285_v52, %s4351_s4 }
 0x7d4   :  { %v5295_v6 = vpop.trf.xlu0 }
 0x7d5   :  { %3143 = vrot.lane.b32.xlu1 %v5289_v50, %s4351_s4 }
 0x7d8   :  { %2937 = vxpose.xlu0.b32.start [1/2] (short) (narrow) %v2803_v37, 16 }
 0x7dc   :  { %v5297_v46 = vpop.trf.xlu0 }
 0x7e0   :  { %2938 = vxpose.xlu0.b32.end [2/2] (short) (narrow) %v2807_v10, 16  ;;  %v3561_v10 = vand.u32 4294901760, %v3500_v4 }
 0x7e2   :  { %3917 = vmatpush.msrb.mxu1 %v3561_v10  ;;  %3562 = vmatpush.msra.mxu2 %v3561_v10 }
 0x7e4   :  { %v5299_v62 = vpop.trf.xlu0  ;;  %3919 = vmatpush.msrb.mxu1 %v3563_v26  ;;  %3564 = vmatpush.msra.mxu2 %v3563_v26 }
 0x7e8   :  { %3193 = vxpose.xlu0.b32.start [1/2] (short) (narrow) %v3118_v23, 16 }
 0x7f0   :  { %3194 = vxpose.xlu0.b32.end [2/2] (short) (narrow) %v3120_v42, 16 }
 0x7f8   :  { %3225 = vxpose.xlu0.b32.start [1/2] (short) (narrow) %v3122_v25, 16 }
 0x800   :  { %3226 = vxpose.xlu0.b32.end [2/2] (short) (narrow) %v3124_v40, 16 }
 0x807   :  { %v5301_v22 = vpop.trf.xlu1 }
 0x80a   :  { %3161 = vxpose.xlu1.b32.start [1/2] (short) (narrow) %v3114_v61, 16 }
 0x80f   :  { %v5303_v21 = vpop.trf.xlu1 }
 0x812   :  { %3162 = vxpose.xlu1.b32.end [2/2] (short) (narrow) %v3116_v3, 16 }
 0x820   :  { %v3126_v33 = vpop.permute.xlu0 %3125 }
 0x821   :  { %3257 = vxpose.xlu0.b32.start [1/2] (short) (narrow) %v3126_v33, 16 }
 0x828   :  { %v3128_v43 = vpop.permute.xlu0 %3127 }
 0x829   :  { %3258 = vxpose.xlu0.b32.end [2/2] (short) (narrow) %v3128_v43, 16 }
 0x831   :  { %3321 = vxpose.xlu0.b32.start [1/2] (short) (narrow) %v3134_v41, 16 }
 0x837   :  { %v3140_v9 = vpop.permute.xlu1 %3139 }
 0x839   :  { %3322 = vxpose.xlu0.b32.end [2/2] (short) (narrow) %v3136_v59, 16 }
 0x83f   :  { %v5309_v63 = vpop.permute.xlu1 %3141 }
 0x847   :  { %v5311_v29 = vpop.permute.xlu1 %3143 }
 0x87c   :  { %v5305_v19 = vpop.trf.xlu0 }
 0x884   :  { %v5307_v51 = vpop.trf.xlu0 }
 0x88c   :  { %v3209_v18 = vpop.trf.xlu0 }
 0x894   :  { %v5313_v31 = vpop.trf.xlu0 }
 0x89c   :  { %v5316_v28 = vpop.trf.xlu0 }
 0x8a4   :  { %v5319_v37 = vpop.trf.xlu0 }
 0x8ae   :  { %v3177_v55 = vpop.trf.xlu1 }
 0x8af   :  { %3433 = vrot.lane.b32.xlu1 %v3177_v55, %s4352_s12 }
 0x8b6   :  { %v3178_v11 = vpop.trf.xlu1 }
 0x8b7   :  { %3435 = vrot.lane.b32.xlu2 %v3178_v11, %s4352_s12 }
 0x8bf   :  { %3437 = vrot.lane.b32.xlu2 %v3209_v18, %s4352_s12 }
 0x8c5   :  { %v3273_v17 = vpop.trf.xlu0 }
 0x8c6   :  { %3445 = vrot.lane.b32.xlu0 %v3273_v17, %s4352_s12 }
 0x8cd   :  { %v3274_v17 = vpop.trf.xlu0 }
 0x8e4   :  { %3001 = vxpose.xlu1.b32.start [1/2] (short) (narrow) %v5248_v58, 16  ;;  %v3711_v58 = vsub.f32 %v3500_v4, %v3561_v10 }
 0x8e5   :  { %3289 = vxpose.xlu2.b32.start [1/2] (short) (narrow) %v3130_v2, 16 }
 0x8e6   :  { %3813 = vmatpush.msrb.mxu0 %v3711_v58 }
 0x8e8   :  { %2969 = vxpose.xlu0.b32.start [1/2] (short) (narrow) %v5236_v57, 16  ;;  %v3498_v57 = vld [vmem:[%s5616_s5 + $0x8] sm:$0xff]  ;;  %s4353_s5 = smov [#allocation8]  }
 0x8e9   :  { %v3565_v38 = vand.u32 4294901760, %v3498_v57  ;;  %s4219_s9 = sshll.u32 %s4353_s5, 4  ;;  %s4220_s9 = int_to_ptr.vmem [resolvable:$true] %s4219_s9 }
 0x8eb   :  { %v3723_v13 = vsub.f32 %v3498_v57, %v3565_v38  ;;  %3921 = vmatpush.msrb.mxu1 %v3565_v38  ;;  %3566 = vmatpush.msra.mxu2 %v3565_v38 }
 0x8ec   :  { %3002 = vxpose.xlu1.b32.end [2/2] (short) (narrow) %v5254_v56, 16  ;;  %v3717_v56 = vsub.f32 %v3499_v7, %v3563_v26 }
 0x8ed   :  { %3290 = vxpose.xlu2.b32.end [2/2] (short) (narrow) %v3132_v60, 16  ;;  %v3724_v20 = vand.u32 4294901760, %v3723_v13  ;;  %3923 = vmatpush.msrb.mxu1 %v3567_v44 }
 0x8ee   :  { %v3718_v53 = vand.u32 4294901760, %v3717_v56  ;;  %3816 = vmatpush.msrb.mxu0 %v3717_v56  ;;  %3568 = vmatpush.msra.mxu2 %v3567_v44 }
 0x8ef   :  { %v3725_v5 = vsub.f32 %v3723_v13, %v3724_v20 }
 0x8f0   :  { %2970 = vxpose.xlu0.b32.end [2/2] (short) (narrow) %v5242_v48, 16  ;;  %v3712_v48 = vand.u32 4294901760, %v3711_v58  ;;  %v3719_v24 = vsub.f32 %v3717_v56, %v3718_v53  ;;  %3819 = vmatpush.msrb.mxu0 %v3723_v13 }
 0x8f1   :  { %v3726_v1 = vand.u32 4294901760, %v3725_v5 }
 0x8f2   :  { %v3713_v16 = vsub.f32 %v3711_v58, %v3712_v48  ;;  %v3720_v47 = vand.u32 4294901760, %v3719_v24  ;;  %3822 = vmatpush.msrb.mxu0 %v3729_v12  ;;  %4036 = vmatpush.msrb.mxu2 %v3712_v48 }
 0x8f4   :  { %3353 = vxpose.xlu1.b32.start [1/2] (short) (narrow) %v3138_v8, 16  ;;  %v3714_v54 = vand.u32 4294901760, %v3713_v16  ;;  %4040 = vmatpush.msrb.mxu2 %v3718_v53 }
 0x8f6   :  { %3715 = vmatpush.msra.mxu3 %v3714_v54  ;;  %4044 = vmatpush.msrb.mxu2 %v3724_v20 }
 0x8f8   :  { %3721 = vmatpush.msra.mxu3 %v3720_v47  ;;  %4048 = vmatpush.msrb.mxu2 %v3730_v35 }
 0x8fa   :  { %3727 = vmatpush.msra.mxu3 %v3726_v1 }
 0x8fc   :  { %3354 = vxpose.xlu1.b32.end [2/2] (short) (narrow) %v3140_v9, 16  ;;  %3733 = vmatpush.msra.mxu3 %v3732_v36 }
 0x8fe   :  { %4127 = vmatpush.msrb.mxu3 %v3561_v10 }
 0x900   :  { %4129 = vmatpush.msrb.mxu3 %v3563_v26 }
 0x902   :  { %4131 = vmatpush.msrb.mxu3 %v3565_v38 }
 0x904   :  { %4133 = vmatpush.msrb.mxu3 %v3567_v44 }
 0x911   :  { %v3436_v27 = vpop.permute.xlu2 %3435 }
 0x912   :  { %v3482_v0 = vsel %vm89_vm0, %v5295_v6, %v3436_v27 }
 0x913   :  { %v3505_v39 = vsel %vm1422_vm1, %v3482_v0, 0 }
 0x914   :  { %v5345_v61 = vand.u32 4294901760, %v3505_v39 }
 0x916   :  { %v3578_v6 = vsub.f32 %v3505_v39, %v5345_v61 }
 0x918   :  { %v3579_v41 = vand.u32 4294901760, %v3578_v6 }
 0x919   :  { %v3438_v23 = vpop.permute.xlu2 %3437 }
 0x91a   :  { %v3483_v40 = vsel %vm89_vm0, %v5297_v46, %v3438_v23  ;;  %v3580_v59 = vsub.f32 %v3578_v6, %v3579_v41 }
 0x91c   :  { %v3581_v9 = vand.u32 4294901760, %v3580_v59 }
 0x921   :  { %v3434_v32 = vpop.permute.xlu1 %3433 }
 0x922   :  { %v3481_v49 = vsel %vm89_vm0, %v5293_v45, %v3434_v32  ;;  %v3508_v45 = vsel %vm1422_vm1, %v3483_v40, 0 }
 0x923   :  { %v3502_v42 = vsel %vm1422_vm1, %v3481_v49, 0  ;;  %v5355_v60 = vand.u32 4294901760, %v3508_v45 }
 0x924   :  { %v5347_v25 = vand.u32 4294901760, %v3502_v42 }
 0x925   :  { %v3586_v46 = vsub.f32 %v3508_v45, %v5355_v60 }
 0x926   :  { %v3570_v3 = vsub.f32 %v3502_v42, %v5347_v25  ;;  %3735 = vmatmul.f32.vlgmr.msra.gmra.mxu3 %v5347_v25 }
 0x927   :  { %v3587_v18 = vand.u32 4294901760, %v3586_v46 }
 0x928   :  { %v3571_v2 = vand.u32 4294901760, %v3570_v3  ;;  %3825 = vmatmul.f32.vlgmr.msrb.gmra.mxu0 %v3570_v3 }
 0x929   :  { %v3588_v55 = vsub.f32 %v3586_v46, %v3587_v18 }
 0x92a   :  { %v3572_v33 = vsub.f32 %v3570_v3, %v3571_v2  ;;  %3927 = vmatmul.f32.vlgmr.msrb.gmra.mxu1 %v3571_v2 }
 0x92b   :  { %v3589_v11 = vand.u32 4294901760, %v3588_v55 }
 0x92c   :  { %v3573_v43 = vand.u32 4294901760, %v3572_v33 }
 0x92e   :  { %3574 = vmatmul.f32.vlgmr.msra.gmra.mxu2 %v3573_v43  ;;  %3739 = vmatmul.f32.gmra.mxu3 %v5345_v61 }
 0x930   :  { %3830 = vmatmul.f32.gmra.mxu0 %v3578_v6 }
 0x932   :  { %3933 = vmatmul.f32.gmra.mxu1 %v3579_v41 }
 0x936   :  { %3582 = vmatmul.f32.gmra.mxu2 %v3581_v9  ;;  %3743 = vmatmul.f32.gmra.mxu3 %v5355_v60 }
 0x938   :  { %3835 = vmatmul.f32.gmra.mxu0 %v3586_v46 }
 0x93a   :  { %3939 = vmatmul.f32.gmra.mxu1 %v3587_v18 }
 0x93e   :  { %3590 = vmatmul.f32.gmra.mxu2 %v3589_v11 }
 0x956   :  { %3439 = vrot.lane.b32.xlu2 %v5313_v31, %s4352_s12  ;;  %v5374_v31 = vpop.trf.xlu0 }
 0x95e   :  { %3441 = vrot.lane.b32.xlu2 %v5316_v28, %s4352_s12 }
 0x966   :  { %3443 = vrot.lane.b32.xlu2 %v5319_v37, %s4352_s12  ;;  %v5379_v37 = vpop.trf.xlu0 }
 0x96e   :  { %3447 = vrot.lane.b32.xlu2 %v3274_v17, %s4352_s12  ;;  %v3446_v16 = vpop.permute.xlu0 %3445 }
 0x96f   :  { %v3487_v44 = vsel %vm89_vm0, %v5305_v19, %v3446_v16 }
 0x970   :  { %v3520_v24 = vsel %vm1422_vm1, %v3487_v44, 0 }
 0x971   :  { %v5402_v5 = vand.u32 4294901760, %v3520_v24 }
 0x973   :  { %v3618_v30 = vsub.f32 %v3520_v24, %v5402_v5 }
 0x975   :  { %v3619_v49 = vand.u32 4294901760, %v3618_v30 }
 0x977   :  { %v3620_v42 = vsub.f32 %v3618_v30, %v3619_v49 }
 0x979   :  { %v3621_v40 = vand.u32 4294901760, %v3620_v42 }
 0x97e   :  { %v3305_v8 = vpop.trf.xlu2 }
 0x97f   :  { %3449 = vrot.lane.b32.xlu2 %v3305_v8, %s4352_s12 }
 0x986   :  { %v5376_v28 = vpop.trf.xlu2 }
 0x988   :  { %v5368_v4 = vpop.trf.xlu1 }
 0x990   :  { %v5370_v10 = vpop.trf.xlu1 }
 0x998   :  { %v3369_v7 = vpop.trf.xlu1 }
 0x999   :  { %3457 = vrot.lane.b32.xlu0 %v3369_v7, %s4352_s12 }
 0x9a0   :  { %v3370_v55 = vpop.trf.xlu1 }
 0x9a5   :  { %3385 = vxpose.xlu2.b32.start [1/2] (short) (narrow) %v5309_v63, 16 }
 0x9ad   :  { %3386 = vxpose.xlu2.b32.end [2/2] (short) (narrow) %v5311_v29, 16 }
 0x9b0   :  { %v3440_v58 = vpop.permute.xlu2 %3439 }
 0x9b1   :  { %v3484_v26 = vsel %vm89_vm0, %v5299_v62, %v3440_v58 }
 0x9b2   :  { %v3511_v57 = vsel %vm1422_vm1, %v3484_v26, 0 }
 0x9b3   :  { %v5384_v48 = vand.u32 4294901760, %v3511_v57 }
 0x9b5   :  { %v3594_v56 = vsub.f32 %v3511_v57, %v5384_v48  ;;  %3747 = vmatmul.f32.gmra.mxu3 %v5384_v48 }
 0x9b7   :  { %3840 = vmatmul.f32.gmra.mxu0 %v3594_v56  ;;  %v3595_v63 = vand.u32 4294901760, %v3594_v56 }
 0x9b8   :  { %v3442_v38 = vpop.permute.xlu2 %3441 }
 0x9b9   :  { %v3485_v29 = vsel %vm89_vm0, %v5301_v22, %v3442_v38  ;;  %3945 = vmatmul.f32.gmra.mxu1 %v3595_v63  ;;  %v3596_v14 = vsub.f32 %v3594_v56, %v3595_v63 }
 0x9ba   :  { %v3514_v53 = vsel %vm1422_vm1, %v3485_v29, 0 }
 0x9bb   :  { %v5391_v62 = vand.u32 4294901760, %v3514_v53  ;;  %3033 = vxpose.xlu0.b32.start [1/2] (short) (narrow) %v5259_v15, 16  ;;  %v3597_v13 = vand.u32 4294901760, %v3596_v14 }
 0x9bd   :  { %v3602_v54 = vsub.f32 %v3514_v53, %v5391_v62  ;;  %3598 = vmatmul.f32.gmra.mxu2 %v3597_v13  ;;  %3751 = vmatmul.f32.gmra.mxu3 %v5391_v62 }
 0x9bf   :  { %3845 = vmatmul.f32.gmra.mxu0 %v3602_v54  ;;  %v3603_v22 = vand.u32 4294901760, %v3602_v54 }
 0x9c0   :  { %v3444_v20 = vpop.permute.xlu2 %3443 }
 0x9c1   :  { %v3486_v12 = vsel %vm89_vm0, %v5303_v21, %v3444_v20  ;;  %3951 = vmatmul.f32.gmra.mxu1 %v3603_v22  ;;  %v3604_v47 = vsub.f32 %v3602_v54, %v3603_v22 }
 0x9c2   :  { %v3517_v15 = vsel %vm1422_vm1, %v3486_v12, 0 }
 0x9c3   :  { %v5404_v19 = vand.u32 4294901760, %v3517_v15  ;;  %3034 = vxpose.xlu0.b32.end [2/2] (short) (narrow) %v5279_v34, 16  ;;  %v3605_v35 = vand.u32 4294901760, %v3604_v47 }
 0x9c5   :  { %v3610_v1 = vsub.f32 %v3517_v15, %v5404_v19  ;;  %3606 = vmatmul.f32.gmra.mxu2 %v3605_v35  ;;  %3755 = vmatmul.f32.gmra.mxu3 %v5404_v19 }
 0x9c7   :  { %3850 = vmatmul.f32.gmra.mxu0 %v3610_v1  ;;  %v3611_v21 = vand.u32 4294901760, %v3610_v1 }
 0x9c8   :  { %v3448_v36 = vpop.permute.xlu2 %3447 }
 0x9c9   :  { %v3488_v27 = vsel %vm89_vm0, %v5307_v51, %v3448_v36  ;;  %3957 = vmatmul.f32.gmra.mxu1 %v3611_v21  ;;  %v3612_v0 = vsub.f32 %v3610_v1, %v3611_v21  ;;  %v2985_v51 = vpop.trf.xlu0 }
 0x9ca   :  { %v3523_v39 = vsel %vm1422_vm1, %v3488_v27, 0 }
 0x9cb   :  { %v5413_v32 = vand.u32 4294901760, %v3523_v39  ;;  %v3613_v34 = vand.u32 4294901760, %v3612_v0 }
 0x9cd   :  { %3614 = vmatmul.f32.gmra.mxu2 %v3613_v34  ;;  %3759 = vmatmul.f32.gmra.mxu3 %v5402_v5  ;;  %v3626_v23 = vsub.f32 %v3523_v39, %v5413_v32 }
 0x9cf   :  { %3855 = vmatmul.f32.gmra.mxu0 %v3618_v30  ;;  %v3627_v3 = vand.u32 4294901760, %v3626_v23 }
 0x9d1   :  { %3963 = vmatmul.f32.gmra.mxu1 %v3619_v49  ;;  %v3628_v6 = vsub.f32 %v3626_v23, %v3627_v3  ;;  %v2986_v8 = vpop.trf.xlu0 }
 0x9d3   :  { %v3629_v43 = vand.u32 4294901760, %v3628_v6  ;;  %v5467_v6 = vpop.f32.mrf.mxu3 }
 0x9d5   :  { %3622 = vmatmul.f32.gmra.mxu2 %v3621_v40  ;;  %3763 = vmatmul.f32.gmra.mxu3 %v5413_v32 }
 0x9d7   :  { %3860 = vmatmul.f32.gmra.mxu0 %v3626_v23 }
 0x9d9   :  { %v3450_v2 = vpop.permute.xlu2 %3449  ;;  %3969 = vmatmul.f32.gmra.mxu1 %v3627_v3 }
 0x9da   :  { %v3489_v45 = vsel %vm89_vm0, %v2985_v51, %v3450_v2  ;;  %v5469_v2 = vpop.f32.mrf.mxu2 }
 0x9db   :  { %v3526_v33 = vsel %vm1422_vm1, %v3489_v45, 0  ;;  %v5471_v45 = vpop.f32.mrf.mxu3 }
 0x9dc   :  { %v5420_v41 = vand.u32 4294901760, %v3526_v33 }
 0x9dd   :  { %3630 = vmatmul.f32.gmra.mxu2 %v3629_v43 }
 0x9de   :  { %v3634_v46 = vsub.f32 %v3526_v33, %v5420_v41  ;;  %3767 = vmatmul.f32.gmra.mxu3 %v5420_v41 }
 0x9e0   :  { %3865 = vmatmul.f32.gmra.mxu0 %v3634_v46  ;;  %v3635_v59 = vand.u32 4294901760, %v3634_v46 }
 0x9e2   :  { %3975 = vmatmul.f32.gmra.mxu1 %v3635_v59  ;;  %v3636_v9 = vsub.f32 %v3634_v46, %v3635_v59  ;;  %v5473_v33 = vpop.f32.mrf.mxu2 }
 0x9e3   :  { %v5475_v43 = vpop.f32.mrf.mxu3 }
 0x9e4   :  { %v3637_v18 = vand.u32 4294901760, %v3636_v9 }
 0x9e6   :  { %3638 = vmatmul.f32.gmra.mxu2 %v3637_v18 }
 0x9ea   :  { %v5477_v46 = vpop.f32.mrf.mxu2 }
 0xa16   :  { %3451 = vrot.lane.b32.xlu2 %v5376_v28, %s4352_s12 }
 0xa1e   :  { %3453 = vrot.lane.b32.xlu2 %v5374_v31, %s4352_s12 }
 0xa26   :  { %3455 = vrot.lane.b32.xlu2 %v5379_v37, %s4352_s12  ;;  %v3458_v37 = vpop.permute.xlu0 %3457 }
 0xa2e   :  { %3459 = vrot.lane.b32.xlu2 %v3370_v55, %s4352_s12 }
 0xa38   :  { %v5479_v59 = vpop.f32.mrf.mxu3 }
 0xa3e   :  { %v3401_v11 = vpop.trf.xlu2 }
 0xa3f   :  { %3461 = vrot.lane.b32.xlu1 %v3401_v11, %s4352_s12 }
 0xa40   :  { %v5481_v9 = vpop.f32.mrf.mxu2  ;;  %v5483_v18 = vpop.f32.mrf.mxu3 }
 0xa46   :  { %v3402_v17 = vpop.trf.xlu2 }
 0xa47   :  { %3463 = vrot.lane.b32.xlu1 %v3402_v17, %s4352_s12 }
 0xa48   :  { %v5485_v55 = vpop.f32.mrf.mxu2  ;;  %v5487_v11 = vpop.f32.mrf.mxu3 }
 0xa50   :  { %v5489_v17 = vpop.f32.mrf.mxu2 }
 0xa54   :  { %3065 = vxpose.xlu2.b32.start [1/2] (short) (narrow) %v5285_v52, 16 }
 0xa5c   :  { %3066 = vxpose.xlu2.b32.end [2/2] (short) (narrow) %v5289_v50, 16 }
 0xa5f   :  { %v3049_v14 = vpop.trf.xlu0 }
 0xa60   :  { %v3493_v53 = vsel %vm89_vm0, %v3049_v14, %v3458_v37 }
 0xa67   :  { %v3050_v35 = vpop.trf.xlu0 }
 0xa70   :  { %v3452_v7 = vpop.permute.xlu2 %3451 }
 0xa71   :  { %v3490_v31 = vsel %vm89_vm0, %v2986_v8, %v3452_v7  ;;  %v5491_v8 = vpop.f32.mrf.mxu3  ;;  %v5493_v7 = vpop.f32.mrf.mxu2 }
 0xa72   :  { %v3529_v28 = vsel %vm1422_vm1, %v3490_v31, 0 }
 0xa73   :  { %v5437_v58 = vand.u32 4294901760, %v3529_v28 }
 0xa75   :  { %v3642_v26 = vsub.f32 %v3529_v28, %v5437_v58  ;;  %3771 = vmatmul.f32.gmra.mxu3 %v5437_v58 }
 0xa77   :  { %3870 = vmatmul.f32.gmra.mxu0 %v3642_v26  ;;  %v3643_v57 = vand.u32 4294901760, %v3642_v26 }
 0xa78   :  { %v3454_v56 = vpop.permute.xlu2 %3453 }
 0xa79   :  { %v3491_v52 = vsel %vm89_vm0, %v5368_v4, %v3454_v56  ;;  %3981 = vmatmul.f32.gmra.mxu1 %v3643_v57  ;;  %v3644_v50 = vsub.f32 %v3642_v26, %v3643_v57  ;;  %v3538_v4 = vsel %vm1422_vm1, %v3493_v53, 0  ;;  %v5495_v31 = vpop.f32.mrf.mxu3  ;;  %v5497_v26 = vpop.f32.mrf.mxu2 }
 0xa7a   :  { %v3532_v63 = vsel %vm1422_vm1, %v3491_v52, 0  ;;  %v5455_v12 = vand.u32 4294901760, %v3538_v4 }
 0xa7b   :  { %v5444_v38 = vand.u32 4294901760, %v3532_v63  ;;  %v3645_v29 = vand.u32 4294901760, %v3644_v50 }
 0xa7c   :  { %v3666_v1 = vsub.f32 %v3538_v4, %v5455_v12 }
 0xa7d   :  { %v3650_v16 = vsub.f32 %v3532_v63, %v5444_v38  ;;  %3646 = vmatmul.f32.gmra.mxu2 %v3645_v29  ;;  %3775 = vmatmul.f32.gmra.mxu3 %v5444_v38 }
 0xa7e   :  { %v3667_v34 = vand.u32 4294901760, %v3666_v1 }
 0xa7f   :  { %3875 = vmatmul.f32.gmra.mxu0 %v3650_v16  ;;  %v3651_v13 = vand.u32 4294901760, %v3650_v16 }
 0xa80   :  { %v3456_v44 = vpop.permute.xlu2 %3455  ;;  %v3668_v23 = vsub.f32 %v3666_v1, %v3667_v34 }
 0xa81   :  { %v3492_v54 = vsel %vm89_vm0, %v5370_v10, %v3456_v44  ;;  %3987 = vmatmul.f32.gmra.mxu1 %v3651_v13  ;;  %v3652_v22 = vsub.f32 %v3650_v16, %v3651_v13  ;;  %v5503_v50 = vpop.f32.mrf.mxu3  ;;  %v5509_v4 = vpop.f32.mrf.mxu2 }
 0xa82   :  { %v3535_v24 = vsel %vm1422_vm1, %v3492_v54, 0  ;;  %v3669_v42 = vand.u32 4294901760, %v3668_v23 }
 0xa83   :  { %v5453_v20 = vand.u32 4294901760, %v3535_v24  ;;  %v3653_v47 = vand.u32 4294901760, %v3652_v22 }
 0xa85   :  { %v3658_v15 = vsub.f32 %v3535_v24, %v5453_v20  ;;  %3654 = vmatmul.f32.gmra.mxu2 %v3653_v47  ;;  %3779 = vmatmul.f32.gmra.mxu3 %v5453_v20 }
 0xa87   :  { %3880 = vmatmul.f32.gmra.mxu0 %v3658_v15  ;;  %v3659_v30 = vand.u32 4294901760, %v3658_v15 }
 0xa88   :  { %v3460_v10 = vpop.permute.xlu2 %3459 }
 0xa89   :  { %v3494_v21 = vsel %vm89_vm0, %v3050_v35, %v3460_v10  ;;  %3993 = vmatmul.f32.gmra.mxu1 %v3659_v30  ;;  %v3660_v36 = vsub.f32 %v3658_v15, %v3659_v30 }
 0xa8a   :  { %v3541_v27 = vsel %vm1422_vm1, %v3494_v21, 0 }
 0xa8b   :  { %v5462_v0 = vand.u32 4294901760, %v3541_v27  ;;  %v3661_v39 = vand.u32 4294901760, %v3660_v36 }
 0xa8d   :  { %3662 = vmatmul.f32.gmra.mxu2 %v3661_v39  ;;  %3783 = vmatmul.f32.gmra.mxu3 %v5455_v12  ;;  %v3674_v49 = vsub.f32 %v3541_v27, %v5462_v0 }
 0xa8f   :  { %3885 = vmatmul.f32.gmra.mxu0 %v3666_v1  ;;  %v3675_v40 = vand.u32 4294901760, %v3674_v49 }
 0xa91   :  { %3999 = vmatmul.f32.gmra.mxu1 %v3667_v34  ;;  %v3676_v3 = vsub.f32 %v3674_v49, %v3675_v40 }
 0xa93   :  { %v3677_v51 = vand.u32 4294901760, %v3676_v3 }
 0xa95   :  { %3670 = vmatmul.f32.gmra.mxu2 %v3669_v42  ;;  %3787 = vmatmul.f32.gmra.mxu3 %v5462_v0 }
 0xa97   :  { %3890 = vmatmul.f32.gmra.mxu0 %v3674_v49 }
 0xa99   :  { %4005 = vmatmul.f32.gmra.mxu1 %v3675_v40 }
 0xa9d   :  { %3678 = vmatmul.f32.gmra.mxu2 %v3677_v51 }
 0xab1   :  { %v3462_v28 = vpop.permute.xlu1 %3461 }
 0xab9   :  { %v3464_v29 = vpop.permute.xlu1 %3463 }
 0xaed   :  { %v3081_v37 = vpop.trf.xlu2 }
 0xaee   :  { %v3495_v57 = vsel %vm89_vm0, %v3081_v37, %v3462_v28 }
 0xaef   :  { %v3544_v56 = vsel %vm1422_vm1, %v3495_v57, 0  ;;  %v3741_v57 = vadd.f32 %v5471_v45, %v5473_v33  ;;  %v3749_v33 = vadd.f32 %v5479_v59, %v5481_v9 }
 0xaf0   :  { %v5501_v52 = vand.u32 4294901760, %v3544_v56 }
 0xaf2   :  { %v3682_v63 = vsub.f32 %v3544_v56, %v5501_v52  ;;  %3791 = vmatmul.f32.gmra.mxu3 %v5501_v52 }
 0xaf4   :  { %3895 = vmatmul.f32.gmra.mxu0 %v3682_v63  ;;  %v3683_v14 = vand.u32 4294901760, %v3682_v63 }
 0xaf5   :  { %v3082_v16 = vpop.trf.xlu2 }
 0xaf6   :  { %v3496_v53 = vsel %vm89_vm0, %v3082_v16, %v3464_v29  ;;  %4011 = vmatmul.f32.gmra.mxu1 %v3683_v14  ;;  %v3684_v13 = vsub.f32 %v3682_v63, %v3683_v14 }
 0xaf7   :  { %v3547_v44 = vsel %vm1422_vm1, %v3496_v53, 0 }
 0xaf8   :  { %v5511_v54 = vand.u32 4294901760, %v3547_v44  ;;  %v3685_v22 = vand.u32 4294901760, %v3684_v13  ;;  %v3772_v47 = vpop.f32.mrf.mxu3 }
 0xafa   :  { %v3690_v24 = vsub.f32 %v3547_v44, %v5511_v54  ;;  %3686 = vmatmul.f32.gmra.mxu2 %v3685_v22  ;;  %3795 = vmatmul.f32.gmra.mxu3 %v5511_v54 }
 0xafc   :  { %3900 = vmatmul.f32.gmra.mxu0 %v3690_v24  ;;  %v3691_v15 = vand.u32 4294901760, %v3690_v24 }
 0xafe   :  { %4017 = vmatmul.f32.gmra.mxu1 %v3691_v15  ;;  %v3692_v35 = vsub.f32 %v3690_v24, %v3691_v15 }
 0xb00   :  { %v3647_v1 = vpop.f32.mrf.mxu2  ;;  %v3693_v30 = vand.u32 4294901760, %v3692_v35  ;;  %v3776_v21 = vpop.f32.mrf.mxu3 }
 0xb01   :  { %v5515_v10 = vadd.f32 %v3772_v47, %v3647_v1 }
 0xb02   :  { %3694 = vmatmul.f32.gmra.mxu2 %v3693_v30  ;;  %4135 = vmatmul.f32.vlgmr.msrb.gmra.mxu3 %v5347_v25 }
 0xb08   :  { %v3655_v36 = vpop.f32.mrf.mxu2  ;;  %v3780_v39 = vpop.f32.mrf.mxu3 }
 0xb09   :  { %v5518_v27 = vadd.f32 %v3776_v21, %v3655_v36 }
 0xb0a   :  { %4050 = vmatmul.f32.vlgmr.msrb.gmra.mxu2 %v5347_v25  ;;  %4139 = vmatmul.f32.gmra.mxu3 %v5345_v61  ;;  %v3826_v25 = vpop.f32.mrf.mxu0 }
 0xb10   :  { %v3663_v34 = vpop.f32.mrf.mxu2  ;;  %v3784_v23 = vpop.f32.mrf.mxu3 }
 0xb11   :  { %v5522_v49 = vadd.f32 %v3780_v39, %v3663_v34  ;;  %v3753_v39 = vadd.f32 %v5483_v18, %v5485_v55  ;;  %v3761_v55 = vadd.f32 %v5491_v8, %v5493_v7  ;;  %v3769_v7 = vadd.f32 %v5503_v50, %v5509_v4 }
 0xb12   :  { %4054 = vmatmul.f32.gmra.mxu2 %v5345_v61  ;;  %4143 = vmatmul.f32.gmra.mxu3 %v5355_v60 }
 0xb18   :  { %v3671_v42 = vpop.f32.mrf.mxu2  ;;  %v5550_v61 = vpop.f32.mrf.mxu3 }
 0xb19   :  { %v5526_v40 = vadd.f32 %v3784_v23, %v3671_v42 }
 0xb1a   :  { %4058 = vmatmul.f32.gmra.mxu2 %v5355_v60  ;;  %4147 = vmatmul.f32.gmra.mxu3 %v5384_v48  ;;  %v3928_v60 = vpop.f32.mrf.mxu1 }
 0xb22   :  { %4062 = vmatmul.f32.gmra.mxu2 %v5384_v48  ;;  %4151 = vmatmul.f32.gmra.mxu3 %v5391_v62  ;;  %v5554_v48 = vpop.f32.mrf.mxu2 }
 0xb2a   :  { %4066 = vmatmul.f32.gmra.mxu2 %v5391_v62  ;;  %4155 = vmatmul.f32.gmra.mxu3 %v5404_v19 }
 0xb32   :  { %4070 = vmatmul.f32.gmra.mxu2 %v5404_v19  ;;  %4159 = vmatmul.f32.gmra.mxu3 %v5402_v5  ;;  %v3934_v19 = vpop.f32.mrf.mxu1 }
 0xb3a   :  { %4074 = vmatmul.f32.gmra.mxu2 %v5402_v5  ;;  %4163 = vmatmul.f32.gmra.mxu3 %v5413_v32  ;;  %v3831_v5 = vpop.f32.mrf.mxu0  ;;  %v3940_v3 = vpop.f32.mrf.mxu1 }
 0xb3b   :  { %v3832_v16 = vadd.f32 %v3831_v5, %v3741_v57  ;;  %v3757_v5 = vadd.f32 %v5487_v11, %v5489_v17  ;;  %v3765_v17 = vadd.f32 %v5495_v31, %v5497_v26 }
 0xb3d   :  { %v3935_v13 = vadd.f32 %v3934_v19, %v3832_v16 }
 0xb42   :  { %4078 = vmatmul.f32.gmra.mxu2 %v5413_v32  ;;  %4167 = vmatmul.f32.gmra.mxu3 %v5420_v41  ;;  %v3946_v29 = vpop.f32.mrf.mxu1 }
 0xb4a   :  { %4082 = vmatmul.f32.gmra.mxu2 %v5420_v41  ;;  %4171 = vmatmul.f32.gmra.mxu3 %v5437_v58  ;;  %v3952_v47 = vpop.f32.mrf.mxu1 }
 0xb52   :  { %4086 = vmatmul.f32.gmra.mxu2 %v5437_v58  ;;  %4175 = vmatmul.f32.gmra.mxu3 %v5444_v38 }
 0xb5a   :  { %4090 = vmatmul.f32.gmra.mxu2 %v5444_v38  ;;  %4179 = vmatmul.f32.gmra.mxu3 %v5453_v20  ;;  %v3836_v38 = vpop.f32.mrf.mxu0 }
 0xb62   :  { %4094 = vmatmul.f32.gmra.mxu2 %v5453_v20  ;;  %4183 = vmatmul.f32.gmra.mxu3 %v5455_v12  ;;  %v3737_v20 = vadd.f32 %v5467_v6, %v5469_v2  ;;  %v3841_v37 = vpop.f32.mrf.mxu0  ;;  %v3745_v6 = vadd.f32 %v5475_v43, %v5477_v46  ;;  %v3958_v46 = vpop.f32.mrf.mxu1 }
 0xb63   :  { %v3842_v36 = vadd.f32 %v3841_v37, %v3749_v33 }
 0xb64   :  { %v3827_v28 = vadd.f32 %v3826_v25, %v3737_v20  ;;  %v3837_v24 = vadd.f32 %v3836_v38, %v3745_v6 }
 0xb65   :  { %v3947_v34 = vadd.f32 %v3946_v29, %v3842_v36 }
 0xb66   :  { %v3929_v56 = vadd.f32 %v3928_v60, %v3827_v28  ;;  %v3941_v15 = vadd.f32 %v3940_v3, %v3837_v24 }
 0xb6a   :  { %4098 = vmatmul.f32.gmra.mxu2 %v5455_v12  ;;  %4187 = vmatmul.f32.gmra.mxu3 %v5462_v0  ;;  %v3846_v2 = vpop.f32.mrf.mxu0  ;;  %v3964_v9 = vpop.f32.mrf.mxu1 }
 0xb6b   :  { %v3847_v60 = vadd.f32 %v3846_v2, %v3753_v39 }
 0xb6d   :  { %v3953_v19 = vadd.f32 %v3952_v47, %v3847_v60 }
 0xb72   :  { %4102 = vmatmul.f32.gmra.mxu2 %v5462_v0  ;;  %4191 = vmatmul.f32.gmra.mxu3 %v5501_v52  ;;  %v3851_v30 = vpop.f32.mrf.mxu0  ;;  %v3970_v57 = vpop.f32.mrf.mxu1 }
 0xb73   :  { %v3852_v20 = vadd.f32 %v3851_v30, %v3757_v5 }
 0xb75   :  { %v3792_v62 = vpop.f32.mrf.mxu3 }
 0xb7a   :  { %4106 = vmatmul.f32.gmra.mxu2 %v5501_v52  ;;  %4195 = vmatmul.f32.gmra.mxu3 %v5511_v54  ;;  %v3976_v8 = vpop.f32.mrf.mxu1 }
 0xb7d   :  { %v3687_v32 = vpop.f32.mrf.mxu2  ;;  %v3796_v41 = vpop.f32.mrf.mxu3 }
 0xb7e   :  { %v5558_v58 = vadd.f32 %v3792_v62, %v3687_v32  ;;  %v3856_v62 = vpop.f32.mrf.mxu0 }
 0xb82   :  { %4110 = vmatmul.f32.gmra.mxu2 %v5511_v54  ;;  %v3982_v31 = vpop.f32.mrf.mxu1 }
 0xb85   :  { %v3695_v12 = vpop.f32.mrf.mxu2  ;;  %v4136_v0 = vpop.f32.mrf.mxu3 }
 0xb86   :  { %v5563_v51 = vadd.f32 %v3796_v41, %v3695_v12  ;;  %v3861_v18 = vpop.f32.mrf.mxu0 }
 0xb8a   :  { %v3988_v50 = vpop.f32.mrf.mxu1 }
 0xb8d   :  { %v4051_v52 = vpop.f32.mrf.mxu2  ;;  %v4140_v63 = vpop.f32.mrf.mxu3 }
 0xb8e   :  { %v4052_v14 = vadd.f32 %v4051_v52, %v3929_v56  ;;  %v3857_v56 = vadd.f32 %v3856_v62, %v3761_v55  ;;  %v3866_v11 = vpop.f32.mrf.mxu0 }
 0xb8f   :  { %v3867_v24 = vadd.f32 %v3866_v11, %v3769_v7 }
 0xb90   :  { %v4137_v53 = vadd.f32 %v4136_v0, %v4052_v14  ;;  %v3959_v0 = vadd.f32 %v3958_v46, %v3852_v20 }
 0xb91   :  { %v3977_v26 = vadd.f32 %v3976_v8, %v3867_v24 }
 0xb92   :  { %4199 = vst.msk [vmem:[#allocation8] sm:$0xff] %vm89_vm0, %v4137_v53  ;;  %v3862_v53 = vadd.f32 %v3861_v18, %v3765_v17 }
 0xb95   :  { %v4055_v44 = vpop.f32.mrf.mxu2  ;;  %v4144_v54 = vpop.f32.mrf.mxu3 }
 0xb96   :  { %v4056_v22 = vadd.f32 %v4055_v44, %v3935_v13  ;;  %v3871_v2 = vpop.f32.mrf.mxu0  ;;  %v3971_v13 = vadd.f32 %v3970_v57, %v3862_v53 }
 0xb98   :  { %v4141_v45 = vadd.f32 %v4140_v63, %v4056_v22  ;;  %v3965_v63 = vadd.f32 %v3964_v9, %v3857_v56 }
 0xb9a   :  { %4200 = vst.msk [vmem:[#allocation8 + $0x8] sm:$0xff] %vm89_vm0, %v4141_v45 }
 0xb9d   :  { %v4059_v35 = vpop.f32.mrf.mxu2  ;;  %v4148_v1 = vpop.f32.mrf.mxu3 }
 0xb9e   :  { %v4060_v21 = vadd.f32 %v4059_v35, %v3941_v15  ;;  %v3876_v35 = vpop.f32.mrf.mxu0 }
 0xb9f   :  { %v3877_v46 = vadd.f32 %v3876_v35, %v5518_v27 }
 0xba0   :  { %v4145_v43 = vadd.f32 %v4144_v54, %v4060_v21 }
 0xba2   :  { %4201 = vst.msk [vmem:[#allocation8 + $0x10] sm:$0xff] %vm89_vm0, %v4145_v43 }
 0xba5   :  { %v4063_v23 = vpop.f32.mrf.mxu2  ;;  %v4152_v42 = vpop.f32.mrf.mxu3 }
 0xba6   :  { %v4064_v25 = vadd.f32 %v4063_v23, %v3947_v34  ;;  %v3881_v34 = vpop.f32.mrf.mxu0  ;;  %v3989_v23 = vadd.f32 %v3988_v50, %v3877_v46 }
 0xba8   :  { %v4149_v59 = vadd.f32 %v4148_v1, %v4064_v25  ;;  %v3872_v1 = vadd.f32 %v3871_v2, %v5515_v10  ;;  %v3882_v10 = vadd.f32 %v3881_v34, %v5522_v49 }
 0xbaa   :  { %4202 = vst.msk [vmem:[#allocation8 + $0x18] sm:$0xff] %vm89_vm0, %v4149_v59  ;;  %v3983_v4 = vadd.f32 %v3982_v31, %v3872_v1 }
 0xbad   :  { %v4067_v32 = vpop.f32.mrf.mxu2  ;;  %v4156_v41 = vpop.f32.mrf.mxu3 }
 0xbae   :  { %v4068_v38 = vadd.f32 %v4067_v32, %v3953_v19  ;;  %v3886_v9 = vpop.f32.mrf.mxu0 }
 0xbaf   :  { %v3887_v27 = vadd.f32 %v3886_v9, %v5526_v40 }
 0xbb0   :  { %v4153_v12 = vadd.f32 %v4152_v42, %v4068_v38  ;;  %v3994_v42 = vpop.f32.mrf.mxu1 }
 0xbb1   :  { %v3995_v5 = vadd.f32 %v3994_v42, %v3882_v10 }
 0xbb2   :  { %4203 = vst.msk [vmem:[#allocation8 + $0x20] sm:$0xff] %vm89_vm0, %v4153_v12  ;;  %v3789_v12 = vadd.f32 %v5550_v61, %v5554_v48 }
 0xbb5   :  { %v4071_v3 = vpop.f32.mrf.mxu2  ;;  %v4160_v28 = vpop.f32.mrf.mxu3 }
 0xbb6   :  { %v4072_v37 = vadd.f32 %v4071_v3, %v3959_v0  ;;  %v3891_v55 = vpop.f32.mrf.mxu0 }
 0xbb7   :  { %v3892_v3 = vadd.f32 %v3891_v55, %v3789_v12 }
 0xbb8   :  { %v4157_v52 = vadd.f32 %v4156_v41, %v4072_v37  ;;  %v4000_v41 = vpop.f32.mrf.mxu1 }
 0xbb9   :  { %v4001_v18 = vadd.f32 %v4000_v41, %v3887_v27 }
 0xbba   :  { %4204 = vst.msk [vmem:[#allocation8 + $0x28] sm:$0xff] %vm89_vm0, %v4157_v52 }
 0xbbd   :  { %v4075_v29 = vpop.f32.mrf.mxu2  ;;  %v4164_v14 = vpop.f32.mrf.mxu3 }
 0xbbe   :  { %v4076_v16 = vadd.f32 %v4075_v29, %v3965_v63  ;;  %v3896_v52 = vpop.f32.mrf.mxu0 }
 0xbbf   :  { %v3897_v17 = vadd.f32 %v3896_v52, %v5558_v58 }
 0xbc0   :  { %v4161_v6 = vadd.f32 %v4160_v28, %v4076_v16  ;;  %v4006_v37 = vpop.f32.mrf.mxu1 }
 0xbc1   :  { %v4007_v56 = vadd.f32 %v4006_v37, %v3892_v3 }
 0xbc2   :  { %4205 = vst.msk [vmem:[#allocation8 + $0x30] sm:$0xff] %vm89_vm0, %v4161_v6 }
 0xbc5   :  { %v4079_v44 = vpop.f32.mrf.mxu2  ;;  %v4168_v54 = vpop.f32.mrf.mxu3 }
 0xbc6   :  { %v4080_v22 = vadd.f32 %v4079_v44, %v3971_v13  ;;  %v3901_v53 = vpop.f32.mrf.mxu0 }
 0xbc7   :  { %v3902_v6 = vadd.f32 %v3901_v53, %v5563_v51 }
 0xbc8   :  { %v4165_v47 = vadd.f32 %v4164_v14, %v4080_v22  ;;  %v4012_v29 = vpop.f32.mrf.mxu1 }
 0xbc9   :  { %v4013_v61 = vadd.f32 %v4012_v29, %v3897_v17 }
 0xbca   :  { %4206 = vst.msk [vmem:[#allocation8 + $0x38] sm:$0xff] %vm89_vm0, %v4165_v47 }
 0xbcd   :  { %v4083_v45 = vpop.f32.mrf.mxu2  ;;  %v4172_v33 = vpop.f32.mrf.mxu3 }
 0xbce   :  { %v4084_v15 = vadd.f32 %v4083_v45, %v3977_v26 }
 0xbd0   :  { %v4169_v30 = vadd.f32 %v4168_v54, %v4084_v15  ;;  %v4018_v7 = vpop.f32.mrf.mxu1 }
 0xbd1   :  { %v4019_v2 = vadd.f32 %v4018_v7, %v3902_v6 }
 0xbd2   :  { %4207 = vst.msk [vmem:[#allocation8 + $0x40] sm:$0xff] %vm89_vm0, %v4169_v30 }
 0xbd5   :  { %v4087_v21 = vpop.f32.mrf.mxu2  ;;  %v4176_v36 = vpop.f32.mrf.mxu3 }
 0xbd6   :  { %v4088_v43 = vadd.f32 %v4087_v21, %v3983_v4 }
 0xbd8   :  { %v4173_v39 = vadd.f32 %v4172_v33, %v4088_v43 }
 0xbda   :  { %4208 = vst.msk [vmem:[#allocation8 + $0x48] sm:$0xff] %vm89_vm0, %v4173_v39 }
 0xbdd   :  { %v4091_v25 = vpop.f32.mrf.mxu2  ;;  %v4180_v62 = vpop.f32.mrf.mxu3 }
 0xbde   :  { %v4092_v60 = vadd.f32 %v4091_v25, %v3989_v23 }
 0xbe0   :  { %v4177_v59 = vadd.f32 %v4176_v36, %v4092_v60 }
 0xbe2   :  { %4209 = vst.msk [vmem:[#allocation8 + $0x50] sm:$0xff] %vm89_vm0, %v4177_v59 }
 0xbe5   :  { %v4095_v19 = vpop.f32.mrf.mxu2  ;;  %v4184_v20 = vpop.f32.mrf.mxu3 }
 0xbe6   :  { %v4096_v32 = vadd.f32 %v4095_v19, %v3995_v5 }
 0xbe8   :  { %v4181_v38 = vadd.f32 %v4180_v62, %v4096_v32 }
 0xbea   :  { %4210 = vst.msk [vmem:[#allocation8 + $0x58] sm:$0xff] %vm89_vm0, %v4181_v38 }
 0xbed   :  { %v4099_v49 = vpop.f32.mrf.mxu2  ;;  %v4188_v57 = vpop.f32.mrf.mxu3 }
 0xbee   :  { %v4100_v0 = vadd.f32 %v4099_v49, %v4001_v18 }
 0xbf0   :  { %v4185_v28 = vadd.f32 %v4184_v20, %v4100_v0 }
 0xbf2   :  { %4211 = vst.msk [vmem:[#allocation8 + $0x60] sm:$0xff] %vm89_vm0, %v4185_v28 }
 0xbf5   :  { %v4103_v40 = vpop.f32.mrf.mxu2  ;;  %v4192_v48 = vpop.f32.mrf.mxu3 }
 0xbf6   :  { %v4104_v11 = vadd.f32 %v4103_v40, %v4007_v56 }
 0xbf8   :  { %v4189_v63 = vadd.f32 %v4188_v57, %v4104_v11 }
 0xbfa   :  { %4212 = vst.msk [vmem:[#allocation8 + $0x68] sm:$0xff] %vm89_vm0, %v4189_v63 }
 0xbfd   :  { %v4107_v14 = vpop.f32.mrf.mxu2  ;;  %v4196_v44 = vpop.f32.mrf.mxu3 }
 0xbfe   :  { %v4108_v16 = vadd.f32 %v4107_v14, %v4013_v61 }
 0xc00   :  { %v4193_v8 = vadd.f32 %v4192_v48, %v4108_v16 }
 0xc02   :  { %4213 = vst.msk [vmem:[#allocation8 + $0x70] sm:$0xff] %vm89_vm0, %v4193_v8 }
 0xc05   :  { %v4111_v13 = vpop.f32.mrf.mxu2 }
 0xc06   :  { %v4112_v58 = vadd.f32 %v4111_v13, %v4019_v2 }
 0xc08   :  { %v4197_v54 = vadd.f32 %v4196_v44, %v4112_v58 }
 0xc0a   :  { %4214 = vst.msk [vmem:[#allocation8 + $0x78] sm:$0xff] %vm89_vm0, %v4197_v54 }
 0xc0b   :  { %4227 = dma.vmem_to_hbm [thread:$0]  %s4220_s9, 2048, %s4222_s0, [#allocation4], %s4347_s29, %s4347_s29, %s4348_s30  }
 0xc0c   :  { %4344 = dma.done.wait [#allocation4], 2048  }
 0xc0d   :  { %4345 = vsyncadd [#allocation4], 4294965248 }
 0xc0e   :  { %4232 = vsyncpa [#allocation3], 1 }
 0xc0f   :  { %4233 = vsyncpa [#allocation6], 1 }
 0xc10   :  { %4234 = vsyncpa [#allocation4], 1 }

// kernel: tpu_custom_call.1
= control target key start
LH: loop header
LB: loop body
LE: loop exit
PB: predicated region body
PF: predicated region fallthrough
CT: control target
= control target key end

     0   :  { %11 = vsyncpa [#allocation3], 0  ;;  %s2494_s0 = inlined_call_operand.hbm [shape: f32[8,16,16], index: 0, kind: input, shape index: {}]   ;;  %s2495_s1 = inlined_call_operand.vmem [shape: f32[16,32], index: 1, kind: input, shape index: {}]   ;;  %s2496_s2 = inlined_call_operand.hbm [shape: f32[16,32], index: 2, kind: input, shape index: {}]   ;;  %s2497_s3 = inlined_call_operand.vmem [shape: f32[32,32], index: 3, kind: input, shape index: {}]   ;;  %s2498_s4 = inlined_call_operand.hbm [shape: f32[32,32], index: 4, kind: input, shape index: {}]   ;;  %s2499_s5 = inlined_call_operand.vmem [shape: f32[32,16], index: 5, kind: input, shape index: {}]   ;;  %s2500_s6 = inlined_call_operand.hbm [shape: f32[8,16,16], index: 6, kind: output, shape index: {}]  }
   0x1   :  { %12 = vsyncpa [#allocation6], 0 }
   0x2   :  { %13 = vsyncpa [#allocation4], 0  ;;  %s33_s23 = sshll.u32 %s2496_s2, 4  ;;  %s2096_s24 = smov [#allocation5]   ;;  %s34_s23 = int_to_ptr.hbm [resolvable:$true] %s33_s23 }
   0x3   :  { %s35_s25 = sshll.u32 %s2096_s24, 4  ;;  %s18_s28 = sshll.u32 %s2494_s0, 4  ;;  %s36_s25 = int_to_ptr.vmem [resolvable:$true] %s35_s25  ;;  %s19_s28 = int_to_ptr.hbm [resolvable:$true] %s18_s28 }
   0x4   :  { %s2097_s29 = smov 128   ;;  %s2098_s30 = smov 8  }
   0x5   :  { %41 = dma.hbm_to_vmem [thread:$0]  %s34_s23, 256, %s36_s25, [#allocation6], %s2097_s29, %s2097_s29, %s2098_s30  }
   0x6   :  { %s2099_s7 = smov [#allocation2]   ;;  %s48_s2 = sshll.u32 %s2498_s4, 4  ;;  %s49_s2 = int_to_ptr.hbm [resolvable:$true] %s48_s2 }
   0x7   :  { %s20_s8 = sshll.u32 %s2099_s7, 4  ;;  %s2100_s0 = smov [#allocation7]   ;;  %s21_s8 = int_to_ptr.vmem [resolvable:$true] %s20_s8 }
   0x8   :  { %26 = dma.hbm_to_vmem [thread:$0]  %s19_s28, 2048, %s21_s8, [#allocation3], %s2097_s29, %s2097_s29, %s2098_s30  }
   0x9   :  { %s50_s11 = sshll.u32 %s2100_s0, 4  ;;  %s51_s11 = int_to_ptr.vmem [resolvable:$true] %s50_s11 }
   0xa   :  { %56 = dma.hbm_to_vmem [thread:$0]  %s49_s2, 512, %s51_s11, [#allocation6], %s2097_s29, %s2097_s29, %s2098_s30  }
   0xb   :  { %2090 = dma.done.wait [#allocation3], 2048  }
   0xc   :  { %2091 = vsyncadd [#allocation3], 4294965248 }
   0xd   :  { %2092 = dma.done.wait [#allocation6], 768  }
   0xe   :  { %2093 = vsyncadd [#allocation6], 4294966528  ;;  %v88_v0 = vld [vmem:[#allocation5 + $0x8] sm:$0xff]  ;;  %v87_v1 = vld [vmem:[#allocation5] sm:$0xff]  ;;  %vm89_vm0 = vcmask 130048   ;;  %s2101_s4 = smov 112  }
   0xf   :  { %152 = vmatpush.msra.mxu0 %v88_v0  ;;  %v71_v2 = vld [vmem:[#allocation2] sm:$0xff]  ;;  %v72_v3 = vld [vmem:[#allocation2 + $0x8] sm:$0xff]  ;;  %v73_v4 = vld [vmem:[#allocation2 + $0x10] sm:$0xff]  ;;  %s2102_s12 = smov 16   ;;  %vm863_vm1 = vcmask 261120   ;;  %s1907_s0 = sshll.u32 %s2500_s6, 4  ;;  %s1908_s0 = int_to_ptr.hbm [resolvable:$true] %s1907_s0 }
  0x10   :  { %v74_v5 = vld [vmem:[#allocation2 + $0x18] sm:$0xff]  ;;  %v75_v6 = vld [vmem:[#allocation2 + $0x20] sm:$0xff]  ;;  %v76_v7 = vld [vmem:[#allocation2 + $0x28] sm:$0xff] }
  0x11   :  { %153 = vmatpush.msra.mxu0 %v87_v1  ;;  %v77_v8 = vld [vmem:[#allocation2 + $0x30] sm:$0xff]  ;;  %v78_v9 = vld [vmem:[#allocation2 + $0x38] sm:$0xff]  ;;  %v79_v10 = vld [vmem:[#allocation2 + $0x40] sm:$0xff] }
  0x12   :  { %1921 = vmatmul.msk.f32.vlgmr.msra.gmra.mxu0 %vm89_vm0, %v71_v2  ;;  %v80_v11 = vld [vmem:[#allocation2 + $0x48] sm:$0xff]  ;;  %v81_v12 = vld [vmem:[#allocation2 + $0x50] sm:$0xff]  ;;  %v82_v13 = vld [vmem:[#allocation2 + $0x58] sm:$0xff] }
  0x13   :  { %v83_v14 = vld [vmem:[#allocation2 + $0x60] sm:$0xff]  ;;  %v84_v15 = vld [vmem:[#allocation2 + $0x68] sm:$0xff]  ;;  %v85_v16 = vld [vmem:[#allocation2 + $0x70] sm:$0xff] }
  0x14   :  { %v86_v39 = vld [vmem:[#allocation2 + $0x78] sm:$0xff]  ;;  %v861_v60 = vld [vmem:[%s2497_s3 + $0x10] sm:$0xff]  ;;  %v860_v61 = vld [vmem:[%s2497_s3 + $0x8] sm:$0xff] }
  0x15   :  { %v862_v59 = vld [vmem:[%s2497_s3 + $0x18] sm:$0xff]  ;;  %v859_v62 = vld [vmem:[%s2497_s3] sm:$0xff] }
  0x16   :  { %924 = vmatpush.msra.mxu1 %v862_v59 }
  0x18   :  { %925 = vmatpush.msra.mxu1 %v861_v60 }
  0x1a   :  { %1922 = vmatmul.msk.f32.gmra.mxu0 %vm89_vm0, %v72_v3  ;;  %926 = vmatpush.msra.mxu1 %v860_v61 }
  0x1c   :  { %927 = vmatpush.msra.mxu1 %v859_v62 }
  0x22   :  { %1923 = vmatmul.msk.f32.gmra.mxu0 %vm89_vm0, %v73_v4 }
  0x2a   :  { %1924 = vmatmul.msk.f32.gmra.mxu0 %vm89_vm0, %v74_v5 }
  0x32   :  { %1925 = vmatmul.msk.f32.gmra.mxu0 %vm89_vm0, %v75_v6 }
  0x3a   :  { %1926 = vmatmul.msk.f32.gmra.mxu0 %vm89_vm0, %v76_v7 }
  0x42   :  { %1927 = vmatmul.msk.f32.gmra.mxu0 %vm89_vm0, %v77_v8 }
  0x4a   :  { %1928 = vmatmul.msk.f32.gmra.mxu0 %vm89_vm0, %v78_v9  ;;  %v998_v9 = vld [vmem:[#allocation7 + $0x18] sm:$0xff] }
  0x4b   :  { %1059 = vmatpush.msra.mxu2 %v998_v9 }
  0x52   :  { %1929 = vmatmul.msk.f32.gmra.mxu0 %vm89_vm0, %v79_v10 }
  0x5a   :  { %1930 = vmatmul.msk.f32.gmra.mxu0 %vm89_vm0, %v80_v11 }
  0x62   :  { %1931 = vmatmul.msk.f32.gmra.mxu0 %vm89_vm0, %v81_v12  ;;  %v997_v12 = vld [vmem:[#allocation7 + $0x10] sm:$0xff] }
  0x63   :  { %1060 = vmatpush.msra.mxu2 %v997_v12 }
  0x6a   :  { %1932 = vmatmul.msk.f32.gmra.mxu0 %vm89_vm0, %v82_v13  ;;  %v996_v13 = vld [vmem:[#allocation7 + $0x8] sm:$0xff] }
  0x6b   :  { %1061 = vmatpush.msra.mxu2 %v996_v13 }
  0x72   :  { %1933 = vmatmul.msk.f32.gmra.mxu0 %vm89_vm0, %v83_v14  ;;  %v995_v14 = vld [vmem:[#allocation7] sm:$0xff] }
  0x73   :  { %1062 = vmatpush.msra.mxu2 %v995_v14 }
  0x7a   :  { %1934 = vmatmul.msk.f32.gmra.mxu0 %vm89_vm0, %v84_v15 }
  0x82   :  { %1935 = vmatmul.msk.f32.gmra.mxu0 %vm89_vm0, %v85_v16 }
  0x8a   :  { %1936 = vmatmul.msk.f32.gmra.mxu0 %vm89_vm0, %v86_v39 }
  0x8f   :  { %v155_v17 = vpop.f32.mrf.mxu0 }
  0x90   :  { %203 = vxpose.xlu2.b32.start [1/2] (short) (narrow) %v155_v17, 16  ;;  %475 = vrot.lane.b32.xlu0 %v155_v17, %s2101_s4  ;;  %v2267_v17 = vld [vmem:[%s2495_s1] sm:$0xff] }
  0x97   :  { %v158_v18 = vpop.f32.mrf.mxu0 }
  0x98   :  { %204 = vxpose.xlu2.b32.end [2/2] (short) (narrow) %v158_v18, 16  ;;  %477 = vrot.lane.b32.xlu0 %v158_v18, %s2101_s4 }
  0x9f   :  { %v161_v19 = vpop.f32.mrf.mxu0 }
  0xa0   :  { %479 = vrot.lane.b32.xlu1 %v161_v19, %s2101_s4 }
  0xa7   :  { %v164_v20 = vpop.f32.mrf.mxu0 }
  0xa8   :  { %481 = vrot.lane.b32.xlu1 %v164_v20, %s2101_s4 }
  0xaf   :  { %v2176_v21 = vpop.f32.mrf.mxu0 }
  0xb7   :  { %v2178_v22 = vpop.f32.mrf.mxu0 }
  0xba   :  { %235 = vxpose.xlu0.b32.start [1/2] (short) (narrow) %v161_v19, 16 }
  0xbf   :  { %v2180_v23 = vpop.f32.mrf.mxu0 }
  0xc0   :  { %487 = vrot.lane.b32.xlu1 %v2180_v23, %s2101_s4 }
  0xc2   :  { %236 = vxpose.xlu0.b32.end [2/2] (short) (narrow) %v164_v20, 16  ;;  %v2275_v20 = vld [vmem:[%s2495_s1 + $0x8] sm:$0xff] }
  0xc7   :  { %v2184_v24 = vpop.f32.mrf.mxu0 }
  0xcf   :  { %v2186_v25 = vpop.f32.mrf.mxu0 }
  0xd7   :  { %v2188_v26 = vpop.f32.mrf.mxu0 }
  0xdf   :  { %v2190_v27 = vpop.f32.mrf.mxu0 }
  0xe0   :  { %495 = vrot.lane.b32.xlu1 %v2190_v27, %s2101_s4 }
  0xe7   :  { %v2198_v28 = vpop.f32.mrf.mxu0 }
  0xef   :  { %v2204_v30 = vpop.f32.mrf.mxu0 }
  0xf7   :  { %v2208_v32 = vpop.f32.mrf.mxu0 }
  0xff   :  { %v2212_v33 = vpop.f32.mrf.mxu0 }
 0x101   :  { %483 = vrot.lane.b32.xlu2 %v2176_v21, %s2101_s4 }
 0x102   :  { %v476_v37 = vpop.permute.xlu0 %475 }
 0x107   :  { %v200_v57 = vpop.f32.mrf.mxu0 }
 0x109   :  { %485 = vrot.lane.b32.xlu2 %v2178_v22, %s2101_s4 }
 0x10a   :  { %v478_v40 = vpop.permute.xlu0 %477 }
 0x111   :  { %489 = vrot.lane.b32.xlu2 %v2184_v24, %s2101_s4 }
 0x112   :  { %v480_v29 = vpop.permute.xlu1 %479 }
 0x115   :  { %555 = vxpose.xlu1.b32.start [1/2] (short) (narrow) %v480_v29, 16 }
 0x119   :  { %491 = vrot.lane.b32.xlu2 %v2186_v25, %s2101_s4 }
 0x11a   :  { %v482_v31 = vpop.permute.xlu1 %481 }
 0x11d   :  { %556 = vxpose.xlu1.b32.end [2/2] (short) (narrow) %v482_v31, 16 }
 0x121   :  { %493 = vrot.lane.b32.xlu2 %v2188_v26, %s2101_s4 }
 0x129   :  { %501 = vrot.lane.b32.xlu2 %v2208_v32, %s2101_s4  ;;  %v219_v35 = vpop.trf.xlu2 }
 0x130   :  { %497 = vrot.lane.b32.xlu0 %v2198_v28, %s2101_s4 }
 0x131   :  { %503 = vrot.lane.b32.xlu2 %v2212_v33, %s2101_s4  ;;  %v220_v36 = vpop.trf.xlu2 }
 0x132   :  { %v488_v34 = vpop.permute.xlu1 %487 }
 0x133   :  { %619 = vxpose.xlu1.b32.start [1/2] (short) (narrow) %v488_v34, 16 }
 0x138   :  { %499 = vrot.lane.b32.xlu0 %v2204_v30, %s2101_s4 }
 0x152   :  { %v2221_v43 = vpop.permute.xlu1 %495 }
 0x15a   :  { %523 = vxpose.xlu0.b32.start [1/2] (short) (narrow) %v476_v37, 16 }
 0x15b   :  { %v484_v38 = vpop.permute.xlu2 %483 }
 0x15c   :  { %587 = vxpose.xlu2.b32.start [1/2] (short) (narrow) %v484_v38, 16 }
 0x15e   :  { %v251_v45 = vpop.trf.xlu0 }
 0x162   :  { %524 = vxpose.xlu0.b32.end [2/2] (short) (narrow) %v478_v40, 16 }
 0x163   :  { %v486_v41 = vpop.permute.xlu2 %485 }
 0x164   :  { %588 = vxpose.xlu2.b32.end [2/2] (short) (narrow) %v486_v41, 16 }
 0x166   :  { %v252_v46 = vpop.trf.xlu0 }
 0x16b   :  { %v490_v42 = vpop.permute.xlu2 %489 }
 0x16c   :  { %620 = vxpose.xlu1.b32.end [2/2] (short) (narrow) %v490_v42, 16 }
 0x173   :  { %v492_v47 = vpop.permute.xlu2 %491 }
 0x17b   :  { %v494_v49 = vpop.permute.xlu2 %493 }
 0x183   :  { %v502_v52 = vpop.permute.xlu2 %501 }
 0x18b   :  { %v2228_v54 = vpop.permute.xlu2 %503 }
 0x1a2   :  { %v2224_v48 = vpop.permute.xlu0 %497 }
 0x1aa   :  { %v500_v50 = vpop.permute.xlu0 %499 }
 0x1b9   :  { %v571_v44 = vpop.trf.xlu1 }
 0x1c1   :  { %v572_v55 = vpop.trf.xlu1 }
 0x1d0   :  { %799 = vrot.lane.b32.xlu0 %v571_v44, %s2102_s12 }
 0x1f2   :  { %651 = vxpose.xlu0.b32.start [1/2] (short) (narrow) %v492_v47, 16 }
 0x1f5   :  { %v603_v56 = vpop.trf.xlu2 }
 0x1fa   :  { %652 = vxpose.xlu0.b32.end [2/2] (short) (narrow) %v494_v49, 16 }
 0x1fd   :  { %v604_v58 = vpop.trf.xlu2 }
 0x1fe   :  { %v539_v51 = vpop.trf.xlu0 }
 0x1ff   :  { %795 = vrot.lane.b32.xlu2 %v539_v51, %s2102_s12 }
 0x206   :  { %v540_v53 = vpop.trf.xlu0 }
 0x207   :  { %797 = vrot.lane.b32.xlu2 %v540_v53, %s2102_s12 }
 0x208   :  { %v635_v63 = vpop.trf.xlu1 }
 0x209   :  { %807 = vrot.lane.b32.xlu1 %v635_v63, %s2102_s12 }
 0x20f   :  { %801 = vrot.lane.b32.xlu2 %v572_v55, %s2102_s12 }
 0x210   :  { %v636_v6 = vpop.trf.xlu1 }
 0x217   :  { %505 = vrot.lane.b32.xlu2 %v200_v57, %s2101_s4 }
 0x21f   :  { %805 = vrot.lane.b32.xlu2 %v604_v58, %s2102_s12 }
 0x242   :  { %v800_v4 = vpop.permute.xlu0 %799 }
 0x243   :  { %v845_v5 = vsel %vm89_vm0, %v251_v45, %v800_v4 }
 0x245   :  { %267 = vxpose.xlu2.b32.start [1/2] (short) (narrow) %v2176_v21, 16 }
 0x24d   :  { %268 = vxpose.xlu2.b32.end [2/2] (short) (narrow) %v2178_v22, 16 }
 0x255   :  { %715 = vxpose.xlu2.b32.start [1/2] (short) (narrow) %v500_v50, 16 }
 0x259   :  { %v796_v0 = vpop.permute.xlu2 %795 }
 0x25a   :  { %v843_v1 = vsel %vm89_vm0, %v219_v35, %v796_v0 }
 0x25b   :  { %1937 = vmatmul.msk.f32.vlgmr.msra.gmra.mxu1 %vm863_vm1, %v843_v1 }
 0x25d   :  { %716 = vxpose.xlu2.b32.end [2/2] (short) (narrow) %v502_v52, 16 }
 0x261   :  { %v798_v2 = vpop.permute.xlu2 %797 }
 0x262   :  { %v844_v3 = vsel %vm89_vm0, %v220_v36, %v798_v2 }
 0x263   :  { %1938 = vmatmul.msk.f32.gmra.mxu1 %vm863_vm1, %v844_v3 }
 0x265   :  { %331 = vxpose.xlu2.b32.start [1/2] (short) (narrow) %v2186_v25, 16 }
 0x268   :  { %803 = vrot.lane.b32.xlu0 %v603_v56, %s2102_s12 }
 0x269   :  { %v802_v7 = vpop.permute.xlu2 %801 }
 0x26a   :  { %v846_v8 = vsel %vm89_vm0, %v252_v46, %v802_v7 }
 0x26b   :  { %1939 = vmatmul.msk.f32.gmra.mxu1 %vm863_vm1, %v845_v5 }
 0x26d   :  { %332 = vxpose.xlu2.b32.end [2/2] (short) (narrow) %v2188_v26, 16 }
 0x270   :  { %809 = vrot.lane.b32.xlu0 %v636_v6, %s2102_s12 }
 0x271   :  { %v506_v15 = vpop.permute.xlu2 %505 }
 0x273   :  { %1940 = vmatmul.msk.f32.gmra.mxu1 %vm863_vm1, %v846_v8 }
 0x275   :  { %427 = vxpose.xlu2.b32.start [1/2] (short) (narrow) %v2212_v33, 16 }
 0x279   :  { %v806_v16 = vpop.permute.xlu2 %805 }
 0x27d   :  { %428 = vxpose.xlu2.b32.end [2/2] (short) (narrow) %v200_v57, 16 }
 0x296   :  { %v667_v10 = vpop.trf.xlu0 }
 0x297   :  { %811 = vrot.lane.b32.xlu0 %v667_v10, %s2102_s12 }
 0x29e   :  { %v668_v11 = vpop.trf.xlu0 }
 0x29f   :  { %813 = vrot.lane.b32.xlu1 %v668_v11, %s2102_s12 }
 0x2d4   :  { %683 = vxpose.xlu1.b32.start [1/2] (short) (narrow) %v2221_v43, 16  ;;  %v808_v43 = vpop.permute.xlu1 %807 }
 0x2d8   :  { %v929_v18 = vpop.f32.mrf.mxu1 }
 0x2d9   :  { %v979_v19 = vmul.f32 %v2267_v17, %v929_v18 }
 0x2da   :  { %v804_v22 = vpop.permute.xlu0 %803 }
 0x2db   :  { %1953 = vmatmul.msk.f32.vlgmr.msra.gmra.mxu2 %vm863_vm1, %v979_v19 }
 0x2dc   :  { %684 = vxpose.xlu1.b32.end [2/2] (short) (narrow) %v2224_v48, 16 }
 0x2de   :  { %v283_v21 = vpop.trf.xlu2 }
 0x2df   :  { %v847_v25 = vsel %vm89_vm0, %v283_v21, %v804_v22 }
 0x2e0   :  { %v932_v26 = vpop.f32.mrf.mxu1  ;;  %1941 = vmatmul.msk.f32.gmra.mxu1 %vm863_vm1, %v847_v25 }
 0x2e1   :  { %v980_v29 = vmul.f32 %v2275_v20, %v932_v26 }
 0x2e3   :  { %1954 = vmatmul.msk.f32.gmra.mxu2 %vm863_vm1, %v980_v29 }
 0x2e4   :  { %747 = vxpose.xlu1.b32.start [1/2] (short) (narrow) %v2228_v54, 16 }
 0x2e6   :  { %v284_v33 = vpop.trf.xlu2 }
 0x2e7   :  { %v848_v35 = vsel %vm89_vm0, %v284_v33, %v806_v16 }
 0x2e8   :  { %v935_v31 = vpop.f32.mrf.mxu1  ;;  %1942 = vmatmul.msk.f32.gmra.mxu1 %vm863_vm1, %v848_v35 }
 0x2e9   :  { %v981_v34 = vmul.f32 %v2267_v17, %v935_v31 }
 0x2eb   :  { %1955 = vmatmul.msk.f32.gmra.mxu2 %vm863_vm1, %v981_v34 }
 0x2ec   :  { %748 = vxpose.xlu1.b32.end [2/2] (short) (narrow) %v506_v15, 16 }
 0x2ee   :  { %v731_v38 = vpop.trf.xlu2 }
 0x2f0   :  { %v938_v36 = vpop.f32.mrf.mxu1 }
 0x2f1   :  { %v982_v37 = vmul.f32 %v2275_v20, %v938_v36 }
 0x2f3   :  { %1956 = vmatmul.msk.f32.gmra.mxu2 %vm863_vm1, %v982_v37 }
 0x2f6   :  { %v732_v39 = vpop.trf.xlu2 }
 0x2fe   :  { %v347_v56 = vpop.trf.xlu2 }
 0x306   :  { %v348_v59 = vpop.trf.xlu2 }
 0x30e   :  { %v443_v61 = vpop.trf.xlu2 }
 0x311   :  { %v814_v48 = vpop.permute.xlu1 %813 }
 0x312   :  { %v852_v63 = vsel %vm89_vm0, %v348_v59, %v814_v48 }
 0x316   :  { %v444_v0 = vpop.trf.xlu2 }
 0x346   :  { %821 = vrot.lane.b32.xlu1 %v732_v39, %s2102_s12 }
 0x35d   :  { %v941_v41 = vpop.f32.mrf.mxu1 }
 0x35e   :  { %v1064_v40 = vpop.f32.mrf.mxu2  ;;  %v983_v42 = vmul.f32 %v2267_v17, %v941_v41 }
 0x360   :  { %1957 = vmatmul.msk.f32.gmra.mxu2 %vm863_vm1, %v983_v42 }
 0x365   :  { %v944_v45 = vpop.f32.mrf.mxu1 }
 0x366   :  { %v1067_v44 = vpop.f32.mrf.mxu2  ;;  %v984_v46 = vmul.f32 %v2275_v20, %v944_v45 }
 0x368   :  { %1958 = vmatmul.msk.f32.gmra.mxu2 %vm863_vm1, %v984_v46 }
 0x36e   :  { %v2293_v47 = vpop.f32.mrf.mxu2 }
 0x36f   :  { %1388 = vrot.lane.b32.xlu1 %v2293_v47, %s2101_s4 }
 0x376   :  { %v2297_v49 = vpop.f32.mrf.mxu2 }
 0x377   :  { %1390 = vrot.lane.b32.xlu1 %v2297_v49, %s2101_s4 }
 0x378   :  { %v699_v50 = vpop.trf.xlu1 }
 0x379   :  { %815 = vrot.lane.b32.xlu0 %v699_v50, %s2102_s12 }
 0x380   :  { %v700_v51 = vpop.trf.xlu1 }
 0x381   :  { %817 = vrot.lane.b32.xlu2 %v700_v51, %s2102_s12  ;;  %819 = vrot.lane.b32.xlu0 %v731_v38, %s2102_s12 }
 0x388   :  { %v763_v52 = vpop.trf.xlu1 }
 0x389   :  { %823 = vrot.lane.b32.xlu2 %v763_v52, %s2102_s12 }
 0x390   :  { %v764_v53 = vpop.trf.xlu1 }
 0x391   :  { %825 = vrot.lane.b32.xlu2 %v764_v53, %s2102_s12 }
 0x399   :  { %1386 = vrot.lane.b32.xlu2 %v1067_v44, %s2101_s4 }
 0x3a3   :  { %299 = vxpose.xlu0.b32.start [1/2] (short) (narrow) %v2180_v23, 16  ;;  %v810_v23 = vpop.permute.xlu0 %809 }
 0x3ab   :  { %300 = vxpose.xlu0.b32.end [2/2] (short) (narrow) %v2184_v24, 16  ;;  %v812_v24 = vpop.permute.xlu0 %811 }
 0x3ac   :  { %v851_v60 = vsel %vm89_vm0, %v347_v56, %v812_v24 }
 0x3b3   :  { %363 = vxpose.xlu0.b32.start [1/2] (short) (narrow) %v2190_v27, 16 }
 0x3b8   :  { %v822_v8 = vpop.permute.xlu1 %821 }
 0x3bb   :  { %364 = vxpose.xlu0.b32.end [2/2] (short) (narrow) %v2198_v28, 16 }
 0x3c3   :  { %395 = vxpose.xlu0.b32.start [1/2] (short) (narrow) %v2204_v30, 16 }
 0x3cb   :  { %396 = vxpose.xlu0.b32.end [2/2] (short) (narrow) %v2208_v32, 16 }
 0x3d3   :  { %1112 = vxpose.xlu0.b32.start [1/2] (short) (narrow) %v1064_v40, 16 }
 0x3db   :  { %1113 = vxpose.xlu0.b32.end [2/2] (short) (narrow) %v1067_v44, 16  ;;  %v818_v3 = vpop.permute.xlu2 %817 }
 0x3e1   :  { %v1389_v45 = vpop.permute.xlu1 %1388 }
 0x3e3   :  { %v2313_v54 = vpop.f32.mrf.mxu2  ;;  %v824_v10 = vpop.permute.xlu2 %823 }
 0x3e4   :  { %1392 = vrot.lane.b32.xlu1 %v2313_v54, %s2101_s4  ;;  %v857_v11 = vsel %vm89_vm0, %v443_v61, %v824_v10 }
 0x3e9   :  { %v1391_v48 = vpop.permute.xlu1 %1390 }
 0x3eb   :  { %v2317_v55 = vpop.f32.mrf.mxu2  ;;  %v816_v27 = vpop.permute.xlu0 %815 }
 0x3ec   :  { %1394 = vrot.lane.b32.xlu1 %v2317_v55, %s2101_s4  ;;  %v826_v12 = vpop.permute.xlu2 %825 }
 0x3ed   :  { %v858_v13 = vsel %vm89_vm0, %v444_v0, %v826_v12 }
 0x3f3   :  { %v820_v28 = vpop.permute.xlu0 %819 }
 0x3f4   :  { %v1387_v56 = vpop.permute.xlu2 %1386 }
 0x447   :  { %v315_v30 = vpop.trf.xlu0 }
 0x448   :  { %v849_v32 = vsel %vm89_vm0, %v315_v30, %v808_v43 }
 0x449   :  { %1384 = vrot.lane.b32.xlu0 %v1064_v40, %s2101_s4  ;;  %1943 = vmatmul.msk.f32.gmra.mxu1 %vm863_vm1, %v849_v32 }
 0x44f   :  { %v316_v57 = vpop.trf.xlu0 }
 0x450   :  { %v850_v58 = vsel %vm89_vm0, %v316_v57, %v810_v23 }
 0x451   :  { %1944 = vmatmul.msk.f32.gmra.mxu1 %vm863_vm1, %v850_v58 }
 0x456   :  { %v1393_v51 = vpop.permute.xlu1 %1392 }
 0x457   :  { %v379_v62 = vpop.trf.xlu0 }
 0x458   :  { %v853_v1 = vsel %vm89_vm0, %v379_v62, %v816_v27 }
 0x459   :  { %1945 = vmatmul.msk.f32.gmra.mxu1 %vm863_vm1, %v851_v60 }
 0x45e   :  { %v1395_v53 = vpop.permute.xlu1 %1394 }
 0x45f   :  { %v380_v2 = vpop.trf.xlu0 }
 0x460   :  { %v854_v4 = vsel %vm89_vm0, %v380_v2, %v818_v3 }
 0x461   :  { %1946 = vmatmul.msk.f32.gmra.mxu1 %vm863_vm1, %v852_v63 }
 0x467   :  { %v411_v5 = vpop.trf.xlu0 }
 0x468   :  { %v855_v6 = vsel %vm89_vm0, %v411_v5, %v820_v28 }
 0x469   :  { %1947 = vmatmul.msk.f32.gmra.mxu1 %vm863_vm1, %v853_v1 }
 0x46f   :  { %v412_v7 = vpop.trf.xlu0 }
 0x470   :  { %v856_v9 = vsel %vm89_vm0, %v412_v7, %v822_v8 }
 0x471   :  { %1948 = vmatmul.msk.f32.gmra.mxu1 %vm863_vm1, %v854_v4 }
 0x477   :  { %v1128_v23 = vpop.trf.xlu0 }
 0x479   :  { %1949 = vmatmul.msk.f32.gmra.mxu1 %vm863_vm1, %v855_v6  ;;  %v1771_v6 = vld [vmem:[%s2499_s5 + $0x18] sm:$0xff] }
 0x47a   :  { %1832 = vmatpush.msra.mxu3 %v1771_v6 }
 0x47f   :  { %v1129_v24 = vpop.trf.xlu0 }
 0x481   :  { %1950 = vmatmul.msk.f32.gmra.mxu1 %vm863_vm1, %v856_v9 }
 0x489   :  { %1951 = vmatmul.msk.f32.gmra.mxu1 %vm863_vm1, %v857_v11 }
 0x491   :  { %1952 = vmatmul.msk.f32.gmra.mxu1 %vm863_vm1, %v858_v13 }
 0x4bb   :  { %v1385_v27 = vpop.permute.xlu0 %1384 }
 0x4c6   :  { %v947_v14 = vpop.f32.mrf.mxu1 }
 0x4c7   :  { %v985_v15 = vmul.f32 %v2267_v17, %v947_v14 }
 0x4c9   :  { %1959 = vmatmul.msk.f32.gmra.mxu2 %vm863_vm1, %v985_v15 }
 0x4ce   :  { %v950_v16 = vpop.f32.mrf.mxu1 }
 0x4cf   :  { %v986_v18 = vmul.f32 %v2275_v20, %v950_v16 }
 0x4d1   :  { %1960 = vmatmul.msk.f32.gmra.mxu2 %vm863_vm1, %v986_v18 }
 0x4d6   :  { %v953_v19 = vpop.f32.mrf.mxu1 }
 0x4d7   :  { %v987_v21 = vmul.f32 %v2267_v17, %v953_v19 }
 0x4d9   :  { %1961 = vmatmul.msk.f32.gmra.mxu2 %vm863_vm1, %v987_v21 }
 0x4de   :  { %v956_v22 = vpop.f32.mrf.mxu1 }
 0x4df   :  { %v988_v25 = vmul.f32 %v2275_v20, %v956_v22 }
 0x4e1   :  { %1962 = vmatmul.msk.f32.gmra.mxu2 %vm863_vm1, %v988_v25 }
 0x4e6   :  { %v959_v26 = vpop.f32.mrf.mxu1 }
 0x4e7   :  { %v989_v29 = vmul.f32 %v2267_v17, %v959_v26 }
 0x4e9   :  { %1963 = vmatmul.msk.f32.gmra.mxu2 %vm863_vm1, %v989_v29 }
 0x4ee   :  { %v962_v31 = vpop.f32.mrf.mxu1 }
 0x4ef   :  { %v990_v33 = vmul.f32 %v2275_v20, %v962_v31 }
 0x4f1   :  { %1964 = vmatmul.msk.f32.gmra.mxu2 %vm863_vm1, %v990_v33 }
 0x4f6   :  { %v965_v34 = vpop.f32.mrf.mxu1 }
 0x4f7   :  { %v991_v35 = vmul.f32 %v2267_v17, %v965_v34 }
 0x4f9   :  { %1965 = vmatmul.msk.f32.gmra.mxu2 %vm863_vm1, %v991_v35 }
 0x4fe   :  { %v968_v36 = vpop.f32.mrf.mxu1 }
 0x4ff   :  { %v992_v37 = vmul.f32 %v2275_v20, %v968_v36 }
 0x501   :  { %1966 = vmatmul.msk.f32.gmra.mxu2 %vm863_vm1, %v992_v37 }
 0x506   :  { %v971_v38 = vpop.f32.mrf.mxu1 }
 0x507   :  { %v993_v39 = vmul.f32 %v2267_v17, %v971_v38 }
 0x509   :  { %1967 = vmatmul.msk.f32.gmra.mxu2 %vm863_vm1, %v993_v39 }
 0x50e   :  { %v974_v40 = vpop.f32.mrf.mxu1 }
 0x50f   :  { %v994_v41 = vmul.f32 %v2275_v20, %v974_v40 }
 0x511   :  { %1968 = vmatmul.msk.f32.gmra.mxu2 %vm863_vm1, %v994_v41 }
 0x54c   :  { %v1082_v42 = vpop.f32.mrf.mxu2 }
 0x54d   :  { %1396 = vrot.lane.b32.xlu0 %v1082_v42, %s2101_s4 }
 0x554   :  { %v2363_v43 = vpop.f32.mrf.mxu2 }
 0x555   :  { %1398 = vrot.lane.b32.xlu0 %v2363_v43, %s2101_s4 }
 0x55c   :  { %v2367_v44 = vpop.f32.mrf.mxu2 }
 0x55d   :  { %1400 = vrot.lane.b32.xlu2 %v2367_v44, %s2101_s4 }
 0x564   :  { %v2371_v17 = vpop.f32.mrf.mxu2 }
 0x565   :  { %1402 = vrot.lane.b32.xlu2 %v2371_v17, %s2101_s4 }
 0x56c   :  { %v2375_v20 = vpop.f32.mrf.mxu2 }
 0x56d   :  { %1404 = vrot.lane.b32.xlu2 %v2375_v20, %s2101_s4 }
 0x574   :  { %v2379_v46 = vpop.f32.mrf.mxu2 }
 0x575   :  { %1406 = vrot.lane.b32.xlu2 %v2379_v46, %s2101_s4 }
 0x577   :  { %1464 = vxpose.xlu0.b32.start [1/2] (short) (narrow) %v1389_v45, 16 }
 0x57c   :  { %v2383_v50 = vpop.f32.mrf.mxu2 }
 0x57d   :  { %1408 = vrot.lane.b32.xlu2 %v2383_v50, %s2101_s4 }
 0x57f   :  { %1465 = vxpose.xlu0.b32.end [2/2] (short) (narrow) %v1391_v48, 16 }
 0x584   :  { %v2387_v52 = vpop.f32.mrf.mxu2 }
 0x585   :  { %1410 = vrot.lane.b32.xlu1 %v2387_v52, %s2101_s4 }
 0x587   :  { %1496 = vxpose.xlu0.b32.start [1/2] (short) (narrow) %v1393_v51, 16 }
 0x58c   :  { %v2392_v62 = vpop.f32.mrf.mxu2 }
 0x58f   :  { %1497 = vxpose.xlu0.b32.end [2/2] (short) (narrow) %v1395_v53, 16 }
 0x594   :  { %v2398_v1 = vpop.f32.mrf.mxu2 }
 0x5b7   :  { %v1401_v2 = vpop.permute.xlu2 %1400 }
 0x5ba   :  { %1432 = vxpose.xlu1.b32.start [1/2] (short) (narrow) %v1385_v27, 16 }
 0x5bf   :  { %v1397_v28 = vpop.permute.xlu0 %1396  ;;  %v1403_v3 = vpop.permute.xlu2 %1402 }
 0x5c0   :  { %1528 = vxpose.xlu0.b32.start [1/2] (short) (narrow) %v1397_v28, 16 }
 0x5c2   :  { %1433 = vxpose.xlu1.b32.end [2/2] (short) (narrow) %v1387_v56, 16 }
 0x5c7   :  { %v1399_v30 = vpop.permute.xlu0 %1398  ;;  %v1405_v4 = vpop.permute.xlu2 %1404 }
 0x5c8   :  { %1529 = vxpose.xlu0.b32.end [2/2] (short) (narrow) %v1399_v30, 16 }
 0x5cf   :  { %v1407_v5 = vpop.permute.xlu2 %1406 }
 0x5d7   :  { %v1409_v7 = vpop.permute.xlu2 %1408 }
 0x5f7   :  { %v1411_v59 = vpop.permute.xlu1 %1410 }
 0x61b   :  { %v1480_v32 = vpop.trf.xlu0 }
 0x623   :  { %v1481_v57 = vpop.trf.xlu0 }
 0x62b   :  { %v1512_v58 = vpop.trf.xlu0 }
 0x633   :  { %v1513_v60 = vpop.trf.xlu0 }
 0x65e   :  { %v1448_v61 = vpop.trf.xlu1 }
 0x65f   :  { %1704 = vrot.lane.b32.xlu1 %v1448_v61, %s2102_s12 }
 0x664   :  { %v1544_v63 = vpop.trf.xlu0 }
 0x665   :  { %1716 = vrot.lane.b32.xlu0 %v1544_v63, %s2102_s12 }
 0x666   :  { %v1449_v0 = vpop.trf.xlu1 }
 0x667   :  { %1412 = vrot.lane.b32.xlu1 %v2392_v62, %s2101_s4  ;;  %1706 = vrot.lane.b32.xlu2 %v1449_v0, %s2102_s12 }
 0x66c   :  { %v1545_v11 = vpop.trf.xlu0 }
 0x66f   :  { %1414 = vrot.lane.b32.xlu1 %v2398_v1, %s2101_s4  ;;  %1708 = vrot.lane.b32.xlu2 %v1480_v32, %s2102_s12 }
 0x687   :  { %1144 = vxpose.xlu0.b32.start [1/2] (short) (narrow) %v2293_v47, 16  ;;  %v1770_v47 = vld [vmem:[%s2499_s5 + $0x10] sm:$0xff] }
 0x688   :  { %1833 = vmatpush.msra.mxu3 %v1770_v47 }
 0x68f   :  { %1145 = vxpose.xlu0.b32.end [2/2] (short) (narrow) %v2297_v49, 16  ;;  %v1769_v49 = vld [vmem:[%s2499_s5 + $0x8] sm:$0xff] }
 0x690   :  { %1834 = vmatpush.msra.mxu3 %v1769_v49 }
 0x695   :  { %1560 = vxpose.xlu2.b32.start [1/2] (short) (narrow) %v1401_v2, 16 }
 0x697   :  { %1592 = vxpose.xlu0.b32.start [1/2] (short) (narrow) %v1405_v4, 16 }
 0x69d   :  { %1561 = vxpose.xlu2.b32.end [2/2] (short) (narrow) %v1403_v3, 16 }
 0x69f   :  { %1593 = vxpose.xlu0.b32.end [2/2] (short) (narrow) %v1407_v5, 16 }
 0x6a4   :  { %1176 = vxpose.xlu1.b32.start [1/2] (short) (narrow) %v2313_v54, 16  ;;  %v1768_v54 = vld [vmem:[%s2499_s5] sm:$0xff]  ;;  %s2103_s5 = smov [#allocation8]  }
 0x6a5   :  { %1835 = vmatpush.msra.mxu3 %v1768_v54  ;;  %s1905_s9 = sshll.u32 %s2103_s5, 4  ;;  %s1906_s9 = int_to_ptr.vmem [resolvable:$true] %s1905_s9 }
 0x6a7   :  { %1208 = vxpose.xlu0.b32.start [1/2] (short) (narrow) %v1082_v42, 16 }
 0x6ac   :  { %1177 = vxpose.xlu1.b32.end [2/2] (short) (narrow) %v2317_v55, 16 }
 0x6af   :  { %1209 = vxpose.xlu0.b32.end [2/2] (short) (narrow) %v2363_v43, 16 }
 0x6b4   :  { %1624 = vxpose.xlu1.b32.start [1/2] (short) (narrow) %v1409_v7, 16 }
 0x6b7   :  { %1240 = vxpose.xlu0.b32.start [1/2] (short) (narrow) %v2367_v44, 16 }
 0x6bc   :  { %1625 = vxpose.xlu1.b32.end [2/2] (short) (narrow) %v1411_v59, 16 }
 0x6bf   :  { %1241 = vxpose.xlu0.b32.end [2/2] (short) (narrow) %v2371_v17, 16 }
 0x6c1   :  { %v1707_v9 = vpop.permute.xlu2 %1706 }
 0x6c2   :  { %v1753_v10 = vsel %vm89_vm0, %v1129_v24, %v1707_v9 }
 0x6c4   :  { %1272 = vxpose.xlu1.b32.start [1/2] (short) (narrow) %v2375_v20, 16 }
 0x6c9   :  { %v1709_v13 = vpop.permute.xlu2 %1708 }
 0x6cc   :  { %1273 = vxpose.xlu1.b32.end [2/2] (short) (narrow) %v2379_v46, 16 }
 0x6d1   :  { %v1705_v55 = vpop.permute.xlu1 %1704 }
 0x6d2   :  { %v1752_v8 = vsel %vm89_vm0, %v1128_v23, %v1705_v55 }
 0x6d3   :  { %1969 = vmatmul.msk.f32.vlgmr.msra.gmra.mxu3 %vm863_vm1, %v1752_v8 }
 0x6d7   :  { %v1717_v12 = vpop.permute.xlu0 %1716 }
 0x6d9   :  { %v1413_v16 = vpop.permute.xlu1 %1412 }
 0x6db   :  { %1970 = vmatmul.msk.f32.gmra.mxu3 %vm863_vm1, %v1753_v10 }
 0x6e1   :  { %v1415_v18 = vpop.permute.xlu1 %1414 }
 0x706   :  { %1710 = vrot.lane.b32.xlu2 %v1481_v57, %s2102_s12 }
 0x70e   :  { %1712 = vrot.lane.b32.xlu2 %v1512_v58, %s2102_s12 }
 0x716   :  { %1714 = vrot.lane.b32.xlu2 %v1513_v60, %s2102_s12 }
 0x72b   :  { %v1160_v14 = vpop.trf.xlu0 }
 0x72c   :  { %v1754_v15 = vsel %vm89_vm0, %v1160_v14, %v1709_v13 }
 0x72d   :  { %1971 = vmatmul.msk.f32.gmra.mxu3 %vm863_vm1, %v1754_v15 }
 0x72e   :  { %v1576_v21 = vpop.trf.xlu2 }
 0x733   :  { %v1161_v29 = vpop.trf.xlu0 }
 0x736   :  { %v1577_v26 = vpop.trf.xlu2 }
 0x73b   :  { %v1608_v36 = vpop.trf.xlu0 }
 0x73c   :  { %1656 = vxpose.xlu2.b32.start [1/2] (short) (narrow) %v1413_v16, 16 }
 0x743   :  { %v1609_v39 = vpop.trf.xlu0 }
 0x744   :  { %1657 = vxpose.xlu2.b32.end [2/2] (short) (narrow) %v1415_v18, 16 }
 0x748   :  { %v1192_v19 = vpop.trf.xlu1 }
 0x74b   :  { %v1224_v42 = vpop.trf.xlu0 }
 0x74c   :  { %v1758_v43 = vsel %vm89_vm0, %v1224_v42, %v1717_v12 }
 0x750   :  { %v1193_v22 = vpop.trf.xlu1 }
 0x756   :  { %v1837_v25 = vpop.f32.mrf.mxu3 }
 0x757   :  { %1885 = vst.msk [vmem:[#allocation8] sm:$0xff] %vm89_vm0, %v1837_v25 }
 0x758   :  { %v1640_v31 = vpop.trf.xlu1 }
 0x759   :  { %1728 = vrot.lane.b32.xlu0 %v1640_v31, %s2102_s12 }
 0x75e   :  { %v1840_v33 = vpop.f32.mrf.mxu3 }
 0x75f   :  { %1886 = vst.msk [vmem:[#allocation8 + $0x8] sm:$0xff] %vm89_vm0, %v1840_v33 }
 0x760   :  { %v1711_v34 = vpop.permute.xlu2 %1710  ;;  %v1641_v17 = vpop.trf.xlu1 }
 0x761   :  { %v1755_v35 = vsel %vm89_vm0, %v1161_v29, %v1711_v34 }
 0x762   :  { %1972 = vmatmul.msk.f32.gmra.mxu3 %vm863_vm1, %v1755_v35 }
 0x768   :  { %v1713_v37 = vpop.permute.xlu2 %1712  ;;  %v1288_v57 = vpop.trf.xlu1 }
 0x769   :  { %v1756_v38 = vsel %vm89_vm0, %v1192_v19, %v1713_v37 }
 0x76a   :  { %1973 = vmatmul.msk.f32.gmra.mxu3 %vm863_vm1, %v1756_v38 }
 0x770   :  { %v1715_v40 = vpop.permute.xlu2 %1714  ;;  %v1289_v61 = vpop.trf.xlu1 }
 0x771   :  { %v1757_v41 = vsel %vm89_vm0, %v1193_v22, %v1715_v40 }
 0x772   :  { %1974 = vmatmul.msk.f32.gmra.mxu3 %vm863_vm1, %v1757_v41 }
 0x77a   :  { %1975 = vmatmul.msk.f32.gmra.mxu3 %vm863_vm1, %v1758_v43 }
 0x77b   :  { %1304 = vxpose.xlu0.b32.start [1/2] (short) (narrow) %v2383_v50, 16 }
 0x783   :  { %1305 = vxpose.xlu0.b32.end [2/2] (short) (narrow) %v2387_v52, 16  ;;  %v1225_v52 = vpop.trf.xlu0 }
 0x78b   :  { %v1256_v24 = vpop.trf.xlu0 }
 0x793   :  { %v1257_v56 = vpop.trf.xlu0 }
 0x7ad   :  { %1718 = vrot.lane.b32.xlu2 %v1545_v11, %s2102_s12 }
 0x7b0   :  { %v1843_v44 = vpop.f32.mrf.mxu3 }
 0x7b1   :  { %1887 = vst.msk [vmem:[#allocation8 + $0x10] sm:$0xff] %vm89_vm0, %v1843_v44 }
 0x7b5   :  { %1720 = vrot.lane.b32.xlu2 %v1576_v21, %s2102_s12 }
 0x7bd   :  { %1722 = vrot.lane.b32.xlu2 %v1577_v26, %s2102_s12 }
 0x7c5   :  { %1724 = vrot.lane.b32.xlu2 %v1608_v36, %s2102_s12 }
 0x7cb   :  { %v1729_v60 = vpop.permute.xlu0 %1728 }
 0x7cd   :  { %1726 = vrot.lane.b32.xlu2 %v1609_v39, %s2102_s12 }
 0x7d5   :  { %1730 = vrot.lane.b32.xlu2 %v1641_v17, %s2102_s12  ;;  %v1672_v20 = vpop.trf.xlu2 }
 0x7d6   :  { %1732 = vrot.lane.b32.xlu1 %v1672_v20, %s2102_s12 }
 0x7dd   :  { %v1673_v45 = vpop.trf.xlu2 }
 0x7de   :  { %1734 = vrot.lane.b32.xlu1 %v1673_v45, %s2102_s12 }
 0x7e5   :  { %v1846_v46 = vpop.f32.mrf.mxu3 }
 0x7e6   :  { %1888 = vst.msk [vmem:[#allocation8 + $0x18] sm:$0xff] %vm89_vm0, %v1846_v46 }
 0x7ed   :  { %v1849_v48 = vpop.f32.mrf.mxu3 }
 0x7ee   :  { %1889 = vst.msk [vmem:[#allocation8 + $0x20] sm:$0xff] %vm89_vm0, %v1849_v48 }
 0x7f5   :  { %v1852_v50 = vpop.f32.mrf.mxu3 }
 0x7f6   :  { %1890 = vst.msk [vmem:[#allocation8 + $0x28] sm:$0xff] %vm89_vm0, %v1852_v50 }
 0x7fb   :  { %1336 = vxpose.xlu2.b32.start [1/2] (short) (narrow) %v2392_v62, 16 }
 0x7fd   :  { %v1855_v51 = vpop.f32.mrf.mxu3 }
 0x7fe   :  { %1891 = vst.msk [vmem:[#allocation8 + $0x30] sm:$0xff] %vm89_vm0, %v1855_v51 }
 0x803   :  { %1337 = vxpose.xlu2.b32.end [2/2] (short) (narrow) %v2398_v1, 16 }
 0x807   :  { %v1719_v53 = vpop.permute.xlu2 %1718 }
 0x808   :  { %v1759_v23 = vsel %vm89_vm0, %v1225_v52, %v1719_v53 }
 0x809   :  { %1976 = vmatmul.msk.f32.gmra.mxu3 %vm863_vm1, %v1759_v23 }
 0x80f   :  { %v1721_v27 = vpop.permute.xlu2 %1720 }
 0x810   :  { %v1760_v28 = vsel %vm89_vm0, %v1256_v24, %v1721_v27 }
 0x811   :  { %1977 = vmatmul.msk.f32.gmra.mxu3 %vm863_vm1, %v1760_v28 }
 0x817   :  { %v1723_v30 = vpop.permute.xlu2 %1722 }
 0x818   :  { %v1761_v32 = vsel %vm89_vm0, %v1257_v56, %v1723_v30 }
 0x819   :  { %1978 = vmatmul.msk.f32.gmra.mxu3 %vm863_vm1, %v1761_v32 }
 0x81f   :  { %v1725_v58 = vpop.permute.xlu2 %1724  ;;  %v1320_v0 = vpop.trf.xlu0 }
 0x820   :  { %v1762_v59 = vsel %vm89_vm0, %v1288_v57, %v1725_v58  ;;  %v1764_v1 = vsel %vm89_vm0, %v1320_v0, %v1729_v60 }
 0x821   :  { %1979 = vmatmul.msk.f32.gmra.mxu3 %vm863_vm1, %v1762_v59 }
 0x827   :  { %v1727_v62 = vpop.permute.xlu2 %1726  ;;  %v1321_v2 = vpop.trf.xlu0 }
 0x828   :  { %v1763_v63 = vsel %vm89_vm0, %v1289_v61, %v1727_v62 }
 0x829   :  { %1980 = vmatmul.msk.f32.gmra.mxu3 %vm863_vm1, %v1763_v63 }
 0x82f   :  { %v1731_v3 = vpop.permute.xlu2 %1730 }
 0x830   :  { %v1765_v4 = vsel %vm89_vm0, %v1321_v2, %v1731_v3 }
 0x831   :  { %1981 = vmatmul.msk.f32.gmra.mxu3 %vm863_vm1, %v1764_v1 }
 0x839   :  { %1982 = vmatmul.msk.f32.gmra.mxu3 %vm863_vm1, %v1765_v4 }
 0x848   :  { %v1733_v6 = vpop.permute.xlu1 %1732 }
 0x850   :  { %v1735_v7 = vpop.permute.xlu1 %1734 }
 0x88c   :  { %v1858_v5 = vpop.f32.mrf.mxu3 }
 0x88d   :  { %1892 = vst.msk [vmem:[#allocation8 + $0x38] sm:$0xff] %vm89_vm0, %v1858_v5 }
 0x894   :  { %v1861_v47 = vpop.f32.mrf.mxu3  ;;  %v1352_v49 = vpop.trf.xlu2 }
 0x895   :  { %1893 = vst.msk [vmem:[#allocation8 + $0x40] sm:$0xff] %vm89_vm0, %v1861_v47  ;;  %v1766_v54 = vsel %vm89_vm0, %v1352_v49, %v1733_v6 }
 0x896   :  { %1983 = vmatmul.msk.f32.gmra.mxu3 %vm863_vm1, %v1766_v54 }
 0x89c   :  { %v1864_v55 = vpop.f32.mrf.mxu3  ;;  %v1353_v8 = vpop.trf.xlu2 }
 0x89d   :  { %1894 = vst.msk [vmem:[#allocation8 + $0x48] sm:$0xff] %vm89_vm0, %v1864_v55  ;;  %v1767_v9 = vsel %vm89_vm0, %v1353_v8, %v1735_v7 }
 0x89e   :  { %1984 = vmatmul.msk.f32.gmra.mxu3 %vm863_vm1, %v1767_v9 }
 0x8a4   :  { %v1867_v10 = vpop.f32.mrf.mxu3 }
 0x8a5   :  { %1895 = vst.msk [vmem:[#allocation8 + $0x50] sm:$0xff] %vm89_vm0, %v1867_v10 }
 0x8ac   :  { %v1870_v11 = vpop.f32.mrf.mxu3 }
 0x8ad   :  { %1896 = vst.msk [vmem:[#allocation8 + $0x58] sm:$0xff] %vm89_vm0, %v1870_v11 }
 0x8b4   :  { %v1873_v12 = vpop.f32.mrf.mxu3 }
 0x8b5   :  { %1897 = vst.msk [vmem:[#allocation8 + $0x60] sm:$0xff] %vm89_vm0, %v1873_v12 }
 0x8bc   :  { %v1876_v13 = vpop.f32.mrf.mxu3 }
 0x8bd   :  { %1898 = vst.msk [vmem:[#allocation8 + $0x68] sm:$0xff] %vm89_vm0, %v1876_v13 }
 0x919   :  { %v1879_v14 = vpop.f32.mrf.mxu3 }
 0x91a   :  { %1899 = vst.msk [vmem:[#allocation8 + $0x70] sm:$0xff] %vm89_vm0, %v1879_v14 }
 0x921   :  { %v1882_v15 = vpop.f32.mrf.mxu3 }
 0x922   :  { %1900 = vst.msk [vmem:[#allocation8 + $0x78] sm:$0xff] %vm89_vm0, %v1882_v15 }
 0x923   :  { %1913 = dma.vmem_to_hbm [thread:$0]  %s1906_s9, 2048, %s1908_s0, [#allocation4], %s2097_s29, %s2097_s29, %s2098_s30  }
 0x924   :  { %2094 = dma.done.wait [#allocation4], 2048  }
 0x925   :  { %2095 = vsyncadd [#allocation4], 4294965248 }
 0x926   :  { %1918 = vsyncpa [#allocation3], 1 }
 0x927   :  { %1919 = vsyncpa [#allocation6], 1 }
 0x928   :  { %1920 = vsyncpa [#allocation4], 1 }

</bundles_post_ra>
